<compile_context>
chip_gen: v7x
topology: tpu7x:2x2x1
jax: 0.10.0
libtpu: 0.0.40
codegen_flags: <defaults>
</compile_context>

<pallas_src>
import functools
import math

import jax
import jax.numpy as jnp
from jax.experimental import pallas as pl
from jax.experimental.pallas import tpu as pltpu

# ---- model config (small, consistent with the module) ----
HIDDEN = 32
NUM_HEADS = 4
HEAD_DIM = HIDDEN // NUM_HEADS
MLP_DIM = 64
NUM_LAYERS = 2
LN_EPS = 1e-6
BATCH = 2
SEQ = 64

# ---- packed-operand layout (collapse ~15 input DMAs into 3) ----
# Vector slab: one lane-dense f32 row per layer holding every 1-row parameter.
VEC_W = 512
OFF_LN1_G = 0
OFF_LN1_B = OFF_LN1_G + HIDDEN
OFF_QKV_B = OFF_LN1_B + HIDDEN            # width 3H, head-major [h0:q|k|v, ...]
OFF_O_B = OFF_QKV_B + 3 * HIDDEN
OFF_LN2_G = OFF_O_B + HIDDEN
OFF_LN2_B = OFF_LN2_G + HIDDEN
OFF_FC1_B = OFF_LN2_B + HIDDEN            # width MLP_DIM
OFF_FC2_B = OFF_FC1_B + MLP_DIM
OFF_NORM_G = OFF_FC2_B + HIDDEN
OFF_NORM_B = OFF_NORM_G + HIDDEN
assert OFF_NORM_B + HIDDEN <= VEC_W

# Weight slab: one (2H, 128) f32 tile per layer:
#   rows [0:H)  cols [0:3H)      -> fused qkv weight (head-major columns)
#   rows [0:H)  cols [3H:4H)     -> attention output projection o_w
#   rows [H:2H) cols [0:MLP)     -> fc1_w
#   rows [H:2H) cols [MLP:2MLP)  -> fc2_w stored transposed
W_ROWS = 2 * HIDDEN
W_COLS = 4 * HIDDEN
assert W_COLS == 128 and 2 * MLP_DIM == W_COLS


def _layernorm(x, g, b, eps=LN_EPS):
    mean = jnp.mean(x, axis=-1, keepdims=True)
    c = x - mean
    var = jnp.mean(c * c, axis=-1, keepdims=True)
    return c * jax.lax.rsqrt(var + eps) * g + b


def _erf(x):
    # Abramowitz & Stegun 7.1.26 (|err| <= 1.5e-7): keeps the exact-GELU
    # semantics of torch.nn.functional.gelu without relying on an erf lowering.
    t = 1.0 / (1.0 + 0.3275911 * jnp.abs(x))
    poly = t * (0.254829592
                + t * (-0.284496736
                       + t * (1.421413741
                              + t * (-1.453152027 + t * 1.061405429))))
    e = 1.0 - poly * jnp.exp(-(x * x))
    return jnp.where(x >= 0, e, -e)


# ---------------- single fused Pallas kernel: whole encoder ----------------

def _encoder_kernel(x_ref, vec_ref, w_ref, out_ref, *, bpb, seq):
    f32, bf16 = jnp.float32, jnp.bfloat16
    m = bpb * seq
    scale = 1.0 / math.sqrt(HEAD_DIM)
    inv_sqrt2 = 1.0 / math.sqrt(2.0)

    # Identity used to emit per-layer outputs transposed (lane-dense store)
    # through the MXU: dot_general(normed, eye, contract dim 0) == normed.T,
    # exact in f32.
    eye = (jax.lax.broadcasted_iota(jnp.int32, (m, m), 0)
           == jax.lax.broadcasted_iota(jnp.int32, (m, m), 1)).astype(f32)

    x = x_ref[...]                                    # (m, HIDDEN) f32 tokens

    for l in range(NUM_LAYERS):                       # static unroll; weights stay VMEM-resident
        def vparam(off, width, _l=l):
            return vec_ref[_l:_l + 1, off:off + width]    # (1, width) f32

        # ---------------- attention block ----------------
        res = x
        xn = _layernorm(x, vparam(OFF_LN1_G, HIDDEN), vparam(OFF_LN1_B, HIDDEN))
        qkv = jnp.dot(xn.astype(bf16),
                      w_ref[l, 0:HIDDEN, 0:3 * HIDDEN].astype(bf16),
                      preferred_element_type=f32) + vparam(OFF_QKV_B, 3 * HIDDEN)
        qkv16 = qkv.astype(bf16)

        attn = None                                   # O-proj accumulated per head (no concat)
        for hh in range(NUM_HEADS):
            off = hh * 3 * HEAD_DIM                   # head-major [q|k|v] columns
            qh = qkv16[:, off:off + HEAD_DIM].reshape(bpb, seq, HEAD_DIM)
            kh = qkv16[:, off + HEAD_DIM:off + 2 * HEAD_DIM].reshape(bpb, seq, HEAD_DIM)
            vh = qkv16[:, off + 2 * HEAD_DIM:off + 3 * HEAD_DIM].reshape(bpb, seq, HEAD_DIM)

            s = jnp.einsum('bqd,bkd->bqk', qh, kh,
                           preferred_element_type=f32) * scale
            s = s - jnp.max(s, axis=-1, keepdims=True)     # stable softmax, f32
            p = jnp.exp(s)
            p = p / jnp.sum(p, axis=-1, keepdims=True)     # exact normalization
            ctx = jnp.einsum('bqk,bkd->bqd', p.astype(bf16), vh,
                             preferred_element_type=f32)   # (bpb, seq, D)

            o_w_h = w_ref[l, hh * HEAD_DIM:(hh + 1) * HEAD_DIM,
                          3 * HIDDEN:4 * HIDDEN]            # (D, HIDDEN)
            contrib = jnp.dot(ctx.reshape(m, HEAD_DIM).astype(bf16),
                              o_w_h.astype(bf16), preferred_element_type=f32)
            attn = contrib if attn is None else attn + contrib

        x = attn + vparam(OFF_O_B, HIDDEN) + res

        # ---------------- MLP block ----------------
        res = x
        xn = _layernorm(x, vparam(OFF_LN2_G, HIDDEN), vparam(OFF_LN2_B, HIDDEN))
        y = jnp.dot(xn.astype(bf16),
                    w_ref[l, HIDDEN:2 * HIDDEN, 0:MLP_DIM].astype(bf16),
                    preferred_element_type=f32) + vparam(OFF_FC1_B, MLP_DIM)
        y = 0.5 * y * (1.0 + _erf(y * inv_sqrt2))           # exact GELU
        y = jax.lax.dot_general(                            # y @ fc2_w (fc2 stored transposed)
            y.astype(bf16),
            w_ref[l, HIDDEN:2 * HIDDEN, MLP_DIM:2 * MLP_DIM].astype(bf16),
            (((1,), (1,)), ((), ())),
            preferred_element_type=f32) + vparam(OFF_FC2_B, HIDDEN)
        x = y + res

        # ---- per-layer encoder_norm, stored lane-dense (transposed) ----
        normed = _layernorm(x, vparam(OFF_NORM_G, HIDDEN), vparam(OFF_NORM_B, HIDDEN))
        out_ref[0, l] = jax.lax.dot_general(                # == normed.T, exact f32
            normed, eye, (((0,), (0,)), ((), ())),
            preferred_element_type=f32)


# ---------------- host-side packing (free layout plumbing) ----------------

def _head_major_concat(q, k, v):
    """Reorder fused qkv columns to [h0:q|k|v, h1:q|k|v, ...]."""
    blocks = []
    for hh in range(NUM_HEADS):
        sl = slice(hh * HEAD_DIM, (hh + 1) * HEAD_DIM)
        blocks += [q[..., sl], k[..., sl], v[..., sl]]
    return jnp.concatenate(blocks, axis=-1)


def _pack_params(params):
    L = NUM_LAYERS
    qkv_w = _head_major_concat(params["q_w"], params["k_w"], params["v_w"])   # (L,H,3H)
    qkv_b = _head_major_concat(params["q_b"], params["k_b"], params["v_b"])   # (L,3H)
    norm_g = jnp.broadcast_to(params["norm_g"], (L, HIDDEN))
    norm_b = jnp.broadcast_to(params["norm_b"], (L, HIDDEN))

    vec = jnp.concatenate(
        [params["ln1_g"], params["ln1_b"], qkv_b, params["o_b"],
         params["ln2_g"], params["ln2_b"], params["fc1_b"], params["fc2_b"],
         norm_g, norm_b], axis=-1)
    vec = jnp.pad(vec, ((0, 0), (0, VEC_W - vec.shape[-1]))).astype(jnp.float32)

    top = jnp.concatenate([qkv_w, params["o_w"]], axis=-1)                    # (L, H, 4H)
    bot = jnp.concatenate([params["fc1_w"],
                           jnp.swapaxes(params["fc2_w"], -1, -2)], axis=-1)   # (L, H, 4H)
    wsl = jnp.concatenate([top, bot], axis=1).astype(jnp.float32)             # (L, 2H, 4H)
    return vec, wsl


def _num_programs(batch):
    """Use a parallel batch grid only when the chip has 2 TensorCores (v7x)."""
    ncores = 1
    try:
        kind = jax.devices()[0].device_kind.lower().replace(" ", "")
        if "v7" in kind or "tpu7" in kind:
            ncores = 2
    except Exception:
        ncores = 1
    while ncores > 1 and batch % ncores != 0:
        ncores -= 1
    return ncores


def encoder_forward(hidden_states, params):
    """Pallas equivalent of Encoder.forward (vis=False, dropout=identity)."""
    B, S, H = hidden_states.shape
    assert H == HIDDEN
    P = _num_programs(B)
    bpb = B // P
    T = bpb * S

    x2 = hidden_states.reshape(B * S, H).astype(jnp.float32)
    vec, wsl = _pack_params(params)

    # Rough roofline numbers so XLA can schedule neighbouring ops around the call.
    flops = 2 * NUM_LAYERS * (
        B * S * H * 3 * H + 2 * B * NUM_HEADS * S * S * HEAD_DIM
        + B * S * H * H + 2 * B * S * H * MLP_DIM)
    transcendentals = NUM_LAYERS * (B * NUM_HEADS * S * S + B * S * MLP_DIM)
    bytes_accessed = 4 * (x2.size + vec.size + wsl.size + NUM_LAYERS * B * S * H)

    out = pl.pallas_call(
        functools.partial(_encoder_kernel, bpb=bpb, seq=S),
        out_shape=jax.ShapeDtypeStruct((P, NUM_LAYERS, H, T), jnp.float32),
        grid=(P,),
        in_specs=[
            pl.BlockSpec((T, H), lambda i: (i, 0)),                          # tokens (batch-blocked)
            pl.BlockSpec((NUM_LAYERS, VEC_W), lambda i: (0, 0)),             # packed vectors
            pl.BlockSpec((NUM_LAYERS, W_ROWS, W_COLS), lambda i: (0, 0, 0)),  # packed weights
        ],
        out_specs=pl.BlockSpec((1, NUM_LAYERS, H, T), lambda i: (i, 0, 0, 0)),
        compiler_params=pltpu.CompilerParams(dimension_semantics=("parallel",)),
        cost_estimate=pl.CostEstimate(flops=int(flops),
                                      transcendentals=int(transcendentals),
                                      bytes_accessed=int(bytes_accessed)),
    )(x2, vec, wsl)

    # (P, L, H, T) -> (L, B, S, H): pure wrapper-side layout plumbing.
    enc = jnp.transpose(out, (1, 0, 3, 2)).reshape(NUM_LAYERS, B, S, H)
    encoded = [enc[l] for l in range(NUM_LAYERS)]
    attn_weights = []          # vis=False -> Encoder returns an empty list
    return encoded, attn_weights


# ---------------- pure-JAX reference (mirrors the torch module) ----------------

def encoder_reference(hidden_states, params):
    B, S, H = hidden_states.shape
    x = hidden_states.reshape(B * S, H).astype(jnp.float32)
    outs = []
    for l in range(NUM_LAYERS):
        h = x
        xn = _layernorm(x, params["ln1_g"][l], params["ln1_b"][l])
        q = xn @ params["q_w"][l] + params["q_b"][l]
        k = xn @ params["k_w"][l] + params["k_b"][l]
        v = xn @ params["v_w"][l] + params["v_b"][l]

        def heads(t):
            return t.reshape(B, S, NUM_HEADS, HEAD_DIM).transpose(0, 2, 1, 3)

        qh, kh, vh = heads(q), heads(k), heads(v)
        s = jnp.einsum("bhqd,bhkd->bhqk", qh, kh) / math.sqrt(HEAD_DIM)
        p = jax.nn.softmax(s, axis=-1)
        ctx = jnp.einsum("bhqk,bhkd->bhqd", p, vh)
        ctx = ctx.transpose(0, 2, 1, 3).reshape(B * S, H)
        x = ctx @ params["o_w"][l] + params["o_b"][l] + h

        h = x
        xn = _layernorm(x, params["ln2_g"][l], params["ln2_b"][l])
        y = xn @ params["fc1_w"][l] + params["fc1_b"][l]
        y = 0.5 * y * (1.0 + jax.lax.erf(y / math.sqrt(2.0)))   # exact GELU
        y = y @ params["fc2_w"][l] + params["fc2_b"][l]
        x = y + h

        outs.append(_layernorm(x, params["norm_g"], params["norm_b"]).reshape(B, S, H))
    return outs


# ---------------- deterministic parameter init ----------------

def init_params(key):
    ks = iter(jax.random.split(key, 24))

    def nrm(shape, scale):
        return scale * jax.random.normal(next(ks), shape, jnp.float32)

    L, H, M = NUM_LAYERS, HIDDEN, MLP_DIM
    return dict(
        ln1_g=1.0 + nrm((L, H), 0.02), ln1_b=nrm((L, H), 0.02),
        q_w=nrm((L, H, H), 0.02), q_b=nrm((L, H), 0.02),
        k_w=nrm((L, H, H), 0.02), k_b=nrm((L, H), 0.02),
        v_w=nrm((L, H, H), 0.02), v_b=nrm((L, H), 0.02),
        o_w=nrm((L, H, H), 0.02), o_b=nrm((L, H), 0.02),
        ln2_g=1.0 + nrm((L, H), 0.02), ln2_b=nrm((L, H), 0.02),
        fc1_w=nrm((L, H, M), 0.1), fc1_b=nrm((L, M), 1e-6),
        fc2_w=nrm((L, M, H), 0.1), fc2_b=nrm((L, H), 1e-6),
        norm_g=1.0 + nrm((H,), 0.02), norm_b=nrm((H,), 0.02),
    )


if __name__ == "__main__":
    key = jax.random.PRNGKey(0)
    pkey, xkey = jax.random.split(key)
    params = init_params(pkey)
    hidden_states = jax.random.normal(xkey, (BATCH, SEQ, HIDDEN), jnp.float32)

    encoded, attn_weights = encoder_forward(hidden_states, params)
    for t in encoded:
        jax.block_until_ready(t)

    # structure checks (Encoder.forward contract, vis=False)
    assert attn_weights == []
    assert len(encoded) == NUM_LAYERS
    assert all(t.shape == (BATCH, SEQ, HIDDEN) for t in encoded)
    assert all(bool(jnp.all(jnp.isfinite(t))) for t in encoded)

    # numerical check vs an all-f32 reference of the torch module; bf16 MXU
    # operands (f32 accumulate) introduce ~1e-3-level error, well within 2e-2.
    ref = encoder_reference(hidden_states, params)
    max_err = max(float(jnp.max(jnp.abs(a - b))) for a, b in zip(encoded, ref))
    assert max_err < 2e-2, f"mismatch vs reference: {max_err}"

    print("KERNEL_OK")
</pallas_src>

<mosaic_0001>
module attributes {stable_mosaic.version = 11 : i64} {
  func.func @_encoder_kernel(%arg0: i32, %arg1: memref<128x32xf32, #tpu.memory_space<vmem>>, %arg2: memref<2x512xf32, #tpu.memory_space<vmem>>, %arg3: memref<2x64x128xf32, #tpu.memory_space<vmem>>, %arg4: memref<1x2x32x128xf32, #tpu.memory_space<vmem>>) attributes {dimension_semantics = [#tpu.dimension_semantics<parallel>], iteration_bounds = array<i64: 1>, scalar_prefetch = 0 : i64, scratch_operands = 0 : i64, tpu.core_type = #tpu.core_type<tc>, window_params = [{transform_indices = @transform_0, window_bounds = array<i64: 128, 32>}, {pipeline_mode = #tpu.pipeline_mode<synchronous>, transform_indices = @transform_1, window_bounds = array<i64: 2, 512>}, {pipeline_mode = #tpu.pipeline_mode<synchronous>, transform_indices = @transform_2, window_bounds = array<i64: 2, 64, 128>}, {transform_indices = @transform_3, window_bounds = array<i64: 1, 2, 32, 128>}]} {
    %0 = tpu.iota {dimensions = array<i32: 0>} : vector<128x128xi32>
    %1 = tpu.iota {dimensions = array<i32: 1>} : vector<128x128xi32>
    %2 = arith.cmpi eq, %0, %1 : vector<128x128xi32>
    %3 = arith.extui %2 : vector<128x128xi1> to vector<128x128xi32>
    %4 = arith.sitofp %3 : vector<128x128xi32> to vector<128x128xf32>
    %c0 = arith.constant 0 : index
    %c0_0 = arith.constant 0 : index
    %5 = vector.load %arg1[%c0, %c0_0] : memref<128x32xf32, #tpu.memory_space<vmem>>, vector<128x32xf32>
    %c0_1 = arith.constant 0 : index
    %c0_2 = arith.constant 0 : index
    %6 = vector.load %arg2[%c0_1, %c0_2] : memref<2x512xf32, #tpu.memory_space<vmem>>, vector<1x32xf32>
    %c0_3 = arith.constant 0 : index
    %c32 = arith.constant 32 : index
    %7 = vector.load %arg2[%c0_3, %c32] : memref<2x512xf32, #tpu.memory_space<vmem>>, vector<1x32xf32>
    %cst = arith.constant dense<0.000000e+00> : vector<128xf32>
    %8 = vector.multi_reduction <add>, %5, %cst [1] : vector<128x32xf32> to vector<128xf32>
    %9 = vector.shape_cast %8 : vector<128xf32> to vector<128x1xf32>
    %cst_4 = arith.constant 3.200000e+01 : f32
    %10 = vector.broadcast %cst_4 : f32 to vector<128x1xf32>
    %11 = arith.divf %9, %10 : vector<128x1xf32>
    %12 = vector.broadcast %11 : vector<128x1xf32> to vector<128x32xf32>
    %13 = arith.subf %5, %12 : vector<128x32xf32>
    %14 = arith.mulf %13, %13 : vector<128x32xf32>
    %cst_5 = arith.constant dense<0.000000e+00> : vector<128xf32>
    %15 = vector.multi_reduction <add>, %14, %cst_5 [1] : vector<128x32xf32> to vector<128xf32>
    %16 = vector.shape_cast %15 : vector<128xf32> to vector<128x1xf32>
    %cst_6 = arith.constant 3.200000e+01 : f32
    %17 = vector.broadcast %cst_6 : f32 to vector<128x1xf32>
    %18 = arith.divf %16, %17 : vector<128x1xf32>
    %cst_7 = arith.constant 9.99999997E-7 : f32
    %19 = vector.broadcast %cst_7 : f32 to vector<128x1xf32>
    %20 = arith.addf %18, %19 : vector<128x1xf32>
    %21 = math.rsqrt %20 : vector<128x1xf32>
    %22 = vector.broadcast %21 : vector<128x1xf32> to vector<128x32xf32>
    %23 = arith.mulf %13, %22 : vector<128x32xf32>
    %24 = vector.broadcast %6 : vector<1x32xf32> to vector<128x32xf32>
    %25 = arith.mulf %23, %24 : vector<128x32xf32>
    %26 = vector.broadcast %7 : vector<1x32xf32> to vector<128x32xf32>
    %27 = arith.addf %25, %26 : vector<128x32xf32>
    %28 = arith.truncf %27 : vector<128x32xf32> to vector<128x32xbf16>
    %c0_8 = arith.constant 0 : index
    %c0_9 = arith.constant 0 : index
    %c0_10 = arith.constant 0 : index
    %29 = vector.load %arg3[%c0_8, %c0_9, %c0_10] : memref<2x64x128xf32, #tpu.memory_space<vmem>>, vector<1x32x96xf32>
    %30 = vector.shape_cast %29 : vector<1x32x96xf32> to vector<32x96xf32>
    %31 = arith.truncf %30 : vector<32x96xf32> to vector<32x96xbf16>
    %cst_11 = arith.constant dense<0.000000e+00> : vector<128x96xf32>
    %32 = tpu.matmul %28, %31, %cst_11 {dimension_numbers = #tpu.dot_dimension_numbers<[1], [0], [0], [1], [0, 0, 1, 1], [], []>} : vector<128x32xbf16>, vector<32x96xbf16>, vector<128x96xf32> -> vector<128x96xf32>
    %c0_12 = arith.constant 0 : index
    %c64 = arith.constant 64 : index
    %33 = vector.load %arg2[%c0_12, %c64] : memref<2x512xf32, #tpu.memory_space<vmem>>, vector<1x96xf32>
    %34 = vector.broadcast %33 : vector<1x96xf32> to vector<128x96xf32>
    %35 = arith.addf %32, %34 : vector<128x96xf32>
    %36 = arith.truncf %35 : vector<128x96xf32> to vector<128x96xbf16>
    %37 = vector.extract_strided_slice %36 {offsets = [0, 0], sizes = [128, 8], strides = [1, 1]} : vector<128x96xbf16> to vector<128x8xbf16>
    %38 = vector.shape_cast %37 : vector<128x8xbf16> to vector<2x64x8xbf16>
    %39 = vector.extract_strided_slice %36 {offsets = [0, 8], sizes = [128, 8], strides = [1, 1]} : vector<128x96xbf16> to vector<128x8xbf16>
    %40 = vector.shape_cast %39 : vector<128x8xbf16> to vector<2x64x8xbf16>
    %41 = vector.extract_strided_slice %36 {offsets = [0, 16], sizes = [128, 8], strides = [1, 1]} : vector<128x96xbf16> to vector<128x8xbf16>
    %42 = vector.shape_cast %41 : vector<128x8xbf16> to vector<2x64x8xbf16>
    "tpu.trace_start"() <{level = 10 : i32, message = "bqd,bkd->bqk"}> : () -> ()
    %cst_13 = arith.constant dense<0.000000e+00> : vector<2x64x64xf32>
    %43 = tpu.matmul %38, %40, %cst_13 {dimension_numbers = #tpu.dot_dimension_numbers<[2], [2], [1], [1], [0, 0, 0, 1, 1, 1], [0], [0]>} : vector<2x64x8xbf16>, vector<2x64x8xbf16>, vector<2x64x64xf32> -> vector<2x64x64xf32>
    "tpu.trace_stop"() : () -> ()
    %cst_14 = arith.constant 0.353553385 : f32
    %44 = vector.broadcast %cst_14 : f32 to vector<2x64x64xf32>
    %45 = arith.mulf %43, %44 : vector<2x64x64xf32>
    %cst_15 = arith.constant dense<0xFF800000> : vector<2x64xf32>
    %46 = vector.multi_reduction <maximumf>, %45, %cst_15 [2] : vector<2x64x64xf32> to vector<2x64xf32>
    %47 = vector.shape_cast %46 : vector<2x64xf32> to vector<2x64x1xf32>
    %48 = vector.broadcast %47 : vector<2x64x1xf32> to vector<2x64x64xf32>
    %49 = arith.subf %45, %48 : vector<2x64x64xf32>
    %50 = math.exp %49 : vector<2x64x64xf32>
    %cst_16 = arith.constant dense<0.000000e+00> : vector<2x64xf32>
    %51 = vector.multi_reduction <add>, %50, %cst_16 [2] : vector<2x64x64xf32> to vector<2x64xf32>
    %52 = vector.shape_cast %51 : vector<2x64xf32> to vector<2x64x1xf32>
    %53 = vector.broadcast %52 : vector<2x64x1xf32> to vector<2x64x64xf32>
    %54 = arith.divf %50, %53 : vector<2x64x64xf32>
    %55 = arith.truncf %54 : vector<2x64x64xf32> to vector<2x64x64xbf16>
    "tpu.trace_start"() <{level = 10 : i32, message = "bqk,bkd->bqd"}> : () -> ()
    %cst_17 = arith.constant dense<0.000000e+00> : vector<2x64x8xf32>
    %56 = tpu.matmul %55, %42, %cst_17 {dimension_numbers = #tpu.dot_dimension_numbers<[2], [1], [1], [2], [0, 0, 0, 1, 1, 2], [0], [0]>} : vector<2x64x64xbf16>, vector<2x64x8xbf16>, vector<2x64x8xf32> -> vector<2x64x8xf32>
    "tpu.trace_stop"() : () -> ()
    %c0_18 = arith.constant 0 : index
    %c0_19 = arith.constant 0 : index
    %c96 = arith.constant 96 : index
    %57 = vector.load %arg3[%c0_18, %c0_19, %c96] : memref<2x64x128xf32, #tpu.memory_space<vmem>>, vector<1x8x32xf32>
    %58 = vector.shape_cast %57 : vector<1x8x32xf32> to vector<8x32xf32>
    %59 = vector.shape_cast %56 : vector<2x64x8xf32> to vector<128x8xf32>
    %60 = arith.truncf %59 : vector<128x8xf32> to vector<128x8xbf16>
    %61 = arith.truncf %58 : vector<8x32xf32> to vector<8x32xbf16>
    %cst_20 = arith.constant dense<0.000000e+00> : vector<128x32xf32>
    %62 = tpu.matmul %60, %61, %cst_20 {dimension_numbers = #tpu.dot_dimension_numbers<[1], [0], [0], [1], [0, 0, 1, 1], [], []>} : vector<128x8xbf16>, vector<8x32xbf16>, vector<128x32xf32> -> vector<128x32xf32>
    %63 = vector.extract_strided_slice %36 {offsets = [0, 24], sizes = [128, 8], strides = [1, 1]} : vector<128x96xbf16> to vector<128x8xbf16>
    %64 = vector.shape_cast %63 : vector<128x8xbf16> to vector<2x64x8xbf16>
    %65 = vector.extract_strided_slice %36 {offsets = [0, 32], sizes = [128, 8], strides = [1, 1]} : vector<128x96xbf16> to vector<128x8xbf16>
    %66 = vector.shape_cast %65 : vector<128x8xbf16> to vector<2x64x8xbf16>
    %67 = vector.extract_strided_slice %36 {offsets = [0, 40], sizes = [128, 8], strides = [1, 1]} : vector<128x96xbf16> to vector<128x8xbf16>
    %68 = vector.shape_cast %67 : vector<128x8xbf16> to vector<2x64x8xbf16>
    "tpu.trace_start"() <{level = 10 : i32, message = "bqd,bkd->bqk"}> : () -> ()
    %cst_21 = arith.constant dense<0.000000e+00> : vector<2x64x64xf32>
    %69 = tpu.matmul %64, %66, %cst_21 {dimension_numbers = #tpu.dot_dimension_numbers<[2], [2], [1], [1], [0, 0, 0, 1, 1, 1], [0], [0]>} : vector<2x64x8xbf16>, vector<2x64x8xbf16>, vector<2x64x64xf32> -> vector<2x64x64xf32>
    "tpu.trace_stop"() : () -> ()
    %cst_22 = arith.constant 0.353553385 : f32
    %70 = vector.broadcast %cst_22 : f32 to vector<2x64x64xf32>
    %71 = arith.mulf %69, %70 : vector<2x64x64xf32>
    %cst_23 = arith.constant dense<0xFF800000> : vector<2x64xf32>
    %72 = vector.multi_reduction <maximumf>, %71, %cst_23 [2] : vector<2x64x64xf32> to vector<2x64xf32>
    %73 = vector.shape_cast %72 : vector<2x64xf32> to vector<2x64x1xf32>
    %74 = vector.broadcast %73 : vector<2x64x1xf32> to vector<2x64x64xf32>
    %75 = arith.subf %71, %74 : vector<2x64x64xf32>
    %76 = math.exp %75 : vector<2x64x64xf32>
    %cst_24 = arith.constant dense<0.000000e+00> : vector<2x64xf32>
    %77 = vector.multi_reduction <add>, %76, %cst_24 [2] : vector<2x64x64xf32> to vector<2x64xf32>
    %78 = vector.shape_cast %77 : vector<2x64xf32> to vector<2x64x1xf32>
    %79 = vector.broadcast %78 : vector<2x64x1xf32> to vector<2x64x64xf32>
    %80 = arith.divf %76, %79 : vector<2x64x64xf32>
    %81 = arith.truncf %80 : vector<2x64x64xf32> to vector<2x64x64xbf16>
    "tpu.trace_start"() <{level = 10 : i32, message = "bqk,bkd->bqd"}> : () -> ()
    %cst_25 = arith.constant dense<0.000000e+00> : vector<2x64x8xf32>
    %82 = tpu.matmul %81, %68, %cst_25 {dimension_numbers = #tpu.dot_dimension_numbers<[2], [1], [1], [2], [0, 0, 0, 1, 1, 2], [0], [0]>} : vector<2x64x64xbf16>, vector<2x64x8xbf16>, vector<2x64x8xf32> -> vector<2x64x8xf32>
    "tpu.trace_stop"() : () -> ()
    %c0_26 = arith.constant 0 : index
    %c8 = arith.constant 8 : index
    %c96_27 = arith.constant 96 : index
    %83 = vector.load %arg3[%c0_26, %c8, %c96_27] : memref<2x64x128xf32, #tpu.memory_space<vmem>>, vector<1x8x32xf32>
    %84 = vector.shape_cast %83 : vector<1x8x32xf32> to vector<8x32xf32>
    %85 = vector.shape_cast %82 : vector<2x64x8xf32> to vector<128x8xf32>
    %86 = arith.truncf %85 : vector<128x8xf32> to vector<128x8xbf16>
    %87 = arith.truncf %84 : vector<8x32xf32> to vector<8x32xbf16>
    %cst_28 = arith.constant dense<0.000000e+00> : vector<128x32xf32>
    %88 = tpu.matmul %86, %87, %cst_28 {dimension_numbers = #tpu.dot_dimension_numbers<[1], [0], [0], [1], [0, 0, 1, 1], [], []>} : vector<128x8xbf16>, vector<8x32xbf16>, vector<128x32xf32> -> vector<128x32xf32>
    %89 = arith.addf %62, %88 : vector<128x32xf32>
    %90 = vector.extract_strided_slice %36 {offsets = [0, 48], sizes = [128, 8], strides = [1, 1]} : vector<128x96xbf16> to vector<128x8xbf16>
    %91 = vector.shape_cast %90 : vector<128x8xbf16> to vector<2x64x8xbf16>
    %92 = vector.extract_strided_slice %36 {offsets = [0, 56], sizes = [128, 8], strides = [1, 1]} : vector<128x96xbf16> to vector<128x8xbf16>
    %93 = vector.shape_cast %92 : vector<128x8xbf16> to vector<2x64x8xbf16>
    %94 = vector.extract_strided_slice %36 {offsets = [0, 64], sizes = [128, 8], strides = [1, 1]} : vector<128x96xbf16> to vector<128x8xbf16>
    %95 = vector.shape_cast %94 : vector<128x8xbf16> to vector<2x64x8xbf16>
    "tpu.trace_start"() <{level = 10 : i32, message = "bqd,bkd->bqk"}> : () -> ()
    %cst_29 = arith.constant dense<0.000000e+00> : vector<2x64x64xf32>
    %96 = tpu.matmul %91, %93, %cst_29 {dimension_numbers = #tpu.dot_dimension_numbers<[2], [2], [1], [1], [0, 0, 0, 1, 1, 1], [0], [0]>} : vector<2x64x8xbf16>, vector<2x64x8xbf16>, vector<2x64x64xf32> -> vector<2x64x64xf32>
    "tpu.trace_stop"() : () -> ()
    %cst_30 = arith.constant 0.353553385 : f32
    %97 = vector.broadcast %cst_30 : f32 to vector<2x64x64xf32>
    %98 = arith.mulf %96, %97 : vector<2x64x64xf32>
    %cst_31 = arith.constant dense<0xFF800000> : vector<2x64xf32>
    %99 = vector.multi_reduction <maximumf>, %98, %cst_31 [2] : vector<2x64x64xf32> to vector<2x64xf32>
    %100 = vector.shape_cast %99 : vector<2x64xf32> to vector<2x64x1xf32>
    %101 = vector.broadcast %100 : vector<2x64x1xf32> to vector<2x64x64xf32>
    %102 = arith.subf %98, %101 : vector<2x64x64xf32>
    %103 = math.exp %102 : vector<2x64x64xf32>
    %cst_32 = arith.constant dense<0.000000e+00> : vector<2x64xf32>
    %104 = vector.multi_reduction <add>, %103, %cst_32 [2] : vector<2x64x64xf32> to vector<2x64xf32>
    %105 = vector.shape_cast %104 : vector<2x64xf32> to vector<2x64x1xf32>
    %106 = vector.broadcast %105 : vector<2x64x1xf32> to vector<2x64x64xf32>
    %107 = arith.divf %103, %106 : vector<2x64x64xf32>
    %108 = arith.truncf %107 : vector<2x64x64xf32> to vector<2x64x64xbf16>
    "tpu.trace_start"() <{level = 10 : i32, message = "bqk,bkd->bqd"}> : () -> ()
    %cst_33 = arith.constant dense<0.000000e+00> : vector<2x64x8xf32>
    %109 = tpu.matmul %108, %95, %cst_33 {dimension_numbers = #tpu.dot_dimension_numbers<[2], [1], [1], [2], [0, 0, 0, 1, 1, 2], [0], [0]>} : vector<2x64x64xbf16>, vector<2x64x8xbf16>, vector<2x64x8xf32> -> vector<2x64x8xf32>
    "tpu.trace_stop"() : () -> ()
    %c0_34 = arith.constant 0 : index
    %c16 = arith.constant 16 : index
    %c96_35 = arith.constant 96 : index
    %110 = vector.load %arg3[%c0_34, %c16, %c96_35] : memref<2x64x128xf32, #tpu.memory_space<vmem>>, vector<1x8x32xf32>
    %111 = vector.shape_cast %110 : vector<1x8x32xf32> to vector<8x32xf32>
    %112 = vector.shape_cast %109 : vector<2x64x8xf32> to vector<128x8xf32>
    %113 = arith.truncf %112 : vector<128x8xf32> to vector<128x8xbf16>
    %114 = arith.truncf %111 : vector<8x32xf32> to vector<8x32xbf16>
    %cst_36 = arith.constant dense<0.000000e+00> : vector<128x32xf32>
    %115 = tpu.matmul %113, %114, %cst_36 {dimension_numbers = #tpu.dot_dimension_numbers<[1], [0], [0], [1], [0, 0, 1, 1], [], []>} : vector<128x8xbf16>, vector<8x32xbf16>, vector<128x32xf32> -> vector<128x32xf32>
    %116 = arith.addf %89, %115 : vector<128x32xf32>
    %117 = vector.extract_strided_slice %36 {offsets = [0, 72], sizes = [128, 8], strides = [1, 1]} : vector<128x96xbf16> to vector<128x8xbf16>
    %118 = vector.shape_cast %117 : vector<128x8xbf16> to vector<2x64x8xbf16>
    %119 = vector.extract_strided_slice %36 {offsets = [0, 80], sizes = [128, 8], strides = [1, 1]} : vector<128x96xbf16> to vector<128x8xbf16>
    %120 = vector.shape_cast %119 : vector<128x8xbf16> to vector<2x64x8xbf16>
    %121 = vector.extract_strided_slice %36 {offsets = [0, 88], sizes = [128, 8], strides = [1, 1]} : vector<128x96xbf16> to vector<128x8xbf16>
    %122 = vector.shape_cast %121 : vector<128x8xbf16> to vector<2x64x8xbf16>
    "tpu.trace_start"() <{level = 10 : i32, message = "bqd,bkd->bqk"}> : () -> ()
    %cst_37 = arith.constant dense<0.000000e+00> : vector<2x64x64xf32>
    %123 = tpu.matmul %118, %120, %cst_37 {dimension_numbers = #tpu.dot_dimension_numbers<[2], [2], [1], [1], [0, 0, 0, 1, 1, 1], [0], [0]>} : vector<2x64x8xbf16>, vector<2x64x8xbf16>, vector<2x64x64xf32> -> vector<2x64x64xf32>
    "tpu.trace_stop"() : () -> ()
    %cst_38 = arith.constant 0.353553385 : f32
    %124 = vector.broadcast %cst_38 : f32 to vector<2x64x64xf32>
    %125 = arith.mulf %123, %124 : vector<2x64x64xf32>
    %cst_39 = arith.constant dense<0xFF800000> : vector<2x64xf32>
    %126 = vector.multi_reduction <maximumf>, %125, %cst_39 [2] : vector<2x64x64xf32> to vector<2x64xf32>
    %127 = vector.shape_cast %126 : vector<2x64xf32> to vector<2x64x1xf32>
    %128 = vector.broadcast %127 : vector<2x64x1xf32> to vector<2x64x64xf32>
    %129 = arith.subf %125, %128 : vector<2x64x64xf32>
    %130 = math.exp %129 : vector<2x64x64xf32>
    %cst_40 = arith.constant dense<0.000000e+00> : vector<2x64xf32>
    %131 = vector.multi_reduction <add>, %130, %cst_40 [2] : vector<2x64x64xf32> to vector<2x64xf32>
    %132 = vector.shape_cast %131 : vector<2x64xf32> to vector<2x64x1xf32>
    %133 = vector.broadcast %132 : vector<2x64x1xf32> to vector<2x64x64xf32>
    %134 = arith.divf %130, %133 : vector<2x64x64xf32>
    %135 = arith.truncf %134 : vector<2x64x64xf32> to vector<2x64x64xbf16>
    "tpu.trace_start"() <{level = 10 : i32, message = "bqk,bkd->bqd"}> : () -> ()
    %cst_41 = arith.constant dense<0.000000e+00> : vector<2x64x8xf32>
    %136 = tpu.matmul %135, %122, %cst_41 {dimension_numbers = #tpu.dot_dimension_numbers<[2], [1], [1], [2], [0, 0, 0, 1, 1, 2], [0], [0]>} : vector<2x64x64xbf16>, vector<2x64x8xbf16>, vector<2x64x8xf32> -> vector<2x64x8xf32>
    "tpu.trace_stop"() : () -> ()
    %c0_42 = arith.constant 0 : index
    %c24 = arith.constant 24 : index
    %c96_43 = arith.constant 96 : index
    %137 = vector.load %arg3[%c0_42, %c24, %c96_43] : memref<2x64x128xf32, #tpu.memory_space<vmem>>, vector<1x8x32xf32>
    %138 = vector.shape_cast %137 : vector<1x8x32xf32> to vector<8x32xf32>
    %139 = vector.shape_cast %136 : vector<2x64x8xf32> to vector<128x8xf32>
    %140 = arith.truncf %139 : vector<128x8xf32> to vector<128x8xbf16>
    %141 = arith.truncf %138 : vector<8x32xf32> to vector<8x32xbf16>
    %cst_44 = arith.constant dense<0.000000e+00> : vector<128x32xf32>
    %142 = tpu.matmul %140, %141, %cst_44 {dimension_numbers = #tpu.dot_dimension_numbers<[1], [0], [0], [1], [0, 0, 1, 1], [], []>} : vector<128x8xbf16>, vector<8x32xbf16>, vector<128x32xf32> -> vector<128x32xf32>
    %143 = arith.addf %116, %142 : vector<128x32xf32>
    %c0_45 = arith.constant 0 : index
    %c160 = arith.constant 160 : index
    %144 = vector.load %arg2[%c0_45, %c160] : memref<2x512xf32, #tpu.memory_space<vmem>>, vector<1x32xf32>
    %145 = vector.broadcast %144 : vector<1x32xf32> to vector<128x32xf32>
    %146 = arith.addf %143, %145 : vector<128x32xf32>
    %147 = arith.addf %146, %5 : vector<128x32xf32>
    %c0_46 = arith.constant 0 : index
    %c192 = arith.constant 192 : index
    %148 = vector.load %arg2[%c0_46, %c192] : memref<2x512xf32, #tpu.memory_space<vmem>>, vector<1x32xf32>
    %c0_47 = arith.constant 0 : index
    %c224 = arith.constant 224 : index
    %149 = vector.load %arg2[%c0_47, %c224] : memref<2x512xf32, #tpu.memory_space<vmem>>, vector<1x32xf32>
    %cst_48 = arith.constant dense<0.000000e+00> : vector<128xf32>
    %150 = vector.multi_reduction <add>, %147, %cst_48 [1] : vector<128x32xf32> to vector<128xf32>
    %151 = vector.shape_cast %150 : vector<128xf32> to vector<128x1xf32>
    %cst_49 = arith.constant 3.200000e+01 : f32
    %152 = vector.broadcast %cst_49 : f32 to vector<128x1xf32>
    %153 = arith.divf %151, %152 : vector<128x1xf32>
    %154 = vector.broadcast %153 : vector<128x1xf32> to vector<128x32xf32>
    %155 = arith.subf %147, %154 : vector<128x32xf32>
    %156 = arith.mulf %155, %155 : vector<128x32xf32>
    %cst_50 = arith.constant dense<0.000000e+00> : vector<128xf32>
    %157 = vector.multi_reduction <add>, %156, %cst_50 [1] : vector<128x32xf32> to vector<128xf32>
    %158 = vector.shape_cast %157 : vector<128xf32> to vector<128x1xf32>
    %cst_51 = arith.constant 3.200000e+01 : f32
    %159 = vector.broadcast %cst_51 : f32 to vector<128x1xf32>
    %160 = arith.divf %158, %159 : vector<128x1xf32>
    %cst_52 = arith.constant 9.99999997E-7 : f32
    %161 = vector.broadcast %cst_52 : f32 to vector<128x1xf32>
    %162 = arith.addf %160, %161 : vector<128x1xf32>
    %163 = math.rsqrt %162 : vector<128x1xf32>
    %164 = vector.broadcast %163 : vector<128x1xf32> to vector<128x32xf32>
    %165 = arith.mulf %155, %164 : vector<128x32xf32>
    %166 = vector.broadcast %148 : vector<1x32xf32> to vector<128x32xf32>
    %167 = arith.mulf %165, %166 : vector<128x32xf32>
    %168 = vector.broadcast %149 : vector<1x32xf32> to vector<128x32xf32>
    %169 = arith.addf %167, %168 : vector<128x32xf32>
    %170 = arith.truncf %169 : vector<128x32xf32> to vector<128x32xbf16>
    %c0_53 = arith.constant 0 : index
    %c32_54 = arith.constant 32 : index
    %c0_55 = arith.constant 0 : index
    %171 = vector.load %arg3[%c0_53, %c32_54, %c0_55] : memref<2x64x128xf32, #tpu.memory_space<vmem>>, vector<1x32x64xf32>
    %172 = vector.shape_cast %171 : vector<1x32x64xf32> to vector<32x64xf32>
    %173 = arith.truncf %172 : vector<32x64xf32> to vector<32x64xbf16>
    %cst_56 = arith.constant dense<0.000000e+00> : vector<128x64xf32>
    %174 = tpu.matmul %170, %173, %cst_56 {dimension_numbers = #tpu.dot_dimension_numbers<[1], [0], [0], [1], [0, 0, 1, 1], [], []>} : vector<128x32xbf16>, vector<32x64xbf16>, vector<128x64xf32> -> vector<128x64xf32>
    %c0_57 = arith.constant 0 : index
    %c256 = arith.constant 256 : index
    %175 = vector.load %arg2[%c0_57, %c256] : memref<2x512xf32, #tpu.memory_space<vmem>>, vector<1x64xf32>
    %176 = vector.broadcast %175 : vector<1x64xf32> to vector<128x64xf32>
    %177 = arith.addf %174, %176 : vector<128x64xf32>
    %cst_58 = arith.constant 5.000000e-01 : f32
    %178 = vector.broadcast %cst_58 : f32 to vector<128x64xf32>
    %179 = arith.mulf %178, %177 : vector<128x64xf32>
    %cst_59 = arith.constant 0.707106769 : f32
    %180 = vector.broadcast %cst_59 : f32 to vector<128x64xf32>
    %181 = arith.mulf %177, %180 : vector<128x64xf32>
    %182 = math.absf %181 : vector<128x64xf32>
    %cst_60 = arith.constant 0.327591091 : f32
    %183 = vector.broadcast %cst_60 : f32 to vector<128x64xf32>
    %184 = arith.mulf %183, %182 : vector<128x64xf32>
    %cst_61 = arith.constant 1.000000e+00 : f32
    %185 = vector.broadcast %cst_61 : f32 to vector<128x64xf32>
    %186 = arith.addf %185, %184 : vector<128x64xf32>
    %cst_62 = arith.constant 1.000000e+00 : f32
    %187 = vector.broadcast %cst_62 : f32 to vector<128x64xf32>
    %188 = arith.divf %187, %186 : vector<128x64xf32>
    %cst_63 = arith.constant 1.06140542 : f32
    %189 = vector.broadcast %cst_63 : f32 to vector<128x64xf32>
    %190 = arith.mulf %188, %189 : vector<128x64xf32>
    %cst_64 = arith.constant -1.45315206 : f32
    %191 = vector.broadcast %cst_64 : f32 to vector<128x64xf32>
    %192 = arith.addf %191, %190 : vector<128x64xf32>
    %193 = arith.mulf %188, %192 : vector<128x64xf32>
    %cst_65 = arith.constant 1.42141378 : f32
    %194 = vector.broadcast %cst_65 : f32 to vector<128x64xf32>
    %195 = arith.addf %194, %193 : vector<128x64xf32>
    %196 = arith.mulf %188, %195 : vector<128x64xf32>
    %cst_66 = arith.constant -0.284496725 : f32
    %197 = vector.broadcast %cst_66 : f32 to vector<128x64xf32>
    %198 = arith.addf %197, %196 : vector<128x64xf32>
    %199 = arith.mulf %188, %198 : vector<128x64xf32>
    %cst_67 = arith.constant 0.254829586 : f32
    %200 = vector.broadcast %cst_67 : f32 to vector<128x64xf32>
    %201 = arith.addf %200, %199 : vector<128x64xf32>
    %202 = arith.mulf %188, %201 : vector<128x64xf32>
    %203 = arith.mulf %181, %181 : vector<128x64xf32>
    %cst_68 = arith.constant 0.000000e+00 : f32
    %204 = vector.broadcast %cst_68 : f32 to vector<128x64xf32>
    %205 = arith.subf %204, %203 : vector<128x64xf32>
    %206 = math.exp %205 : vector<128x64xf32>
    %207 = arith.mulf %202, %206 : vector<128x64xf32>
    %cst_69 = arith.constant 1.000000e+00 : f32
    %208 = vector.broadcast %cst_69 : f32 to vector<128x64xf32>
    %209 = arith.subf %208, %207 : vector<128x64xf32>
    %cst_70 = arith.constant 0.000000e+00 : f32
    %210 = vector.broadcast %cst_70 : f32 to vector<128x64xf32>
    %211 = arith.cmpf oge, %181, %210 : vector<128x64xf32>
    %cst_71 = arith.constant 0.000000e+00 : f32
    %212 = vector.broadcast %cst_71 : f32 to vector<128x64xf32>
    %213 = arith.subf %212, %209 : vector<128x64xf32>
    %214 = arith.select %211, %209, %213 : vector<128x64xi1>, vector<128x64xf32>
    %cst_72 = arith.constant 1.000000e+00 : f32
    %215 = vector.broadcast %cst_72 : f32 to vector<128x64xf32>
    %216 = arith.addf %215, %214 : vector<128x64xf32>
    %217 = arith.mulf %179, %216 : vector<128x64xf32>
    %218 = arith.truncf %217 : vector<128x64xf32> to vector<128x64xbf16>
    %c0_73 = arith.constant 0 : index
    %c32_74 = arith.constant 32 : index
    %c64_75 = arith.constant 64 : index
    %219 = vector.load %arg3[%c0_73, %c32_74, %c64_75] : memref<2x64x128xf32, #tpu.memory_space<vmem>>, vector<1x32x64xf32>
    %220 = vector.shape_cast %219 : vector<1x32x64xf32> to vector<32x64xf32>
    %221 = arith.truncf %220 : vector<32x64xf32> to vector<32x64xbf16>
    %cst_76 = arith.constant dense<0.000000e+00> : vector<128x32xf32>
    %222 = tpu.matmul %218, %221, %cst_76 {dimension_numbers = #tpu.dot_dimension_numbers<[1], [1], [0], [0], [0, 0, 1, 0], [], []>} : vector<128x64xbf16>, vector<32x64xbf16>, vector<128x32xf32> -> vector<128x32xf32>
    %c0_77 = arith.constant 0 : index
    %c320 = arith.constant 320 : index
    %223 = vector.load %arg2[%c0_77, %c320] : memref<2x512xf32, #tpu.memory_space<vmem>>, vector<1x32xf32>
    %224 = vector.broadcast %223 : vector<1x32xf32> to vector<128x32xf32>
    %225 = arith.addf %222, %224 : vector<128x32xf32>
    %226 = arith.addf %225, %147 : vector<128x32xf32>
    %c0_78 = arith.constant 0 : index
    %c352 = arith.constant 352 : index
    %227 = vector.load %arg2[%c0_78, %c352] : memref<2x512xf32, #tpu.memory_space<vmem>>, vector<1x32xf32>
    %c0_79 = arith.constant 0 : index
    %c384 = arith.constant 384 : index
    %228 = vector.load %arg2[%c0_79, %c384] : memref<2x512xf32, #tpu.memory_space<vmem>>, vector<1x32xf32>
    %cst_80 = arith.constant dense<0.000000e+00> : vector<128xf32>
    %229 = vector.multi_reduction <add>, %226, %cst_80 [1] : vector<128x32xf32> to vector<128xf32>
    %230 = vector.shape_cast %229 : vector<128xf32> to vector<128x1xf32>
    %cst_81 = arith.constant 3.200000e+01 : f32
    %231 = vector.broadcast %cst_81 : f32 to vector<128x1xf32>
    %232 = arith.divf %230, %231 : vector<128x1xf32>
    %233 = vector.broadcast %232 : vector<128x1xf32> to vector<128x32xf32>
    %234 = arith.subf %226, %233 : vector<128x32xf32>
    %235 = arith.mulf %234, %234 : vector<128x32xf32>
    %cst_82 = arith.constant dense<0.000000e+00> : vector<128xf32>
    %236 = vector.multi_reduction <add>, %235, %cst_82 [1] : vector<128x32xf32> to vector<128xf32>
    %237 = vector.shape_cast %236 : vector<128xf32> to vector<128x1xf32>
    %cst_83 = arith.constant 3.200000e+01 : f32
    %238 = vector.broadcast %cst_83 : f32 to vector<128x1xf32>
    %239 = arith.divf %237, %238 : vector<128x1xf32>
    %cst_84 = arith.constant 9.99999997E-7 : f32
    %240 = vector.broadcast %cst_84 : f32 to vector<128x1xf32>
    %241 = arith.addf %239, %240 : vector<128x1xf32>
    %242 = math.rsqrt %241 : vector<128x1xf32>
    %243 = vector.broadcast %242 : vector<128x1xf32> to vector<128x32xf32>
    %244 = arith.mulf %234, %243 : vector<128x32xf32>
    %245 = vector.broadcast %227 : vector<1x32xf32> to vector<128x32xf32>
    %246 = arith.mulf %244, %245 : vector<128x32xf32>
    %247 = vector.broadcast %228 : vector<1x32xf32> to vector<128x32xf32>
    %248 = arith.addf %246, %247 : vector<128x32xf32>
    %cst_85 = arith.constant dense<0.000000e+00> : vector<32x128xf32>
    %249 = tpu.matmul %248, %4, %cst_85 {dimension_numbers = #tpu.dot_dimension_numbers<[0], [0], [1], [1], [0, 1, 1, 1], [], []>} : vector<128x32xf32>, vector<128x128xf32>, vector<32x128xf32> -> vector<32x128xf32>
    %c0_86 = arith.constant 0 : index
    %c0_87 = arith.constant 0 : index
    %c0_88 = arith.constant 0 : index
    %c0_89 = arith.constant 0 : index
    %250 = vector.load %arg4[%c0_86, %c0_87, %c0_88, %c0_89] : memref<1x2x32x128xf32, #tpu.memory_space<vmem>>, vector<1x1x32x128xf32>
    %251 = vector.shape_cast %250 : vector<1x1x32x128xf32> to vector<32x128xf32>
    %252 = vector.shape_cast %249 : vector<32x128xf32> to vector<1x1x32x128xf32>
    tpu.vector_store %arg4[%c0_86, %c0_87, %c0_88, %c0_89], %252 {strides = array<i32>} : memref<1x2x32x128xf32, #tpu.memory_space<vmem>>, vector<1x1x32x128xf32>,
    %c1 = arith.constant 1 : index
    %c0_90 = arith.constant 0 : index
    %253 = vector.load %arg2[%c1, %c0_90] : memref<2x512xf32, #tpu.memory_space<vmem>>, vector<1x32xf32>
    %c1_91 = arith.constant 1 : index
    %c32_92 = arith.constant 32 : index
    %254 = vector.load %arg2[%c1_91, %c32_92] : memref<2x512xf32, #tpu.memory_space<vmem>>, vector<1x32xf32>
    %cst_93 = arith.constant dense<0.000000e+00> : vector<128xf32>
    %255 = vector.multi_reduction <add>, %226, %cst_93 [1] : vector<128x32xf32> to vector<128xf32>
    %256 = vector.shape_cast %255 : vector<128xf32> to vector<128x1xf32>
    %cst_94 = arith.constant 3.200000e+01 : f32
    %257 = vector.broadcast %cst_94 : f32 to vector<128x1xf32>
    %258 = arith.divf %256, %257 : vector<128x1xf32>
    %259 = vector.broadcast %258 : vector<128x1xf32> to vector<128x32xf32>
    %260 = arith.subf %226, %259 : vector<128x32xf32>
    %261 = arith.mulf %260, %260 : vector<128x32xf32>
    %cst_95 = arith.constant dense<0.000000e+00> : vector<128xf32>
    %262 = vector.multi_reduction <add>, %261, %cst_95 [1] : vector<128x32xf32> to vector<128xf32>
    %263 = vector.shape_cast %262 : vector<128xf32> to vector<128x1xf32>
    %cst_96 = arith.constant 3.200000e+01 : f32
    %264 = vector.broadcast %cst_96 : f32 to vector<128x1xf32>
    %265 = arith.divf %263, %264 : vector<128x1xf32>
    %cst_97 = arith.constant 9.99999997E-7 : f32
    %266 = vector.broadcast %cst_97 : f32 to vector<128x1xf32>
    %267 = arith.addf %265, %266 : vector<128x1xf32>
    %268 = math.rsqrt %267 : vector<128x1xf32>
    %269 = vector.broadcast %268 : vector<128x1xf32> to vector<128x32xf32>
    %270 = arith.mulf %260, %269 : vector<128x32xf32>
    %271 = vector.broadcast %253 : vector<1x32xf32> to vector<128x32xf32>
    %272 = arith.mulf %270, %271 : vector<128x32xf32>
    %273 = vector.broadcast %254 : vector<1x32xf32> to vector<128x32xf32>
    %274 = arith.addf %272, %273 : vector<128x32xf32>
    %275 = arith.truncf %274 : vector<128x32xf32> to vector<128x32xbf16>
    %c1_98 = arith.constant 1 : index
    %c0_99 = arith.constant 0 : index
    %c0_100 = arith.constant 0 : index
    %276 = vector.load %arg3[%c1_98, %c0_99, %c0_100] : memref<2x64x128xf32, #tpu.memory_space<vmem>>, vector<1x32x96xf32>
    %277 = vector.shape_cast %276 : vector<1x32x96xf32> to vector<32x96xf32>
    %278 = arith.truncf %277 : vector<32x96xf32> to vector<32x96xbf16>
    %cst_101 = arith.constant dense<0.000000e+00> : vector<128x96xf32>
    %279 = tpu.matmul %275, %278, %cst_101 {dimension_numbers = #tpu.dot_dimension_numbers<[1], [0], [0], [1], [0, 0, 1, 1], [], []>} : vector<128x32xbf16>, vector<32x96xbf16>, vector<128x96xf32> -> vector<128x96xf32>
    %c1_102 = arith.constant 1 : index
    %c64_103 = arith.constant 64 : index
    %280 = vector.load %arg2[%c1_102, %c64_103] : memref<2x512xf32, #tpu.memory_space<vmem>>, vector<1x96xf32>
    %281 = vector.broadcast %280 : vector<1x96xf32> to vector<128x96xf32>
    %282 = arith.addf %279, %281 : vector<128x96xf32>
    %283 = arith.truncf %282 : vector<128x96xf32> to vector<128x96xbf16>
    %284 = vector.extract_strided_slice %283 {offsets = [0, 0], sizes = [128, 8], strides = [1, 1]} : vector<128x96xbf16> to vector<128x8xbf16>
    %285 = vector.shape_cast %284 : vector<128x8xbf16> to vector<2x64x8xbf16>
    %286 = vector.extract_strided_slice %283 {offsets = [0, 8], sizes = [128, 8], strides = [1, 1]} : vector<128x96xbf16> to vector<128x8xbf16>
    %287 = vector.shape_cast %286 : vector<128x8xbf16> to vector<2x64x8xbf16>
    %288 = vector.extract_strided_slice %283 {offsets = [0, 16], sizes = [128, 8], strides = [1, 1]} : vector<128x96xbf16> to vector<128x8xbf16>
    %289 = vector.shape_cast %288 : vector<128x8xbf16> to vector<2x64x8xbf16>
    "tpu.trace_start"() <{level = 10 : i32, message = "bqd,bkd->bqk"}> : () -> ()
    %cst_104 = arith.constant dense<0.000000e+00> : vector<2x64x64xf32>
    %290 = tpu.matmul %285, %287, %cst_104 {dimension_numbers = #tpu.dot_dimension_numbers<[2], [2], [1], [1], [0, 0, 0, 1, 1, 1], [0], [0]>} : vector<2x64x8xbf16>, vector<2x64x8xbf16>, vector<2x64x64xf32> -> vector<2x64x64xf32>
    "tpu.trace_stop"() : () -> ()
    %cst_105 = arith.constant 0.353553385 : f32
    %291 = vector.broadcast %cst_105 : f32 to vector<2x64x64xf32>
    %292 = arith.mulf %290, %291 : vector<2x64x64xf32>
    %cst_106 = arith.constant dense<0xFF800000> : vector<2x64xf32>
    %293 = vector.multi_reduction <maximumf>, %292, %cst_106 [2] : vector<2x64x64xf32> to vector<2x64xf32>
    %294 = vector.shape_cast %293 : vector<2x64xf32> to vector<2x64x1xf32>
    %295 = vector.broadcast %294 : vector<2x64x1xf32> to vector<2x64x64xf32>
    %296 = arith.subf %292, %295 : vector<2x64x64xf32>
    %297 = math.exp %296 : vector<2x64x64xf32>
    %cst_107 = arith.constant dense<0.000000e+00> : vector<2x64xf32>
    %298 = vector.multi_reduction <add>, %297, %cst_107 [2] : vector<2x64x64xf32> to vector<2x64xf32>
    %299 = vector.shape_cast %298 : vector<2x64xf32> to vector<2x64x1xf32>
    %300 = vector.broadcast %299 : vector<2x64x1xf32> to vector<2x64x64xf32>
    %301 = arith.divf %297, %300 : vector<2x64x64xf32>
    %302 = arith.truncf %301 : vector<2x64x64xf32> to vector<2x64x64xbf16>
    "tpu.trace_start"() <{level = 10 : i32, message = "bqk,bkd->bqd"}> : () -> ()
    %cst_108 = arith.constant dense<0.000000e+00> : vector<2x64x8xf32>
    %303 = tpu.matmul %302, %289, %cst_108 {dimension_numbers = #tpu.dot_dimension_numbers<[2], [1], [1], [2], [0, 0, 0, 1, 1, 2], [0], [0]>} : vector<2x64x64xbf16>, vector<2x64x8xbf16>, vector<2x64x8xf32> -> vector<2x64x8xf32>
    "tpu.trace_stop"() : () -> ()
    %c1_109 = arith.constant 1 : index
    %c0_110 = arith.constant 0 : index
    %c96_111 = arith.constant 96 : index
    %304 = vector.load %arg3[%c1_109, %c0_110, %c96_111] : memref<2x64x128xf32, #tpu.memory_space<vmem>>, vector<1x8x32xf32>
    %305 = vector.shape_cast %304 : vector<1x8x32xf32> to vector<8x32xf32>
    %306 = vector.shape_cast %303 : vector<2x64x8xf32> to vector<128x8xf32>
    %307 = arith.truncf %306 : vector<128x8xf32> to vector<128x8xbf16>
    %308 = arith.truncf %305 : vector<8x32xf32> to vector<8x32xbf16>
    %cst_112 = arith.constant dense<0.000000e+00> : vector<128x32xf32>
    %309 = tpu.matmul %307, %308, %cst_112 {dimension_numbers = #tpu.dot_dimension_numbers<[1], [0], [0], [1], [0, 0, 1, 1], [], []>} : vector<128x8xbf16>, vector<8x32xbf16>, vector<128x32xf32> -> vector<128x32xf32>
    %310 = vector.extract_strided_slice %283 {offsets = [0, 24], sizes = [128, 8], strides = [1, 1]} : vector<128x96xbf16> to vector<128x8xbf16>
    %311 = vector.shape_cast %310 : vector<128x8xbf16> to vector<2x64x8xbf16>
    %312 = vector.extract_strided_slice %283 {offsets = [0, 32], sizes = [128, 8], strides = [1, 1]} : vector<128x96xbf16> to vector<128x8xbf16>
    %313 = vector.shape_cast %312 : vector<128x8xbf16> to vector<2x64x8xbf16>
    %314 = vector.extract_strided_slice %283 {offsets = [0, 40], sizes = [128, 8], strides = [1, 1]} : vector<128x96xbf16> to vector<128x8xbf16>
    %315 = vector.shape_cast %314 : vector<128x8xbf16> to vector<2x64x8xbf16>
    "tpu.trace_start"() <{level = 10 : i32, message = "bqd,bkd->bqk"}> : () -> ()
    %cst_113 = arith.constant dense<0.000000e+00> : vector<2x64x64xf32>
    %316 = tpu.matmul %311, %313, %cst_113 {dimension_numbers = #tpu.dot_dimension_numbers<[2], [2], [1], [1], [0, 0, 0, 1, 1, 1], [0], [0]>} : vector<2x64x8xbf16>, vector<2x64x8xbf16>, vector<2x64x64xf32> -> vector<2x64x64xf32>
    "tpu.trace_stop"() : () -> ()
    %cst_114 = arith.constant 0.353553385 : f32
    %317 = vector.broadcast %cst_114 : f32 to vector<2x64x64xf32>
    %318 = arith.mulf %316, %317 : vector<2x64x64xf32>
    %cst_115 = arith.constant dense<0xFF800000> : vector<2x64xf32>
    %319 = vector.multi_reduction <maximumf>, %318, %cst_115 [2] : vector<2x64x64xf32> to vector<2x64xf32>
    %320 = vector.shape_cast %319 : vector<2x64xf32> to vector<2x64x1xf32>
    %321 = vector.broadcast %320 : vector<2x64x1xf32> to vector<2x64x64xf32>
    %322 = arith.subf %318, %321 : vector<2x64x64xf32>
    %323 = math.exp %322 : vector<2x64x64xf32>
    %cst_116 = arith.constant dense<0.000000e+00> : vector<2x64xf32>
    %324 = vector.multi_reduction <add>, %323, %cst_116 [2] : vector<2x64x64xf32> to vector<2x64xf32>
    %325 = vector.shape_cast %324 : vector<2x64xf32> to vector<2x64x1xf32>
    %326 = vector.broadcast %325 : vector<2x64x1xf32> to vector<2x64x64xf32>
    %327 = arith.divf %323, %326 : vector<2x64x64xf32>
    %328 = arith.truncf %327 : vector<2x64x64xf32> to vector<2x64x64xbf16>
    "tpu.trace_start"() <{level = 10 : i32, message = "bqk,bkd->bqd"}> : () -> ()
    %cst_117 = arith.constant dense<0.000000e+00> : vector<2x64x8xf32>
    %329 = tpu.matmul %328, %315, %cst_117 {dimension_numbers = #tpu.dot_dimension_numbers<[2], [1], [1], [2], [0, 0, 0, 1, 1, 2], [0], [0]>} : vector<2x64x64xbf16>, vector<2x64x8xbf16>, vector<2x64x8xf32> -> vector<2x64x8xf32>
    "tpu.trace_stop"() : () -> ()
    %c1_118 = arith.constant 1 : index
    %c8_119 = arith.constant 8 : index
    %c96_120 = arith.constant 96 : index
    %330 = vector.load %arg3[%c1_118, %c8_119, %c96_120] : memref<2x64x128xf32, #tpu.memory_space<vmem>>, vector<1x8x32xf32>
    %331 = vector.shape_cast %330 : vector<1x8x32xf32> to vector<8x32xf32>
    %332 = vector.shape_cast %329 : vector<2x64x8xf32> to vector<128x8xf32>
    %333 = arith.truncf %332 : vector<128x8xf32> to vector<128x8xbf16>
    %334 = arith.truncf %331 : vector<8x32xf32> to vector<8x32xbf16>
    %cst_121 = arith.constant dense<0.000000e+00> : vector<128x32xf32>
    %335 = tpu.matmul %333, %334, %cst_121 {dimension_numbers = #tpu.dot_dimension_numbers<[1], [0], [0], [1], [0, 0, 1, 1], [], []>} : vector<128x8xbf16>, vector<8x32xbf16>, vector<128x32xf32> -> vector<128x32xf32>
    %336 = arith.addf %309, %335 : vector<128x32xf32>
    %337 = vector.extract_strided_slice %283 {offsets = [0, 48], sizes = [128, 8], strides = [1, 1]} : vector<128x96xbf16> to vector<128x8xbf16>
    %338 = vector.shape_cast %337 : vector<128x8xbf16> to vector<2x64x8xbf16>
    %339 = vector.extract_strided_slice %283 {offsets = [0, 56], sizes = [128, 8], strides = [1, 1]} : vector<128x96xbf16> to vector<128x8xbf16>
    %340 = vector.shape_cast %339 : vector<128x8xbf16> to vector<2x64x8xbf16>
    %341 = vector.extract_strided_slice %283 {offsets = [0, 64], sizes = [128, 8], strides = [1, 1]} : vector<128x96xbf16> to vector<128x8xbf16>
    %342 = vector.shape_cast %341 : vector<128x8xbf16> to vector<2x64x8xbf16>
    "tpu.trace_start"() <{level = 10 : i32, message = "bqd,bkd->bqk"}> : () -> ()
    %cst_122 = arith.constant dense<0.000000e+00> : vector<2x64x64xf32>
    %343 = tpu.matmul %338, %340, %cst_122 {dimension_numbers = #tpu.dot_dimension_numbers<[2], [2], [1], [1], [0, 0, 0, 1, 1, 1], [0], [0]>} : vector<2x64x8xbf16>, vector<2x64x8xbf16>, vector<2x64x64xf32> -> vector<2x64x64xf32>
    "tpu.trace_stop"() : () -> ()
    %cst_123 = arith.constant 0.353553385 : f32
    %344 = vector.broadcast %cst_123 : f32 to vector<2x64x64xf32>
    %345 = arith.mulf %343, %344 : vector<2x64x64xf32>
    %cst_124 = arith.constant dense<0xFF800000> : vector<2x64xf32>
    %346 = vector.multi_reduction <maximumf>, %345, %cst_124 [2] : vector<2x64x64xf32> to vector<2x64xf32>
    %347 = vector.shape_cast %346 : vector<2x64xf32> to vector<2x64x1xf32>
    %348 = vector.broadcast %347 : vector<2x64x1xf32> to vector<2x64x64xf32>
    %349 = arith.subf %345, %348 : vector<2x64x64xf32>
    %350 = math.exp %349 : vector<2x64x64xf32>
    %cst_125 = arith.constant dense<0.000000e+00> : vector<2x64xf32>
    %351 = vector.multi_reduction <add>, %350, %cst_125 [2] : vector<2x64x64xf32> to vector<2x64xf32>
    %352 = vector.shape_cast %351 : vector<2x64xf32> to vector<2x64x1xf32>
    %353 = vector.broadcast %352 : vector<2x64x1xf32> to vector<2x64x64xf32>
    %354 = arith.divf %350, %353 : vector<2x64x64xf32>
    %355 = arith.truncf %354 : vector<2x64x64xf32> to vector<2x64x64xbf16>
    "tpu.trace_start"() <{level = 10 : i32, message = "bqk,bkd->bqd"}> : () -> ()
    %cst_126 = arith.constant dense<0.000000e+00> : vector<2x64x8xf32>
    %356 = tpu.matmul %355, %342, %cst_126 {dimension_numbers = #tpu.dot_dimension_numbers<[2], [1], [1], [2], [0, 0, 0, 1, 1, 2], [0], [0]>} : vector<2x64x64xbf16>, vector<2x64x8xbf16>, vector<2x64x8xf32> -> vector<2x64x8xf32>
    "tpu.trace_stop"() : () -> ()
    %c1_127 = arith.constant 1 : index
    %c16_128 = arith.constant 16 : index
    %c96_129 = arith.constant 96 : index
    %357 = vector.load %arg3[%c1_127, %c16_128, %c96_129] : memref<2x64x128xf32, #tpu.memory_space<vmem>>, vector<1x8x32xf32>
    %358 = vector.shape_cast %357 : vector<1x8x32xf32> to vector<8x32xf32>
    %359 = vector.shape_cast %356 : vector<2x64x8xf32> to vector<128x8xf32>
    %360 = arith.truncf %359 : vector<128x8xf32> to vector<128x8xbf16>
    %361 = arith.truncf %358 : vector<8x32xf32> to vector<8x32xbf16>
    %cst_130 = arith.constant dense<0.000000e+00> : vector<128x32xf32>
    %362 = tpu.matmul %360, %361, %cst_130 {dimension_numbers = #tpu.dot_dimension_numbers<[1], [0], [0], [1], [0, 0, 1, 1], [], []>} : vector<128x8xbf16>, vector<8x32xbf16>, vector<128x32xf32> -> vector<128x32xf32>
    %363 = arith.addf %336, %362 : vector<128x32xf32>
    %364 = vector.extract_strided_slice %283 {offsets = [0, 72], sizes = [128, 8], strides = [1, 1]} : vector<128x96xbf16> to vector<128x8xbf16>
    %365 = vector.shape_cast %364 : vector<128x8xbf16> to vector<2x64x8xbf16>
    %366 = vector.extract_strided_slice %283 {offsets = [0, 80], sizes = [128, 8], strides = [1, 1]} : vector<128x96xbf16> to vector<128x8xbf16>
    %367 = vector.shape_cast %366 : vector<128x8xbf16> to vector<2x64x8xbf16>
    %368 = vector.extract_strided_slice %283 {offsets = [0, 88], sizes = [128, 8], strides = [1, 1]} : vector<128x96xbf16> to vector<128x8xbf16>
    %369 = vector.shape_cast %368 : vector<128x8xbf16> to vector<2x64x8xbf16>
    "tpu.trace_start"() <{level = 10 : i32, message = "bqd,bkd->bqk"}> : () -> ()
    %cst_131 = arith.constant dense<0.000000e+00> : vector<2x64x64xf32>
    %370 = tpu.matmul %365, %367, %cst_131 {dimension_numbers = #tpu.dot_dimension_numbers<[2], [2], [1], [1], [0, 0, 0, 1, 1, 1], [0], [0]>} : vector<2x64x8xbf16>, vector<2x64x8xbf16>, vector<2x64x64xf32> -> vector<2x64x64xf32>
    "tpu.trace_stop"() : () -> ()
    %cst_132 = arith.constant 0.353553385 : f32
    %371 = vector.broadcast %cst_132 : f32 to vector<2x64x64xf32>
    %372 = arith.mulf %370, %371 : vector<2x64x64xf32>
    %cst_133 = arith.constant dense<0xFF800000> : vector<2x64xf32>
    %373 = vector.multi_reduction <maximumf>, %372, %cst_133 [2] : vector<2x64x64xf32> to vector<2x64xf32>
    %374 = vector.shape_cast %373 : vector<2x64xf32> to vector<2x64x1xf32>
    %375 = vector.broadcast %374 : vector<2x64x1xf32> to vector<2x64x64xf32>
    %376 = arith.subf %372, %375 : vector<2x64x64xf32>
    %377 = math.exp %376 : vector<2x64x64xf32>
    %cst_134 = arith.constant dense<0.000000e+00> : vector<2x64xf32>
    %378 = vector.multi_reduction <add>, %377, %cst_134 [2] : vector<2x64x64xf32> to vector<2x64xf32>
    %379 = vector.shape_cast %378 : vector<2x64xf32> to vector<2x64x1xf32>
    %380 = vector.broadcast %379 : vector<2x64x1xf32> to vector<2x64x64xf32>
    %381 = arith.divf %377, %380 : vector<2x64x64xf32>
    %382 = arith.truncf %381 : vector<2x64x64xf32> to vector<2x64x64xbf16>
    "tpu.trace_start"() <{level = 10 : i32, message = "bqk,bkd->bqd"}> : () -> ()
    %cst_135 = arith.constant dense<0.000000e+00> : vector<2x64x8xf32>
    %383 = tpu.matmul %382, %369, %cst_135 {dimension_numbers = #tpu.dot_dimension_numbers<[2], [1], [1], [2], [0, 0, 0, 1, 1, 2], [0], [0]>} : vector<2x64x64xbf16>, vector<2x64x8xbf16>, vector<2x64x8xf32> -> vector<2x64x8xf32>
    "tpu.trace_stop"() : () -> ()
    %c1_136 = arith.constant 1 : index
    %c24_137 = arith.constant 24 : index
    %c96_138 = arith.constant 96 : index
    %384 = vector.load %arg3[%c1_136, %c24_137, %c96_138] : memref<2x64x128xf32, #tpu.memory_space<vmem>>, vector<1x8x32xf32>
    %385 = vector.shape_cast %384 : vector<1x8x32xf32> to vector<8x32xf32>
    %386 = vector.shape_cast %383 : vector<2x64x8xf32> to vector<128x8xf32>
    %387 = arith.truncf %386 : vector<128x8xf32> to vector<128x8xbf16>
    %388 = arith.truncf %385 : vector<8x32xf32> to vector<8x32xbf16>
    %cst_139 = arith.constant dense<0.000000e+00> : vector<128x32xf32>
    %389 = tpu.matmul %387, %388, %cst_139 {dimension_numbers = #tpu.dot_dimension_numbers<[1], [0], [0], [1], [0, 0, 1, 1], [], []>} : vector<128x8xbf16>, vector<8x32xbf16>, vector<128x32xf32> -> vector<128x32xf32>
    %390 = arith.addf %363, %389 : vector<128x32xf32>
    %c1_140 = arith.constant 1 : index
    %c160_141 = arith.constant 160 : index
    %391 = vector.load %arg2[%c1_140, %c160_141] : memref<2x512xf32, #tpu.memory_space<vmem>>, vector<1x32xf32>
    %392 = vector.broadcast %391 : vector<1x32xf32> to vector<128x32xf32>
    %393 = arith.addf %390, %392 : vector<128x32xf32>
    %394 = arith.addf %393, %226 : vector<128x32xf32>
    %c1_142 = arith.constant 1 : index
    %c192_143 = arith.constant 192 : index
    %395 = vector.load %arg2[%c1_142, %c192_143] : memref<2x512xf32, #tpu.memory_space<vmem>>, vector<1x32xf32>
    %c1_144 = arith.constant 1 : index
    %c224_145 = arith.constant 224 : index
    %396 = vector.load %arg2[%c1_144, %c224_145] : memref<2x512xf32, #tpu.memory_space<vmem>>, vector<1x32xf32>
    %cst_146 = arith.constant dense<0.000000e+00> : vector<128xf32>
    %397 = vector.multi_reduction <add>, %394, %cst_146 [1] : vector<128x32xf32> to vector<128xf32>
    %398 = vector.shape_cast %397 : vector<128xf32> to vector<128x1xf32>
    %cst_147 = arith.constant 3.200000e+01 : f32
    %399 = vector.broadcast %cst_147 : f32 to vector<128x1xf32>
    %400 = arith.divf %398, %399 : vector<128x1xf32>
    %401 = vector.broadcast %400 : vector<128x1xf32> to vector<128x32xf32>
    %402 = arith.subf %394, %401 : vector<128x32xf32>
    %403 = arith.mulf %402, %402 : vector<128x32xf32>
    %cst_148 = arith.constant dense<0.000000e+00> : vector<128xf32>
    %404 = vector.multi_reduction <add>, %403, %cst_148 [1] : vector<128x32xf32> to vector<128xf32>
    %405 = vector.shape_cast %404 : vector<128xf32> to vector<128x1xf32>
    %cst_149 = arith.constant 3.200000e+01 : f32
    %406 = vector.broadcast %cst_149 : f32 to vector<128x1xf32>
    %407 = arith.divf %405, %406 : vector<128x1xf32>
    %cst_150 = arith.constant 9.99999997E-7 : f32
    %408 = vector.broadcast %cst_150 : f32 to vector<128x1xf32>
    %409 = arith.addf %407, %408 : vector<128x1xf32>
    %410 = math.rsqrt %409 : vector<128x1xf32>
    %411 = vector.broadcast %410 : vector<128x1xf32> to vector<128x32xf32>
    %412 = arith.mulf %402, %411 : vector<128x32xf32>
    %413 = vector.broadcast %395 : vector<1x32xf32> to vector<128x32xf32>
    %414 = arith.mulf %412, %413 : vector<128x32xf32>
    %415 = vector.broadcast %396 : vector<1x32xf32> to vector<128x32xf32>
    %416 = arith.addf %414, %415 : vector<128x32xf32>
    %417 = arith.truncf %416 : vector<128x32xf32> to vector<128x32xbf16>
    %c1_151 = arith.constant 1 : index
    %c32_152 = arith.constant 32 : index
    %c0_153 = arith.constant 0 : index
    %418 = vector.load %arg3[%c1_151, %c32_152, %c0_153] : memref<2x64x128xf32, #tpu.memory_space<vmem>>, vector<1x32x64xf32>
    %419 = vector.shape_cast %418 : vector<1x32x64xf32> to vector<32x64xf32>
    %420 = arith.truncf %419 : vector<32x64xf32> to vector<32x64xbf16>
    %cst_154 = arith.constant dense<0.000000e+00> : vector<128x64xf32>
    %421 = tpu.matmul %417, %420, %cst_154 {dimension_numbers = #tpu.dot_dimension_numbers<[1], [0], [0], [1], [0, 0, 1, 1], [], []>} : vector<128x32xbf16>, vector<32x64xbf16>, vector<128x64xf32> -> vector<128x64xf32>
    %c1_155 = arith.constant 1 : index
    %c256_156 = arith.constant 256 : index
    %422 = vector.load %arg2[%c1_155, %c256_156] : memref<2x512xf32, #tpu.memory_space<vmem>>, vector<1x64xf32>
    %423 = vector.broadcast %422 : vector<1x64xf32> to vector<128x64xf32>
    %424 = arith.addf %421, %423 : vector<128x64xf32>
    %cst_157 = arith.constant 5.000000e-01 : f32
    %425 = vector.broadcast %cst_157 : f32 to vector<128x64xf32>
    %426 = arith.mulf %425, %424 : vector<128x64xf32>
    %cst_158 = arith.constant 0.707106769 : f32
    %427 = vector.broadcast %cst_158 : f32 to vector<128x64xf32>
    %428 = arith.mulf %424, %427 : vector<128x64xf32>
    %429 = math.absf %428 : vector<128x64xf32>
    %cst_159 = arith.constant 0.327591091 : f32
    %430 = vector.broadcast %cst_159 : f32 to vector<128x64xf32>
    %431 = arith.mulf %430, %429 : vector<128x64xf32>
    %cst_160 = arith.constant 1.000000e+00 : f32
    %432 = vector.broadcast %cst_160 : f32 to vector<128x64xf32>
    %433 = arith.addf %432, %431 : vector<128x64xf32>
    %cst_161 = arith.constant 1.000000e+00 : f32
    %434 = vector.broadcast %cst_161 : f32 to vector<128x64xf32>
    %435 = arith.divf %434, %433 : vector<128x64xf32>
    %cst_162 = arith.constant 1.06140542 : f32
    %436 = vector.broadcast %cst_162 : f32 to vector<128x64xf32>
    %437 = arith.mulf %435, %436 : vector<128x64xf32>
    %cst_163 = arith.constant -1.45315206 : f32
    %438 = vector.broadcast %cst_163 : f32 to vector<128x64xf32>
    %439 = arith.addf %438, %437 : vector<128x64xf32>
    %440 = arith.mulf %435, %439 : vector<128x64xf32>
    %cst_164 = arith.constant 1.42141378 : f32
    %441 = vector.broadcast %cst_164 : f32 to vector<128x64xf32>
    %442 = arith.addf %441, %440 : vector<128x64xf32>
    %443 = arith.mulf %435, %442 : vector<128x64xf32>
    %cst_165 = arith.constant -0.284496725 : f32
    %444 = vector.broadcast %cst_165 : f32 to vector<128x64xf32>
    %445 = arith.addf %444, %443 : vector<128x64xf32>
    %446 = arith.mulf %435, %445 : vector<128x64xf32>
    %cst_166 = arith.constant 0.254829586 : f32
    %447 = vector.broadcast %cst_166 : f32 to vector<128x64xf32>
    %448 = arith.addf %447, %446 : vector<128x64xf32>
    %449 = arith.mulf %435, %448 : vector<128x64xf32>
    %450 = arith.mulf %428, %428 : vector<128x64xf32>
    %cst_167 = arith.constant 0.000000e+00 : f32
    %451 = vector.broadcast %cst_167 : f32 to vector<128x64xf32>
    %452 = arith.subf %451, %450 : vector<128x64xf32>
    %453 = math.exp %452 : vector<128x64xf32>
    %454 = arith.mulf %449, %453 : vector<128x64xf32>
    %cst_168 = arith.constant 1.000000e+00 : f32
    %455 = vector.broadcast %cst_168 : f32 to vector<128x64xf32>
    %456 = arith.subf %455, %454 : vector<128x64xf32>
    %cst_169 = arith.constant 0.000000e+00 : f32
    %457 = vector.broadcast %cst_169 : f32 to vector<128x64xf32>
    %458 = arith.cmpf oge, %428, %457 : vector<128x64xf32>
    %cst_170 = arith.constant 0.000000e+00 : f32
    %459 = vector.broadcast %cst_170 : f32 to vector<128x64xf32>
    %460 = arith.subf %459, %456 : vector<128x64xf32>
    %461 = arith.select %458, %456, %460 : vector<128x64xi1>, vector<128x64xf32>
    %cst_171 = arith.constant 1.000000e+00 : f32
    %462 = vector.broadcast %cst_171 : f32 to vector<128x64xf32>
    %463 = arith.addf %462, %461 : vector<128x64xf32>
    %464 = arith.mulf %426, %463 : vector<128x64xf32>
    %465 = arith.truncf %464 : vector<128x64xf32> to vector<128x64xbf16>
    %c1_172 = arith.constant 1 : index
    %c32_173 = arith.constant 32 : index
    %c64_174 = arith.constant 64 : index
    %466 = vector.load %arg3[%c1_172, %c32_173, %c64_174] : memref<2x64x128xf32, #tpu.memory_space<vmem>>, vector<1x32x64xf32>
    %467 = vector.shape_cast %466 : vector<1x32x64xf32> to vector<32x64xf32>
    %468 = arith.truncf %467 : vector<32x64xf32> to vector<32x64xbf16>
    %cst_175 = arith.constant dense<0.000000e+00> : vector<128x32xf32>
    %469 = tpu.matmul %465, %468, %cst_175 {dimension_numbers = #tpu.dot_dimension_numbers<[1], [1], [0], [0], [0, 0, 1, 0], [], []>} : vector<128x64xbf16>, vector<32x64xbf16>, vector<128x32xf32> -> vector<128x32xf32>
    %c1_176 = arith.constant 1 : index
    %c320_177 = arith.constant 320 : index
    %470 = vector.load %arg2[%c1_176, %c320_177] : memref<2x512xf32, #tpu.memory_space<vmem>>, vector<1x32xf32>
    %471 = vector.broadcast %470 : vector<1x32xf32> to vector<128x32xf32>
    %472 = arith.addf %469, %471 : vector<128x32xf32>
    %473 = arith.addf %472, %394 : vector<128x32xf32>
    %c1_178 = arith.constant 1 : index
    %c352_179 = arith.constant 352 : index
    %474 = vector.load %arg2[%c1_178, %c352_179] : memref<2x512xf32, #tpu.memory_space<vmem>>, vector<1x32xf32>
    %c1_180 = arith.constant 1 : index
    %c384_181 = arith.constant 384 : index
    %475 = vector.load %arg2[%c1_180, %c384_181] : memref<2x512xf32, #tpu.memory_space<vmem>>, vector<1x32xf32>
    %cst_182 = arith.constant dense<0.000000e+00> : vector<128xf32>
    %476 = vector.multi_reduction <add>, %473, %cst_182 [1] : vector<128x32xf32> to vector<128xf32>
    %477 = vector.shape_cast %476 : vector<128xf32> to vector<128x1xf32>
    %cst_183 = arith.constant 3.200000e+01 : f32
    %478 = vector.broadcast %cst_183 : f32 to vector<128x1xf32>
    %479 = arith.divf %477, %478 : vector<128x1xf32>
    %480 = vector.broadcast %479 : vector<128x1xf32> to vector<128x32xf32>
    %481 = arith.subf %473, %480 : vector<128x32xf32>
    %482 = arith.mulf %481, %481 : vector<128x32xf32>
    %cst_184 = arith.constant dense<0.000000e+00> : vector<128xf32>
    %483 = vector.multi_reduction <add>, %482, %cst_184 [1] : vector<128x32xf32> to vector<128xf32>
    %484 = vector.shape_cast %483 : vector<128xf32> to vector<128x1xf32>
    %cst_185 = arith.constant 3.200000e+01 : f32
    %485 = vector.broadcast %cst_185 : f32 to vector<128x1xf32>
    %486 = arith.divf %484, %485 : vector<128x1xf32>
    %cst_186 = arith.constant 9.99999997E-7 : f32
    %487 = vector.broadcast %cst_186 : f32 to vector<128x1xf32>
    %488 = arith.addf %486, %487 : vector<128x1xf32>
    %489 = math.rsqrt %488 : vector<128x1xf32>
    %490 = vector.broadcast %489 : vector<128x1xf32> to vector<128x32xf32>
    %491 = arith.mulf %481, %490 : vector<128x32xf32>
    %492 = vector.broadcast %474 : vector<1x32xf32> to vector<128x32xf32>
    %493 = arith.mulf %491, %492 : vector<128x32xf32>
    %494 = vector.broadcast %475 : vector<1x32xf32> to vector<128x32xf32>
    %495 = arith.addf %493, %494 : vector<128x32xf32>
    %cst_187 = arith.constant dense<0.000000e+00> : vector<32x128xf32>
    %496 = tpu.matmul %495, %4, %cst_187 {dimension_numbers = #tpu.dot_dimension_numbers<[0], [0], [1], [1], [0, 1, 1, 1], [], []>} : vector<128x32xf32>, vector<128x128xf32>, vector<32x128xf32> -> vector<32x128xf32>
    %c0_188 = arith.constant 0 : index
    %c1_189 = arith.constant 1 : index
    %c0_190 = arith.constant 0 : index
    %c0_191 = arith.constant 0 : index
    %497 = vector.load %arg4[%c0_188, %c1_189, %c0_190, %c0_191] : memref<1x2x32x128xf32, #tpu.memory_space<vmem>>, vector<1x1x32x128xf32>
    %498 = vector.shape_cast %497 : vector<1x1x32x128xf32> to vector<32x128xf32>
    %499 = vector.shape_cast %496 : vector<32x128xf32> to vector<1x1x32x128xf32>
    tpu.vector_store %arg4[%c0_188, %c1_189, %c0_190, %c0_191], %499 {strides = array<i32>} : memref<1x2x32x128xf32, #tpu.memory_space<vmem>>, vector<1x1x32x128xf32>,
    return
  }
  func.func @transform_0(%arg0: i32) -> (i32, i32) {
    %c0_i32 = arith.constant 0 : i32
    %c0_i32_0 = arith.constant 0 : i32
    return %arg0, %c0_i32 : i32, i32
  }
  func.func @transform_1(%arg0: i32) -> (i32, i32) {
    %c0_i32 = arith.constant 0 : i32
    %c0_i32_0 = arith.constant 0 : i32
    %c0_i32_1 = arith.constant 0 : i32
    return %c0_i32, %c0_i32_0 : i32, i32
  }
  func.func @transform_2(%arg0: i32) -> (i32, i32, i32) {
    %c0_i32 = arith.constant 0 : i32
    %c0_i32_0 = arith.constant 0 : i32
    %c0_i32_1 = arith.constant 0 : i32
    %c0_i32_2 = arith.constant 0 : i32
    return %c0_i32, %c0_i32_0, %c0_i32_1 : i32, i32, i32
  }
  func.func @transform_3(%arg0: i32) -> (i32, i32, i32, i32) {
    %c0_i32 = arith.constant 0 : i32
    %c0_i32_0 = arith.constant 0 : i32
    %c0_i32_1 = arith.constant 0 : i32
    %c0_i32_2 = arith.constant 0 : i32
    return %arg0, %c0_i32, %c0_i32_0, %c0_i32_1 : i32, i32, i32, i32
  }
}

</mosaic_0001>

<bundles_post_ra>
// kernel: tpu_custom_call.1
= control target key start
LH: loop header
LB: loop body
LE: loop exit
PB: predicated region body
PF: predicated region fallthrough
CT: control target
= control target key end

     0   :  { %vm100_vm0 = vcmask 261120   ;;  %s16786_s0 = inlined_call_operand.vmem [shape: f32[128,32], index: 0, kind: input, shape index: {}]   ;;  %s16787_s1 = inlined_call_operand.vmem [shape: f32[2,512], index: 1, kind: input, shape index: {}]   ;;  %s16788_s2 = inlined_call_operand.vmem [shape: f32[2,64,128], index: 2, kind: input, shape index: {}]   ;;  %s16789_s3 = inlined_call_operand.hbm [shape: f32[1,2,32,128], index: 3, kind: output, shape index: {}]  }
   0x1   :  { %v83_v0 = vld [vmem:[%s16786_s0] sm:$0xff]  ;;  %v85_v1 = vld [vmem:[%s16786_s0 + $0x10] sm:$0xff]  ;;  %v84_v2 = vld [vmem:[%s16786_s0 + $0x8] sm:$0xff] }
   0x2   :  { %v101_v3 = vsel %vm100_vm0, %v83_v0, 0.0  ;;  %v107_v4 = vsel %vm100_vm0, %v85_v1, 0.0  ;;  %v86_v5 = vld [vmem:[%s16786_s0 + $0x18] sm:$0xff]  ;;  %v104_v6 = vsel %vm100_vm0, %v84_v2, 0.0  ;;  %v87_v8 = vld [vmem:[%s16786_s0 + $0x20] sm:$0xff]  ;;  %v88_v9 = vld [vmem:[%s16786_s0 + $0x28] sm:$0xff] }
   0x3   :  { %102 = vadd.xlane.f32.xlu0 %v101_v3  ;;  %108 = vadd.xlane.f32.xlu1 %v107_v4  ;;  %v110_v7 = vsel %vm100_vm0, %v86_v5, 0.0 }
   0x4   :  { %8 = vsyncpa [#allocation3], 0  ;;  %v113_v10 = vsel %vm100_vm0, %v87_v8, 0.0  ;;  %v116_v11 = vsel %vm100_vm0, %v88_v9, 0.0  ;;  %v12125_v12 = vld [vmem:[%s16786_s0 + $0x30] sm:$0xff]  ;;  %v12130_v13 = vld [vmem:[%s16786_s0 + $0x38] sm:$0xff] }
   0x5   :  { %v119_v14 = vsel %vm100_vm0, %v12125_v12, 0.0  ;;  %v122_v15 = vsel %vm100_vm0, %v12130_v13, 0.0  ;;  %v12139_v16 = vld [vmem:[%s16786_s0 + $0x40] sm:$0xff]  ;;  %v12144_v17 = vld [vmem:[%s16786_s0 + $0x48] sm:$0xff]  ;;  %v12153_v20 = vld [vmem:[%s16786_s0 + $0x50] sm:$0xff]  ;;  %s12062_s27 = smov 96  }
   0x6   :  { %v125_v18 = vsel %vm100_vm0, %v12139_v16, 0.0  ;;  %v128_v19 = vsel %vm100_vm0, %v12144_v17, 0.0  ;;  %v12158_v21 = vld [vmem:[%s16786_s0 + $0x58] sm:$0xff]  ;;  %v131_v22 = vsel %vm100_vm0, %v12153_v20, 0.0  ;;  %v12167_v24 = vld [vmem:[%s16786_s0 + $0x60] sm:$0xff]  ;;  %v12172_v25 = vld [vmem:[%s16786_s0 + $0x68] sm:$0xff] }
   0x7   :  { %105 = vadd.xlane.f32.xlu0 %v104_v6  ;;  %111 = vadd.xlane.f32.xlu1 %v110_v7  ;;  %v134_v23 = vsel %vm100_vm0, %v12158_v21, 0.0  ;;  %v137_v26 = vsel %vm100_vm0, %v12167_v24, 0.0  ;;  %v140_v27 = vsel %vm100_vm0, %v12172_v25, 0.0  ;;  %v12181_v28 = vld [vmem:[%s16786_s0 + $0x70] sm:$0xff]  ;;  %v12186_v29 = vld [vmem:[%s16786_s0 + $0x78] sm:$0xff]  ;;  %s12063_s30 = smov 64  }
   0x8   :  { %v143_v30 = vsel %vm100_vm0, %v12181_v28, 0.0  ;;  %v146_v31 = vsel %vm100_vm0, %v12186_v29, 0.0  ;;  %vm390_vm1 = vcmask 523264   ;;  %vm534_vm2 = vcmask 64512   ;;  %s12064_s4 = smov 120   ;;  %s12065_s5 = smov 112  }
   0x9   :  { %s12066_s6 = smov 104   ;;  %s12067_s7 = smov 88   ;;  %vm1738_vm3 = vcmask 1043456  }
   0xa   :  { %s12068_s8 = smov 72   ;;  %s12069_s9 = smov 80  }
   0xb   :  { %114 = vadd.xlane.f32.xlu0 %v113_v10  ;;  %117 = vadd.xlane.f32.xlu1 %v116_v11  ;;  %s12070_s14 = smov 32   ;;  %s12071_s17 = smov 48  }
   0xc   :  { %s12072_s18 = smov 56   ;;  %s12073_s19 = smov 40  }
   0xf   :  { %120 = vadd.xlane.f32.xlu0 %v119_v14  ;;  %123 = vadd.xlane.f32.xlu1 %v122_v15 }
  0x13   :  { %126 = vadd.xlane.f32.xlu0 %v125_v18  ;;  %129 = vadd.xlane.f32.xlu1 %v128_v19 }
  0x17   :  { %132 = vadd.xlane.f32.xlu0 %v131_v22  ;;  %135 = vadd.xlane.f32.xlu1 %v134_v23 }
  0x1b   :  { %138 = vadd.xlane.f32.xlu0 %v137_v26  ;;  %141 = vadd.xlane.f32.xlu1 %v140_v27 }
  0x1f   :  { %144 = vadd.xlane.f32.xlu0 %v143_v30  ;;  %147 = vadd.xlane.f32.xlu1 %v146_v31 }
  0x90   :  { %v103_v32 = vpop.xlane.xlu0 %102  ;;  %v109_v33 = vpop.xlane.xlu1 %108 }
  0x91   :  { %v150_v34 = vmul.f32 0.03125, %v103_v32  ;;  %v152_v35 = vmul.f32 0.03125, %v109_v33 }
  0x93   :  { %v12192_v36 = vsub.f32 %v83_v0, %v150_v34  ;;  %v12194_v37 = vsub.f32 %v85_v1, %v152_v35 }
  0x94   :  { %v106_v38 = vpop.xlane.xlu0 %105  ;;  %v112_v39 = vpop.xlane.xlu1 %111 }
  0x95   :  { %v151_v40 = vmul.f32 0.03125, %v106_v38  ;;  %v153_v41 = vmul.f32 0.03125, %v112_v39  ;;  %v182_v42 = vmul.f32 %v12192_v36, %v12192_v36  ;;  %v184_v43 = vmul.f32 %v12194_v37, %v12194_v37 }
  0x97   :  { %v12200_v44 = vsub.f32 %v84_v2, %v151_v40  ;;  %v12202_v45 = vsub.f32 %v86_v5, %v153_v41  ;;  %v198_v46 = vsel %vm100_vm0, %v182_v42, 0.0  ;;  %v204_v49 = vsel %vm100_vm0, %v184_v43, 0.0 }
  0x98   :  { %199 = vadd.xlane.f32.xlu0 %v198_v46  ;;  %v115_v47 = vpop.xlane.xlu0 %114  ;;  %v118_v48 = vpop.xlane.xlu1 %117 }
  0x99   :  { %v154_v50 = vmul.f32 0.03125, %v115_v47  ;;  %v155_v51 = vmul.f32 0.03125, %v118_v48  ;;  %v183_v52 = vmul.f32 %v12200_v44, %v12200_v44  ;;  %v185_v53 = vmul.f32 %v12202_v45, %v12202_v45 }
  0x9b   :  { %v12210_v54 = vsub.f32 %v87_v8, %v154_v50  ;;  %v12212_v55 = vsub.f32 %v88_v9, %v155_v51  ;;  %v201_v56 = vsel %vm100_vm0, %v183_v52, 0.0  ;;  %v207_v59 = vsel %vm100_vm0, %v185_v53, 0.0  ;;  %v359_v53 = vld [vmem:[%s16788_s2 + $0x8] sm:$0xff] }
  0x9c   :  { %205 = vadd.xlane.f32.xlu0 %v204_v49  ;;  %202 = vadd.xlane.f32.xlu1 %v201_v56  ;;  %v121_v57 = vpop.xlane.xlu0 %120  ;;  %v124_v58 = vpop.xlane.xlu1 %123 }
  0x9d   :  { %v156_v60 = vmul.f32 0.03125, %v121_v57  ;;  %v157_v61 = vmul.f32 0.03125, %v124_v58  ;;  %v186_v62 = vmul.f32 %v12210_v54, %v12210_v54  ;;  %v187_v63 = vmul.f32 %v12212_v55, %v12212_v55  ;;  %v360_v57 = vld [vmem:[%s16788_s2 + $0x10] sm:$0xff]  ;;  %v361_v58 = vld [vmem:[%s16788_s2 + $0x18] sm:$0xff] }
  0x9f   :  { %v12221_v0 = vsub.f32 %v12125_v12, %v156_v60  ;;  %v12224_v1 = vsub.f32 %v12130_v13, %v157_v61  ;;  %v210_v2 = vsel %vm100_vm0, %v186_v62, 0.0  ;;  %v213_v5 = vsel %vm100_vm0, %v187_v63, 0.0  ;;  %v12297_v60 = vld [vmem:[%s16787_s1] ss:$0 sm:$0xff] }
  0xa0   :  { %208 = vadd.xlane.f32.xlu1 %v207_v59  ;;  %211 = vadd.xlane.f32.xlu0 %v210_v2  ;;  %v127_v3 = vpop.xlane.xlu0 %126  ;;  %v130_v4 = vpop.xlane.xlu1 %129  ;;  %v363_v59 = vpack.c.bf16 %v361_v58, %v360_v57  ;;  %v16791_v61 = vlaneseq  ;;  %v364_v63 = vld [vmem:[%s16787_s1] sm:$0x5] }
  0xa1   :  { %v158_v6 = vmul.f32 0.03125, %v127_v3  ;;  %v159_v7 = vmul.f32 0.03125, %v130_v4  ;;  %v188_v8 = vmul.f32 %v12221_v0, %v12221_v0  ;;  %v189_v9 = vmul.f32 %v12224_v1, %v12224_v1 }
  0xa2   :  { %v12302_v62 = vshrl.u32 %v16791_v61, 7 }
  0xa3   :  { %v12233_v10 = vsub.f32 %v12139_v16, %v158_v6  ;;  %v12236_v11 = vsub.f32 %v12144_v17, %v159_v7  ;;  %v216_v12 = vsel %vm100_vm0, %v188_v8, 0.0  ;;  %v219_v15 = vsel %vm100_vm0, %v189_v9, 0.0 }
  0xa4   :  { %214 = vadd.xlane.f32.xlu1 %v213_v5  ;;  %217 = vadd.xlane.f32.xlu0 %v216_v12  ;;  %v133_v13 = vpop.xlane.xlu0 %132  ;;  %v136_v14 = vpop.xlane.xlu1 %135  ;;  %16853 = vst [vmem:[#allocation5_spill] sm:$0xff] %v12302_v62  ;;  %v12308_v2 = vsub.s32 0, %v12302_v62  ;;  %v16790_v3 = vsub.s32 2, %v12302_v62 }
  0xa5   :  { %v160_v18 = vmul.f32 0.03125, %v133_v13  ;;  %v161_v19 = vmul.f32 0.03125, %v136_v14  ;;  %v190_v22 = vmul.f32 %v12233_v10, %v12233_v10  ;;  %v191_v16 = vmul.f32 %v12236_v11, %v12236_v11 }
  0xa6   :  { %16854 = vst [vmem:[#allocation6_spill] sm:$0xff] %v12308_v2  ;;  %v369_v4 = vrot.slane %v364_v63, %v12308_v2  ;;  %v373_v5 = vrot.slane %v364_v63, %v16790_v3 }
  0xa7   :  { %v12245_v23 = vsub.f32 %v12153_v20, %v160_v18  ;;  %v12248_v17 = vsub.f32 %v12158_v21, %v161_v19  ;;  %v222_v26 = vsel %vm100_vm0, %v190_v22, 0.0  ;;  %v225_v31 = vsel %vm100_vm0, %v191_v16, 0.0 }
  0xa8   :  { %220 = vadd.xlane.f32.xlu1 %v219_v15  ;;  %223 = vadd.xlane.f32.xlu0 %v222_v26  ;;  %v139_v27 = vpop.xlane.xlu0 %138  ;;  %v142_v30 = vpop.xlane.xlu1 %141  ;;  %v379_v6 = vrot.slane %v369_v4, %v12308_v2  ;;  %v383_v7 = vrot.slane %v373_v5, %v12308_v2 }
  0xa9   :  { %v162_v32 = vmul.f32 0.03125, %v139_v27  ;;  %v163_v33 = vmul.f32 0.03125, %v142_v30  ;;  %v192_v34 = vmul.f32 %v12245_v23, %v12245_v23  ;;  %v193_v20 = vmul.f32 %v12248_v17, %v12248_v17 }
  0xab   :  { %v12257_v35 = vsub.f32 %v12167_v24, %v162_v32  ;;  %v12260_v21 = vsub.f32 %v12172_v25, %v163_v33  ;;  %v228_v38 = vsel %vm100_vm0, %v192_v34, 0.0  ;;  %v231_v41 = vsel %vm100_vm0, %v193_v20, 0.0 }
  0xac   :  { %226 = vadd.xlane.f32.xlu1 %v225_v31  ;;  %229 = vadd.xlane.f32.xlu0 %v228_v38  ;;  %v145_v39 = vpop.xlane.xlu0 %144  ;;  %v148_v40 = vpop.xlane.xlu1 %147 }
  0xad   :  { %v164_v42 = vmul.f32 0.03125, %v145_v39  ;;  %v165_v43 = vmul.f32 0.03125, %v148_v40  ;;  %v194_v46 = vmul.f32 %v12257_v35, %v12257_v35  ;;  %v195_v24 = vmul.f32 %v12260_v21, %v12260_v21 }
  0xaf   :  { %v12269_v47 = vsub.f32 %v12181_v28, %v164_v42  ;;  %v12272_v25 = vsub.f32 %v12186_v29, %v165_v43  ;;  %v234_v48 = vsel %vm100_vm0, %v194_v46, 0.0  ;;  %v237_v49 = vsel %vm100_vm0, %v195_v24, 0.0  ;;  %v358_v29 = vld [vmem:[%s16788_s2] sm:$0xff] }
  0xb0   :  { %232 = vadd.xlane.f32.xlu1 %v231_v41  ;;  %235 = vadd.xlane.f32.xlu0 %v234_v48  ;;  %v362_v56 = vpack.c.bf16 %v359_v53, %v358_v29 }
  0xb1   :  { %v196_v50 = vmul.f32 %v12269_v47, %v12269_v47  ;;  %v197_v51 = vmul.f32 %v12272_v25, %v12272_v25 }
  0xb2   :  { %10116 = vmatprep.subr.bf16.mxu1 %v362_v56 }
  0xb3   :  { %v240_v52 = vsel %vm100_vm0, %v196_v50, 0.0  ;;  %v243_v28 = vsel %vm100_vm0, %v197_v51, 0.0  ;;  %10117 = vmatpush3.bf16.msra.mxu1 %v362_v56 }
  0xb4   :  { %238 = vadd.xlane.f32.xlu1 %v237_v49  ;;  %241 = vadd.xlane.f32.xlu0 %v240_v52 }
  0xb5   :  { %10118 = vmatprep.subr.bf16.mxu1 %v363_v59 }
  0xb7   :  { %10119 = vmatpush3.bf16.msra.mxu1 %v363_v59 }
  0xb8   :  { %244 = vadd.xlane.f32.xlu1 %v243_v28 }
  0xc9   :  { %386 = vrot.lane.b32.xlu1 %v379_v6, %s12063_s30 }
  0xca   :  { %331 = vrot.lane.b32.xlu0 %v12297_v60, %s12062_s27 }
  0xcd   :  { %388 = vrot.lane.b32.xlu1 %v383_v7, %s12063_s30 }
 0x125   :  { %v200_v8 = vpop.xlane.xlu0 %199 }
 0x126   :  { %v246_v9 = vmul.f32 0.03125, %v200_v8 }
 0x128   :  { %v262_v18 = vadd.f32 1e-06, %v246_v9 }
 0x129   :  { %v203_v12 = vpop.xlane.xlu1 %202  ;;  %v206_v13 = vpop.xlane.xlu0 %205 }
 0x12a   :  { %v247_v14 = vmul.f32 0.03125, %v203_v12  ;;  %v248_v15 = vmul.f32 0.03125, %v206_v13  ;;  %11220 = vrsqrt.f32 %v262_v18 }
 0x12c   :  { %v263_v19 = vadd.f32 1e-06, %v247_v14  ;;  %v264_v26 = vadd.f32 1e-06, %v248_v15 }
 0x12d   :  { %v209_v22 = vpop.xlane.xlu1 %208  ;;  %v212_v16 = vpop.xlane.xlu0 %211 }
 0x12e   :  { %v249_v27 = vmul.f32 0.03125, %v209_v22  ;;  %v250_v30 = vmul.f32 0.03125, %v212_v16  ;;  %11222 = vrsqrt.f32 %v263_v19 }
 0x12f   :  { %11224 = vrsqrt.f32 %v264_v26 }
 0x130   :  { %v265_v31 = vadd.f32 1e-06, %v249_v27  ;;  %v266_v32 = vadd.f32 1e-06, %v250_v30 }
 0x131   :  { %v215_v33 = vpop.xlane.xlu1 %214  ;;  %v218_v34 = vpop.xlane.xlu0 %217 }
 0x132   :  { %v251_v20 = vmul.f32 0.03125, %v215_v33  ;;  %v252_v38 = vmul.f32 0.03125, %v218_v34  ;;  %11226 = vrsqrt.f32 %v265_v31 }
 0x133   :  { %11228 = vrsqrt.f32 %v266_v32 }
 0x134   :  { %v267_v39 = vadd.f32 1e-06, %v251_v20  ;;  %v268_v40 = vadd.f32 1e-06, %v252_v38  ;;  %v11221_v51 = vpop.eup %11220 }
 0x135   :  { %v221_v41 = vpop.xlane.xlu1 %220  ;;  %v224_v42 = vpop.xlane.xlu0 %223  ;;  %v294_v7 = vmul.f32 %v11221_v51, %v12192_v36 }
 0x136   :  { %11230 = vrsqrt.f32 %v267_v39  ;;  %v253_v43 = vmul.f32 0.03125, %v221_v41  ;;  %v254_v46 = vmul.f32 0.03125, %v224_v42 }
 0x137   :  { %11232 = vrsqrt.f32 %v268_v40  ;;  %v314_v30 = vmul.f32 %v12297_v60, %v294_v7 }
 0x138   :  { %v269_v24 = vadd.f32 1e-06, %v253_v43  ;;  %v270_v48 = vadd.f32 1e-06, %v254_v46  ;;  %v11223_v29 = vpop.eup %11222 }
 0x139   :  { %v227_v49 = vpop.xlane.xlu1 %226  ;;  %v230_v50 = vpop.xlane.xlu0 %229  ;;  %v295_v13 = vmul.f32 %v11223_v29, %v12200_v44 }
 0x13a   :  { %11234 = vrsqrt.f32 %v269_v24  ;;  %v255_v52 = vmul.f32 0.03125, %v227_v49  ;;  %v256_v28 = vmul.f32 0.03125, %v230_v50  ;;  %v11225_v53 = vpop.eup %11224 }
 0x13b   :  { %11236 = vrsqrt.f32 %v270_v48  ;;  %v296_v14 = vmul.f32 %v11225_v53, %v12194_v37  ;;  %v315_v37 = vmul.f32 %v12297_v60, %v295_v13 }
 0x13c   :  { %v271_v56 = vadd.f32 1e-06, %v255_v52  ;;  %v11227_v57 = vpop.eup %11226  ;;  %v272_v58 = vadd.f32 1e-06, %v256_v28 }
 0x13d   :  { %v233_v59 = vpop.xlane.xlu1 %232  ;;  %v236_v63 = vpop.xlane.xlu0 %235  ;;  %v297_v19 = vmul.f32 %v11227_v57, %v12202_v45 }
 0x13e   :  { %v11229_v4 = vpop.eup %11228  ;;  %11238 = vrsqrt.f32 %v271_v56  ;;  %v257_v5 = vmul.f32 0.03125, %v233_v59  ;;  %v258_v6 = vmul.f32 0.03125, %v236_v63 }
 0x13f   :  { %11240 = vrsqrt.f32 %v272_v58  ;;  %v298_v22 = vmul.f32 %v11229_v4, %v12210_v54  ;;  %v316_v54 = vmul.f32 %v12297_v60, %v296_v14 }
 0x140   :  { %v11231_v8 = vpop.eup %11230  ;;  %v273_v9 = vadd.f32 1e-06, %v257_v5  ;;  %v274_v12 = vadd.f32 1e-06, %v258_v6 }
 0x141   :  { %v239_v15 = vpop.xlane.xlu1 %238  ;;  %v242_v18 = vpop.xlane.xlu0 %241  ;;  %v299_v16 = vmul.f32 %v11231_v8, %v12212_v55  ;;  %v317_v55 = vmul.f32 %v12297_v60, %v297_v19  ;;  %v318_v20 = vmul.f32 %v12297_v60, %v298_v22 }
 0x142   :  { %11242 = vrsqrt.f32 %v273_v9  ;;  %v259_v26 = vmul.f32 0.03125, %v239_v15  ;;  %v260_v27 = vmul.f32 0.03125, %v242_v18  ;;  %v11233_v36 = vpop.eup %11232 }
 0x143   :  { %11244 = vrsqrt.f32 %v274_v12  ;;  %v319_v33 = vmul.f32 %v12297_v60, %v299_v16  ;;  %v300_v48 = vmul.f32 %v11233_v36, %v12221_v0 }
 0x144   :  { %v11235_v31 = vpop.eup %11234  ;;  %v275_v44 = vadd.f32 1e-06, %v259_v26  ;;  %v276_v32 = vadd.f32 1e-06, %v260_v27 }
 0x145   :  { %v245_v34 = vpop.xlane.xlu1 %244  ;;  %v12327_v45 = vpop.permute.xlu0 %331  ;;  %v301_v38 = vmul.f32 %v11235_v31, %v12224_v1  ;;  %v320_v0 = vmul.f32 %v12297_v60, %v300_v48 }
 0x146   :  { %v11237_v39 = vpop.eup %11236  ;;  %11246 = vrsqrt.f32 %v275_v44  ;;  %v261_v40 = vmul.f32 0.03125, %v245_v34  ;;  %v334_v41 = vadd.f32 %v12327_v45, %v314_v30  ;;  %v335_v42 = vadd.f32 %v12327_v45, %v315_v37 }
 0x147   :  { %v336_v43 = vadd.f32 %v12327_v45, %v316_v54  ;;  %v337_v46 = vadd.f32 %v12327_v45, %v317_v55  ;;  %v338_v24 = vadd.f32 %v12327_v45, %v318_v20  ;;  %11248 = vrsqrt.f32 %v276_v32 }
 0x148   :  { %v11239_v49 = vpop.eup %11238  ;;  %v277_v50 = vadd.f32 1e-06, %v261_v40  ;;  %v350_v51 = vpack.c.bf16 %v335_v42, %v334_v41  ;;  %v339_v1 = vadd.f32 %v12327_v45, %v319_v33  ;;  %v321_v28 = vmul.f32 %v12297_v60, %v301_v38 }
 0x149   :  { %v351_v52 = vpack.c.bf16 %v337_v46, %v336_v43  ;;  %v302_v29 = vmul.f32 %v11237_v39, %v12233_v10  ;;  %v303_v53 = vmul.f32 %v11239_v49, %v12236_v11  ;;  %v11241_v57 = vpop.eup %11240  ;;  %v340_v6 = vadd.f32 %v12327_v45, %v320_v0 }
 0x14a   :  { %11250 = vrsqrt.f32 %v277_v50  ;;  %10120 = vmatprep.mubr.msk.bf16.mxu1 %vm100_vm0, %v350_v51  ;;  %v352_v56 = vpack.c.bf16 %v339_v1, %v338_v24  ;;  %v341_v10 = vadd.f32 %v12327_v45, %v321_v28  ;;  %v304_v7 = vmul.f32 %v11241_v57, %v12245_v23 }
 0x14b   :  { %10121 = vmatmul.mubr.msk.bf16.vlgmr.msra.gmra.mrb[0].mxu1 %vm100_vm0, %v351_v52  ;;  %v323_v58 = vmul.f32 %v12297_v60, %v303_v53  ;;  %v322_v63 = vmul.f32 %v12297_v60, %v302_v29 }
 0x14c   :  { %v11243_v59 = vpop.eup %11242  ;;  %10124 = vmatprep.mubr.msk.bf16.mxu1 %vm100_vm0, %v352_v56  ;;  %v353_v13 = vpack.c.bf16 %v341_v10, %v340_v6 }
 0x14d   :  { %v11245_v4 = vpop.eup %11244  ;;  %v305_v11 = vmul.f32 %v11243_v59, %v12248_v17  ;;  %v343_v5 = vadd.f32 %v12327_v45, %v323_v58  ;;  %v342_v9 = vadd.f32 %v12327_v45, %v322_v63  ;;  %v324_v17 = vmul.f32 %v12297_v60, %v304_v7 }
 0x14e   :  { %v306_v12 = vmul.f32 %v11245_v4, %v12257_v35 }
 0x14f   :  { %v325_v14 = vmul.f32 %v12297_v60, %v305_v11  ;;  %v354_v19 = vpack.c.bf16 %v343_v5, %v342_v9 }
 0x150   :  { %v11247_v8 = vpop.eup %11246  ;;  %v326_v23 = vmul.f32 %v12297_v60, %v306_v12 }
 0x151   :  { %v307_v15 = vmul.f32 %v11247_v8, %v12260_v21  ;;  %v11249_v18 = vpop.eup %11248  ;;  %v345_v35 = vadd.f32 %v12327_v45, %v325_v14  ;;  %v344_v21 = vadd.f32 %v12327_v45, %v324_v17 }
 0x152   :  { %v308_v36 = vmul.f32 %v11249_v18, %v12269_v47  ;;  %v346_v30 = vadd.f32 %v12327_v45, %v326_v23  ;;  %v387_v47 = vpop.permute.xlu1 %386 }
 0x153   :  { %10125 = vmatmul.mubr.msk.bf16.gmra.mrb[4].mxu1 %vm100_vm0, %v353_v13  ;;  %v327_v22 = vmul.f32 %v12297_v60, %v307_v15  ;;  %v355_v31 = vpack.c.bf16 %v345_v35, %v344_v21 }
 0x154   :  { %v11251_v16 = vpop.eup %11250  ;;  %10128 = vmatprep.mubr.msk.bf16.mxu1 %vm100_vm0, %v354_v19  ;;  %v328_v37 = vmul.f32 %v12297_v60, %v308_v36 }
 0x155   :  { %v309_v26 = vmul.f32 %v11251_v16, %v12272_v25  ;;  %v347_v27 = vadd.f32 %v12327_v45, %v327_v22 }
 0x156   :  { %v348_v33 = vadd.f32 %v12327_v45, %v328_v37  ;;  %v389_v54 = vpop.permute.xlu1 %388 }
 0x157   :  { %v329_v44 = vmul.f32 %v12297_v60, %v309_v26  ;;  %v356_v32 = vpack.c.bf16 %v347_v27, %v346_v30  ;;  %v391_v55 = vsel %vm390_vm1, %v387_v47, %v389_v54 }
 0x159   :  { %v349_v25 = vadd.f32 %v12327_v45, %v329_v44 }
 0x15b   :  { %10129 = vmatmul.mubr.msk.bf16.gmra.mrb[8].mxu1 %vm100_vm0, %v355_v31  ;;  %v357_v34 = vpack.c.bf16 %v349_v25, %v348_v33 }
 0x15c   :  { %10132 = vmatprep.mubr.msk.bf16.mxu1 %vm100_vm0, %v356_v32 }
 0x163   :  { %10133 = vmatmul.mubr.msk.bf16.gmra.mrb[12].mxu1 %vm100_vm0, %v357_v34 }
 0x21e   :  { %v10122_v20 = vpop.f32.mrb[0].mxu1 }
 0x21f   :  { %v451_v38 = vpop.f32.mrb[1].mxu1  ;;  %v460_v40 = vadd.f32 %v10122_v20, %v391_v55 }
 0x220   :  { %v10123_v39 = vpop.f32.mrb[2].mxu1  ;;  %v452_v42 = vadd.f32 %v451_v38, %v391_v55 }
 0x221   :  { %v463_v41 = vadd.f32 %v10123_v39, %v391_v55  ;;  %v454_v60 = vpop.f32.mrb[3].mxu1 }
 0x222   :  { %v455_v43 = vadd.f32 %v454_v60, %v391_v55 }
 0x223   :  { %v12377_v46 = vpack.c.bf16 %v463_v41, %v460_v40 }
 0x224   :  { %v12379_v45 = vpack.c.bf16 %v455_v43, %v452_v42 }
 0x226   :  { %v10126_v24 = vpop.f32.mrb[4].mxu1  ;;  %10144 = vmatprep.mubr.msk.bf16.mxu1 %vm534_vm2, %v12379_v45 }
 0x227   :  { %v467_v48 = vpop.f32.mrb[5].mxu1  ;;  %v476_v50 = vadd.f32 %v10126_v24, %v391_v55 }
 0x228   :  { %v10127_v49 = vpop.f32.mrb[6].mxu1  ;;  %v468_v52 = vadd.f32 %v467_v48, %v391_v55 }
 0x229   :  { %v479_v51 = vadd.f32 %v10127_v49, %v391_v55  ;;  %v470_v1 = vpop.f32.mrb[7].mxu1 }
 0x22a   :  { %v471_v28 = vadd.f32 %v470_v1, %v391_v55 }
 0x22b   :  { %v12383_v29 = vpack.c.bf16 %v479_v51, %v476_v50 }
 0x22c   :  { %v12385_v53 = vpack.c.bf16 %v471_v28, %v468_v52 }
 0x22e   :  { %v10130_v56 = vpop.f32.mrb[8].mxu1 }
 0x22f   :  { %v483_v57 = vpop.f32.mrb[9].mxu1  ;;  %v492_v58 = vadd.f32 %v10130_v56, %v391_v55 }
 0x230   :  { %v10131_v0 = vpop.f32.mrb[10].mxu1  ;;  %v484_v4 = vadd.f32 %v483_v57, %v391_v55 }
 0x231   :  { %v495_v59 = vadd.f32 %v10131_v0, %v391_v55  ;;  %v486_v63 = vpop.f32.mrb[11].mxu1 }
 0x232   :  { %v487_v10 = vadd.f32 %v486_v63, %v391_v55 }
 0x233   :  { %v12387_v11 = vpack.c.bf16 %v495_v59, %v492_v58 }
 0x234   :  { %v12389_v5 = vpack.c.bf16 %v487_v10, %v484_v4 }
 0x235   :  { %630 = vrot.lane.b32.xlu0 %v12387_v11, %s12064_s4 }
 0x236   :  { %v10134_v6 = vpop.f32.mrb[12].mxu1  ;;  %628 = vrot.lane.b32.xlu1 %v12389_v5, %s12064_s4  ;;  %10160 = vmatprep.mubr.msk.bf16.mxu0 %vm534_vm2, %v12389_v5 }
 0x237   :  { %v499_v7 = vpop.f32.mrb[13].mxu1  ;;  %v508_v9 = vadd.f32 %v10134_v6, %v391_v55 }
 0x238   :  { %v10135_v8 = vpop.f32.mrb[14].mxu1  ;;  %v500_v14 = vadd.f32 %v499_v7, %v391_v55 }
 0x239   :  { %v511_v12 = vadd.f32 %v10135_v8, %v391_v55  ;;  %v502_v13 = vpop.f32.mrb[15].mxu1 }
 0x23a   :  { %v503_v15 = vadd.f32 %v502_v13, %v391_v55 }
 0x23b   :  { %v12397_v18 = vpack.c.bf16 %v511_v12, %v508_v9 }
 0x23c   :  { %v12399_v19 = vpack.c.bf16 %v503_v15, %v500_v14 }
 0x23d   :  { %634 = vrot.lane.b32.xlu0 %v12397_v18, %s12064_s4 }
 0x23e   :  { %632 = vrot.lane.b32.xlu1 %v12399_v19, %s12064_s4 }
 0x241   :  { %528 = vrot.lane.b32.xlu0 %v12377_v46, %s12064_s4 }
 0x242   :  { %526 = vrot.lane.b32.xlu1 %v12379_v45, %s12064_s4 }
 0x245   :  { %532 = vrot.lane.b32.xlu0 %v12383_v29, %s12064_s4 }
 0x246   :  { %530 = vrot.lane.b32.xlu1 %v12385_v53, %s12064_s4 }
 0x249   :  { %1016 = vrot.lane.b32.xlu0 %v12387_v11, %s12065_s5 }
 0x24a   :  { %1014 = vrot.lane.b32.xlu1 %v12389_v5, %s12065_s5 }
 0x24e   :  { %1020 = vrot.lane.b32.xlu1 %v12397_v18, %s12065_s5 }
 0x252   :  { %1226 = vrot.lane.b32.xlu1 %v12389_v5, %s12062_s27 }
 0x256   :  { %1018 = vrot.lane.b32.xlu1 %v12399_v19, %s12065_s5 }
 0x2a7   :  { %v631_v16 = vpop.permute.xlu0 %630 }
 0x2a8   :  { %v629_v17 = vpop.permute.xlu1 %628  ;;  %v652_v26 = vsel %vm534_vm2, %v631_v16, 0 }
 0x2a9   :  { %11132 = vmatprep.subr.msk.bf16.mxu0 %vm534_vm2, %v629_v17  ;;  %v649_v22 = vsel %vm534_vm2, %v629_v17, 0 }
 0x2aa   :  { %10153 = vmatpush3.bf16.xpose.msra.mxu0 %v649_v22 }
 0x2ab   :  { %11133 = vmatprep.subr.msk.bf16.mxu0 %vm534_vm2, %v631_v16 }
 0x2af   :  { %v635_v23 = vpop.permute.xlu0 %634 }
 0x2b0   :  { %v633_v35 = vpop.permute.xlu1 %632  ;;  %v658_v37 = vsel %vm534_vm2, %v635_v23, 0 }
 0x2b1   :  { %v655_v31 = vsel %vm534_vm2, %v633_v35, 0 }
 0x2b2   :  { %10155 = vmatpush3.bf16.xpose.msra.mxu0 %v652_v26 }
 0x2b3   :  { %11134 = vmatprep.subr.msk.bf16.mxu0 %vm534_vm2, %v633_v35  ;;  %v529_v36 = vpop.permute.xlu0 %528 }
 0x2b4   :  { %v527_v27 = vpop.permute.xlu1 %526  ;;  %v551_v32 = vsel %vm534_vm2, %v529_v36, 0 }
 0x2b5   :  { %11128 = vmatprep.subr.msk.bf16.mxu1 %vm534_vm2, %v527_v27  ;;  %v548_v21 = vsel %vm534_vm2, %v527_v27, 0 }
 0x2b6   :  { %10137 = vmatpush3.bf16.xpose.msra.mxu1 %v548_v21 }
 0x2b7   :  { %11129 = vmatprep.subr.msk.bf16.mxu1 %vm534_vm2, %v529_v36  ;;  %v533_v33 = vpop.permute.xlu0 %532 }
 0x2b8   :  { %v531_v30 = vpop.permute.xlu1 %530  ;;  %v557_v55 = vsel %vm534_vm2, %v533_v33, 0 }
 0x2b9   :  { %v554_v34 = vsel %vm534_vm2, %v531_v30, 0 }
 0x2ba   :  { %10157 = vmatpush3.bf16.xpose.msra.mxu0 %v655_v31 }
 0x2bb   :  { %11135 = vmatprep.subr.msk.bf16.mxu0 %vm534_vm2, %v635_v23  ;;  %v1017_v54 = vpop.permute.xlu0 %1016 }
 0x2bc   :  { %v1015_v44 = vpop.permute.xlu1 %1014 }
 0x2be   :  { %10139 = vmatpush3.bf16.xpose.msra.mxu1 %v551_v32 }
 0x2bf   :  { %11130 = vmatprep.subr.msk.bf16.mxu1 %vm534_vm2, %v531_v30 }
 0x2c0   :  { %v1021_v25 = vpop.permute.xlu1 %1020 }
 0x2c2   :  { %10159 = vmatpush3.bf16.xpose.msra.mxu0 %v658_v37 }
 0x2c3   :  { %10184 = vmatprep.subr.bf16.mxu0 %v1015_v44 }
 0x2c4   :  { %v12438_v47 = vpop.permute.xlu1 %1226 }
 0x2c6   :  { %10141 = vmatpush3.bf16.xpose.msra.mxu1 %v554_v34 }
 0x2c7   :  { %11131 = vmatprep.subr.msk.bf16.mxu1 %vm534_vm2, %v533_v33 }
 0x2c8   :  { %v1019_v20 = vpop.permute.xlu1 %1018 }
 0x2c9   :  { %10161 = vmatmul.mubr.msk.bf16.vlgmr.msra.gmra.mrb[0].mxu0 %vm534_vm2, %v12387_v11 }
 0x2ca   :  { %10164 = vmatprep.mubr.msk.bf16.mxu0 %vm534_vm2, %v12399_v19  ;;  %10185 = vmatpush3.bf16.msra.mxu0 %v1015_v44 }
 0x2cb   :  { %10186 = vmatprep.subr.bf16.mxu0 %v1017_v54 }
 0x2ce   :  { %10143 = vmatpush3.bf16.xpose.msra.mxu1 %v557_v55  ;;  %10187 = vmatpush3.bf16.msra.mxu0 %v1017_v54 }
 0x2cf   :  { %10188 = vmatprep.subr.bf16.mxu0 %v1019_v20 }
 0x2d1   :  { %10165 = vmatmul.mubr.msk.bf16.gmra.mrb[4].mxu0 %vm534_vm2, %v12397_v18 }
 0x2d2   :  { %10189 = vmatpush3.bf16.msra.mxu0 %v1019_v20 }
 0x2d3   :  { %10190 = vmatprep.subr.bf16.mxu0 %v1021_v25 }
 0x2d5   :  { %10145 = vmatmul.mubr.msk.bf16.vlgmr.msra.gmra.mrb[16].mxu1 %vm534_vm2, %v12377_v46 }
 0x2d6   :  { %10148 = vmatprep.mubr.msk.bf16.mxu1 %vm534_vm2, %v12385_v53  ;;  %10191 = vmatpush3.bf16.msra.mxu0 %v1021_v25 }
 0x2d7   :  { %11140 = vmatprep.subr.msk.bf16.mxu0 %vm534_vm2, %v12438_v47 }
 0x2dd   :  { %10149 = vmatmul.mubr.msk.bf16.gmra.mrb[20].mxu1 %vm534_vm2, %v12383_v29 }
 0x39c   :  { %v10162_v38 = vpop.f32.mrb[0].mxu0 }
 0x39d   :  { %v735_v39 = vmul.f32 0.35355338, %v10162_v38  ;;  %v694_v40 = vpop.f32.mrb[1].mxu0 }
 0x39e   :  { %v733_v41 = vmul.f32 0.35355338, %v694_v40  ;;  %v10163_v60 = vpop.f32.mrb[2].mxu0 }
 0x39f   :  { %v736_v42 = vmul.f32 0.35355338, %v10163_v60  ;;  %v697_v43 = vpop.f32.mrb[3].mxu0  ;;  %v771_v24 = vsel %vm390_vm1, %v735_v39, -inf }
 0x3a0   :  { %772 = vmax.xlane.f32.xlu0 %v771_v24  ;;  %v765_v48 = vsel %vm390_vm1, %v733_v41, -inf  ;;  %v734_v49 = vmul.f32 0.35355338, %v697_v43 }
 0x3a1   :  { %766 = vmax.xlane.f32.xlu1 %v765_v48  ;;  %v774_v50 = vsel %vm390_vm1, %v736_v42, -inf }
 0x3a2   :  { %v768_v56 = vsel %vm390_vm1, %v734_v49, -inf }
 0x3a4   :  { %v10166_v51 = vpop.f32.mrb[4].mxu0  ;;  %775 = vmax.xlane.f32.xlu0 %v774_v50 }
 0x3a5   :  { %v739_v1 = vmul.f32 0.35355338, %v10166_v51  ;;  %v710_v52 = vpop.f32.mrb[5].mxu0 }
 0x3a6   :  { %v10167_v28 = vpop.f32.mrb[6].mxu0  ;;  %v12459_v57 = vmul.f32 0.35355338, %v710_v52 }
 0x3a7   :  { %v740_v0 = vmul.f32 0.35355338, %v10167_v28  ;;  %v713_v58 = vpop.f32.mrb[7].mxu0  ;;  %v783_v59 = vsel %vm390_vm1, %v739_v1, -inf }
 0x3a8   :  { %769 = vmax.xlane.f32.xlu0 %v768_v56  ;;  %784 = vmax.xlane.f32.xlu1 %v783_v59  ;;  %v12462_v63 = vpop.f32.mrb[16].mxu1  ;;  %v738_v6 = vmul.f32 0.35355338, %v713_v58  ;;  %v777_v9 = vsel %vm390_vm1, %v12459_v57, -inf }
 0x3a9   :  { %v12464_v4 = vpop.f32.mrb[17].mxu1  ;;  %v786_v8 = vsel %vm390_vm1, %v740_v0, -inf }
 0x3aa   :  { %v12466_v10 = vpop.f32.mrb[18].mxu1  ;;  %v780_v12 = vsel %vm390_vm1, %v738_v6, -inf }
 0x3ab   :  { %v12468_v7 = vpop.f32.mrb[19].mxu1 }
 0x3ac   :  { %787 = vmax.xlane.f32.xlu0 %v786_v8  ;;  %778 = vmax.xlane.f32.xlu1 %v777_v9  ;;  %v12524_v8 = vmul.f32 0.35355338, %v12464_v4  ;;  %v12539_v4 = vmul.f32 0.35355338, %v12466_v10 }
 0x3b0   :  { %781 = vmax.xlane.f32.xlu0 %v780_v12  ;;  %v12474_v13 = vpop.f32.mrb[20].mxu1  ;;  %v741_v12 = vsel %vm390_vm1, %v12524_v8, -inf }
 0x3b1   :  { %v12476_v14 = vpop.f32.mrb[21].mxu1  ;;  %v12553_v10 = vmul.f32 0.35355338, %v12474_v13 }
 0x3b2   :  { %v12478_v15 = vpop.f32.mrb[22].mxu1 }
 0x3b3   :  { %v12480_v17 = vpop.f32.mrb[23].mxu1 }
 0x3bd   :  { %1230 = vrot.lane.b32.xlu1 %v12399_v19, %s12062_s27 }
 0x3c1   :  { %1232 = vrot.lane.b32.xlu1 %v12397_v18, %s12062_s27 }
 0x3c6   :  { %1228 = vrot.lane.b32.xlu0 %v12387_v11, %s12062_s27 }
 0x42d   :  { %v773_v22 = vpop.xlane.xlu0 %772 }
 0x42e   :  { %v799_v16 = vsub.f32 %v735_v39, %v773_v22  ;;  %v767_v23 = vpop.xlane.xlu1 %766  ;;  %v12534_v22 = vmul.f32 0.35355338, %v12462_v63  ;;  %v12550_v63 = vmul.f32 0.35355338, %v12476_v14 }
 0x42f   :  { %v797_v35 = vsub.f32 %v733_v41, %v767_v23 }
 0x430   :  { %v825_v26 = vmul.f32 1.442695, %v799_v16  ;;  %v747_v23 = vsel %vm390_vm1, %v12534_v22, -inf }
 0x431   :  { %v821_v27 = vmul.f32 1.442695, %v797_v35  ;;  %v776_v21 = vpop.xlane.xlu0 %775  ;;  %v753_v35 = vsel %vm390_vm1, %v12550_v63, -inf }
 0x432   :  { %11252 = vpow2.f32 %v825_v26  ;;  %v800_v36 = vsub.f32 %v736_v42, %v776_v21  ;;  %v759_v26 = vsel %vm390_vm1, %v12553_v10, -inf }
 0x433   :  { %11254 = vpow2.f32 %v821_v27  ;;  %v12560_v27 = vmul.f32 0.35355338, %v12480_v17 }
 0x434   :  { %v827_v30 = vmul.f32 1.442695, %v800_v36  ;;  %v12563_v36 = vmul.f32 0.35355338, %v12478_v15 }
 0x435   :  { %v770_v31 = vpop.xlane.xlu0 %769  ;;  %v785_v44 = vpop.xlane.xlu1 %784  ;;  %v756_v14 = vsel %vm390_vm1, %v12560_v27, -inf }
 0x436   :  { %11256 = vpow2.f32 %v827_v30  ;;  %v798_v32 = vsub.f32 %v734_v49, %v770_v31  ;;  %v803_v37 = vsub.f32 %v739_v1, %v785_v44  ;;  %v762_v30 = vsel %vm390_vm1, %v12563_v36, -inf }
 0x438   :  { %v823_v25 = vmul.f32 1.442695, %v798_v32  ;;  %v833_v33 = vmul.f32 1.442695, %v803_v37 }
 0x439   :  { %v788_v34 = vpop.xlane.xlu0 %787 }
 0x43a   :  { %11258 = vpow2.f32 %v823_v25  ;;  %v804_v54 = vsub.f32 %v740_v0, %v788_v34  ;;  %v779_v0 = vpop.xlane.xlu1 %778 }
 0x43b   :  { %11260 = vpow2.f32 %v833_v33  ;;  %v801_v58 = vsub.f32 %v12459_v57, %v779_v0  ;;  %v12531_v57 = vmul.f32 0.35355338, %v12468_v7  ;;  %v750_v7 = vsel %vm390_vm1, %v12539_v4, -inf }
 0x43c   :  { %v12488_v55 = vpop.eup %11252  ;;  %v835_v20 = vmul.f32 1.442695, %v804_v54 }
 0x43d   :  { %v782_v38 = vpop.xlane.xlu0 %781  ;;  %v867_v39 = vsel %vm390_vm1, %v12488_v55, 0.0  ;;  %v12492_v40 = vpop.eup %11254  ;;  %v829_v59 = vmul.f32 1.442695, %v801_v58  ;;  %v744_v16 = vsel %vm390_vm1, %v12531_v57, -inf }
 0x43e   :  { %v802_v41 = vsub.f32 %v738_v6, %v782_v38  ;;  %868 = vadd.xlane.f32.xlu1 %v867_v39  ;;  %11262 = vpow2.f32 %v835_v20  ;;  %v861_v24 = vsel %vm390_vm1, %v12492_v40, 0.0  ;;  %v1231_v21 = vpop.permute.xlu1 %1230 }
 0x440   :  { %v12494_v60 = vpop.eup %11256  ;;  %v831_v42 = vmul.f32 1.442695, %v802_v41 }
 0x441   :  { %v870_v43 = vsel %vm390_vm1, %v12494_v60, 0.0  ;;  %v1229_v31 = vpop.permute.xlu0 %1228 }
 0x442   :  { %871 = vadd.xlane.f32.xlu0 %v870_v43  ;;  %862 = vadd.xlane.f32.xlu1 %v861_v24  ;;  %11264 = vpow2.f32 %v831_v42  ;;  %v1233_v13 = vpop.permute.xlu1 %1232  ;;  %v1247_v43 = vsel %vm534_vm2, %v12438_v47, 0 }
 0x443   :  { %11266 = vpow2.f32 %v829_v59 }
 0x444   :  { %v12500_v48 = vpop.eup %11258 }
 0x445   :  { %v864_v49 = vsel %vm390_vm1, %v12500_v48, 0.0  ;;  %v12504_v50 = vpop.eup %11260 }
 0x446   :  { %865 = vadd.xlane.f32.xlu0 %v864_v49  ;;  %v879_v51 = vsel %vm390_vm1, %v12504_v50, 0.0 }
 0x448   :  { %v12508_v1 = vpop.eup %11262 }
 0x449   :  { %v882_v52 = vsel %vm390_vm1, %v12508_v1, 0.0 }
 0x44a   :  { %880 = vadd.xlane.f32.xlu0 %v879_v51 }
 0x44c   :  { %v12512_v28 = vpop.eup %11264 }
 0x44d   :  { %v876_v56 = vsel %vm390_vm1, %v12512_v28, 0.0  ;;  %v12521_v6 = vpop.eup %11266 }
 0x44e   :  { %883 = vadd.xlane.f32.xlu0 %v882_v52  ;;  %v873_v9 = vsel %vm390_vm1, %v12521_v6, 0.0 }
 0x452   :  { %877 = vadd.xlane.f32.xlu0 %v876_v56 }
 0x453   :  { %1218 = vrot.lane.b32.xlu1 %v12389_v5, %s12066_s6 }
 0x468   :  { %1220 = vrot.lane.b32.xlu0 %v12387_v11, %s12066_s6 }
 0x477   :  { %874 = vadd.xlane.f32.xlu1 %v873_v9 }
 0x47b   :  { %742 = vmax.xlane.f32.xlu1 %v741_v12 }
 0x487   :  { %745 = vmax.xlane.f32.xlu0 %v744_v16 }
 0x48b   :  { %748 = vmax.xlane.f32.xlu0 %v747_v23 }
 0x48c   :  { %1222 = vrot.lane.b32.xlu1 %v12399_v19, %s12066_s6 }
 0x48f   :  { %751 = vmax.xlane.f32.xlu0 %v750_v7 }
 0x4a5   :  { %1224 = vrot.lane.b32.xlu0 %v12397_v18, %s12066_s6 }
 0x4b0   :  { %754 = vmax.xlane.f32.xlu1 %v753_v35 }
 0x4b4   :  { %760 = vmax.xlane.f32.xlu1 %v759_v26 }
 0x4c4   :  { %757 = vmax.xlane.f32.xlu0 %v756_v14 }
 0x4c8   :  { %763 = vmax.xlane.f32.xlu0 %v762_v30 }
 0x4cb   :  { %v869_v44 = vpop.xlane.xlu1 %868 }
 0x4cf   :  { %v872_v32 = vpop.xlane.xlu0 %871  ;;  %v863_v37 = vpop.xlane.xlu1 %862 }
 0x4d0   :  { %11268 = vrcp.f32 %v872_v32 }
 0x4d1   :  { %11270 = vrcp.f32 %v863_v37 }
 0x4d2   :  { %11272 = vrcp.f32 %v869_v44 }
 0x4d3   :  { %v866_v17 = vpop.xlane.xlu0 %865  ;;  %v1219_v49 = vpop.permute.xlu1 %1218 }
 0x4d4   :  { %11274 = vrcp.f32 %v866_v17 }
 0x4da   :  { %v11269_v15 = vpop.eup %11268 }
 0x4db   :  { %v11271_v25 = vpop.eup %11270  ;;  %v908_v54 = vmul.f32 %v11269_v15, %v12494_v60  ;;  %v1250_v60 = vsel %vm534_vm2, %v1229_v31, 0 }
 0x4dc   :  { %v11273_v33 = vpop.eup %11272  ;;  %v902_v20 = vmul.f32 %v11271_v25, %v12492_v40  ;;  %v881_v40 = vpop.xlane.xlu0 %880 }
 0x4dd   :  { %v906_v39 = vmul.f32 %v11273_v33, %v12488_v55  ;;  %v1253_v55 = vsel %vm534_vm2, %v1231_v21, 0 }
 0x4de   :  { %v11275_v34 = vpop.eup %11274 }
 0x4df   :  { %v904_v38 = vmul.f32 %v11275_v34, %v12500_v48  ;;  %v922_v42 = vpack.c.bf16 %v908_v54, %v906_v39  ;;  %v1256_v48 = vsel %vm534_vm2, %v1233_v13, 0 }
 0x4e0   :  { %v884_v24 = vpop.xlane.xlu0 %883 }
 0x4e1   :  { %v921_v41 = vpack.c.bf16 %v904_v38, %v902_v20  ;;  %11276 = vrcp.f32 %v884_v24 }
 0x4e3   :  { %10192 = vmatprep.mubr.msk.bf16.mxu0 %vm390_vm1, %v921_v41 }
 0x4e4   :  { %10193 = vmatmul.mubr.msk.bf16.vlgmr.msra.gmra.mrb[8].mxu0 %vm390_vm1, %v922_v42  ;;  %v878_v47 = vpop.xlane.xlu0 %877 }
 0x4e5   :  { %10217 = vmatpush3.bf16.xpose.msra.mxu0 %v1247_v43  ;;  %11278 = vrcp.f32 %v878_v47 }
 0x4e6   :  { %11141 = vmatprep.subr.msk.bf16.mxu0 %vm534_vm2, %v1229_v31  ;;  %11280 = vrcp.f32 %v881_v40 }
 0x4e8   :  { %v1221_v23 = vpop.permute.xlu0 %1220 }
 0x4eb   :  { %v11277_v58 = vpop.eup %11276 }
 0x4ec   :  { %v916_v16 = vmul.f32 %v11277_v58, %v12508_v1 }
 0x4ed   :  { %10219 = vmatpush3.bf16.xpose.msra.mxu0 %v1250_v60 }
 0x4ee   :  { %11142 = vmatprep.subr.msk.bf16.mxu0 %vm534_vm2, %v1231_v21 }
 0x4ef   :  { %v11279_v59 = vpop.eup %11278 }
 0x4f0   :  { %v11281_v9 = vpop.eup %11280  ;;  %v912_v35 = vmul.f32 %v11279_v59, %v12512_v28 }
 0x4f1   :  { %v914_v26 = vmul.f32 %v11281_v9, %v12504_v50 }
 0x4f3   :  { %v924_v14 = vpack.c.bf16 %v916_v16, %v914_v26 }
 0x4f5   :  { %10221 = vmatpush3.bf16.xpose.msra.mxu0 %v1253_v55 }
 0x4f6   :  { %11143 = vmatprep.subr.msk.bf16.mxu0 %vm534_vm2, %v1233_v13 }
 0x4fd   :  { %10223 = vmatpush3.bf16.xpose.msra.mxu0 %v1256_v48 }
 0x504   :  { %v875_v51 = vpop.xlane.xlu1 %874 }
 0x505   :  { %11282 = vrcp.f32 %v875_v51 }
 0x508   :  { %v743_v52 = vpop.xlane.xlu1 %742 }
 0x509   :  { %v789_v56 = vsub.f32 %v12524_v8, %v743_v52 }
 0x50b   :  { %v805_v0 = vmul.f32 1.442695, %v789_v56 }
 0x50c   :  { %v1223_v32 = vpop.permute.xlu1 %1222 }
 0x50d   :  { %11284 = vpow2.f32 %v805_v0 }
 0x50f   :  { %v11283_v12 = vpop.eup %11282 }
 0x510   :  { %v910_v7 = vmul.f32 %v11283_v12, %v12521_v6 }
 0x512   :  { %v923_v21 = vpack.c.bf16 %v912_v35, %v910_v7 }
 0x514   :  { %10196 = vmatprep.mubr.msk.bf16.mxu0 %vm390_vm1, %v923_v21  ;;  %v746_v8 = vpop.xlane.xlu0 %745 }
 0x515   :  { %v790_v13 = vsub.f32 %v12531_v57, %v746_v8  ;;  %10197 = vmatmul.mubr.msk.bf16.gmra.mrb[12].mxu0 %vm390_vm1, %v924_v14 }
 0x516   :  { %10224 = vmatprep.mubr.msk.bf16.mxu0 %vm534_vm2, %v1219_v49 }
 0x517   :  { %v12592_v30 = vpop.eup %11284  ;;  %v807_v1 = vmul.f32 1.442695, %v790_v13 }
 0x518   :  { %v749_v31 = vpop.xlane.xlu0 %748  ;;  %v837_v28 = vsel %vm390_vm1, %v12592_v30, 0.0 }
 0x519   :  { %11286 = vpow2.f32 %v807_v1  ;;  %v791_v50 = vsub.f32 %v12534_v22, %v749_v31  ;;  %838 = vadd.xlane.f32.xlu1 %v837_v28 }
 0x51b   :  { %v809_v6 = vmul.f32 1.442695, %v791_v50 }
 0x51c   :  { %v752_v44 = vpop.xlane.xlu0 %751 }
 0x51d   :  { %11288 = vpow2.f32 %v809_v6  ;;  %v792_v57 = vsub.f32 %v12539_v4, %v752_v44  ;;  %10225 = vmatmul.mubr.msk.bf16.vlgmr.msra.gmra.mrb[16].mxu0 %vm534_vm2, %v1221_v23 }
 0x51e   :  { %10228 = vmatprep.mubr.msk.bf16.mxu0 %vm534_vm2, %v1223_v32 }
 0x51f   :  { %v811_v37 = vmul.f32 1.442695, %v792_v57 }
 0x520   :  { %v1225_v15 = vpop.permute.xlu0 %1224 }
 0x521   :  { %11290 = vpow2.f32 %v811_v37 }
 0x523   :  { %v12600_v17 = vpop.eup %11286 }
 0x524   :  { %v840_v25 = vsel %vm390_vm1, %v12600_v17, 0.0 }
 0x525   :  { %10229 = vmatmul.mubr.msk.bf16.gmra.mrb[20].mxu0 %vm534_vm2, %v1225_v15  ;;  %841 = vadd.xlane.f32.xlu0 %v840_v25 }
 0x527   :  { %v12605_v22 = vpop.eup %11288 }
 0x528   :  { %v843_v4 = vsel %vm390_vm1, %v12605_v22, 0.0 }
 0x529   :  { %844 = vadd.xlane.f32.xlu1 %v843_v4 }
 0x52b   :  { %v12609_v33 = vpop.eup %11290 }
 0x52c   :  { %v846_v34 = vsel %vm390_vm1, %v12609_v33, 0.0 }
 0x52d   :  { %847 = vadd.xlane.f32.xlu0 %v846_v34 }
 0x53a   :  { %925 = vrot.lane.b32.xlu1 %v12379_v45, %s12065_s5 }
 0x53d   :  { %v755_v54 = vpop.xlane.xlu1 %754 }
 0x53e   :  { %929 = vrot.lane.b32.xlu1 %v12385_v53, %s12065_s5  ;;  %v793_v38 = vsub.f32 %v12550_v63, %v755_v54 }
 0x540   :  { %v813_v43 = vmul.f32 1.442695, %v793_v38 }
 0x541   :  { %v761_v20 = vpop.xlane.xlu1 %760 }
 0x542   :  { %931 = vrot.lane.b32.xlu1 %v12383_v29, %s12065_s5  ;;  %v795_v39 = vsub.f32 %v12553_v10, %v761_v20 }
 0x543   :  { %927 = vrot.lane.b32.xlu0 %v12377_v46, %s12065_s5 }
 0x544   :  { %v817_v60 = vmul.f32 1.442695, %v795_v39 }
 0x551   :  { %v758_v41 = vpop.xlane.xlu0 %757 }
 0x552   :  { %v794_v42 = vsub.f32 %v12560_v27, %v758_v41 }
 0x554   :  { %v815_v40 = vmul.f32 1.442695, %v794_v42 }
 0x555   :  { %v764_v55 = vpop.xlane.xlu0 %763 }
 0x556   :  { %11292 = vpow2.f32 %v815_v40  ;;  %v796_v24 = vsub.f32 %v12563_v36, %v764_v55 }
 0x557   :  { %11294 = vpow2.f32 %v813_v43 }
 0x558   :  { %11296 = vpow2.f32 %v817_v60  ;;  %v819_v48 = vmul.f32 1.442695, %v796_v24 }
 0x55a   :  { %11298 = vpow2.f32 %v819_v48 }
 0x560   :  { %v12625_v49 = vpop.eup %11292 }
 0x561   :  { %v12627_v47 = vpop.eup %11294  ;;  %v852_v63 = vsel %vm390_vm1, %v12625_v49, 0.0 }
 0x562   :  { %v12631_v10 = vpop.eup %11296  ;;  %853 = vadd.xlane.f32.xlu0 %v852_v63  ;;  %v849_v27 = vsel %vm390_vm1, %v12627_v47, 0.0 }
 0x563   :  { %v855_v36 = vsel %vm390_vm1, %v12631_v10, 0.0 }
 0x564   :  { %v12637_v51 = vpop.eup %11298 }
 0x565   :  { %v858_v52 = vsel %vm390_vm1, %v12637_v51, 0.0 }
 0x566   :  { %850 = vadd.xlane.f32.xlu1 %v849_v27  ;;  %856 = vadd.xlane.f32.xlu0 %v855_v36 }
 0x56a   :  { %859 = vadd.xlane.f32.xlu0 %v858_v52 }
 0x577   :  { %1121 = vrot.lane.b32.xlu1 %v12379_v45, %s12062_s27 }
 0x57b   :  { %1125 = vrot.lane.b32.xlu1 %v12385_v53, %s12062_s27 }
 0x57f   :  { %1127 = vrot.lane.b32.xlu1 %v12383_v29, %s12062_s27 }
 0x580   :  { %1123 = vrot.lane.b32.xlu0 %v12377_v46, %s12062_s27 }
 0x583   :  { %1113 = vrot.lane.b32.xlu1 %v12379_v45, %s12066_s6 }
 0x584   :  { %1115 = vrot.lane.b32.xlu0 %v12377_v46, %s12066_s6 }
 0x587   :  { %1117 = vrot.lane.b32.xlu1 %v12385_v53, %s12066_s6 }
 0x588   :  { %1119 = vrot.lane.b32.xlu0 %v12383_v29, %s12066_s6 }
 0x58b   :  { %1612 = vrot.lane.b32.xlu1 %v12389_v5, %s12067_s7 }
 0x58c   :  { %1614 = vrot.lane.b32.xlu0 %v12387_v11, %s12067_s7 }
 0x58f   :  { %1616 = vrot.lane.b32.xlu1 %v12399_v19, %s12067_s7 }
 0x590   :  { %1976 = vrot.lane.b32.xlu0 %v12377_v46, %s12068_s8 }
 0x593   :  { %1618 = vrot.lane.b32.xlu1 %v12397_v18, %s12067_s7 }
 0x597   :  { %1974 = vrot.lane.b32.xlu1 %v12379_v45, %s12068_s8 }
 0x59b   :  { %1978 = vrot.lane.b32.xlu1 %v12385_v53, %s12068_s8 }
 0x5a6   :  { %v839_v56 = vpop.xlane.xlu1 %838 }
 0x5a7   :  { %11300 = vrcp.f32 %v839_v56 }
 0x5b1   :  { %v11301_v35 = vpop.eup %11300 }
 0x5b2   :  { %v842_v0 = vpop.xlane.xlu0 %841  ;;  %v886_v8 = vmul.f32 %v11301_v35, %v12592_v30 }
 0x5b3   :  { %11302 = vrcp.f32 %v842_v0 }
 0x5b6   :  { %v845_v58 = vpop.xlane.xlu1 %844 }
 0x5b7   :  { %v12671_v59 = vpop.f32.mrb[8].mxu0  ;;  %11304 = vrcp.f32 %v845_v58 }
 0x5b8   :  { %v12673_v9 = vpop.f32.mrb[9].mxu0 }
 0x5b9   :  { %v12675_v12 = vpop.f32.mrb[10].mxu0 }
 0x5ba   :  { %v12679_v23 = vpop.f32.mrb[11].mxu0  ;;  %v926_v7 = vpop.permute.xlu1 %925 }
 0x5bb   :  { %v848_v21 = vpop.xlane.xlu0 %847  ;;  %10168 = vmatprep.subr.bf16.mxu1 %v926_v7 }
 0x5bc   :  { %11306 = vrcp.f32 %v848_v21  ;;  %10169 = vmatpush3.bf16.msra.mxu1 %v926_v7 }
 0x5bd   :  { %v11303_v14 = vpop.eup %11302 }
 0x5be   :  { %v888_v13 = vmul.f32 %v11303_v14, %v12600_v17  ;;  %v930_v1 = vpop.permute.xlu1 %929 }
 0x5bf   :  { %v928_v31 = vpop.permute.xlu0 %927 }
 0x5c0   :  { %10170 = vmatprep.subr.bf16.mxu1 %v928_v31  ;;  %v917_v28 = vpack.c.bf16 %v888_v13, %v886_v8 }
 0x5c1   :  { %10171 = vmatpush3.bf16.msra.mxu1 %v928_v31  ;;  %v11305_v50 = vpop.eup %11304 }
 0x5c2   :  { %10172 = vmatprep.subr.bf16.mxu1 %v930_v1  ;;  %10176 = vmatprep.mubr.msk.bf16.mxu1 %vm390_vm1, %v917_v28  ;;  %v932_v6 = vpop.permute.xlu1 %931  ;;  %v890_v32 = vmul.f32 %v11305_v50, %v12605_v22 }
 0x5c5   :  { %10173 = vmatpush3.bf16.msra.mxu1 %v930_v1 }
 0x5c6   :  { %v11307_v44 = vpop.eup %11306  ;;  %10174 = vmatprep.subr.bf16.mxu1 %v932_v6 }
 0x5c7   :  { %v892_v57 = vmul.f32 %v11307_v44, %v12609_v33 }
 0x5c9   :  { %v918_v30 = vpack.c.bf16 %v892_v57, %v890_v32  ;;  %10175 = vmatpush3.bf16.msra.mxu1 %v932_v6 }
 0x5cc   :  { %10177 = vmatmul.mubr.msk.bf16.vlgmr.msra.gmra.mrb[24].mxu1 %vm390_vm1, %v918_v30 }
 0x5e8   :  { %v12689_v37 = vpop.f32.mrb[12].mxu0 }
 0x5e9   :  { %v12691_v17 = vpop.f32.mrb[13].mxu0 }
 0x5ea   :  { %v12693_v15 = vpop.f32.mrb[14].mxu0 }
 0x5eb   :  { %v12697_v4 = vpop.f32.mrb[15].mxu0 }
 0x5ef   :  { %v854_v34 = vpop.xlane.xlu0 %853 }
 0x5f0   :  { %v10226_v33 = vpop.f32.mrb[16].mxu0  ;;  %11308 = vrcp.f32 %v854_v34 }
 0x5f1   :  { %v12701_v54 = vmul.f32 0.35355338, %v10226_v33  ;;  %v1292_v20 = vpop.f32.mrb[17].mxu0 }
 0x5f2   :  { %v12703_v38 = vmul.f32 0.35355338, %v1292_v20  ;;  %v10227_v39 = vpop.f32.mrb[18].mxu0 }
 0x5f3   :  { %v12705_v41 = vmul.f32 0.35355338, %v10227_v39  ;;  %v1295_v42 = vpop.f32.mrb[19].mxu0  ;;  %v851_v43 = vpop.xlane.xlu1 %850  ;;  %v1369_v60 = vsel %vm390_vm1, %v12701_v54, -inf }
 0x5f4   :  { %11310 = vrcp.f32 %v851_v43  ;;  %v857_v40 = vpop.xlane.xlu0 %856  ;;  %1370 = vmax.xlane.f32.xlu0 %v1369_v60  ;;  %v1363_v55 = vsel %vm390_vm1, %v12703_v38, -inf  ;;  %v12711_v24 = vmul.f32 0.35355338, %v1295_v42 }
 0x5f5   :  { %1364 = vmax.xlane.f32.xlu1 %v1363_v55  ;;  %11312 = vrcp.f32 %v857_v40  ;;  %v1372_v63 = vsel %vm390_vm1, %v12705_v41, -inf }
 0x5f6   :  { %v1366_v21 = vsel %vm390_vm1, %v12711_v24, -inf }
 0x5f7   :  { %v1122_v48 = vpop.permute.xlu1 %1121 }
 0x5f8   :  { %v860_v27 = vpop.xlane.xlu0 %859  ;;  %v12715_v36 = vpop.f32.mrb[20].mxu0  ;;  %1373 = vmax.xlane.f32.xlu0 %v1372_v63  ;;  %11136 = vmatprep.subr.msk.bf16.mxu1 %vm534_vm2, %v1122_v48  ;;  %v1142_v52 = vsel %vm534_vm2, %v1122_v48, 0 }
 0x5f9   :  { %11314 = vrcp.f32 %v860_v27  ;;  %10201 = vmatpush3.bf16.xpose.msra.mxu1 %v1142_v52  ;;  %v1308_v56 = vpop.f32.mrb[21].mxu0  ;;  %v1337_v27 = vmul.f32 0.35355338, %v12715_v36 }
 0x5fa   :  { %v10231_v0 = vpop.f32.mrb[22].mxu0  ;;  %v11309_v14 = vpop.eup %11308  ;;  %v1335_v52 = vmul.f32 0.35355338, %v1308_v56 }
 0x5fb   :  { %v12719_v58 = vmul.f32 0.35355338, %v10231_v0  ;;  %v1311_v7 = vpop.f32.mrb[23].mxu0  ;;  %v1126_v35 = vpop.permute.xlu1 %1125  ;;  %v896_v6 = vmul.f32 %v11309_v14, %v12625_v49  ;;  %v1381_v0 = vsel %vm390_vm1, %v1337_v27, -inf }
 0x5fc   :  { %v1124_v8 = vpop.permute.xlu0 %1123  ;;  %1367 = vmax.xlane.f32.xlu0 %v1366_v21  ;;  %v12724_v1 = vmul.f32 0.35355338, %v1311_v7  ;;  %v1148_v60 = vsel %vm534_vm2, %v1126_v35, 0  ;;  %v1375_v7 = vsel %vm390_vm1, %v1335_v52, -inf }
 0x5fd   :  { %11137 = vmatprep.subr.msk.bf16.mxu1 %vm534_vm2, %v1124_v8  ;;  %v1384_v28 = vsel %vm390_vm1, %v12719_v58, -inf  ;;  %v1145_v44 = vsel %vm534_vm2, %v1124_v8, 0 }
 0x5fe   :  { %v11311_v13 = vpop.eup %11310  ;;  %v1378_v20 = vsel %vm390_vm1, %v12724_v1, -inf }
 0x5ff   :  { %v1128_v31 = vpop.permute.xlu1 %1127  ;;  %v894_v50 = vmul.f32 %v11311_v13, %v12627_v47  ;;  %v11313_v32 = vpop.eup %11312 }
 0x600   :  { %1385 = vmax.xlane.f32.xlu0 %v1384_v28  ;;  %v1116_v57 = vpop.permute.xlu0 %1115  ;;  %v898_v47 = vmul.f32 %v11313_v32, %v12631_v10  ;;  %v1151_v55 = vsel %vm534_vm2, %v1128_v31, 0 }
 0x601   :  { %10203 = vmatpush3.bf16.xpose.msra.mxu1 %v1145_v44  ;;  %v919_v30 = vpack.c.bf16 %v896_v6, %v894_v50 }
 0x602   :  { %11138 = vmatprep.subr.msk.bf16.mxu1 %vm534_vm2, %v1126_v35 }
 0x603   :  { %v11315_v34 = vpop.eup %11314  ;;  %v1114_v33 = vpop.permute.xlu1 %1113  ;;  %10180 = vmatprep.mubr.msk.bf16.mxu1 %vm390_vm1, %v919_v30 }
 0x604   :  { %1379 = vmax.xlane.f32.xlu0 %v1378_v20  ;;  %v900_v49 = vmul.f32 %v11315_v34, %v12637_v51  ;;  %v1120_v42 = vpop.permute.xlu0 %1119 }
 0x606   :  { %1980 = vrot.lane.b32.xlu1 %v12383_v29, %s12068_s8  ;;  %v920_v39 = vpack.c.bf16 %v900_v49, %v898_v47 }
 0x607   :  { %v1118_v43 = vpop.permute.xlu1 %1117 }
 0x608   :  { %10181 = vmatmul.mubr.msk.bf16.gmra.mrb[28].mxu1 %vm390_vm1, %v920_v39  ;;  %v1615_v10 = vpop.permute.xlu0 %1614 }
 0x609   :  { %10208 = vmatprep.mubr.msk.bf16.mxu1 %vm534_vm2, %v1114_v33  ;;  %10205 = vmatpush3.bf16.xpose.msra.mxu1 %v1148_v60 }
 0x60a   :  { %11139 = vmatprep.subr.msk.bf16.mxu1 %vm534_vm2, %v1128_v31 }
 0x60b   :  { %v1613_v40 = vpop.permute.xlu1 %1612 }
 0x60c   :  { %10248 = vmatprep.subr.bf16.mxu0 %v1613_v40  ;;  %v12758_v35 = vpop.permute.xlu0 %1976 }
 0x60d   :  { %10249 = vmatpush3.bf16.msra.mxu0 %v1613_v40 }
 0x60e   :  { %10250 = vmatprep.subr.bf16.mxu0 %v1615_v10 }
 0x60f   :  { %v1617_v51 = vpop.permute.xlu1 %1616 }
 0x611   :  { %10207 = vmatpush3.bf16.xpose.msra.mxu1 %v1151_v55  ;;  %10251 = vmatpush3.bf16.msra.mxu0 %v1615_v10 }
 0x612   :  { %10252 = vmatprep.subr.bf16.mxu0 %v1617_v51 }
 0x613   :  { %v1619_v48 = vpop.permute.xlu1 %1618 }
 0x615   :  { %10253 = vmatpush3.bf16.msra.mxu0 %v1617_v51 }
 0x616   :  { %10254 = vmatprep.subr.bf16.mxu0 %v1619_v48 }
 0x617   :  { %v12745_v63 = vpop.permute.xlu1 %1974 }
 0x618   :  { %10209 = vmatmul.mubr.msk.bf16.vlgmr.msra.gmra.mrb[32].mxu1 %vm534_vm2, %v1116_v57  ;;  %v1995_v16 = vsel %vm534_vm2, %v12745_v63, 0 }
 0x619   :  { %10212 = vmatprep.mubr.msk.bf16.mxu1 %vm534_vm2, %v1118_v43  ;;  %10255 = vmatpush3.bf16.msra.mxu0 %v1619_v48 }
 0x61a   :  { %2079 = vrot.lane.b32.xlu0 %v12389_v5, %s12068_s8  ;;  %11146 = vmatprep.subr.msk.bf16.mxu0 %vm534_vm2, %v12745_v63 }
 0x61b   :  { %v12760_v21 = vpop.permute.xlu1 %1978 }
 0x620   :  { %10213 = vmatmul.mubr.msk.bf16.gmra.mrb[36].mxu1 %vm534_vm2, %v1120_v42 }
 0x62a   :  { %1382 = vmax.xlane.f32.xlu1 %v1381_v0 }
 0x62e   :  { %1376 = vmax.xlane.f32.xlu1 %v1375_v7 }
 0x63f   :  { %1966 = vrot.lane.b32.xlu1 %v12379_v45, %s12069_s9 }
 0x681   :  { %v1371_v14 = vpop.xlane.xlu0 %1370 }
 0x682   :  { %v1397_v8 = vsub.f32 %v12701_v54, %v1371_v14  ;;  %v1365_v13 = vpop.xlane.xlu1 %1364 }
 0x683   :  { %v1395_v36 = vsub.f32 %v12703_v38, %v1365_v13 }
 0x684   :  { %v1423_v56 = vmul.f32 1.442695, %v1397_v8 }
 0x685   :  { %v1419_v31 = vmul.f32 1.442695, %v1395_v36  ;;  %v1374_v28 = vpop.xlane.xlu0 %1373 }
 0x686   :  { %11316 = vpow2.f32 %v1423_v56  ;;  %v1398_v50 = vsub.f32 %v12705_v41, %v1374_v28  ;;  %v12794_v10 = vpop.permute.xlu1 %1980 }
 0x687   :  { %11318 = vpow2.f32 %v1419_v31 }
 0x688   :  { %v1425_v6 = vmul.f32 1.442695, %v1398_v50 }
 0x689   :  { %v1368_v44 = vpop.xlane.xlu0 %1367 }
 0x68a   :  { %11320 = vpow2.f32 %v1425_v6  ;;  %v1396_v32 = vsub.f32 %v12711_v24, %v1368_v44 }
 0x68c   :  { %v1421_v57 = vmul.f32 1.442695, %v1396_v32 }
 0x68d   :  { %v1386_v40 = vpop.xlane.xlu0 %1385 }
 0x68e   :  { %11322 = vpow2.f32 %v1421_v57  ;;  %v1402_v51 = vsub.f32 %v12719_v58, %v1386_v40 }
 0x690   :  { %v12766_v30 = vpop.eup %11316  ;;  %v1433_v7 = vmul.f32 1.442695, %v1402_v51 }
 0x691   :  { %v1465_v54 = vsel %vm390_vm1, %v12766_v30, 0.0  ;;  %v12770_v38 = vpop.eup %11318  ;;  %v1380_v55 = vpop.xlane.xlu0 %1379 }
 0x692   :  { %1466 = vadd.xlane.f32.xlu1 %v1465_v54  ;;  %v1459_v41 = vsel %vm390_vm1, %v12770_v38, 0.0  ;;  %v1400_v14 = vsub.f32 %v12724_v1, %v1380_v55 }
 0x694   :  { %v12772_v34 = vpop.eup %11320  ;;  %v1429_v56 = vmul.f32 1.442695, %v1400_v14 }
 0x695   :  { %v1468_v33 = vsel %vm390_vm1, %v12772_v34, 0.0 }
 0x696   :  { %1460 = vadd.xlane.f32.xlu1 %v1459_v41  ;;  %1469 = vadd.xlane.f32.xlu0 %v1468_v33 }
 0x698   :  { %v12778_v24 = vpop.eup %11322 }
 0x699   :  { %v1462_v20 = vsel %vm390_vm1, %v12778_v24, 0.0 }
 0x69a   :  { %1463 = vadd.xlane.f32.xlu0 %v1462_v20 }
 0x69f   :  { %v12782_v47 = vpop.f32.mrb[24].mxu1 }
 0x6a0   :  { %v12784_v49 = vpop.f32.mrb[25].mxu1 }
 0x6a1   :  { %v12786_v39 = vpop.f32.mrb[26].mxu1 }
 0x6a2   :  { %v12790_v43 = vpop.f32.mrb[27].mxu1 }
 0x6b7   :  { %v1383_v48 = vpop.xlane.xlu1 %1382 }
 0x6b8   :  { %v1401_v0 = vsub.f32 %v1337_v27, %v1383_v48 }
 0x6ba   :  { %v1431_v8 = vmul.f32 1.442695, %v1401_v0 }
 0x6bb   :  { %v1377_v13 = vpop.xlane.xlu1 %1376 }
 0x6bc   :  { %11324 = vpow2.f32 %v1431_v8  ;;  %v1399_v36 = vsub.f32 %v1335_v52, %v1377_v13 }
 0x6bd   :  { %11326 = vpow2.f32 %v1433_v7 }
 0x6be   :  { %v1427_v31 = vmul.f32 1.442695, %v1399_v36 }
 0x6c0   :  { %11328 = vpow2.f32 %v1427_v31 }
 0x6c1   :  { %11330 = vpow2.f32 %v1429_v56 }
 0x6c6   :  { %v12798_v28 = vpop.eup %11324 }
 0x6c7   :  { %v1477_v58 = vsel %vm390_vm1, %v12798_v28, 0.0  ;;  %v12802_v50 = vpop.eup %11326 }
 0x6c8   :  { %1478 = vadd.xlane.f32.xlu0 %v1477_v58  ;;  %v1480_v52 = vsel %vm390_vm1, %v12802_v50, 0.0 }
 0x6ca   :  { %v12804_v27 = vpop.eup %11328 }
 0x6cb   :  { %v1471_v1 = vsel %vm390_vm1, %v12804_v27, 0.0  ;;  %v12810_v6 = vpop.eup %11330 }
 0x6cc   :  { %1472 = vadd.xlane.f32.xlu1 %v1471_v1  ;;  %1481 = vadd.xlane.f32.xlu0 %v1480_v52  ;;  %v1474_v44 = vsel %vm390_vm1, %v12810_v6, 0.0 }
 0x6d0   :  { %1475 = vadd.xlane.f32.xlu0 %v1474_v44 }
 0x6db   :  { %v12814_v32 = vpop.f32.mrb[28].mxu1 }
 0x6dc   :  { %v12816_v57 = vpop.f32.mrb[29].mxu1 }
 0x6dd   :  { %v12818_v54 = vpop.f32.mrb[30].mxu1  ;;  %1968 = vrot.lane.b32.xlu1 %v12377_v46, %s12069_s9 }
 0x6de   :  { %v12824_v33 = vpop.f32.mrb[31].mxu1 }
 0x6e6   :  { %2081 = vrot.lane.b32.xlu0 %v12387_v11, %s12068_s8 }
 0x6eb   :  { %v10210_v40 = vpop.f32.mrb[32].mxu1 }
 0x6ec   :  { %v1187_v51 = vpop.f32.mrb[33].mxu1  ;;  %v12836_v31 = vmul.f32 0.35355338, %v10210_v40 }
 0x6ed   :  { %v10211_v55 = vpop.f32.mrb[34].mxu1  ;;  %v12830_v13 = vmul.f32 0.35355338, %v1187_v51 }
 0x6ee   :  { %v1190_v48 = vpop.f32.mrb[35].mxu1  ;;  %v12840_v1 = vmul.f32 0.35355338, %v10211_v55  ;;  %v1345_v52 = vsel %vm390_vm1, %v12836_v31, -inf }
 0x6ef   :  { %v12832_v36 = vmul.f32 0.35355338, %v1190_v48  ;;  %v1339_v56 = vsel %vm390_vm1, %v12830_v13, -inf }
 0x6f0   :  { %v1348_v51 = vsel %vm390_vm1, %v12840_v1, -inf }
 0x6f1   :  { %v1342_v58 = vsel %vm390_vm1, %v12832_v36, -inf }
 0x6f3   :  { %v10214_v0 = vpop.f32.mrb[36].mxu1 }
 0x6f4   :  { %v1203_v7 = vpop.f32.mrb[37].mxu1  ;;  %v12854_v55 = vmul.f32 0.35355338, %v10214_v0 }
 0x6f5   :  { %v10215_v14 = vpop.f32.mrb[38].mxu1  ;;  %v12844_v44 = vmul.f32 0.35355338, %v1203_v7 }
 0x6f6   :  { %v1206_v8 = vpop.f32.mrb[39].mxu1  ;;  %v12860_v7 = vmul.f32 0.35355338, %v10215_v14 }
 0x6f7   :  { %v12848_v48 = vmul.f32 0.35355338, %v1206_v8  ;;  %v1351_v40 = vsel %vm390_vm1, %v12844_v44, -inf  ;;  %v1357_v8 = vsel %vm390_vm1, %v12854_v55, -inf }
 0x6f8   :  { %v1360_v0 = vsel %vm390_vm1, %v12860_v7, -inf }
 0x701   :  { %1340 = vmax.xlane.f32.xlu1 %v1339_v56  ;;  %v1354_v56 = vsel %vm390_vm1, %v12848_v48, -inf }
 0x705   :  { %1343 = vmax.xlane.f32.xlu0 %v1342_v58  ;;  %v1967_v58 = vpop.permute.xlu1 %1966 }
 0x709   :  { %1346 = vmax.xlane.f32.xlu0 %v1345_v52  ;;  %v2080_v52 = vpop.permute.xlu0 %2079 }
 0x70d   :  { %1349 = vmax.xlane.f32.xlu0 %v1348_v51 }
 0x711   :  { %1352 = vmax.xlane.f32.xlu0 %v1351_v40 }
 0x712   :  { %2083 = vrot.lane.b32.xlu1 %v12399_v19, %s12068_s8 }
 0x715   :  { %1355 = vmax.xlane.f32.xlu0 %v1354_v56 }
 0x716   :  { %1970 = vrot.lane.b32.xlu1 %v12385_v53, %s12069_s9 }
 0x719   :  { %1358 = vmax.xlane.f32.xlu0 %v1357_v8 }
 0x71a   :  { %2085 = vrot.lane.b32.xlu1 %v12397_v18, %s12068_s8 }
 0x71d   :  { %1361 = vmax.xlane.f32.xlu0 %v1360_v0 }
 0x71e   :  { %2071 = vrot.lane.b32.xlu1 %v12389_v5, %s12069_s9 }
 0x71f   :  { %v1467_v51 = vpop.xlane.xlu1 %1466 }
 0x722   :  { %2073 = vrot.lane.b32.xlu1 %v12387_v11, %s12069_s9 }
 0x723   :  { %v1461_v14 = vpop.xlane.xlu1 %1460  ;;  %v1470_v40 = vpop.xlane.xlu0 %1469 }
 0x724   :  { %11332 = vrcp.f32 %v1470_v40 }
 0x725   :  { %11334 = vrcp.f32 %v1461_v14 }
 0x726   :  { %2075 = vrot.lane.b32.xlu1 %v12399_v19, %s12069_s9  ;;  %11336 = vrcp.f32 %v1467_v51 }
 0x727   :  { %v1464_v56 = vpop.xlane.xlu0 %1463 }
 0x728   :  { %11338 = vrcp.f32 %v1464_v56 }
 0x72a   :  { %2077 = vrot.lane.b32.xlu1 %v12397_v18, %s12069_s9 }
 0x72e   :  { %v11333_v8 = vpop.eup %11332 }
 0x72f   :  { %v11335_v0 = vpop.eup %11334  ;;  %v1506_v25 = vmul.f32 %v11333_v8, %v12772_v34 }
 0x730   :  { %v11337_v3 = vpop.eup %11336  ;;  %v1500_v14 = vmul.f32 %v11335_v0, %v12770_v38  ;;  %v1998_v38 = vsel %vm534_vm2, %v12758_v35, 0 }
 0x731   :  { %v1504_v51 = vmul.f32 %v11337_v3, %v12766_v30  ;;  %v2004_v3 = vsel %vm534_vm2, %v12794_v10, 0 }
 0x732   :  { %v11339_v61 = vpop.eup %11338 }
 0x733   :  { %1972 = vrot.lane.b32.xlu0 %v12383_v29, %s12069_s9  ;;  %v1502_v40 = vmul.f32 %v11339_v61, %v12778_v24  ;;  %v1520_v56 = vpack.c.bf16 %v1506_v25, %v1504_v51  ;;  %v2001_v61 = vsel %vm534_vm2, %v12760_v21, 0 }
 0x735   :  { %v1519_v22 = vpack.c.bf16 %v1502_v40, %v1500_v14 }
 0x737   :  { %10256 = vmatprep.mubr.msk.bf16.mxu0 %vm390_vm1, %v1519_v22 }
 0x738   :  { %10257 = vmatmul.mubr.msk.bf16.vlgmr.msra.gmra.mrb[24].mxu0 %vm390_vm1, %v1520_v56  ;;  %v2100_v56 = vsel %vm534_vm2, %v2080_v52, 0 }
 0x739   :  { %10301 = vmatpush3.bf16.xpose.msra.mxu0 %v1995_v16 }
 0x73a   :  { %11147 = vmatprep.subr.msk.bf16.mxu0 %vm534_vm2, %v12758_v35 }
 0x741   :  { %10303 = vmatpush3.bf16.xpose.msra.mxu0 %v1998_v38 }
 0x742   :  { %11148 = vmatprep.subr.msk.bf16.mxu0 %vm534_vm2, %v12760_v21 }
 0x749   :  { %10305 = vmatpush3.bf16.xpose.msra.mxu0 %v2001_v61 }
 0x74a   :  { %11149 = vmatprep.subr.msk.bf16.mxu0 %vm534_vm2, %v12794_v10 }
 0x751   :  { %10307 = vmatpush3.bf16.xpose.msra.mxu0 %v2004_v3 }
 0x752   :  { %11150 = vmatprep.subr.msk.bf16.mxu0 %vm534_vm2, %v2080_v52 }
 0x755   :  { %v1479_v16 = vpop.xlane.xlu0 %1478 }
 0x759   :  { %v1473_v25 = vpop.xlane.xlu1 %1472  ;;  %v1482_v22 = vpop.xlane.xlu0 %1481 }
 0x75a   :  { %11340 = vrcp.f32 %v1482_v22 }
 0x75b   :  { %11342 = vrcp.f32 %v1473_v25 }
 0x75c   :  { %11344 = vrcp.f32 %v1479_v16 }
 0x75d   :  { %v1476_v63 = vpop.xlane.xlu0 %1475  ;;  %v1969_v51 = vpop.permute.xlu1 %1968 }
 0x75e   :  { %11346 = vrcp.f32 %v1476_v63 }
 0x764   :  { %v11341_v35 = vpop.eup %11340 }
 0x765   :  { %v11343_v21 = vpop.eup %11342  ;;  %v1514_v24 = vmul.f32 %v11341_v35, %v12802_v50  ;;  %v2082_v50 = vpop.permute.xlu0 %2081 }
 0x766   :  { %v11345_v30 = vpop.eup %11344  ;;  %v1508_v8 = vmul.f32 %v11343_v21, %v12804_v27  ;;  %v2103_v27 = vsel %vm534_vm2, %v2082_v50, 0 }
 0x767   :  { %v1512_v0 = vmul.f32 %v11345_v30, %v12798_v28 }
 0x768   :  { %v11347_v34 = vpop.eup %11346 }
 0x769   :  { %v1510_v10 = vmul.f32 %v11347_v34, %v12810_v6  ;;  %v1522_v40 = vpack.c.bf16 %v1514_v24, %v1512_v0 }
 0x76b   :  { %v1521_v14 = vpack.c.bf16 %v1510_v10, %v1508_v8 }
 0x76d   :  { %10260 = vmatprep.mubr.msk.bf16.mxu0 %vm390_vm1, %v1521_v14 }
 0x76e   :  { %10261 = vmatmul.mubr.msk.bf16.gmra.mrb[28].mxu0 %vm390_vm1, %v1522_v40 }
 0x76f   :  { %10308 = vmatprep.mubr.msk.bf16.mxu0 %vm534_vm2, %v1967_v58 }
 0x776   :  { %10309 = vmatmul.mubr.msk.bf16.vlgmr.msra.gmra.mrb[32].mxu0 %vm534_vm2, %v1969_v51 }
 0x777   :  { %10317 = vmatpush3.bf16.xpose.msra.mxu0 %v2100_v56 }
 0x778   :  { %11151 = vmatprep.subr.msk.bf16.mxu0 %vm534_vm2, %v2082_v50 }
 0x77f   :  { %10319 = vmatpush3.bf16.xpose.msra.mxu0 %v2103_v27 }
 0x78e   :  { %v1341_v28 = vpop.xlane.xlu1 %1340 }
 0x78f   :  { %v1387_v6 = vsub.f32 %v12830_v13, %v1341_v28 }
 0x791   :  { %v1403_v38 = vmul.f32 1.442695, %v1387_v6 }
 0x792   :  { %v2084_v61 = vpop.permute.xlu1 %2083  ;;  %v1344_v3 = vpop.xlane.xlu0 %1343 }
 0x793   :  { %11348 = vpow2.f32 %v1403_v38  ;;  %v1388_v58 = vsub.f32 %v12832_v36, %v1344_v3  ;;  %11152 = vmatprep.subr.msk.bf16.mxu0 %vm534_vm2, %v2084_v61  ;;  %v2106_v52 = vsel %vm534_vm2, %v2084_v61, 0 }
 0x794   :  { %10321 = vmatpush3.bf16.xpose.msra.mxu0 %v2106_v52 }
 0x795   :  { %v1405_v16 = vmul.f32 1.442695, %v1388_v58 }
 0x796   :  { %v1971_v25 = vpop.permute.xlu1 %1970  ;;  %v1347_v22 = vpop.xlane.xlu0 %1346 }
 0x797   :  { %11350 = vpow2.f32 %v1405_v16  ;;  %v1389_v63 = vsub.f32 %v12836_v31, %v1347_v22  ;;  %10312 = vmatprep.mubr.msk.bf16.mxu0 %vm534_vm2, %v1971_v25 }
 0x799   :  { %v1407_v13 = vmul.f32 1.442695, %v1389_v63 }
 0x79a   :  { %v2086_v35 = vpop.permute.xlu1 %2085  ;;  %v1350_v21 = vpop.xlane.xlu0 %1349 }
 0x79b   :  { %11352 = vpow2.f32 %v1407_v13  ;;  %v1390_v30 = vsub.f32 %v12840_v1, %v1350_v21  ;;  %11153 = vmatprep.subr.msk.bf16.mxu0 %vm534_vm2, %v2086_v35  ;;  %v2109_v36 = vsel %vm534_vm2, %v2086_v35, 0 }
 0x79c   :  { %10323 = vmatpush3.bf16.xpose.msra.mxu0 %v2109_v36 }
 0x79d   :  { %v12919_v34 = vpop.eup %11348  ;;  %v1409_v24 = vmul.f32 1.442695, %v1390_v30 }
 0x79e   :  { %v1353_v8 = vpop.xlane.xlu0 %1352  ;;  %v1435_v31 = vsel %vm390_vm1, %v12919_v34, 0.0 }
 0x79f   :  { %11354 = vpow2.f32 %v1409_v24  ;;  %v1391_v10 = vsub.f32 %v12844_v44, %v1353_v8  ;;  %1436 = vadd.xlane.f32.xlu1 %v1435_v31  ;;  %v1701_v8 = vld [vmem:[%s16788_s2 + $0x8] sm:$0xff]  ;;  %v1103_v31 = vld [vmem:[%s16788_s2] sm:$0xff] }
 0x7a1   :  { %v12924_v0 = vpop.eup %11350  ;;  %v1411_v14 = vmul.f32 1.442695, %v1391_v10  ;;  %v1710_v10 = vpack.c.bf16 %v1701_v8, %v1701_v8 }
 0x7a2   :  { %v1356_v1 = vpop.xlane.xlu0 %1355  ;;  %v1438_v40 = vsel %vm390_vm1, %v12924_v0, 0.0 }
 0x7a3   :  { %11356 = vpow2.f32 %v1411_v14  ;;  %v1392_v51 = vsub.f32 %v12848_v48, %v1356_v1  ;;  %1439 = vadd.xlane.f32.xlu0 %v1438_v40  ;;  %v2072_v48 = vpop.permute.xlu1 %2071  ;;  %v1112_v14 = vpack.c.bf16 %v1103_v31, %v1103_v31 }
 0x7a5   :  { %v12929_v56 = vpop.eup %11352  ;;  %v1413_v50 = vmul.f32 1.442695, %v1392_v51 }
 0x7a6   :  { %v1359_v27 = vpop.xlane.xlu0 %1358  ;;  %v1441_v28 = vsel %vm390_vm1, %v12929_v56, 0.0 }
 0x7a7   :  { %11358 = vpow2.f32 %v1413_v50  ;;  %v1393_v44 = vsub.f32 %v12854_v55, %v1359_v27  ;;  %1442 = vadd.xlane.f32.xlu0 %v1441_v28  ;;  %v2074_v63 = vpop.permute.xlu1 %2073 }
 0x7a9   :  { %v12934_v6 = vpop.eup %11354  ;;  %v1415_v38 = vmul.f32 1.442695, %v1393_v44 }
 0x7aa   :  { %v1362_v61 = vpop.xlane.xlu0 %1361  ;;  %v1444_v3 = vsel %vm390_vm1, %v12934_v6, 0.0 }
 0x7ab   :  { %11360 = vpow2.f32 %v1415_v38  ;;  %v1394_v58 = vsub.f32 %v12860_v7, %v1362_v61  ;;  %1445 = vadd.xlane.f32.xlu0 %v1444_v3  ;;  %v2076_v21 = vpop.permute.xlu1 %2075 }
 0x7ad   :  { %v12939_v52 = vpop.eup %11356  ;;  %v1417_v16 = vmul.f32 1.442695, %v1394_v58 }
 0x7ae   :  { %v1973_v25 = vpop.permute.xlu0 %1972  ;;  %v1447_v55 = vsel %vm390_vm1, %v12939_v52, 0.0 }
 0x7af   :  { %11362 = vpow2.f32 %v1417_v16  ;;  %1448 = vadd.xlane.f32.xlu1 %v1447_v55  ;;  %10313 = vmatmul.mubr.msk.bf16.gmra.mrb[36].mxu0 %vm534_vm2, %v1973_v25  ;;  %v2078_v24 = vpop.permute.xlu1 %2077 }
 0x7b0   :  { %10324 = vmatprep.mubr.msk.bf16.mxu0 %vm534_vm2, %v2072_v48 }
 0x7b1   :  { %v12945_v22 = vpop.eup %11358 }
 0x7b2   :  { %v1450_v7 = vsel %vm390_vm1, %v12945_v22, 0.0 }
 0x7b3   :  { %1451 = vadd.xlane.f32.xlu0 %v1450_v7 }
 0x7b5   :  { %v12949_v13 = vpop.eup %11360 }
 0x7b6   :  { %v1453_v35 = vsel %vm390_vm1, %v12949_v13, 0.0 }
 0x7b7   :  { %1454 = vadd.xlane.f32.xlu1 %v1453_v35  ;;  %10325 = vmatmul.mubr.msk.bf16.vlgmr.msra.gmra.mrb[40].mxu0 %vm534_vm2, %v2074_v63 }
 0x7b8   :  { %10328 = vmatprep.mubr.msk.bf16.mxu0 %vm534_vm2, %v2076_v21 }
 0x7b9   :  { %v12955_v30 = vpop.eup %11362 }
 0x7ba   :  { %v1456_v36 = vsel %vm390_vm1, %v12955_v30, 0.0 }
 0x7bb   :  { %1457 = vadd.xlane.f32.xlu0 %v1456_v36 }
 0x7bf   :  { %10329 = vmatmul.mubr.msk.bf16.gmra.mrb[44].mxu0 %vm534_vm2, %v2078_v24 }
 0x7c8   :  { %1523 = vrot.lane.b32.xlu1 %v12379_v45, %s12067_s7 }
 0x7cc   :  { %1527 = vrot.lane.b32.xlu1 %v12385_v53, %s12067_s7 }
 0x7d0   :  { %1529 = vrot.lane.b32.xlu1 %v12383_v29, %s12067_s7 }
 0x7d1   :  { %1525 = vrot.lane.b32.xlu0 %v12377_v46, %s12067_s7 }
 0x7d4   :  { %1712 = vrot.lane.b32.xlu1 %v1710_v10, %s12070_s14 }
 0x7d5   :  { %1840 = vrot.lane.b32.xlu0 %v1112_v14, %s12070_s14 }
 0x7d8   :  { %2376 = vrot.lane.b32.xlu1 %v12379_v45, %s12063_s30 }
 0x7dc   :  { %2378 = vrot.lane.b32.xlu1 %v12377_v46, %s12063_s30 }
 0x80b   :  { %v12980_v1 = vpop.f32.mrb[24].mxu0 }
 0x80c   :  { %v12982_v40 = vpop.f32.mrb[25].mxu0 }
 0x80d   :  { %v12984_v51 = vpop.f32.mrb[26].mxu0 }
 0x80e   :  { %v12988_v27 = vpop.f32.mrb[27].mxu0 }
 0x82c   :  { %v1437_v44 = vpop.xlane.xlu1 %1436 }
 0x82d   :  { %11364 = vrcp.f32 %v1437_v44 }
 0x830   :  { %v1440_v38 = vpop.xlane.xlu0 %1439 }
 0x831   :  { %11366 = vrcp.f32 %v1440_v38 }
 0x834   :  { %v1443_v3 = vpop.xlane.xlu0 %1442 }
 0x837   :  { %v11365_v61 = vpop.eup %11364 }
 0x838   :  { %v1484_v58 = vmul.f32 %v11365_v61, %v12919_v34  ;;  %v1446_v55 = vpop.xlane.xlu0 %1445 }
 0x839   :  { %11368 = vrcp.f32 %v1446_v55 }
 0x83b   :  { %v11367_v48 = vpop.eup %11366 }
 0x83c   :  { %v1486_v16 = vmul.f32 %v11367_v48, %v12924_v0  ;;  %v1449_v63 = vpop.xlane.xlu1 %1448 }
 0x83e   :  { %v1515_v25 = vpack.c.bf16 %v1486_v16, %v1484_v58 }
 0x840   :  { %10240 = vmatprep.mubr.msk.bf16.mxu1 %vm390_vm1, %v1515_v25  ;;  %v1452_v21 = vpop.xlane.xlu0 %1451 }
 0x841   :  { %v12995_v7 = vpop.f32.mrb[28].mxu0  ;;  %11370 = vrcp.f32 %v1452_v21 }
 0x842   :  { %v12997_v35 = vpop.f32.mrb[29].mxu0  ;;  %11372 = vrcp.f32 %v1443_v3 }
 0x843   :  { %v12999_v36 = vpop.f32.mrb[30].mxu0  ;;  %11374 = vrcp.f32 %v1449_v63 }
 0x844   :  { %v13003_v8 = vpop.f32.mrb[31].mxu0  ;;  %v1455_v34 = vpop.xlane.xlu1 %1454 }
 0x848   :  { %v1524_v31 = vpop.permute.xlu1 %1523  ;;  %v1458_v10 = vpop.xlane.xlu0 %1457 }
 0x849   :  { %10232 = vmatprep.subr.bf16.mxu1 %v1524_v31  ;;  %v10310_v14 = vpop.f32.mrb[32].mxu0  ;;  %11376 = vrcp.f32 %v1458_v10 }
 0x84a   :  { %v13007_v44 = vmul.f32 0.35355338, %v10310_v14  ;;  %10233 = vmatpush3.bf16.msra.mxu1 %v1524_v31  ;;  %v2040_v38 = vpop.f32.mrb[33].mxu0  ;;  %v11369_v14 = vpop.eup %11368  ;;  %11378 = vrcp.f32 %v1455_v34 }
 0x84b   :  { %v13009_v61 = vmul.f32 0.35355338, %v2040_v38  ;;  %v10311_v48 = vpop.f32.mrb[34].mxu0  ;;  %v1490_v41 = vmul.f32 %v11369_v14, %v12934_v6 }
 0x84c   :  { %v13011_v58 = vmul.f32 0.35355338, %v10311_v48  ;;  %v2043_v16 = vpop.f32.mrb[35].mxu0  ;;  %v1528_v25 = vpop.permute.xlu1 %1527  ;;  %v2198_v55 = vsel %vm390_vm1, %v13007_v44, -inf }
 0x84d   :  { %v1526_v21 = vpop.permute.xlu0 %1525  ;;  %2199 = vmax.xlane.f32.xlu0 %v2198_v55  ;;  %v2192_v3 = vsel %vm390_vm1, %v13009_v61, -inf  ;;  %v13017_v63 = vmul.f32 0.35355338, %v2043_v16  ;;  %v11371_v48 = vpop.eup %11370 }
 0x84e   :  { %10234 = vmatprep.subr.bf16.mxu1 %v1526_v21  ;;  %2193 = vmax.xlane.f32.xlu1 %v2192_v3  ;;  %v2201_v31 = vsel %vm390_vm1, %v13011_v58, -inf  ;;  %v11373_v26 = vpop.eup %11372  ;;  %v1494_v16 = vmul.f32 %v11371_v48, %v12945_v22 }
 0x84f   :  { %10235 = vmatpush3.bf16.msra.mxu1 %v1526_v21  ;;  %v11375_v55 = vpop.eup %11374  ;;  %v2195_v10 = vsel %vm390_vm1, %v13017_v63, -inf  ;;  %v1488_v21 = vmul.f32 %v11373_v26, %v12929_v56 }
 0x850   :  { %10236 = vmatprep.subr.bf16.mxu1 %v1528_v25  ;;  %v1530_v38 = vpop.permute.xlu1 %1529  ;;  %v1492_v34 = vmul.f32 %v11375_v55, %v12939_v52 }
 0x851   :  { %2202 = vmax.xlane.f32.xlu0 %v2201_v31  ;;  %v1516_v31 = vpack.c.bf16 %v1490_v41, %v1488_v21  ;;  %v13029_v20 = vpop.permute.xlu0 %1840 }
 0x852   :  { %v1517_v14 = vpack.c.bf16 %v1494_v16, %v1492_v34 }
 0x853   :  { %10237 = vmatpush3.bf16.msra.mxu1 %v1528_v25  ;;  %v11377_v6 = vpop.eup %11376 }
 0x854   :  { %10238 = vmatprep.subr.bf16.mxu1 %v1530_v38  ;;  %v1713_v3 = vpop.permute.xlu1 %1712  ;;  %v1498_v26 = vmul.f32 %v11377_v6, %v12955_v30 }
 0x855   :  { %2196 = vmax.xlane.f32.xlu0 %v2195_v10  ;;  %v1740_v25 = vsel %vm1738_vm3, %v1713_v3, 0  ;;  %v11379_v10 = vpop.eup %11378 }
 0x856   :  { %v1496_v41 = vmul.f32 %v11379_v10, %v12949_v13 }
 0x857   :  { %10239 = vmatpush3.bf16.msra.mxu1 %v1530_v38 }
 0x858   :  { %11144 = vmatprep.subr.msk.bf16.mxu1 %vm1738_vm3, %v1713_v3  ;;  %v1518_v56 = vpack.c.bf16 %v1498_v26, %v1496_v41 }
 0x85a   :  { %10241 = vmatmul.mubr.msk.bf16.vlgmr.msra.gmra.mrb[40].mxu1 %vm390_vm1, %v1516_v31 }
 0x85b   :  { %10244 = vmatprep.mubr.msk.bf16.mxu1 %vm390_vm1, %v1517_v14  ;;  %10265 = vmatpush3.bf16.msra.mxu1 %v1740_v25 }
 0x85c   :  { %11145 = vmatprep.subr.msk.bf16.mxu1 %vm1738_vm3, %v13029_v20 }
 0x862   :  { %10245 = vmatmul.mubr.msk.bf16.gmra.mrb[44].mxu1 %vm390_vm1, %v1518_v56 }
 0x882   :  { %v10314_v52 = vpop.f32.mrb[36].mxu0 }
 0x883   :  { %v13038_v22 = vmul.f32 0.35355338, %v10314_v52  ;;  %v2056_v38 = vpop.f32.mrb[37].mxu0 }
 0x884   :  { %v10315_v48 = vpop.f32.mrb[38].mxu0  ;;  %v13040_v55 = vmul.f32 0.35355338, %v2056_v38 }
 0x885   :  { %v13042_v16 = vmul.f32 0.35355338, %v10315_v48  ;;  %v2059_v21 = vpop.f32.mrb[39].mxu0  ;;  %v2210_v30 = vsel %vm390_vm1, %v13038_v22, -inf }
 0x886   :  { %2211 = vmax.xlane.f32.xlu1 %v2210_v30  ;;  %v13046_v3 = vmul.f32 0.35355338, %v2059_v21  ;;  %v2204_v34 = vsel %vm390_vm1, %v13040_v55, -inf }
 0x887   :  { %v2213_v13 = vsel %vm390_vm1, %v13042_v16, -inf }
 0x888   :  { %2214 = vmax.xlane.f32.xlu0 %v2213_v13  ;;  %v2207_v14 = vsel %vm390_vm1, %v13046_v3, -inf }
 0x88a   :  { %2205 = vmax.xlane.f32.xlu1 %v2204_v34  ;;  %v10326_v31 = vpop.f32.mrb[40].mxu0 }
 0x88b   :  { %v13052_v25 = vmul.f32 0.35355338, %v10326_v31  ;;  %v2145_v6 = vpop.f32.mrb[41].mxu0 }
 0x88c   :  { %2208 = vmax.xlane.f32.xlu0 %v2207_v14  ;;  %v10327_v10 = vpop.f32.mrb[42].mxu0  ;;  %v13056_v26 = vmul.f32 0.35355338, %v2145_v6 }
 0x88d   :  { %v13058_v41 = vmul.f32 0.35355338, %v10327_v10  ;;  %v2148_v56 = vpop.f32.mrb[43].mxu0  ;;  %v2222_v52 = vsel %vm390_vm1, %v13052_v25, -inf }
 0x88e   :  { %2223 = vmax.xlane.f32.xlu1 %v2222_v52  ;;  %v13062_v38 = vmul.f32 0.35355338, %v2148_v56  ;;  %v2216_v21 = vsel %vm390_vm1, %v13056_v26, -inf }
 0x88f   :  { %v2225_v48 = vsel %vm390_vm1, %v13058_v41, -inf }
 0x890   :  { %2226 = vmax.xlane.f32.xlu0 %v2225_v48  ;;  %v2219_v31 = vsel %vm390_vm1, %v13062_v38, -inf }
 0x892   :  { %2217 = vmax.xlane.f32.xlu1 %v2216_v21  ;;  %v10330_v30 = vpop.f32.mrb[44].mxu0 }
 0x893   :  { %v13068_v13 = vmul.f32 0.35355338, %v10330_v30  ;;  %v2161_v34 = vpop.f32.mrb[45].mxu0 }
 0x894   :  { %2220 = vmax.xlane.f32.xlu0 %v2219_v31  ;;  %v10331_v6 = vpop.f32.mrb[46].mxu0  ;;  %v13072_v14 = vmul.f32 0.35355338, %v2161_v34  ;;  %v13090_v31 = vpop.permute.xlu1 %2376 }
 0x895   :  { %v13074_v10 = vmul.f32 0.35355338, %v10331_v6  ;;  %v2164_v56 = vpop.f32.mrb[47].mxu0  ;;  %v2234_v52 = vsel %vm390_vm1, %v13068_v13, -inf }
 0x896   :  { %2235 = vmax.xlane.f32.xlu1 %v2234_v52  ;;  %v13078_v48 = vmul.f32 0.35355338, %v2164_v56  ;;  %v2228_v30 = vsel %vm390_vm1, %v13072_v14, -inf }
 0x897   :  { %v2237_v21 = vsel %vm390_vm1, %v13074_v10, -inf }
 0x898   :  { %2238 = vmax.xlane.f32.xlu0 %v2237_v21  ;;  %v2231_v34 = vsel %vm390_vm1, %v13078_v48, -inf  ;;  %v13092_v6 = vpop.permute.xlu1 %2378 }
 0x89a   :  { %2229 = vmax.xlane.f32.xlu1 %v2228_v30 }
 0x89c   :  { %2232 = vmax.xlane.f32.xlu0 %v2231_v34 }
 0x8ab   :  { %2382 = vrot.lane.b32.xlu1 %v12383_v29, %s12063_s30 }
 0x8b2   :  { %2380 = vrot.lane.b32.xlu0 %v12385_v53, %s12063_s30 }
 0x8da   :  { %v2200_v56 = vpop.xlane.xlu0 %2199 }
 0x8db   :  { %v2242_v52 = vsub.f32 %v13007_v44, %v2200_v56  ;;  %v2194_v21 = vpop.xlane.xlu1 %2193 }
 0x8dc   :  { %v2240_v30 = vsub.f32 %v13009_v61, %v2194_v21 }
 0x8dd   :  { %v2260_v42 = vmul.f32 1.442695, %v2242_v52 }
 0x8de   :  { %v2256_v60 = vmul.f32 1.442695, %v2240_v30  ;;  %v2203_v24 = vpop.xlane.xlu0 %2202 }
 0x8df   :  { %11380 = vpow2.f32 %v2260_v42  ;;  %v2243_v34 = vsub.f32 %v13011_v58, %v2203_v24 }
 0x8e0   :  { %11382 = vpow2.f32 %v2256_v60 }
 0x8e1   :  { %v2262_v0 = vmul.f32 1.442695, %v2243_v34 }
 0x8e2   :  { %v2197_v50 = vpop.xlane.xlu0 %2196 }
 0x8e3   :  { %11384 = vpow2.f32 %v2262_v0  ;;  %v2241_v28 = vsub.f32 %v13017_v63, %v2197_v50 }
 0x8e5   :  { %v2258_v2 = vmul.f32 1.442695, %v2241_v28 }
 0x8e7   :  { %11386 = vpow2.f32 %v2258_v2 }
 0x8e9   :  { %v13098_v62 = vpop.eup %11380 }
 0x8ea   :  { %16855 = vst [vmem:[#allocation7_spill] sm:$0xff] %v13098_v62  ;;  %v2294_v44 = vsel %vm390_vm1, %v13098_v62, 0.0  ;;  %v13102_v61 = vpop.eup %11382 }
 0x8eb   :  { %2295 = vadd.xlane.f32.xlu1 %v2294_v44  ;;  %v2288_v42 = vsel %vm390_vm1, %v13102_v61, 0.0 }
 0x8ed   :  { %v13104_v56 = vpop.eup %11384 }
 0x8ee   :  { %v2297_v60 = vsel %vm390_vm1, %v13104_v56, 0.0 }
 0x8ef   :  { %2289 = vadd.xlane.f32.xlu1 %v2288_v42  ;;  %2298 = vadd.xlane.f32.xlu0 %v2297_v60 }
 0x8f1   :  { %v13110_v50 = vpop.eup %11386 }
 0x8f2   :  { %v2291_v2 = vsel %vm390_vm1, %v13110_v50, 0.0 }
 0x8f3   :  { %2292 = vadd.xlane.f32.xlu0 %v2291_v2 }
 0x913   :  { %v2212_v28 = vpop.xlane.xlu1 %2211 }
 0x914   :  { %v2246_v24 = vsub.f32 %v13038_v22, %v2212_v28 }
 0x915   :  { %v2215_v0 = vpop.xlane.xlu0 %2214 }
 0x916   :  { %v2268_v58 = vmul.f32 1.442695, %v2246_v24  ;;  %v2247_v63 = vsub.f32 %v13042_v16, %v2215_v0 }
 0x917   :  { %v2206_v52 = vpop.xlane.xlu1 %2205 }
 0x918   :  { %11388 = vpow2.f32 %v2268_v58  ;;  %v2270_v21 = vmul.f32 1.442695, %v2247_v63  ;;  %v2244_v30 = vsub.f32 %v13040_v55, %v2206_v52 }
 0x919   :  { %v2209_v34 = vpop.xlane.xlu0 %2208 }
 0x91a   :  { %11390 = vpow2.f32 %v2270_v21  ;;  %v2264_v44 = vmul.f32 1.442695, %v2244_v30  ;;  %v2245_v42 = vsub.f32 %v13046_v3, %v2209_v34 }
 0x91b   :  { %v2224_v60 = vpop.xlane.xlu1 %2223 }
 0x91c   :  { %11392 = vpow2.f32 %v2264_v44  ;;  %v2266_v2 = vmul.f32 1.442695, %v2245_v42  ;;  %v2250_v62 = vsub.f32 %v13052_v25, %v2224_v60 }
 0x91d   :  { %v2227_v22 = vpop.xlane.xlu0 %2226 }
 0x91e   :  { %11394 = vpow2.f32 %v2266_v2  ;;  %v2276_v28 = vmul.f32 1.442695, %v2250_v62  ;;  %v2251_v16 = vsub.f32 %v13058_v41, %v2227_v22 }
 0x91f   :  { %v2218_v24 = vpop.xlane.xlu1 %2217 }
 0x920   :  { %11396 = vpow2.f32 %v2276_v28  ;;  %v2248_v0 = vsub.f32 %v13056_v26, %v2218_v24  ;;  %v2278_v52 = vmul.f32 1.442695, %v2251_v16 }
 0x921   :  { %v2221_v55 = vpop.xlane.xlu0 %2220 }
 0x922   :  { %v13121_v58 = vpop.eup %11388  ;;  %v2272_v63 = vmul.f32 1.442695, %v2248_v0  ;;  %v2249_v3 = vsub.f32 %v13062_v38, %v2221_v55 }
 0x923   :  { %v2236_v21 = vpop.xlane.xlu1 %2235  ;;  %v2306_v25 = vsel %vm390_vm1, %v13121_v58, 0.0 }
 0x924   :  { %v13126_v30 = vpop.eup %11390  ;;  %11398 = vpow2.f32 %v2272_v63  ;;  %v2254_v62 = vsub.f32 %v13068_v13, %v2236_v21  ;;  %2307 = vadd.xlane.f32.xlu1 %v2306_v25  ;;  %v2274_v38 = vmul.f32 1.442695, %v2249_v3 }
 0x925   :  { %v2239_v41 = vpop.xlane.xlu0 %2238  ;;  %v2309_v26 = vsel %vm390_vm1, %v13126_v30, 0.0  ;;  %11400 = vpow2.f32 %v2278_v52 }
 0x926   :  { %v13131_v34 = vpop.eup %11392  ;;  %v2284_v44 = vmul.f32 1.442695, %v2254_v62  ;;  %v2255_v42 = vsub.f32 %v13074_v10, %v2239_v41  ;;  %2310 = vadd.xlane.f32.xlu0 %v2309_v26 }
 0x927   :  { %v2230_v60 = vpop.xlane.xlu1 %2229  ;;  %v2300_v2 = vsel %vm390_vm1, %v13131_v34, 0.0 }
 0x928   :  { %v13136_v22 = vpop.eup %11394  ;;  %11402 = vpow2.f32 %v2284_v44  ;;  %v2252_v13 = vsub.f32 %v13072_v14, %v2230_v60  ;;  %2301 = vadd.xlane.f32.xlu1 %v2300_v2  ;;  %v2286_v10 = vmul.f32 1.442695, %v2255_v42  ;;  %v1867_v60 = vsel %vm1738_vm3, %v13029_v20, 0 }
 0x929   :  { %v2233_v28 = vpop.xlane.xlu0 %2232  ;;  %v2303_v16 = vsel %vm390_vm1, %v13136_v22, 0.0  ;;  %11404 = vpow2.f32 %v2274_v38 }
 0x92a   :  { %v13141_v24 = vpop.eup %11396  ;;  %v2280_v0 = vmul.f32 1.442695, %v2252_v13  ;;  %v2253_v55 = vsub.f32 %v13078_v48, %v2233_v28  ;;  %2304 = vadd.xlane.f32.xlu0 %v2303_v16 }
 0x92b   :  { %v2318_v3 = vsel %vm390_vm1, %v13141_v24, 0.0 }
 0x92c   :  { %11406 = vpow2.f32 %v2280_v0  ;;  %v2282_v63 = vmul.f32 1.442695, %v2253_v55 }
 0x92d   :  { %v10242_v52 = vpop.f32.mrb[40].mxu1  ;;  %11408 = vpow2.f32 %v2286_v10 }
 0x92e   :  { %v13146_v14 = vpop.eup %11398  ;;  %v1581_v21 = vpop.f32.mrb[41].mxu1  ;;  %2319 = vadd.xlane.f32.xlu0 %v2318_v3  ;;  %11410 = vpow2.f32 %v2282_v63 }
 0x92f   :  { %v10243_v25 = vpop.f32.mrb[42].mxu1  ;;  %v13148_v26 = vpop.eup %11400  ;;  %v2312_v44 = vsel %vm390_vm1, %v13146_v14, 0.0 }
 0x930   :  { %v1703_v62 = vpack.c.bf16 %v10243_v25, %v10242_v52  ;;  %v1584_v41 = vpop.f32.mrb[43].mxu1  ;;  %v2321_v28 = vsel %vm390_vm1, %v13148_v26, 0.0 }
 0x931   :  { %v1702_v48 = vpack.c.bf16 %v1584_v41, %v1581_v21  ;;  %v16856_v41 = vpack.c.bf16 %v12988_v27, %v12982_v40  ;;  %v16860_v40 = vpack.c.bf16 %v12790_v43, %v12784_v49  ;;  %v16862_v43 = vpack.c.bf16 %v12824_v33, %v12816_v57  ;;  %v2383_v57 = vpop.permute.xlu1 %2382 }
 0x932   :  { %v13152_v42 = vpop.eup %11402  ;;  %2313 = vadd.xlane.f32.xlu0 %v2312_v44  ;;  %v16857_v44 = vpack.c.bf16 %v12984_v51, %v12980_v1  ;;  %v2554_v1 = vld [vmem:[%s16788_s2 + $0x10] sm:$0xff]  ;;  %v16861_v51 = vpack.c.bf16 %v12786_v39, %v12782_v47  ;;  %v2381_v47 = vpop.permute.xlu0 %2380  ;;  %v16863_v39 = vpack.c.bf16 %v12818_v54, %v12814_v32  ;;  %v16864_v33 = vpack.c.bf16 %v12679_v23, %v12673_v9 }
 0x933   :  { %10266 = vmatprep.mubr.msk.bf16.mxu1 %vm534_vm2, %v1702_v48  ;;  %v2330_v38 = vsel %vm390_vm1, %v13152_v42, 0.0  ;;  %v13160_v2 = vpop.eup %11404  ;;  %v2563_v49 = vpack.c.bf16 %v2554_v1, %v2554_v1  ;;  %v16865_v32 = vpack.c.bf16 %v12675_v12, %v12671_v59  ;;  %v16866_v9 = vpack.c.bf16 %v12697_v4, %v12691_v17 }
 0x934   :  { %10267 = vmatmul.mubr.msk.bf16.vlgmr.msra.gmra.mrb[48].mxu1 %vm534_vm2, %v1703_v62  ;;  %2331 = vadd.xlane.f32.xlu1 %v2330_v38  ;;  %v2315_v21 = vsel %vm390_vm1, %v13160_v2, 0.0  ;;  %v16858_v38 = vpack.c.bf16 %v13003_v8, %v12997_v35  ;;  %v16867_v59 = vpack.c.bf16 %v12693_v15, %v12689_v37  ;;  %v16868_v8 = vld [vmem:[#allocation7_spill] sm:$0xff] }
 0x935   :  { %10283 = vmatpush3.bf16.msra.mxu1 %v1867_v60  ;;  %v10246_v13 = vpop.f32.mrb[44].mxu1  ;;  %v16859_v60 = vpack.c.bf16 %v12999_v36, %v12995_v7 }
 0x936   :  { %v13164_v16 = vpop.eup %11406  ;;  %10332 = vmatprep.subr.bf16.mxu1 %v13090_v31  ;;  %v1597_v10 = vpop.f32.mrb[45].mxu1  ;;  %2322 = vadd.xlane.f32.xlu0 %v2321_v28 }
 0x937   :  { %v10247_v0 = vpop.f32.mrb[46].mxu1  ;;  %v2324_v55 = vsel %vm390_vm1, %v13164_v16, 0.0  ;;  %v13169_v63 = vpop.eup %11408 }
 0x938   :  { %v1705_v20 = vpack.c.bf16 %v10247_v0, %v10246_v13  ;;  %v1600_v52 = vpop.f32.mrb[47].mxu1  ;;  %2325 = vadd.xlane.f32.xlu1 %v2324_v55  ;;  %v13173_v25 = vpop.eup %11410  ;;  %v2333_v62 = vsel %vm390_vm1, %v13169_v63, 0.0 }
 0x939   :  { %v1704_v3 = vpack.c.bf16 %v1600_v52, %v1597_v10  ;;  %v2327_v48 = vsel %vm390_vm1, %v13173_v25, 0.0 }
 0x93a   :  { %2316 = vadd.xlane.f32.xlu0 %v2315_v21 }
 0x93b   :  { %10270 = vmatprep.mubr.msk.bf16.mxu1 %vm534_vm2, %v1704_v3 }
 0x93c   :  { %10271 = vmatmul.mubr.msk.bf16.gmra.mrb[52].mxu1 %vm534_vm2, %v1705_v20  ;;  %2334 = vadd.xlane.f32.xlu1 %v2333_v62 }
 0x93d   :  { %10274 = vmatprep.mubr.msk.bf16.mxu1 %vm534_vm2, %v16856_v41 }
 0x93e   :  { %2328 = vadd.xlane.f32.xlu0 %v2327_v48 }
 0x944   :  { %10275 = vmatmul.mubr.msk.bf16.gmra.mrb[56].mxu1 %vm534_vm2, %v16857_v44 }
 0x945   :  { %10278 = vmatprep.mubr.msk.bf16.mxu1 %vm534_vm2, %v16858_v38 }
 0x94c   :  { %10279 = vmatmul.mubr.msk.bf16.gmra.mrb[60].mxu1 %vm534_vm2, %v16859_v60 }
 0x94d   :  { %10284 = vmatprep.mubr.msk.bf16.mxu1 %vm534_vm2, %v16860_v40  ;;  %2467 = vrot.lane.b32.xlu1 %v12387_v11, %s12063_s30 }
 0x951   :  { %2469 = vrot.lane.b32.xlu1 %v12399_v19, %s12063_s30 }
 0x954   :  { %10285 = vmatmul.mubr.msk.bf16.vlgmr.msra.gmra.mrb[48].mxu1 %vm534_vm2, %v16861_v51  ;;  %2465 = vrot.lane.b32.xlu0 %v12389_v5, %s12063_s30 }
 0x955   :  { %10333 = vmatpush3.bf16.msra.mxu1 %v13090_v31  ;;  %10288 = vmatprep.mubr.msk.bf16.mxu1 %vm534_vm2, %v16862_v43 }
 0x956   :  { %10334 = vmatprep.subr.bf16.mxu1 %v13092_v6  ;;  %2471 = vrot.lane.b32.xlu1 %v12397_v18, %s12063_s30 }
 0x958   :  { %2565 = vrot.lane.b32.xlu0 %v2563_v49, %s12070_s14 }
 0x959   :  { %10335 = vmatpush3.bf16.msra.mxu1 %v13092_v6 }
 0x95a   :  { %10336 = vmatprep.subr.bf16.mxu1 %v2381_v47  ;;  %2715 = vrot.lane.b32.xlu1 %v12379_v45, %s12071_s17 }
 0x95c   :  { %10289 = vmatmul.mubr.msk.bf16.gmra.mrb[52].mxu1 %vm534_vm2, %v16863_v39  ;;  %2719 = vrot.lane.b32.xlu0 %v12385_v53, %s12071_s17 }
 0x95d   :  { %10337 = vmatpush3.bf16.msra.mxu1 %v2381_v47  ;;  %10292 = vmatprep.mubr.msk.bf16.mxu1 %vm534_vm2, %v16864_v33 }
 0x95e   :  { %10338 = vmatprep.subr.bf16.mxu1 %v2383_v57  ;;  %2717 = vrot.lane.b32.xlu1 %v12377_v46, %s12071_s17 }
 0x960   :  { %2721 = vrot.lane.b32.xlu0 %v12383_v29, %s12071_s17 }
 0x961   :  { %10339 = vmatpush3.bf16.msra.mxu1 %v2383_v57 }
 0x962   :  { %2820 = vrot.lane.b32.xlu1 %v12389_v5, %s12071_s17 }
 0x964   :  { %10293 = vmatmul.mubr.msk.bf16.gmra.mrb[56].mxu1 %vm534_vm2, %v16865_v32  ;;  %2707 = vrot.lane.b32.xlu0 %v12379_v45, %s12072_s18 }
 0x965   :  { %10296 = vmatprep.mubr.msk.bf16.mxu1 %vm534_vm2, %v16866_v9 }
 0x966   :  { %2822 = vrot.lane.b32.xlu1 %v12387_v11, %s12071_s17 }
 0x968   :  { %2824 = vrot.lane.b32.xlu0 %v12399_v19, %s12071_s17 }
 0x96a   :  { %2709 = vrot.lane.b32.xlu1 %v12377_v46, %s12072_s18 }
 0x96c   :  { %10297 = vmatmul.mubr.msk.bf16.gmra.mrb[60].mxu1 %vm534_vm2, %v16867_v59  ;;  %2713 = vrot.lane.b32.xlu0 %v12383_v29, %s12072_s18 }
 0x96e   :  { %2711 = vrot.lane.b32.xlu1 %v12385_v53, %s12072_s18 }
 0x970   :  { %2812 = vrot.lane.b32.xlu0 %v12389_v5, %s12072_s18 }
 0x972   :  { %2826 = vrot.lane.b32.xlu1 %v12397_v18, %s12071_s17 }
 0x974   :  { %2816 = vrot.lane.b32.xlu0 %v12399_v19, %s12072_s18 }
 0x976   :  { %2814 = vrot.lane.b32.xlu1 %v12387_v11, %s12072_s18 }
 0x978   :  { %v2296_v12 = vpop.xlane.xlu1 %2295 }
 0x97a   :  { %2818 = vrot.lane.b32.xlu1 %v12397_v18, %s12072_s18 }
 0x97c   :  { %v2290_v23 = vpop.xlane.xlu1 %2289  ;;  %v2299_v37 = vpop.xlane.xlu0 %2298 }
 0x97d   :  { %11412 = vrcp.f32 %v2299_v37 }
 0x97e   :  { %11414 = vrcp.f32 %v2290_v23 }
 0x97f   :  { %11416 = vrcp.f32 %v2296_v12 }
 0x980   :  { %v2293_v17 = vpop.xlane.xlu0 %2292 }
 0x981   :  { %11418 = vrcp.f32 %v2293_v17 }
 0x987   :  { %v11413_v15 = vpop.eup %11412 }
 0x988   :  { %v11415_v4 = vpop.eup %11414  ;;  %v2343_v7 = vmul.f32 %v11413_v15, %v13104_v56 }
 0x989   :  { %v11417_v54 = vpop.eup %11416  ;;  %v2337_v35 = vmul.f32 %v11415_v4, %v13102_v61 }
 0x98a   :  { %v2341_v31 = vmul.f32 %v11417_v54, %v16868_v8 }
 0x98b   :  { %v11419_v27 = vpop.eup %11418 }
 0x98c   :  { %v2339_v36 = vmul.f32 %v11419_v27, %v13110_v50  ;;  %v2369_v13 = vpack.c.bf16 %v2343_v7, %v2341_v31 }
 0x98e   :  { %v2368_v6 = vpack.c.bf16 %v2339_v36, %v2337_v35 }
 0x990   :  { %10340 = vmatprep.mubr.msk.bf16.mxu1 %vm390_vm1, %v2368_v6 }
 0x991   :  { %10341 = vmatmul.mubr.msk.bf16.vlgmr.msra.gmra.mrb[64].mxu1 %vm390_vm1, %v2369_v13 }
 0x9b1   :  { %v2308_v28 = vpop.xlane.xlu1 %2307 }
 0x9b3   :  { %v2311_v10 = vpop.xlane.xlu0 %2310 }
 0x9b4   :  { %11420 = vrcp.f32 %v2311_v10 }
 0x9b5   :  { %v2302_v0 = vpop.xlane.xlu1 %2301 }
 0x9b6   :  { %11422 = vrcp.f32 %v2302_v0 }
 0x9b7   :  { %11424 = vrcp.f32 %v2308_v28  ;;  %v2305_v55 = vpop.xlane.xlu0 %2304 }
 0x9b8   :  { %11426 = vrcp.f32 %v2305_v55 }
 0x9bb   :  { %v2320_v56 = vpop.xlane.xlu0 %2319 }
 0x9be   :  { %v11421_v61 = vpop.eup %11420 }
 0x9bf   :  { %v2314_v20 = vpop.xlane.xlu0 %2313  ;;  %v2351_v62 = vmul.f32 %v11421_v61, %v13126_v30 }
 0x9c0   :  { %v11423_v50 = vpop.eup %11422  ;;  %11428 = vrcp.f32 %v2314_v20 }
 0x9c1   :  { %v11425_v52 = vpop.eup %11424  ;;  %v2332_v3 = vpop.xlane.xlu1 %2331  ;;  %v2345_v48 = vmul.f32 %v11423_v50, %v13131_v34 }
 0x9c2   :  { %v11427_v21 = vpop.eup %11426  ;;  %v2349_v38 = vmul.f32 %v11425_v52, %v13121_v58 }
 0x9c3   :  { %v2323_v41 = vpop.xlane.xlu0 %2322  ;;  %v2347_v44 = vmul.f32 %v11427_v21, %v13136_v22 }
 0x9c4   :  { %v2371_v1 = vpack.c.bf16 %v2351_v62, %v2349_v38 }
 0x9c5   :  { %v2326_v60 = vpop.xlane.xlu1 %2325  ;;  %v2370_v40 = vpack.c.bf16 %v2347_v44, %v2345_v48 }
 0x9c7   :  { %10344 = vmatprep.mubr.msk.bf16.mxu1 %vm390_vm1, %v2370_v40  ;;  %v2317_v51 = vpop.xlane.xlu0 %2316 }
 0x9c8   :  { %11430 = vrcp.f32 %v2317_v51  ;;  %10345 = vmatmul.mubr.msk.bf16.gmra.mrb[68].mxu1 %vm390_vm1, %v2371_v1 }
 0x9c9   :  { %v2335_v49 = vpop.xlane.xlu1 %2334  ;;  %11432 = vrcp.f32 %v2323_v41 }
 0x9ca   :  { %v11429_v22 = vpop.eup %11428 }
 0x9cb   :  { %v2329_v43 = vpop.xlane.xlu0 %2328  ;;  %v2353_v57 = vmul.f32 %v11429_v22, %v13146_v14 }
 0x9cc   :  { %11434 = vrcp.f32 %v2329_v43 }
 0x9cd   :  { %v2468_v30 = vpop.permute.xlu1 %2467  ;;  %11436 = vrcp.f32 %v2320_v56 }
 0x9ce   :  { %11438 = vrcp.f32 %v2326_v60 }
 0x9cf   :  { %v2466_v34 = vpop.permute.xlu0 %2465  ;;  %11440 = vrcp.f32 %v2335_v49 }
 0x9d0   :  { %10348 = vmatprep.subr.bf16.mxu0 %v2466_v34  ;;  %11442 = vrcp.f32 %v2332_v3 }
 0x9d1   :  { %v2470_v58 = vpop.permute.xlu1 %2469  ;;  %10349 = vmatpush3.bf16.msra.mxu0 %v2466_v34 }
 0x9d2   :  { %v11431_v47 = vpop.eup %11430  ;;  %10350 = vmatprep.subr.bf16.mxu0 %v2468_v30 }
 0x9d3   :  { %v2566_v39 = vpop.permute.xlu0 %2565  ;;  %v2355_v33 = vmul.f32 %v11431_v47, %v13160_v2  ;;  %v11433_v12 = vpop.eup %11432 }
 0x9d4   :  { %11154 = vmatprep.subr.msk.bf16.mxu1 %vm1738_vm3, %v2566_v39  ;;  %v2592_v32 = vsel %vm1738_vm3, %v2566_v39, 0  ;;  %v2359_v2 = vmul.f32 %v11433_v12, %v13148_v26 }
 0x9d5   :  { %v2472_v9 = vpop.permute.xlu1 %2471  ;;  %10351 = vmatpush3.bf16.msra.mxu0 %v2468_v30  ;;  %v2372_v59 = vpack.c.bf16 %v2355_v33, %v2353_v57  ;;  %10365 = vmatpush3.bf16.msra.mxu1 %v2592_v32 }
 0x9d6   :  { %10352 = vmatprep.subr.bf16.mxu0 %v2470_v58  ;;  %v11435_v23 = vpop.eup %11434 }
 0x9d7   :  { %10356 = vmatprep.mubr.msk.bf16.mxu0 %vm390_vm1, %v2372_v59  ;;  %v11437_v37 = vpop.eup %11436  ;;  %v2363_v15 = vmul.f32 %v11435_v23, %v13173_v25  ;;  %v2720_v54 = vpop.permute.xlu0 %2719 }
 0x9d8   :  { %v11439_v14 = vpop.eup %11438  ;;  %v2357_v4 = vmul.f32 %v11437_v37, %v13141_v24 }
 0x9d9   :  { %v2716_v17 = vpop.permute.xlu1 %2715  ;;  %10353 = vmatpush3.bf16.msra.mxu0 %v2470_v58  ;;  %v2361_v7 = vmul.f32 %v11439_v14, %v13164_v16  ;;  %v11441_v36 = vpop.eup %11440 }
 0x9da   :  { %10354 = vmatprep.subr.bf16.mxu0 %v2472_v9  ;;  %v2373_v35 = vpack.c.bf16 %v2359_v2, %v2357_v4  ;;  %v11443_v31 = vpop.eup %11442  ;;  %v2367_v24 = vmul.f32 %v11441_v36, %v13169_v63  ;;  %v2736_v16 = vsel %vm534_vm2, %v2716_v17, 0  ;;  %v2742_v63 = vsel %vm534_vm2, %v2720_v54, 0 }
 0x9db   :  { %v2374_v8 = vpack.c.bf16 %v2363_v15, %v2361_v7  ;;  %v2722_v26 = vpop.permute.xlu0 %2721  ;;  %v2365_v25 = vmul.f32 %v11443_v31, %v13152_v42 }
 0x9dc   :  { %v2745_v0 = vsel %vm534_vm2, %v2722_v26, 0 }
 0x9dd   :  { %v2718_v27 = vpop.permute.xlu1 %2717  ;;  %10355 = vmatpush3.bf16.msra.mxu0 %v2472_v9  ;;  %v2375_v13 = vpack.c.bf16 %v2367_v24, %v2365_v25 }
 0x9de   :  { %11155 = vmatprep.subr.msk.bf16.mxu0 %vm534_vm2, %v2716_v17  ;;  %v2739_v10 = vsel %vm534_vm2, %v2718_v27, 0 }
 0x9df   :  { %v2708_v28 = vpop.permute.xlu0 %2707 }
 0x9e0   :  { %10357 = vmatmul.mubr.msk.bf16.vlgmr.msra.gmra.mrb[48].mxu0 %vm390_vm1, %v2373_v35 }
 0x9e1   :  { %v2821_v6 = vpop.permute.xlu1 %2820  ;;  %10360 = vmatprep.mubr.msk.bf16.mxu0 %vm390_vm1, %v2374_v8 }
 0x9e2   :  { %11159 = vmatprep.subr.msk.bf16.mxu1 %vm534_vm2, %v2821_v6  ;;  %v2841_v48 = vsel %vm534_vm2, %v2821_v6, 0 }
 0x9e3   :  { %v2825_v61 = vpop.permute.xlu0 %2824 }
 0x9e4   :  { %v2847_v38 = vsel %vm534_vm2, %v2825_v61, 0 }
 0x9e5   :  { %v2823_v42 = vpop.permute.xlu1 %2822 }
 0x9e6   :  { %10383 = vmatpush3.bf16.xpose.msra.mxu0 %v2736_v16  ;;  %v2844_v44 = vsel %vm534_vm2, %v2823_v42, 0 }
 0x9e7   :  { %11156 = vmatprep.subr.msk.bf16.mxu0 %vm534_vm2, %v2718_v27  ;;  %v2714_v20 = vpop.permute.xlu0 %2713 }
 0x9e8   :  { %10361 = vmatmul.mubr.msk.bf16.gmra.mrb[52].mxu0 %vm390_vm1, %v2375_v13 }
 0x9e9   :  { %10390 = vmatprep.mubr.msk.bf16.mxu0 %vm534_vm2, %v2708_v28  ;;  %v2710_v55 = vpop.permute.xlu1 %2709 }
 0x9eb   :  { %v2813_v17 = vpop.permute.xlu0 %2812 }
 0x9ed   :  { %v2712_v56 = vpop.permute.xlu1 %2711 }
 0x9ee   :  { %10385 = vmatpush3.bf16.xpose.msra.mxu0 %v2739_v10 }
 0x9ef   :  { %11157 = vmatprep.subr.msk.bf16.mxu0 %vm534_vm2, %v2720_v54  ;;  %v2817_v2 = vpop.permute.xlu0 %2816 }
 0x9f1   :  { %v2827_v60 = vpop.permute.xlu1 %2826 }
 0x9f2   :  { %v2850_v40 = vsel %vm534_vm2, %v2827_v60, 0 }
 0x9f5   :  { %v2815_v14 = vpop.permute.xlu1 %2814 }
 0x9f6   :  { %10387 = vmatpush3.bf16.xpose.msra.mxu0 %v2742_v63 }
 0x9f7   :  { %11158 = vmatprep.subr.msk.bf16.mxu0 %vm534_vm2, %v2722_v26 }
 0x9f9   :  { %v2819_v15 = vpop.permute.xlu1 %2818 }
 0x9fe   :  { %10389 = vmatpush3.bf16.xpose.msra.mxu0 %v2745_v0 }
 0xa05   :  { %10391 = vmatmul.mubr.msk.bf16.vlgmr.msra.gmra.mrb[56].mxu0 %vm534_vm2, %v2710_v55 }
 0xa06   :  { %10394 = vmatprep.mubr.msk.bf16.mxu0 %vm534_vm2, %v2712_v56 }
 0xa0d   :  { %10395 = vmatmul.mubr.msk.bf16.gmra.mrb[60].mxu0 %vm534_vm2, %v2714_v20 }
 0xa64   :  { %v10342_v50 = vpop.f32.mrb[64].mxu1 }
 0xa65   :  { %v2434_v52 = vpop.f32.mrb[65].mxu1 }
 0xa66   :  { %v10343_v3 = vpop.f32.mrb[66].mxu1 }
 0xa67   :  { %v2556_v21 = vpack.c.bf16 %v10343_v3, %v10342_v50  ;;  %v2437_v62 = vpop.f32.mrb[67].mxu1 }
 0xa68   :  { %v2555_v41 = vpack.c.bf16 %v2437_v62, %v2434_v52 }
 0xa6a   :  { %10366 = vmatprep.mubr.msk.bf16.mxu1 %vm534_vm2, %v2555_v41 }
 0xa6b   :  { %10367 = vmatmul.mubr.msk.bf16.vlgmr.msra.gmra.mrb[48].mxu1 %vm534_vm2, %v2556_v21 }
 0xa6c   :  { %10399 = vmatpush3.bf16.xpose.msra.mxu1 %v2841_v48 }
 0xa6d   :  { %11160 = vmatprep.subr.msk.bf16.mxu1 %vm534_vm2, %v2823_v42 }
 0xa74   :  { %10401 = vmatpush3.bf16.xpose.msra.mxu1 %v2844_v44 }
 0xa75   :  { %11161 = vmatprep.subr.msk.bf16.mxu1 %vm534_vm2, %v2825_v61 }
 0xa7c   :  { %10403 = vmatpush3.bf16.xpose.msra.mxu1 %v2847_v38 }
 0xa7d   :  { %11162 = vmatprep.subr.msk.bf16.mxu1 %vm534_vm2, %v2827_v60 }
 0xa84   :  { %10405 = vmatpush3.bf16.xpose.msra.mxu1 %v2850_v40 }
 0xa9b   :  { %v10346_v1 = vpop.f32.mrb[68].mxu1 }
 0xa9c   :  { %v2450_v51 = vpop.f32.mrb[69].mxu1 }
 0xa9d   :  { %v10347_v49 = vpop.f32.mrb[70].mxu1 }
 0xa9e   :  { %v2558_v43 = vpack.c.bf16 %v10347_v49, %v10346_v1  ;;  %v2453_v30 = vpop.f32.mrb[71].mxu1 }
 0xa9f   :  { %v2557_v34 = vpack.c.bf16 %v2453_v30, %v2450_v51 }
 0xaa1   :  { %10370 = vmatprep.mubr.msk.bf16.mxu1 %vm534_vm2, %v2557_v34 }
 0xaa2   :  { %10371 = vmatmul.mubr.msk.bf16.gmra.mrb[52].mxu1 %vm534_vm2, %v2558_v43 }
 0xab3   :  { %v10358_v22 = vpop.f32.mrb[48].mxu0 }
 0xab4   :  { %v2523_v58 = vpop.f32.mrb[49].mxu0 }
 0xab5   :  { %v10359_v47 = vpop.f32.mrb[50].mxu0 }
 0xab6   :  { %v2560_v39 = vpack.c.bf16 %v10359_v47, %v10358_v22  ;;  %v2526_v57 = vpop.f32.mrb[51].mxu0 }
 0xab7   :  { %v2559_v33 = vpack.c.bf16 %v2526_v57, %v2523_v58 }
 0xab9   :  { %10374 = vmatprep.mubr.msk.bf16.mxu1 %vm534_vm2, %v2559_v33 }
 0xaba   :  { %10375 = vmatmul.mubr.msk.bf16.gmra.mrb[56].mxu1 %vm534_vm2, %v2560_v39 }
 0xabb   :  { %v10362_v32 = vpop.f32.mrb[52].mxu0 }
 0xabc   :  { %v2539_v9 = vpop.f32.mrb[53].mxu0 }
 0xabd   :  { %v10363_v59 = vpop.f32.mrb[54].mxu0 }
 0xabe   :  { %v2562_v12 = vpack.c.bf16 %v10363_v59, %v10362_v32  ;;  %v2542_v23 = vpop.f32.mrb[55].mxu0 }
 0xabf   :  { %v2561_v37 = vpack.c.bf16 %v2542_v23, %v2539_v9 }
 0xac1   :  { %10378 = vmatprep.mubr.msk.bf16.mxu1 %vm534_vm2, %v2561_v37 }
 0xac2   :  { %10379 = vmatmul.mubr.msk.bf16.gmra.mrb[60].mxu1 %vm534_vm2, %v2562_v12 }
 0xac3   :  { %10406 = vmatprep.mubr.msk.bf16.mxu1 %vm534_vm2, %v2813_v17 }
 0xaca   :  { %10407 = vmatmul.mubr.msk.bf16.vlgmr.msra.gmra.mrb[72].mxu1 %vm534_vm2, %v2815_v14 }
 0xacb   :  { %10410 = vmatprep.mubr.msk.bf16.mxu1 %vm534_vm2, %v2817_v2 }
 0xad2   :  { %10411 = vmatmul.mubr.msk.bf16.gmra.mrb[76].mxu1 %vm534_vm2, %v2819_v15 }
 0xad8   :  { %v10392_v4 = vpop.f32.mrb[56].mxu0 }
 0xad9   :  { %v2919_v54 = vmul.f32 0.35355338, %v10392_v4  ;;  %v2781_v27 = vpop.f32.mrb[57].mxu0 }
 0xada   :  { %v10393_v7 = vpop.f32.mrb[58].mxu0  ;;  %v2917_v35 = vmul.f32 0.35355338, %v2781_v27 }
 0xadb   :  { %v2784_v36 = vpop.f32.mrb[59].mxu0  ;;  %v2939_v8 = vsel %vm390_vm1, %v2919_v54, -inf  ;;  %v2920_v26 = vmul.f32 0.35355338, %v10393_v7 }
 0xadc   :  { %v2918_v31 = vmul.f32 0.35355338, %v2784_v36  ;;  %2940 = vmax.xlane.f32.xlu0 %v2939_v8  ;;  %v2933_v24 = vsel %vm390_vm1, %v2917_v35, -inf }
 0xadd   :  { %v2942_v42 = vsel %vm390_vm1, %v2920_v26, -inf }
 0xade   :  { %v2936_v6 = vsel %vm390_vm1, %v2918_v31, -inf }
 0xadf   :  { %2937 = vmax.xlane.f32.xlu1 %v2936_v6 }
 0xae0   :  { %2934 = vmax.xlane.f32.xlu0 %v2933_v24  ;;  %v10396_v25 = vpop.f32.mrb[60].mxu0 }
 0xae1   :  { %v2797_v16 = vpop.f32.mrb[61].mxu0  ;;  %v13337_v28 = vmul.f32 0.35355338, %v10396_v25 }
 0xae2   :  { %v10397_v13 = vpop.f32.mrb[62].mxu0  ;;  %v2921_v56 = vmul.f32 0.35355338, %v2797_v16 }
 0xae3   :  { %v2924_v10 = vmul.f32 0.35355338, %v10397_v13  ;;  %v2800_v63 = vpop.f32.mrb[63].mxu0  ;;  %v2951_v61 = vsel %vm390_vm1, %v13337_v28, -inf }
 0xae4   :  { %2943 = vmax.xlane.f32.xlu0 %v2942_v42  ;;  %v2922_v0 = vmul.f32 0.35355338, %v2800_v63  ;;  %v2945_v50 = vsel %vm390_vm1, %v2921_v56, -inf }
 0xae5   :  { %v2954_v55 = vsel %vm390_vm1, %v2924_v10, -inf }
 0xae6   :  { %2955 = vmax.xlane.f32.xlu1 %v2954_v55  ;;  %v2948_v20 = vsel %vm390_vm1, %v2922_v0, -inf }
 0xae8   :  { %2952 = vmax.xlane.f32.xlu0 %v2951_v61 }
 0xaea   :  { %2949 = vmax.xlane.f32.xlu1 %v2948_v20 }
 0xaec   :  { %2946 = vmax.xlane.f32.xlu0 %v2945_v50 }
 0xb69   :  { %v2941_v52 = vpop.xlane.xlu0 %2940 }
 0xb6a   :  { %v2983_v3 = vsub.f32 %v2919_v54, %v2941_v52 }
 0xb6c   :  { %v3001_v21 = vmul.f32 1.442695, %v2983_v3  ;;  %v2938_v62 = vpop.xlane.xlu1 %2937 }
 0xb6d   :  { %v2935_v41 = vpop.xlane.xlu0 %2934  ;;  %v2982_v44 = vsub.f32 %v2918_v31, %v2938_v62 }
 0xb6e   :  { %11444 = vpow2.f32 %v3001_v21  ;;  %v2981_v48 = vsub.f32 %v2917_v35, %v2935_v41 }
 0xb6f   :  { %v2999_v51 = vmul.f32 1.442695, %v2982_v44 }
 0xb70   :  { %v2997_v38 = vmul.f32 1.442695, %v2981_v48 }
 0xb71   :  { %v2944_v60 = vpop.xlane.xlu0 %2943 }
 0xb72   :  { %11446 = vpow2.f32 %v2997_v38  ;;  %v2984_v40 = vsub.f32 %v2920_v26, %v2944_v60 }
 0xb73   :  { %v2956_v1 = vpop.xlane.xlu1 %2955 }
 0xb74   :  { %v3003_v49 = vmul.f32 1.442695, %v2984_v40  ;;  %v2988_v4 = vsub.f32 %v2924_v10, %v2956_v1 }
 0xb75   :  { %v2953_v43 = vpop.xlane.xlu0 %2952 }
 0xb76   :  { %11448 = vpow2.f32 %v3003_v49  ;;  %v3011_v54 = vmul.f32 1.442695, %v2988_v4  ;;  %v2987_v27 = vsub.f32 %v13337_v28, %v2953_v43 }
 0xb77   :  { %v2950_v30 = vpop.xlane.xlu1 %2949  ;;  %11450 = vpow2.f32 %v2999_v51 }
 0xb78   :  { %v13345_v34 = vpop.eup %11444  ;;  %v2986_v22 = vsub.f32 %v2922_v0, %v2950_v30  ;;  %v3009_v8 = vmul.f32 1.442695, %v2987_v27 }
 0xb79   :  { %v2947_v58 = vpop.xlane.xlu0 %2946  ;;  %v3035_v47 = vsel %vm390_vm1, %v13345_v34, 0.0 }
 0xb7a   :  { %v3007_v39 = vmul.f32 1.442695, %v2986_v22  ;;  %v2985_v57 = vsub.f32 %v2921_v56, %v2947_v58  ;;  %3036 = vadd.xlane.f32.xlu0 %v3035_v47 }
 0xb7c   :  { %v13349_v33 = vpop.eup %11446  ;;  %11452 = vpow2.f32 %v3007_v39  ;;  %v3005_v32 = vmul.f32 1.442695, %v2985_v57 }
 0xb7d   :  { %v3029_v9 = vsel %vm390_vm1, %v13349_v33, 0.0 }
 0xb7e   :  { %11454 = vpow2.f32 %v3005_v32  ;;  %3030 = vadd.xlane.f32.xlu0 %v3029_v9 }
 0xb7f   :  { %11456 = vpow2.f32 %v3011_v54 }
 0xb80   :  { %v13353_v59 = vpop.eup %11448  ;;  %11458 = vpow2.f32 %v3009_v8 }
 0xb81   :  { %v3038_v12 = vsel %vm390_vm1, %v13353_v59, 0.0  ;;  %v13357_v23 = vpop.eup %11450 }
 0xb82   :  { %3039 = vadd.xlane.f32.xlu1 %v3038_v12  ;;  %v3032_v37 = vsel %vm390_vm1, %v13357_v23, 0.0 }
 0xb86   :  { %v13361_v17 = vpop.eup %11452  ;;  %3033 = vadd.xlane.f32.xlu1 %v3032_v37 }
 0xb87   :  { %v3044_v2 = vsel %vm390_vm1, %v13361_v17, 0.0 }
 0xb88   :  { %v13363_v14 = vpop.eup %11454 }
 0xb89   :  { %v3041_v15 = vsel %vm390_vm1, %v13363_v14, 0.0  ;;  %v13386_v55 = vpop.eup %11456 }
 0xb8a   :  { %3045 = vadd.xlane.f32.xlu1 %v3044_v2  ;;  %3042 = vadd.xlane.f32.xlu0 %v3041_v15  ;;  %v3050_v52 = vsel %vm390_vm1, %v13386_v55, 0.0  ;;  %v13392_v21 = vpop.eup %11458 }
 0xb8b   :  { %v3047_v62 = vsel %vm390_vm1, %v13392_v21, 0.0 }
 0xb9d   :  { %v10408_v7 = vpop.f32.mrb[72].mxu1 }
 0xb9e   :  { %v13370_v35 = vmul.f32 0.35355338, %v10408_v7  ;;  %v2886_v36 = vpop.f32.mrb[73].mxu1 }
 0xb9f   :  { %v10409_v31 = vpop.f32.mrb[74].mxu1  ;;  %v13372_v6 = vmul.f32 0.35355338, %v2886_v36 }
 0xba0   :  { %v13374_v26 = vmul.f32 0.35355338, %v10409_v31  ;;  %v2889_v24 = vpop.f32.mrb[75].mxu1  ;;  %v2963_v25 = vsel %vm390_vm1, %v13370_v35, -inf }
 0xba1   :  { %2964 = vmax.xlane.f32.xlu0 %v2963_v25  ;;  %v13378_v16 = vmul.f32 0.35355338, %v2889_v24  ;;  %v2957_v28 = vsel %vm390_vm1, %v13372_v6, -inf }
 0xba2   :  { %v2966_v13 = vsel %vm390_vm1, %v13374_v26, -inf }
 0xba3   :  { %2967 = vmax.xlane.f32.xlu1 %v2966_v13  ;;  %v2960_v0 = vsel %vm390_vm1, %v13378_v16, -inf }
 0xba5   :  { %v10412_v10 = vpop.f32.mrb[76].mxu1  ;;  %2958 = vmax.xlane.f32.xlu0 %v2957_v28 }
 0xba6   :  { %v2931_v63 = vmul.f32 0.35355338, %v10412_v10  ;;  %v2902_v42 = vpop.f32.mrb[77].mxu1 }
 0xba7   :  { %v10413_v56 = vpop.f32.mrb[78].mxu1  ;;  %2961 = vmax.xlane.f32.xlu1 %v2960_v0  ;;  %v2929_v61 = vmul.f32 0.35355338, %v2902_v42 }
 0xba8   :  { %v2905_v20 = vpop.f32.mrb[79].mxu1  ;;  %v2975_v50 = vsel %vm390_vm1, %v2931_v63, -inf  ;;  %v13404_v41 = vmul.f32 0.35355338, %v10413_v56 }
 0xba9   :  { %2976 = vmax.xlane.f32.xlu0 %v2975_v50  ;;  %v2969_v3 = vsel %vm390_vm1, %v2929_v61, -inf  ;;  %v13406_v48 = vmul.f32 0.35355338, %v2905_v20 }
 0xbaa   :  { %v2978_v44 = vsel %vm390_vm1, %v13404_v41, -inf }
 0xbab   :  { %3051 = vadd.xlane.f32.xlu1 %v3050_v52 }
 0xbad   :  { %2970 = vmax.xlane.f32.xlu0 %v2969_v3 }
 0xbb1   :  { %3048 = vadd.xlane.f32.xlu0 %v3047_v62 }
 0xbbc   :  { %3119 = vrot.lane.b32.xlu1 %v12377_v46, %s12073_s19  ;;  %v2972_v46 = vsel %vm390_vm1, %v13406_v48, -inf }
 0xbc7   :  { %3117 = vrot.lane.b32.xlu0 %v12379_v45, %s12073_s19 }
 0xbcb   :  { %3121 = vrot.lane.b32.xlu0 %v12385_v53, %s12073_s19 }
 0xbcf   :  { %3123 = vrot.lane.b32.xlu0 %v12383_v29, %s12073_s19 }
 0xbe0   :  { %2979 = vmax.xlane.f32.xlu1 %v2978_v44 }
 0xbe4   :  { %2973 = vmax.xlane.f32.xlu1 %v2972_v46 }
 0xbf5   :  { %3206 = vrot.lane.b32.xlu1 %v12389_v5, %s12073_s19 }
 0xbf9   :  { %3208 = vrot.lane.b32.xlu1 %v12387_v11, %s12073_s19 }
 0xc07   :  { %v3037_v45 = vpop.xlane.xlu0 %3036 }
 0xc0b   :  { %v3031_v29 = vpop.xlane.xlu0 %3030 }
 0xc0c   :  { %11460 = vrcp.f32 %v3031_v29 }
 0xc0f   :  { %v3040_v53 = vpop.xlane.xlu1 %3039 }
 0xc13   :  { %v3034_v38 = vpop.xlane.xlu1 %3033 }
 0xc14   :  { %11462 = vrcp.f32 %v3034_v38 }
 0xc16   :  { %v11461_v60 = vpop.eup %11460 }
 0xc17   :  { %v3078_v1 = vmul.f32 %v11461_v60, %v13349_v33  ;;  %v3043_v43 = vpop.xlane.xlu0 %3042  ;;  %v3046_v5 = vpop.xlane.xlu1 %3045 }
 0xc1e   :  { %v11463_v40 = vpop.eup %11462 }
 0xc1f   :  { %v3080_v51 = vmul.f32 %v11463_v40, %v13357_v23 }
 0xc21   :  { %v3109_v49 = vpack.c.bf16 %v3080_v51, %v3078_v1 }
 0xc23   :  { %10422 = vmatprep.mubr.msk.bf16.mxu0 %vm390_vm1, %v3109_v49 }
 0xc2e   :  { %v2965_v30 = vpop.xlane.xlu0 %2964 }
 0xc2f   :  { %v2991_v11 = vsub.f32 %v13370_v35, %v2965_v30 }
 0xc30   :  { %v2968_v22 = vpop.xlane.xlu1 %2967 }
 0xc31   :  { %v3017_v58 = vmul.f32 1.442695, %v2991_v11  ;;  %v2992_v47 = vsub.f32 %v13374_v26, %v2968_v22 }
 0xc32   :  { %v2959_v39 = vpop.xlane.xlu0 %2958 }
 0xc33   :  { %11464 = vpow2.f32 %v3017_v58  ;;  %v2989_v57 = vsub.f32 %v13372_v6, %v2959_v39  ;;  %v3019_v33 = vmul.f32 1.442695, %v2992_v47  ;;  %v13471_v58 = vld [vmem:[%s16787_s1 + $0x2] ss:$0 sm:$0xff] }
 0xc34   :  { %v2962_v32 = vpop.xlane.xlu1 %2961 }
 0xc35   :  { %v3013_v9 = vmul.f32 1.442695, %v2989_v57  ;;  %v2990_v12 = vsub.f32 %v13378_v16, %v2962_v32 }
 0xc36   :  { %v2977_v23 = vpop.xlane.xlu0 %2976 }
 0xc37   :  { %11466 = vpow2.f32 %v3013_v9  ;;  %v2995_v37 = vsub.f32 %v2931_v63, %v2977_v23  ;;  %v3015_v2 = vmul.f32 1.442695, %v2990_v12 }
 0xc38   :  { %11468 = vpow2.f32 %v3019_v33  ;;  %v3052_v35 = vpop.xlane.xlu1 %3051 }
 0xc39   :  { %v3025_v15 = vmul.f32 1.442695, %v2995_v37 }
 0xc3a   :  { %v2971_v4 = vpop.xlane.xlu0 %2970 }
 0xc3b   :  { %11470 = vpow2.f32 %v3025_v15  ;;  %v2993_v54 = vsub.f32 %v2929_v61, %v2971_v4 }
 0xc3c   :  { %11472 = vpow2.f32 %v3015_v2  ;;  %v3120_v25 = vpop.permute.xlu1 %3119 }
 0xc3d   :  { %v13423_v27 = vpop.eup %11464  ;;  %v3021_v7 = vmul.f32 1.442695, %v2993_v54  ;;  %11474 = vrcp.f32 %v3040_v53 }
 0xc3e   :  { %v3049_v36 = vpop.xlane.xlu0 %3048  ;;  %v3059_v8 = vsel %vm390_vm1, %v13423_v27, 0.0 }
 0xc3f   :  { %11476 = vpow2.f32 %v3021_v7  ;;  %3060 = vadd.xlane.f32.xlu1 %v3059_v8 }
 0xc40   :  { %11478 = vrcp.f32 %v3046_v5 }
 0xc41   :  { %v13427_v31 = vpop.eup %11466  ;;  %11480 = vrcp.f32 %v3043_v43 }
 0xc42   :  { %11482 = vrcp.f32 %v3037_v45  ;;  %v3118_v6 = vpop.permute.xlu0 %3117  ;;  %v3053_v26 = vsel %vm390_vm1, %v13427_v31, 0.0  ;;  %v13431_v24 = vpop.eup %11468 }
 0xc43   :  { %3054 = vadd.xlane.f32.xlu1 %v3053_v26  ;;  %10414 = vmatprep.subr.bf16.mxu0 %v3118_v6  ;;  %v3062_v28 = vsel %vm390_vm1, %v13431_v24, 0.0  ;;  %11484 = vrcp.f32 %v3049_v36 }
 0xc44   :  { %10415 = vmatpush3.bf16.msra.mxu0 %v3118_v6  ;;  %11486 = vrcp.f32 %v3052_v35 }
 0xc45   :  { %v13433_v16 = vpop.eup %11470  ;;  %10416 = vmatprep.subr.bf16.mxu0 %v3120_v25 }
 0xc46   :  { %v3122_v13 = vpop.permute.xlu0 %3121  ;;  %v3071_v10 = vsel %vm390_vm1, %v13433_v16, 0.0  ;;  %v13439_v63 = vpop.eup %11472 }
 0xc47   :  { %3063 = vadd.xlane.f32.xlu1 %v3062_v28  ;;  %3072 = vadd.xlane.f32.xlu0 %v3071_v10  ;;  %v11475_v42 = vpop.eup %11474  ;;  %v3056_v61 = vsel %vm390_vm1, %v13439_v63, 0.0 }
 0xc48   :  { %10417 = vmatpush3.bf16.msra.mxu0 %v3120_v25  ;;  %v3084_v62 = vmul.f32 %v11475_v42, %v13353_v59 }
 0xc49   :  { %v13441_v0 = vpop.eup %11476  ;;  %10418 = vmatprep.subr.bf16.mxu0 %v3122_v13 }
 0xc4a   :  { %v11479_v56 = vpop.eup %11478  ;;  %v3065_v20 = vsel %vm390_vm1, %v13441_v0, 0.0  ;;  %v3124_v3 = vpop.permute.xlu0 %3123 }
 0xc4b   :  { %v11481_v50 = vpop.eup %11480  ;;  %3057 = vadd.xlane.f32.xlu1 %v3056_v61  ;;  %3066 = vadd.xlane.f32.xlu0 %v3065_v20  ;;  %v3088_v46 = vmul.f32 %v11479_v56, %v13361_v17 }
 0xc4c   :  { %v11483_v52 = vpop.eup %11482  ;;  %10419 = vmatpush3.bf16.msra.mxu0 %v3122_v13  ;;  %v3086_v44 = vmul.f32 %v11481_v50, %v13363_v14 }
 0xc4d   :  { %10420 = vmatprep.subr.bf16.mxu0 %v3124_v3  ;;  %v3082_v45 = vmul.f32 %v11483_v52, %v13345_v34  ;;  %v11485_v53 = vpop.eup %11484 }
 0xc4e   :  { %v3111_v38 = vpack.c.bf16 %v3088_v46, %v3086_v44  ;;  %v11487_v60 = vpop.eup %11486  ;;  %v3090_v40 = vmul.f32 %v11485_v53, %v13392_v21 }
 0xc4f   :  { %v3110_v29 = vpack.c.bf16 %v3084_v62, %v3082_v45  ;;  %v3092_v59 = vmul.f32 %v11487_v60, %v13386_v55 }
 0xc50   :  { %10421 = vmatpush3.bf16.msra.mxu0 %v3124_v3 }
 0xc51   :  { %v3112_v1 = vpack.c.bf16 %v3092_v59, %v3090_v40 }
 0xc53   :  { %10423 = vmatmul.mubr.msk.bf16.vlgmr.msra.gmra.mrb[64].mxu0 %vm390_vm1, %v3110_v29 }
 0xc54   :  { %10426 = vmatprep.mubr.msk.bf16.mxu0 %vm390_vm1, %v3111_v38 }
 0xc5b   :  { %10427 = vmatmul.mubr.msk.bf16.gmra.mrb[68].mxu0 %vm390_vm1, %v3112_v1 }
 0xc6d   :  { %v2980_v14 = vpop.xlane.xlu1 %2979 }
 0xc6e   :  { %v2996_v17 = vsub.f32 %v13404_v41, %v2980_v14 }
 0xc70   :  { %v3027_v34 = vmul.f32 1.442695, %v2996_v17 }
 0xc71   :  { %v2974_v51 = vpop.xlane.xlu1 %2973 }
 0xc72   :  { %11488 = vpow2.f32 %v3027_v34  ;;  %v2994_v49 = vsub.f32 %v13406_v48, %v2974_v51  ;;  %v3295_v48 = vld [vmem:[%s16788_s2 + $0x18] sm:$0xff] }
 0xc73   :  { %v3304_v22 = vpack.c.bf16 %v3295_v48, %v3295_v48 }
 0xc74   :  { %v3023_v43 = vmul.f32 1.442695, %v2994_v49 }
 0xc75   :  { %v3207_v5 = vpop.permute.xlu1 %3206 }
 0xc76   :  { %11490 = vpow2.f32 %v3023_v43  ;;  %10430 = vmatprep.subr.bf16.mxu1 %v3207_v5 }
 0xc77   :  { %10431 = vmatpush3.bf16.msra.mxu1 %v3207_v5 }
 0xc79   :  { %v3209_v30 = vpop.permute.xlu1 %3208 }
 0xc7a   :  { %10432 = vmatprep.subr.bf16.mxu1 %v3209_v30 }
 0xc7b   :  { %10433 = vmatpush3.bf16.msra.mxu1 %v3209_v30 }
 0xc7c   :  { %v11489_v55 = vpop.eup %11488 }
 0xc7d   :  { %v3074_v21 = vsel %vm390_vm1, %v11489_v55, 0.0 }
 0xc7e   :  { %3075 = vadd.xlane.f32.xlu0 %v3074_v21 }
 0xc80   :  { %v11491_v11 = vpop.eup %11490 }
 0xc81   :  { %v3068_v41 = vsel %vm390_vm1, %v11491_v11, 0.0 }
 0xc82   :  { %3069 = vadd.xlane.f32.xlu1 %v3068_v41 }
 0xc93   :  { %3212 = vrot.lane.b32.xlu1 %v12397_v18, %s12073_s19 }
 0xc94   :  { %3210 = vrot.lane.b32.xlu0 %v12399_v19, %s12073_s19 }
 0xc97   :  { %3454 = vrot.lane.b32.xlu1 %v13471_v58, %s12062_s27 }
 0xc98   :  { %3306 = vrot.lane.b32.xlu0 %v3304_v22, %s12070_s14 }
 0xccc   :  { %v3061_v47 = vpop.xlane.xlu1 %3060 }
 0xcd0   :  { %v3055_v39 = vpop.xlane.xlu1 %3054 }
 0xcd1   :  { %11492 = vrcp.f32 %v3055_v39 }
 0xcd4   :  { %v3064_v57 = vpop.xlane.xlu1 %3063  ;;  %v3073_v23 = vpop.xlane.xlu0 %3072 }
 0xcd8   :  { %v3058_v32 = vpop.xlane.xlu1 %3057  ;;  %v3067_v37 = vpop.xlane.xlu0 %3066 }
 0xcd9   :  { %11494 = vrcp.f32 %v3058_v32  ;;  %v12021_v32 = vld [vmem:[%s16786_s0 + $0x10] sm:$0xff] }
 0xcda   :  { %11496 = vrcp.f32 %v3064_v57 }
 0xcdb   :  { %v11493_v18 = vpop.eup %11492  ;;  %11498 = vrcp.f32 %v3061_v47  ;;  %v12020_v47 = vld [vmem:[%s16786_s0] sm:$0xff] }
 0xcdc   :  { %v3094_v19 = vmul.f32 %v11493_v18, %v13427_v31 }
 0xce3   :  { %v11495_v33 = vpop.eup %11494 }
 0xce4   :  { %v3096_v9 = vmul.f32 %v11495_v33, %v13439_v63  ;;  %v11497_v15 = vpop.eup %11496 }
 0xce5   :  { %v11499_v7 = vpop.eup %11498  ;;  %v3100_v35 = vmul.f32 %v11497_v15, %v13431_v24  ;;  %v12023_v15 = vld [vmem:[%s16786_s0 + $0x18] sm:$0xff] }
 0xce6   :  { %v3113_v12 = vpack.c.bf16 %v3096_v9, %v3094_v19  ;;  %v3098_v31 = vmul.f32 %v11499_v7, %v13423_v27  ;;  %v12022_v19 = vld [vmem:[%s16786_s0 + $0x8] sm:$0xff] }
 0xce8   :  { %10438 = vmatprep.mubr.msk.bf16.mxu1 %vm390_vm1, %v3113_v12  ;;  %v3114_v6 = vpack.c.bf16 %v3100_v35, %v3098_v31 }
 0xd0b   :  { %v3076_v2 = vpop.xlane.xlu0 %3075 }
 0xd0c   :  { %11500 = vrcp.f32 %v3076_v2 }
 0xd0d   :  { %11502 = vrcp.f32 %v3067_v37 }
 0xd0e   :  { %11504 = vrcp.f32 %v3073_v23 }
 0xd0f   :  { %v3070_v4 = vpop.xlane.xlu1 %3069  ;;  %v3211_v54 = vpop.permute.xlu0 %3210 }
 0xd10   :  { %11506 = vrcp.f32 %v3070_v4  ;;  %10434 = vmatprep.subr.bf16.mxu1 %v3211_v54 }
 0xd11   :  { %10435 = vmatpush3.bf16.msra.mxu1 %v3211_v54 }
 0xd13   :  { %v3213_v36 = vpop.permute.xlu1 %3212  ;;  %v3307_v8 = vpop.permute.xlu0 %3306 }
 0xd14   :  { %10436 = vmatprep.subr.bf16.mxu1 %v3213_v36  ;;  %v3333_v26 = vsel %vm1738_vm3, %v3307_v8, 0 }
 0xd15   :  { %10437 = vmatpush3.bf16.msra.mxu1 %v3213_v36 }
 0xd16   :  { %11163 = vmatprep.subr.msk.bf16.mxu1 %vm1738_vm3, %v3307_v8  ;;  %v11501_v25 = vpop.eup %11500 }
 0xd17   :  { %v11503_v13 = vpop.eup %11502  ;;  %v3108_v63 = vmul.f32 %v11501_v25, %v11489_v55  ;;  %v13495_v30 = vpop.permute.xlu1 %3454 }
 0xd18   :  { %10439 = vmatmul.mubr.msk.bf16.vlgmr.msra.gmra.mrb[80].mxu1 %vm390_vm1, %v3114_v6  ;;  %v11505_v28 = vpop.eup %11504  ;;  %v3102_v24 = vmul.f32 %v11503_v13, %v13441_v0  ;;  %v12025_v13 = vld [vmem:[%s16786_s0 + $0x28] sm:$0xff] }
 0xd19   :  { %10447 = vmatpush3.bf16.msra.mxu1 %v3333_v26  ;;  %v3106_v27 = vmul.f32 %v11505_v28, %v13433_v16  ;;  %v12024_v26 = vld [vmem:[%s16786_s0 + $0x20] sm:$0xff] }
 0xd1a   :  { %v11507_v10 = vpop.eup %11506 }
 0xd1b   :  { %v3104_v42 = vmul.f32 %v11507_v10, %v11491_v11  ;;  %v3116_v61 = vpack.c.bf16 %v3108_v63, %v3106_v27  ;;  %v12026_v63 = vld [vmem:[%s16786_s0 + $0x38] sm:$0xff]  ;;  %v12027_v27 = vld [vmem:[%s16786_s0 + $0x30] sm:$0xff] }
 0xd1d   :  { %v3115_v56 = vpack.c.bf16 %v3104_v42, %v3102_v24 }
 0xd1f   :  { %10442 = vmatprep.mubr.msk.bf16.mxu1 %vm390_vm1, %v3115_v56 }
 0xd20   :  { %10443 = vmatmul.mubr.msk.bf16.gmra.mrb[84].mxu1 %vm390_vm1, %v3116_v61 }
 0xd26   :  { %v10424_v20 = vpop.f32.mrb[64].mxu0 }
 0xd27   :  { %v3175_v50 = vpop.f32.mrb[65].mxu0 }
 0xd28   :  { %v10425_v52 = vpop.f32.mrb[66].mxu0 }
 0xd29   :  { %v3297_v3 = vpack.c.bf16 %v10425_v52, %v10424_v20  ;;  %v3178_v62 = vpop.f32.mrb[67].mxu0 }
 0xd2a   :  { %v3296_v44 = vpack.c.bf16 %v3178_v62, %v3175_v50 }
 0xd2c   :  { %10448 = vmatprep.mubr.msk.bf16.mxu1 %vm534_vm2, %v3296_v44 }
 0xd2d   :  { %10449 = vmatmul.mubr.msk.bf16.vlgmr.msra.gmra.mrb[48].mxu1 %vm534_vm2, %v3297_v3 }
 0xd2e   :  { %v10428_v0 = vpop.f32.mrb[68].mxu0 }
 0xd2f   :  { %v3191_v46 = vpop.f32.mrb[69].mxu0 }
 0xd30   :  { %v10429_v45 = vpop.f32.mrb[70].mxu0 }
 0xd31   :  { %v3299_v16 = vpack.c.bf16 %v10429_v45, %v10428_v0  ;;  %v3194_v29 = vpop.f32.mrb[71].mxu0 }
 0xd32   :  { %v3298_v53 = vpack.c.bf16 %v3194_v29, %v3191_v46  ;;  %v12028_v29 = vld [vmem:[%s16786_s0 + $0x40] sm:$0xff] }
 0xd34   :  { %10452 = vmatprep.mubr.msk.bf16.mxu1 %vm534_vm2, %v3298_v53 }
 0xd35   :  { %10453 = vmatmul.mubr.msk.bf16.gmra.mrb[52].mxu1 %vm534_vm2, %v3299_v16 }
 0xdeb   :  { %v10440_v38 = vpop.f32.mrb[80].mxu1 }
 0xdec   :  { %v3264_v60 = vpop.f32.mrb[81].mxu1 }
 0xded   :  { %v10441_v40 = vpop.f32.mrb[82].mxu1 }
 0xdee   :  { %v3301_v59 = vpack.c.bf16 %v10441_v40, %v10440_v38  ;;  %v3267_v1 = vpop.f32.mrb[83].mxu1  ;;  %v12029_v40 = vld [vmem:[%s16786_s0 + $0x50] sm:$0xff] }
 0xdef   :  { %v3300_v14 = vpack.c.bf16 %v3267_v1, %v3264_v60  ;;  %v12030_v1 = vld [vmem:[%s16786_s0 + $0x48] sm:$0xff] }
 0xdf1   :  { %10456 = vmatprep.mubr.msk.bf16.mxu1 %vm534_vm2, %v3300_v14 }
 0xdf2   :  { %10457 = vmatmul.mubr.msk.bf16.gmra.mrb[56].mxu1 %vm534_vm2, %v3301_v59 }
 0xdf3   :  { %v10444_v17 = vpop.f32.mrb[84].mxu1 }
 0xdf4   :  { %v3280_v34 = vpop.f32.mrb[85].mxu1 }
 0xdf5   :  { %v10445_v51 = vpop.f32.mrb[86].mxu1 }
 0xdf6   :  { %v3303_v49 = vpack.c.bf16 %v10445_v51, %v10444_v17  ;;  %v3283_v43 = vpop.f32.mrb[87].mxu1 }
 0xdf7   :  { %v3302_v5 = vpack.c.bf16 %v3283_v43, %v3280_v34 }
 0xdf9   :  { %10460 = vmatprep.mubr.msk.bf16.mxu1 %vm534_vm2, %v3302_v5 }
 0xdfa   :  { %10461 = vmatmul.mubr.msk.bf16.gmra.mrb[60].mxu1 %vm534_vm2, %v3303_v49  ;;  %v12031_v49 = vld [vmem:[%s16786_s0 + $0x58] sm:$0xff] }
 0xe00   :  { %v10450_v55 = vpop.f32.mrb[48].mxu1 }
 0xe01   :  { %v3369_v21 = vpop.f32.mrb[49].mxu1  ;;  %v3459_v11 = vadd.f32 %v10450_v55, %v13495_v30 }
 0xe02   :  { %v3457_v41 = vadd.f32 %v13495_v30, %v3369_v21  ;;  %v10451_v48 = vpop.f32.mrb[50].mxu1 }
 0xe03   :  { %v3372_v22 = vpop.f32.mrb[51].mxu1  ;;  %v13508_v18 = vadd.f32 %v12021_v32, %v3459_v11  ;;  %v3460_v33 = vadd.f32 %v10451_v48, %v13495_v30 }
 0xe04   :  { %v13502_v39 = vadd.f32 %v12020_v47, %v3457_v41  ;;  %v3458_v57 = vadd.f32 %v13495_v30, %v3372_v22 }
 0xe05   :  { %v13523_v4 = vadd.f32 %v12023_v15, %v3460_v33  ;;  %v3495_v35 = vsel %vm100_vm0, %v13508_v18, 0.0  ;;  %v12032_v33 = vld [vmem:[%s16786_s0 + $0x60] sm:$0xff] }
 0xe06   :  { %v13514_v9 = vadd.f32 %v12022_v19, %v3458_v57  ;;  %v3489_v12 = vsel %vm100_vm0, %v13502_v39, 0.0 }
 0xe07   :  { %3490 = vadd.xlane.f32.xlu0 %v3489_v12  ;;  %v3498_v10 = vsel %vm100_vm0, %v13523_v4, 0.0 }
 0xe08   :  { %v10454_v23 = vpop.f32.mrb[52].mxu1  ;;  %v3492_v37 = vsel %vm100_vm0, %v13514_v9, 0.0 }
 0xe09   :  { %3493 = vadd.xlane.f32.xlu1 %v3492_v37  ;;  %v3385_v2 = vpop.f32.mrb[53].mxu1  ;;  %v3463_v6 = vadd.f32 %v10454_v23, %v13495_v30 }
 0xe0a   :  { %v3461_v54 = vadd.f32 %v13495_v30, %v3385_v2  ;;  %v10455_v7 = vpop.f32.mrb[54].mxu1 }
 0xe0b   :  { %3496 = vadd.xlane.f32.xlu0 %v3495_v35  ;;  %v3388_v36 = vpop.f32.mrb[55].mxu1  ;;  %v3464_v8 = vadd.f32 %v10455_v7, %v13495_v30  ;;  %v13553_v56 = vadd.f32 %v12027_v27, %v3463_v6  ;;  %v12033_v7 = vld [vmem:[%s16786_s0 + $0x70] sm:$0xff] }
 0xe0c   :  { %v3462_v31 = vadd.f32 %v13495_v30, %v3388_v36  ;;  %v13534_v25 = vadd.f32 %v12024_v26, %v3461_v54  ;;  %v12034_v36 = vld [vmem:[%s16786_s0 + $0x68] sm:$0xff] }
 0xe0d   :  { %v13546_v24 = vadd.f32 %v12026_v63, %v3464_v8  ;;  %v3507_v50 = vsel %vm100_vm0, %v13553_v56, 0.0 }
 0xe0e   :  { %v13539_v28 = vadd.f32 %v12025_v13, %v3462_v31  ;;  %v3501_v61 = vsel %vm100_vm0, %v13534_v25, 0.0  ;;  %v12035_v13 = vld [vmem:[%s16786_s0 + $0x78] sm:$0xff] }
 0xe0f   :  { %3499 = vadd.xlane.f32.xlu0 %v3498_v10  ;;  %16870 = vst [vmem:[#allocation8_spill] sm:$0xff] %v13546_v24  ;;  %v3510_v20 = vsel %vm100_vm0, %v13546_v24, 0.0 }
 0xe10   :  { %16869 = vst [vmem:[#allocation7_spill] sm:$0xff] %v13539_v28  ;;  %v3504_v42 = vsel %vm100_vm0, %v13539_v28, 0.0 }
 0xe11   :  { %3505 = vadd.xlane.f32.xlu1 %v3504_v42 }
 0xe13   :  { %3502 = vadd.xlane.f32.xlu0 %v3501_v61 }
 0xe15   :  { %3511 = vadd.xlane.f32.xlu1 %v3510_v20 }
 0xe17   :  { %3508 = vadd.xlane.f32.xlu0 %v3507_v50 }
 0xe94   :  { %v3491_v52 = vpop.xlane.xlu0 %3490 }
 0xe95   :  { %v3537_v21 = vmul.f32 0.03125, %v3491_v52 }
 0xe96   :  { %v3494_v51 = vpop.xlane.xlu1 %3493 }
 0xe97   :  { %v3538_v57 = vmul.f32 0.03125, %v3494_v51  ;;  %v13603_v2 = vsub.f32 %v13502_v39, %v3537_v21 }
 0xe98   :  { %v3497_v62 = vpop.xlane.xlu0 %3496 }
 0xe99   :  { %v3539_v54 = vmul.f32 0.03125, %v3497_v62  ;;  %v13618_v6 = vsub.f32 %v13514_v9, %v3538_v57  ;;  %v3569_v20 = vmul.f32 %v13603_v2, %v13603_v2 }
 0xe9b   :  { %v13628_v42 = vsub.f32 %v13508_v18, %v3539_v54 }
 0xe9c   :  { %v3500_v34 = vpop.xlane.xlu0 %3499 }
 0xe9d   :  { %v3540_v26 = vmul.f32 0.03125, %v3500_v34 }
 0xe9e   :  { %v3506_v31 = vpop.xlane.xlu1 %3505 }
 0xe9f   :  { %v13635_v52 = vsub.f32 %v13523_v4, %v3540_v26 }
 0xea0   :  { %v3503_v15 = vpop.xlane.xlu0 %3502 }
 0xea1   :  { %v3541_v27 = vmul.f32 0.03125, %v3503_v15 }
 0xea4   :  { %v3509_v50 = vpop.xlane.xlu0 %3508 }
 0xec5   :  { %v10458_v3 = vpop.f32.mrb[56].mxu1 }
 0xec6   :  { %v3401_v44 = vpop.f32.mrb[57].mxu1  ;;  %v3467_v0 = vadd.f32 %v10458_v3, %v13495_v30  ;;  %v3542_v3 = vmul.f32 0.03125, %v3506_v31 }
 0xec7   :  { %v3465_v46 = vadd.f32 %v13495_v30, %v3401_v44  ;;  %v10459_v45 = vpop.f32.mrb[58].mxu1  ;;  %v3570_v44 = vmul.f32 %v13618_v6, %v13618_v6 }
 0xec8   :  { %v3404_v16 = vpop.f32.mrb[59].mxu1  ;;  %v3468_v38 = vadd.f32 %v10459_v45, %v13495_v30  ;;  %v13573_v59 = vadd.f32 %v12029_v40, %v3467_v0  ;;  %v3512_v0 = vpop.xlane.xlu1 %3511  ;;  %v3543_v45 = vmul.f32 0.03125, %v3509_v50 }
 0xec9   :  { %v13566_v53 = vadd.f32 %v12028_v29, %v3465_v46  ;;  %v3466_v60 = vadd.f32 %v13495_v30, %v3404_v16  ;;  %v13642_v46 = vsub.f32 %v13534_v25, %v3541_v27  ;;  %v3585_v16 = vsel %vm100_vm0, %v3569_v20, 0.0 }
 0xeca   :  { %16872 = vst [vmem:[#allocation10_spill] sm:$0xff] %v13573_v59  ;;  %v13585_v43 = vadd.f32 %v12031_v49, %v3468_v38  ;;  %v3519_v47 = vsel %vm100_vm0, %v13573_v59, 0.0  ;;  %v3571_v29 = vmul.f32 %v13628_v42, %v13628_v42  ;;  %v13648_v38 = vsub.f32 %v13539_v28, %v3542_v3 }
 0xecb   :  { %16871 = vst [vmem:[#allocation9_spill] sm:$0xff] %v13566_v53  ;;  %v13578_v14 = vadd.f32 %v12030_v1, %v3466_v60  ;;  %v3513_v17 = vsel %vm100_vm0, %v13566_v53, 0.0  ;;  %v3544_v60 = vmul.f32 0.03125, %v3512_v0  ;;  %v3588_v40 = vsel %vm100_vm0, %v3570_v44, 0.0 }
 0xecc   :  { %3514 = vadd.xlane.f32.xlu0 %v3513_v17  ;;  %16874 = vst [vmem:[#allocation12_spill] sm:$0xff] %v13585_v43  ;;  %v3522_v37 = vsel %vm100_vm0, %v13585_v43, 0.0  ;;  %v3572_v1 = vmul.f32 %v13635_v52, %v13635_v52  ;;  %v13654_v17 = vsub.f32 %v13553_v56, %v3543_v45  ;;  %v3591_v34 = vsel %vm100_vm0, %v3571_v29, 0.0 }
 0xecd   :  { %16873 = vst [vmem:[#allocation11_spill] sm:$0xff] %v13578_v14  ;;  %v10462_v5 = vpop.f32.mrb[60].mxu1  ;;  %v3516_v55 = vsel %vm100_vm0, %v13578_v14, 0.0  ;;  %v3573_v51 = vmul.f32 %v13642_v46, %v13642_v46  ;;  %v13660_v49 = vsub.f32 %v13546_v24, %v3544_v60 }
 0xece   :  { %3517 = vadd.xlane.f32.xlu1 %v3516_v55  ;;  %v3417_v11 = vpop.f32.mrb[61].mxu1  ;;  %v3471_v41 = vadd.f32 %v10462_v5, %v13495_v30  ;;  %v3594_v5 = vsel %vm100_vm0, %v3572_v1, 0.0  ;;  %v3574_v55 = vmul.f32 %v13648_v38, %v13648_v38 }
 0xecf   :  { %v3469_v48 = vadd.f32 %v13495_v30, %v3417_v11  ;;  %v10463_v22 = vpop.f32.mrb[62].mxu1  ;;  %v3597_v21 = vsel %vm100_vm0, %v3573_v51, 0.0  ;;  %v3575_v11 = vmul.f32 %v13654_v17, %v13654_v17 }
 0xed0   :  { %3520 = vadd.xlane.f32.xlu0 %v3519_v47  ;;  %v3420_v32 = vpop.f32.mrb[63].mxu1  ;;  %v3472_v12 = vadd.f32 %v10463_v22, %v13495_v30  ;;  %v13608_v35 = vadd.f32 %v12033_v7, %v3471_v41  ;;  %v3600_v41 = vsel %vm100_vm0, %v3574_v55, 0.0 }
 0xed1   :  { %v13596_v19 = vadd.f32 %v12032_v33, %v3469_v48  ;;  %v3470_v23 = vadd.f32 %v13495_v30, %v3420_v32  ;;  %v3576_v48 = vmul.f32 %v13660_v49, %v13660_v49  ;;  %v3603_v22 = vsel %vm100_vm0, %v3575_v11, 0.0 }
 0xed2   :  { %3523 = vadd.xlane.f32.xlu1 %v3522_v37  ;;  %16876 = vst [vmem:[#allocation14_spill] sm:$0xff] %v13608_v35  ;;  %v13623_v10 = vadd.f32 %v12035_v13, %v3472_v12  ;;  %v3531_v61 = vsel %vm100_vm0, %v13608_v35, 0.0 }
 0xed3   :  { %16875 = vst [vmem:[#allocation13_spill] sm:$0xff] %v13596_v19  ;;  %v13613_v30 = vadd.f32 %v12034_v36, %v3470_v23  ;;  %v3525_v8 = vsel %vm100_vm0, %v13596_v19, 0.0  ;;  %v3606_v47 = vsel %vm100_vm0, %v3576_v48, 0.0 }
 0xed4   :  { %3526 = vadd.xlane.f32.xlu0 %v3525_v8  ;;  %16878 = vst [vmem:[#allocation16_spill] sm:$0xff] %v13623_v10  ;;  %v3534_v62 = vsel %vm100_vm0, %v13623_v10, 0.0 }
 0xed5   :  { %16877 = vst [vmem:[#allocation15_spill] sm:$0xff] %v13613_v30  ;;  %v3528_v63 = vsel %vm100_vm0, %v13613_v30, 0.0 }
 0xed6   :  { %3529 = vadd.xlane.f32.xlu1 %v3528_v63 }
 0xed8   :  { %3532 = vadd.xlane.f32.xlu0 %v3531_v61 }
 0xeda   :  { %3535 = vadd.xlane.f32.xlu1 %v3534_v62 }
 0xedc   :  { %3586 = vadd.xlane.f32.xlu0 %v3585_v16 }
 0xede   :  { %3589 = vadd.xlane.f32.xlu1 %v3588_v40 }
 0xee0   :  { %3592 = vadd.xlane.f32.xlu0 %v3591_v34 }
 0xee2   :  { %3595 = vadd.xlane.f32.xlu1 %v3594_v5 }
 0xee4   :  { %3598 = vadd.xlane.f32.xlu0 %v3597_v21 }
 0xee6   :  { %3601 = vadd.xlane.f32.xlu1 %v3600_v41 }
 0xee8   :  { %3604 = vadd.xlane.f32.xlu0 %v3603_v22 }
 0xeea   :  { %3607 = vadd.xlane.f32.xlu1 %v3606_v47 }
 0xf59   :  { %v3515_v57 = vpop.xlane.xlu0 %3514 }
 0xf5a   :  { %v3545_v33 = vmul.f32 0.03125, %v3515_v57 }
 0xf5b   :  { %v3518_v32 = vpop.xlane.xlu1 %3517 }
 0xf5c   :  { %v3546_v23 = vmul.f32 0.03125, %v3518_v32  ;;  %v13674_v54 = vsub.f32 %v13566_v53, %v3545_v33  ;;  %v3743_v32 = vld [vmem:[%s16788_s2 + $0x20] sm:$0xff]  ;;  %v3744_v33 = vld [vmem:[%s16788_s2 + $0x28] sm:$0xff] }
 0xf5d   :  { %v3521_v12 = vpop.xlane.xlu0 %3520 }
 0xf5e   :  { %v3547_v37 = vmul.f32 0.03125, %v3521_v12  ;;  %v13680_v31 = vsub.f32 %v13578_v14, %v3546_v23  ;;  %v3577_v50 = vmul.f32 %v13674_v54, %v13674_v54  ;;  %v3747_v12 = vpack.c.bf16 %v3744_v33, %v3743_v32  ;;  %v3745_v23 = vld [vmem:[%s16788_s2 + $0x30] sm:$0xff] }
 0xf5f   :  { %v3524_v15 = vpop.xlane.xlu1 %3523 }
 0xf60   :  { %v13677_v7 = vsub.f32 %v13573_v59, %v3547_v37  ;;  %v3548_v36 = vmul.f32 0.03125, %v3524_v15  ;;  %v3578_v45 = vmul.f32 %v13680_v31, %v13680_v31  ;;  %v3609_v1 = vsel %vm100_vm0, %v3577_v50, 0.0  ;;  %10464 = vmatprep.subr.bf16.mxu0 %v3747_v12  ;;  %v3746_v37 = vld [vmem:[%s16788_s2 + $0x38] sm:$0xff] }
 0xf61   :  { %v3527_v8 = vpop.xlane.xlu0 %3526  ;;  %10465 = vmatpush3.bf16.msra.mxu0 %v3747_v12  ;;  %v3748_v15 = vpack.c.bf16 %v3746_v37, %v3745_v23 }
 0xf62   :  { %v13683_v26 = vsub.f32 %v13585_v43, %v3548_v36  ;;  %v3579_v13 = vmul.f32 %v13677_v7, %v13677_v7  ;;  %v3549_v27 = vmul.f32 0.03125, %v3527_v8  ;;  %v3612_v5 = vsel %vm100_vm0, %v3578_v45, 0.0 }
 0xf63   :  { %v3530_v63 = vpop.xlane.xlu1 %3529  ;;  %10466 = vmatprep.subr.bf16.mxu0 %v3748_v15 }
 0xf64   :  { %v3615_v61 = vsel %vm100_vm0, %v3579_v13, 0.0  ;;  %v3580_v20 = vmul.f32 %v13683_v26, %v13683_v26  ;;  %v3550_v62 = vmul.f32 0.03125, %v3530_v63  ;;  %v13696_v29 = vsub.f32 %v13596_v19, %v3549_v27 }
 0xf65   :  { %3616 = vadd.xlane.f32.xlu0 %v3615_v61  ;;  %v3533_v3 = vpop.xlane.xlu0 %3532  ;;  %10467 = vmatpush3.bf16.msra.mxu0 %v3748_v15 }
 0xf66   :  { %v3551_v44 = vmul.f32 0.03125, %v3533_v3  ;;  %v3618_v0 = vsel %vm100_vm0, %v3580_v20, 0.0  ;;  %v13703_v34 = vsub.f32 %v13613_v30, %v3550_v62  ;;  %v3581_v41 = vmul.f32 %v13696_v29, %v13696_v29 }
 0xf67   :  { %3619 = vadd.xlane.f32.xlu1 %v3618_v0  ;;  %v3536_v16 = vpop.xlane.xlu1 %3535 }
 0xf68   :  { %v13699_v60 = vsub.f32 %v13608_v35, %v3551_v44  ;;  %v3552_v40 = vmul.f32 0.03125, %v3536_v16  ;;  %v3582_v22 = vmul.f32 %v13703_v34, %v13703_v34  ;;  %v3621_v47 = vsel %vm100_vm0, %v3581_v41, 0.0 }
 0xf69   :  { %3610 = vadd.xlane.f32.xlu0 %v3609_v1  ;;  %v3587_v36 = vpop.xlane.xlu0 %3586 }
 0xf6a   :  { %v13706_v51 = vsub.f32 %v13623_v10, %v3552_v40  ;;  %v3583_v55 = vmul.f32 %v13699_v60, %v13699_v60  ;;  %v3624_v57 = vsel %vm100_vm0, %v3582_v22, 0.0  ;;  %v3633_v20 = vmul.f32 0.03125, %v3587_v36 }
 0xf6b   :  { %3613 = vadd.xlane.f32.xlu1 %v3612_v5  ;;  %v3590_v8 = vpop.xlane.xlu1 %3589 }
 0xf6c   :  { %v3627_v21 = vsel %vm100_vm0, %v3583_v55, 0.0  ;;  %v3584_v11 = vmul.f32 %v13706_v51, %v13706_v51  ;;  %v3634_v50 = vmul.f32 0.03125, %v3590_v8  ;;  %v3649_v0 = vadd.f32 1e-06, %v3633_v20 }
 0xf6d   :  { %3628 = vadd.xlane.f32.xlu0 %v3627_v21  ;;  %v3593_v13 = vpop.xlane.xlu0 %3592 }
 0xf6e   :  { %v3630_v48 = vsel %vm100_vm0, %v3584_v11, 0.0  ;;  %v3635_v3 = vmul.f32 0.03125, %v3593_v13  ;;  %v3650_v16 = vadd.f32 1e-06, %v3634_v50  ;;  %11508 = vrsqrt.f32 %v3649_v0 }
 0xf6f   :  { %3631 = vadd.xlane.f32.xlu1 %v3630_v48  ;;  %v3596_v63 = vpop.xlane.xlu1 %3595 }
 0xf70   :  { %v3636_v62 = vmul.f32 0.03125, %v3596_v63  ;;  %v3651_v1 = vadd.f32 1e-06, %v3635_v3  ;;  %11510 = vrsqrt.f32 %v3650_v16 }
 0xf71   :  { %3622 = vadd.xlane.f32.xlu0 %v3621_v47  ;;  %v3599_v27 = vpop.xlane.xlu0 %3598 }
 0xf72   :  { %v3637_v45 = vmul.f32 0.03125, %v3599_v27  ;;  %v3652_v55 = vadd.f32 1e-06, %v3636_v62  ;;  %11512 = vrsqrt.f32 %v3651_v1 }
 0xf73   :  { %3625 = vadd.xlane.f32.xlu1 %v3624_v57  ;;  %v3602_v61 = vpop.xlane.xlu1 %3601 }
 0xf74   :  { %v3638_v40 = vmul.f32 0.03125, %v3602_v61  ;;  %v3653_v11 = vadd.f32 1e-06, %v3637_v45  ;;  %11514 = vrsqrt.f32 %v3652_v55 }
 0xf75   :  { %v3605_v44 = vpop.xlane.xlu0 %3604 }
 0xf76   :  { %v3639_v5 = vmul.f32 0.03125, %v3605_v44  ;;  %v3654_v41 = vadd.f32 1e-06, %v3638_v40  ;;  %11516 = vrsqrt.f32 %v3653_v11 }
 0xf78   :  { %v3655_v48 = vadd.f32 1e-06, %v3639_v5  ;;  %11518 = vrsqrt.f32 %v3654_v41  ;;  %v11509_v23 = vpop.eup %11508 }
 0xf79   :  { %v3681_v5 = vmul.f32 %v11509_v23, %v13603_v2 }
 0xf7a   :  { %11520 = vrsqrt.f32 %v3655_v48 }
 0xf84   :  { %3716 = vrot.lane.b32.xlu1 %v13471_v58, %s12070_s14 }
 0xf87   :  { %3697 = vrot.lane.b32.xlu0 %v13471_v58, %s12063_s30  ;;  %v3608_v58 = vpop.xlane.xlu1 %3607 }
 0xf88   :  { %4317 = vrot.lane.b32.xlu1 %v3747_v12, %s12063_s30  ;;  %v3640_v21 = vmul.f32 0.03125, %v3608_v58 }
 0xf8a   :  { %v3656_v22 = vadd.f32 1e-06, %v3640_v21 }
 0xf8c   :  { %4319 = vrot.lane.b32.xlu1 %v3748_v15, %s12063_s30  ;;  %11522 = vrsqrt.f32 %v3656_v22  ;;  %v11511_v15 = vpop.eup %11510 }
 0xf8d   :  { %v11513_v63 = vpop.eup %11512  ;;  %v3682_v41 = vmul.f32 %v11511_v15, %v13618_v6 }
 0xf8e   :  { %v11515_v61 = vpop.eup %11514  ;;  %v3683_v55 = vmul.f32 %v11513_v63, %v13628_v42 }
 0xf8f   :  { %v11517_v3 = vpop.eup %11516  ;;  %v3684_v21 = vmul.f32 %v11515_v61, %v13635_v52 }
 0xf90   :  { %v11519_v44 = vpop.eup %11518  ;;  %v3685_v48 = vmul.f32 %v11517_v3, %v13642_v46 }
 0xf91   :  { %v11521_v45 = vpop.eup %11520 }
 0xf92   :  { %v3687_v2 = vmul.f32 %v11521_v45, %v13654_v17 }
 0xf96   :  { %v11523_v40 = vpop.eup %11522 }
 0xf97   :  { %v3688_v42 = vmul.f32 %v11523_v40, %v13660_v49 }
 0xff2   :  { %v3617_v47 = vpop.xlane.xlu0 %3616 }
 0xff3   :  { %v3643_v36 = vmul.f32 0.03125, %v3617_v47 }
 0xff4   :  { %v3620_v57 = vpop.xlane.xlu1 %3619 }
 0xff5   :  { %v3644_v33 = vmul.f32 0.03125, %v3620_v57  ;;  %v3659_v0 = vadd.f32 1e-06, %v3643_v36 }
 0xff6   :  { %v3611_v32 = vpop.xlane.xlu0 %3610 }
 0xff7   :  { %v3641_v12 = vmul.f32 0.03125, %v3611_v32  ;;  %v3660_v20 = vadd.f32 1e-06, %v3644_v33 }
 0xff8   :  { %v3614_v37 = vpop.xlane.xlu1 %3613 }
 0xff9   :  { %v3657_v8 = vadd.f32 1e-06, %v3641_v12  ;;  %v3642_v13 = vmul.f32 0.03125, %v3614_v37  ;;  %v3686_v12 = vmul.f32 %v11519_v44, %v13648_v38 }
 0xffa   :  { %v3629_v27 = vpop.xlane.xlu0 %3628 }
 0xffb   :  { %11524 = vrsqrt.f32 %v3657_v8  ;;  %v3658_v50 = vadd.f32 1e-06, %v3642_v13  ;;  %v3647_v22 = vmul.f32 0.03125, %v3629_v27 }
 0xffc   :  { %v3632_v62 = vpop.xlane.xlu1 %3631 }
 0xffd   :  { %11526 = vrsqrt.f32 %v3658_v50  ;;  %v3648_v58 = vmul.f32 0.03125, %v3632_v62  ;;  %v3663_v17 = vadd.f32 1e-06, %v3647_v22 }
 0xffe   :  { %v3623_v16 = vpop.xlane.xlu0 %3622  ;;  %11528 = vrsqrt.f32 %v3660_v20 }
 0xfff   :  { %v3645_v1 = vmul.f32 0.03125, %v3623_v16  ;;  %11530 = vrsqrt.f32 %v3659_v0  ;;  %v3664_v32 = vadd.f32 1e-06, %v3648_v58 }
0x1000   :  { %v3626_v11 = vpop.xlane.xlu1 %3625 }
0x1001   :  { %v3661_v47 = vadd.f32 1e-06, %v3645_v1  ;;  %v3646_v57 = vmul.f32 0.03125, %v3626_v11 }
0x1002   :  { %v13744_v33 = vpop.permute.xlu0 %3697 }
0x1003   :  { %11532 = vrsqrt.f32 %v3661_v47  ;;  %v3662_v52 = vadd.f32 1e-06, %v3646_v57  ;;  %v3700_v23 = vmul.f32 %v13744_v33, %v3681_v5  ;;  %v3701_v6 = vmul.f32 %v13744_v33, %v3682_v41 }
0x1004   :  { %v13751_v46 = vpop.permute.xlu1 %3716  ;;  %v3702_v37 = vmul.f32 %v13744_v33, %v3683_v55  ;;  %v3703_v15 = vmul.f32 %v13744_v33, %v3684_v21  ;;  %v3704_v36 = vmul.f32 %v13744_v33, %v3685_v48  ;;  %v3705_v38 = vmul.f32 %v13744_v33, %v3686_v12 }
0x1005   :  { %v11525_v8 = vpop.eup %11524  ;;  %11534 = vrsqrt.f32 %v3662_v52  ;;  %v3719_v49 = vadd.f32 %v13751_v46, %v3700_v23  ;;  %v3720_v13 = vadd.f32 %v13751_v46, %v3701_v6  ;;  %v3706_v0 = vmul.f32 %v13744_v33, %v3687_v2 }
0x1006   :  { %v3721_v63 = vadd.f32 %v13751_v46, %v3702_v37  ;;  %v3722_v27 = vadd.f32 %v13751_v46, %v3703_v15  ;;  %v3723_v61 = vadd.f32 %v13751_v46, %v3704_v36  ;;  %v3724_v20 = vadd.f32 %v13751_v46, %v3705_v38 }
0x1007   :  { %v11527_v50 = vpop.eup %11526  ;;  %11536 = vrsqrt.f32 %v3664_v32  ;;  %v3735_v3 = vpack.c.bf16 %v3720_v13, %v3719_v49  ;;  %v3689_v62 = vmul.f32 %v11525_v8, %v13674_v54  ;;  %v3707_v45 = vmul.f32 %v13744_v33, %v3688_v42 }
0x1008   :  { %v3736_v44 = vpack.c.bf16 %v3722_v27, %v3721_v63  ;;  %v3690_v58 = vmul.f32 %v11527_v50, %v13680_v31  ;;  %v11529_v16 = vpop.eup %11528  ;;  %11538 = vrsqrt.f32 %v3663_v17  ;;  %v3737_v40 = vpack.c.bf16 %v3724_v20, %v3723_v61  ;;  %v4318_v61 = vpop.permute.xlu1 %4317 }
0x1009   :  { %10468 = vmatprep.mubr.msk.bf16.mxu0 %vm100_vm0, %v3735_v3  ;;  %v11531_v5 = vpop.eup %11530  ;;  %v3708_v54 = vmul.f32 %v13744_v33, %v3689_v62  ;;  %v3725_v55 = vadd.f32 %v13751_v46, %v3706_v0  ;;  %v3726_v21 = vadd.f32 %v13751_v46, %v3707_v45  ;;  %v3692_v31 = vmul.f32 %v11529_v16, %v13683_v26 }
0x100a   :  { %10469 = vmatmul.mubr.msk.bf16.vlgmr.msra.gmra.mrb[72].mxu0 %vm100_vm0, %v3736_v44  ;;  %v3709_v1 = vmul.f32 %v13744_v33, %v3690_v58  ;;  %v3691_v48 = vmul.f32 %v11531_v5, %v13677_v7  ;;  %11164 = vmatprep.subr.msk.bf16.mxu0 %vm390_vm1, %v4318_v61 }
0x100b   :  { %10472 = vmatprep.mubr.msk.bf16.mxu0 %vm100_vm0, %v3737_v40  ;;  %v3727_v47 = vadd.f32 %v13751_v46, %v3708_v54  ;;  %v3738_v32 = vpack.c.bf16 %v3726_v21, %v3725_v55  ;;  %v3711_v12 = vmul.f32 %v13744_v33, %v3692_v31 }
0x100c   :  { %v3728_v41 = vadd.f32 %v13751_v46, %v3709_v1  ;;  %v3710_v26 = vmul.f32 %v13744_v33, %v3691_v48  ;;  %v4320_v20 = vpop.permute.xlu1 %4319 }
0x100d   :  { %v11533_v11 = vpop.eup %11532 }
0x100e   :  { %v3693_v57 = vmul.f32 %v11533_v11, %v13696_v29  ;;  %v3739_v52 = vpack.c.bf16 %v3728_v41, %v3727_v47  ;;  %v3730_v29 = vadd.f32 %v13751_v46, %v3711_v12 }
0x100f   :  { %v11535_v22 = vpop.eup %11534 }
0x1010   :  { %v3694_v2 = vmul.f32 %v11535_v22, %v13703_v34  ;;  %v3712_v7 = vmul.f32 %v13744_v33, %v3693_v57  ;;  %v3729_v34 = vadd.f32 %v13751_v46, %v3710_v26 }
0x1011   :  { %v11537_v42 = vpop.eup %11536 }
0x1012   :  { %10473 = vmatmul.mubr.msk.bf16.gmra.mrb[76].mxu0 %vm100_vm0, %v3738_v32  ;;  %v3713_v23 = vmul.f32 %v13744_v33, %v3694_v2  ;;  %v11539_v6 = vpop.eup %11538  ;;  %v3696_v37 = vmul.f32 %v11537_v42, %v13706_v51  ;;  %v3731_v38 = vadd.f32 %v13751_v46, %v3712_v7  ;;  %v3740_v8 = vpack.c.bf16 %v3730_v29, %v3729_v34 }
0x1013   :  { %10476 = vmatprep.mubr.msk.bf16.mxu0 %vm100_vm0, %v3739_v52  ;;  %v3695_v36 = vmul.f32 %v11539_v6, %v13699_v60  ;;  %v13802_v60 = vld [vmem:[%s16787_s1 + $0x4] ss:$0 sm:$0xff] }
0x1014   :  { %v3732_v15 = vadd.f32 %v13751_v46, %v3713_v23  ;;  %v3715_v17 = vmul.f32 %v13744_v33, %v3696_v37  ;;  %4322 = vrot.lane.b32.xlu0 %v13802_v60, %s12063_s30 }
0x1015   :  { %v3714_v13 = vmul.f32 %v13744_v33, %v3695_v36  ;;  %v4350_v33 = vsel %vm390_vm1, %v4318_v61, 0 }
0x1016   :  { %v3741_v49 = vpack.c.bf16 %v3732_v15, %v3731_v38  ;;  %v3734_v51 = vadd.f32 %v13751_v46, %v3715_v17  ;;  %10485 = vmatpush3.bf16.xpose.msra.mxu0 %v4350_v33 }
0x1017   :  { %v3733_v63 = vadd.f32 %v13751_v46, %v3714_v13  ;;  %11165 = vmatprep.subr.msk.bf16.mxu0 %vm390_vm1, %v4320_v20  ;;  %v4353_v46 = vsel %vm390_vm1, %v4320_v20, 0 }
0x1019   :  { %v3742_v27 = vpack.c.bf16 %v3734_v51, %v3733_v63 }
0x101a   :  { %10477 = vmatmul.mubr.msk.bf16.gmra.mrb[80].mxu0 %vm100_vm0, %v3740_v8 }
0x101b   :  { %10480 = vmatprep.mubr.msk.bf16.mxu0 %vm100_vm0, %v3741_v49 }
0x101e   :  { %10487 = vmatpush3.bf16.xpose.msra.mxu0 %v4353_v46 }
0x1022   :  { %10481 = vmatmul.mubr.msk.bf16.gmra.mrb[84].mxu0 %vm100_vm0, %v3742_v27 }
0x10dd   :  { %v10470_v50 = vpop.f32.mrb[72].mxu0 }
0x10de   :  { %v3821_v3 = vadd.f32 %v10470_v50, %v13802_v60  ;;  %v3812_v62 = vpop.f32.mrb[73].mxu0 }
0x10df   :  { %v3813_v44 = vadd.f32 %v13802_v60, %v3812_v62  ;;  %v10471_v0 = vpop.f32.mrb[74].mxu0 }
0x10e0   :  { %v13812_v45 = vmul.f32 0.70710677, %v3821_v3  ;;  %v13815_v58 = vadd.f32 %v10471_v0, %v13802_v60  ;;  %v3815_v16 = vpop.f32.mrb[75].mxu0 }
0x10e1   :  { %v13817_v40 = vmul.f32 0.70710677, %v3813_v44  ;;  %v13820_v1 = vadd.f32 %v13802_v60, %v3815_v16 }
0x10e2   :  { %v3909_v5 = vand.u32 2147483647, %v13812_v45  ;;  %v13825_v55 = vmul.f32 0.70710677, %v13815_v58  ;;  %v4133_v31 = vmul.f32 %v13812_v45, %v13812_v45  ;;  %vm4229_vm4 = vcmp.ge.f32.partialorder %v13812_v45, 0.0 }
0x10e3   :  { %v3907_v54 = vand.u32 2147483647, %v13817_v40  ;;  %v13830_v11 = vmul.f32 0.70710677, %v13820_v1  ;;  %v4131_v48 = vmul.f32 %v13817_v40, %v13817_v40  ;;  %vm4227_vm5 = vcmp.ge.f32.partialorder %v13817_v40, 0.0 }
0x10e4   :  { %v3925_v21 = vmul.f32 0.3275911, %v3909_v5  ;;  %v3910_v22 = vand.u32 2147483647, %v13825_v55  ;;  %v4134_v32 = vmul.f32 %v13825_v55, %v13825_v55  ;;  %v4149_v52 = vsub.f32 0.0, %v4133_v31 }
0x10e5   :  { %v3923_v41 = vmul.f32 0.3275911, %v3907_v54  ;;  %v10474_v47 = vpop.f32.mrb[76].mxu0  ;;  %v3908_v12 = vand.u32 2147483647, %v13830_v11  ;;  %v4147_v6 = vsub.f32 0.0, %v4131_v48  ;;  %v4132_v8 = vmul.f32 %v13830_v11, %v13830_v11 }
0x10e6   :  { %v3941_v57 = vadd.f32 1.0, %v3925_v21  ;;  %v3926_v42 = vmul.f32 0.3275911, %v3910_v22  ;;  %v3828_v23 = vpop.f32.mrb[77].mxu0  ;;  %v13839_v29 = vadd.f32 %v10474_v47, %v13802_v60  ;;  %v4150_v15 = vsub.f32 0.0, %v4134_v32 }
0x10e7   :  { %v3939_v2 = vadd.f32 1.0, %v3923_v41  ;;  %v3924_v26 = vmul.f32 0.3275911, %v3908_v12  ;;  %v10475_v37 = vpop.f32.mrb[78].mxu0  ;;  %v13842_v36 = vadd.f32 %v13802_v60, %v3828_v23  ;;  %v4167_v49 = vmul.f32 1.442695, %v4149_v52 }
0x10e8   :  { %11540 = vrcp.f32 %v3941_v57  ;;  %v3942_v7 = vadd.f32 1.0, %v3926_v42  ;;  %v3831_v38 = vpop.f32.mrb[79].mxu0  ;;  %v13847_v17 = vmul.f32 0.70710677, %v13839_v29  ;;  %v13853_v51 = vadd.f32 %v10475_v37, %v13802_v60 }
0x10e9   :  { %11542 = vrcp.f32 %v3939_v2  ;;  %v3940_v34 = vadd.f32 1.0, %v3924_v26  ;;  %v13850_v13 = vmul.f32 0.70710677, %v13842_v36  ;;  %v4163_v63 = vmul.f32 1.442695, %v4147_v6 }
0x10ea   :  { %11544 = vrcp.f32 %v3942_v7  ;;  %v3913_v27 = vand.u32 2147483647, %v13847_v17  ;;  %v4169_v33 = vmul.f32 1.442695, %v4150_v15  ;;  %v4137_v20 = vmul.f32 %v13847_v17, %v13847_v17 }
0x10eb   :  { %11546 = vrcp.f32 %v3940_v34  ;;  %v3911_v46 = vand.u32 2147483647, %v13850_v13  ;;  %v4148_v62 = vsub.f32 0.0, %v4132_v8  ;;  %v13864_v54 = vmul.f32 0.70710677, %v13853_v51 }
0x10ec   :  { %v3929_v0 = vmul.f32 0.3275911, %v3913_v27  ;;  %11548 = vpow2.f32 %v4167_v49  ;;  %v13867_v21 = vadd.f32 %v13802_v60, %v3831_v38  ;;  %v13871_v41 = vmul.f32 0.5, %v3821_v3 }
0x10ed   :  { %v10478_v61 = vpop.f32.mrb[80].mxu0  ;;  %v3927_v5 = vmul.f32 0.3275911, %v3911_v46  ;;  %v13873_v48 = vmul.f32 0.5, %v3813_v44  ;;  %11550 = vpow2.f32 %v4163_v63  ;;  %v4153_v57 = vsub.f32 0.0, %v4137_v20 }
0x10ee   :  { %v13859_v50 = vpop.f32.mrb[81].mxu0  ;;  %v3945_v22 = vadd.f32 1.0, %v3929_v0  ;;  %11552 = vpow2.f32 %v4169_v33  ;;  %v3914_v12 = vand.u32 2147483647, %v13864_v54  ;;  %v13880_v42 = vmul.f32 0.5, %v13815_v58 }
0x10ef   :  { %v13861_v16 = vpop.f32.mrb[82].mxu0  ;;  %v3943_v32 = vadd.f32 1.0, %v3927_v5  ;;  %v4165_v52 = vmul.f32 1.442695, %v4148_v62  ;;  %v4135_v44 = vmul.f32 %v13850_v13, %v13850_v13  ;;  %v13887_v23 = vmul.f32 0.70710677, %v13867_v21 }
0x10f0   :  { %v13869_v31 = vpop.f32.mrb[83].mxu0  ;;  %11554 = vrcp.f32 %v3945_v22  ;;  %v3930_v26 = vmul.f32 0.3275911, %v3914_v12  ;;  %v13890_v6 = vadd.f32 %v10478_v61, %v13802_v60  ;;  %v13894_v58 = vmul.f32 0.5, %v13820_v1 }
0x10f1   :  { %11556 = vrcp.f32 %v3943_v32  ;;  %v4175_v38 = vmul.f32 1.442695, %v4153_v57  ;;  %v4138_v49 = vmul.f32 %v13864_v54, %v13864_v54  ;;  %v3912_v63 = vand.u32 2147483647, %v13887_v23 }
0x10f2   :  { %v13875_v47 = vpop.eup %11540  ;;  %v3946_v8 = vadd.f32 1.0, %v3930_v26  ;;  %11558 = vpow2.f32 %v4165_v52  ;;  %v4151_v62 = vsub.f32 0.0, %v4135_v44  ;;  %v13912_v5 = vmul.f32 0.70710677, %v13890_v6 }
0x10f3   :  { %v3989_v2 = vmul.f32 1.0614054, %v13875_v47  ;;  %v13882_v3 = vpop.eup %11542  ;;  %v3928_v0 = vmul.f32 0.3275911, %v3912_v63  ;;  %v4154_v52 = vsub.f32 0.0, %v4138_v49  ;;  %v13927_v49 = vadd.f32 %v13802_v60, %v13859_v50 }
0x10f4   :  { %v3987_v37 = vmul.f32 1.0614054, %v13882_v3  ;;  %v13898_v34 = vpop.eup %11544  ;;  %11560 = vrcp.f32 %v3946_v8  ;;  %v3917_v44 = vand.u32 2147483647, %v13912_v5  ;;  %vm4230_vm6 = vcmp.ge.f32.partialorder %v13825_v55, 0.0 }
0x10f5   :  { %v4005_v7 = vadd.f32 -1.4531521, %v3989_v2  ;;  %v13896_v15 = vpop.f32.mrb[84].mxu0  ;;  %v3990_v1 = vmul.f32 1.0614054, %v13898_v34  ;;  %v13909_v46 = vpop.eup %11546  ;;  %vm4228_vm7 = vcmp.ge.f32.partialorder %v13830_v11, 0.0 }
0x10f6   :  { %v13903_v27 = vpop.f32.mrb[85].mxu0  ;;  %v4003_v33 = vadd.f32 -1.4531521, %v3987_v37  ;;  %v3988_v2 = vmul.f32 1.0614054, %v13909_v46  ;;  %v11549_v26 = vpop.eup %11548  ;;  %v4136_v37 = vmul.f32 %v13887_v23, %v13887_v23  ;;  %vm4233_vm8 = vcmp.ge.f32.partialorder %v13847_v17, 0.0 }
0x10f7   :  { %v4021_v61 = vmul.f32 %v13875_v47, %v4005_v7  ;;  %v13907_v20 = vpop.f32.mrb[86].mxu0  ;;  %v4006_v12 = vadd.f32 -1.4531521, %v3990_v1  ;;  %v3944_v7 = vadd.f32 1.0, %v3928_v0  ;;  %v11551_v8 = vpop.eup %11550  ;;  %v3933_v1 = vmul.f32 0.3275911, %v3917_v44 }
0x10f8   :  { %v13914_v22 = vpop.f32.mrb[87].mxu0  ;;  %v4019_v32 = vmul.f32 %v13882_v3, %v4003_v33  ;;  %v13923_v35 = vpop.eup %11552  ;;  %v4171_v33 = vmul.f32 1.442695, %v4151_v62  ;;  %vm4231_vm9 = vcmp.ge.f32.partialorder %v13850_v13, 0.0  ;;  %vm4234_vm10 = vcmp.ge.f32.partialorder %v13864_v54, 0.0 }
0x10f9   :  { %v4037_v57 = vadd.f32 1.4214138, %v4021_v61  ;;  %v4022_v30 = vmul.f32 %v13898_v34, %v4006_v12  ;;  %v4004_v61 = vadd.f32 -1.4531521, %v3988_v2  ;;  %11562 = vrcp.f32 %v3944_v7 }
0x10fa   :  { %v4035_v10 = vadd.f32 1.4214138, %v4019_v32  ;;  %v13929_v0 = vpop.eup %11554  ;;  %11564 = vpow2.f32 %v4175_v38  ;;  %v4177_v12 = vmul.f32 1.442695, %v4154_v52  ;;  %v4152_v2 = vsub.f32 0.0, %v4136_v37 }
0x10fb   :  { %v4053_v63 = vmul.f32 %v13875_v47, %v4037_v57  ;;  %v4038_v14 = vadd.f32 1.4214138, %v4022_v30  ;;  %v4020_v57 = vmul.f32 %v13909_v46, %v4004_v61  ;;  %v3993_v32 = vmul.f32 1.0614054, %v13929_v0  ;;  %v13934_v62 = vpop.eup %11556 }
0x10fc   :  { %v4051_v43 = vmul.f32 %v13882_v3, %v4035_v10  ;;  %11566 = vpow2.f32 %v4171_v33  ;;  %v3949_v30 = vadd.f32 1.0, %v3933_v1  ;;  %v11559_v10 = vpop.eup %11558  ;;  %vm4232_vm11 = vcmp.ge.f32.partialorder %v13887_v23, 0.0 }
0x10fd   :  { %v4069_v19 = vadd.f32 -0.28449672, %v4053_v63  ;;  %v4054_v50 = vmul.f32 %v13898_v34, %v4038_v14  ;;  %v4036_v59 = vadd.f32 1.4214138, %v4020_v57  ;;  %v4009_v53 = vadd.f32 -1.4531521, %v3993_v32 }
0x10fe   :  { %v4067_v44 = vadd.f32 -0.28449672, %v4051_v43  ;;  %v3991_v63 = vmul.f32 1.0614054, %v13934_v62  ;;  %v13941_v37 = vpop.eup %11560  ;;  %11568 = vpow2.f32 %v4177_v12  ;;  %vm4237_vm12 = vcmp.ge.f32.partialorder %v13912_v5, 0.0 }
0x10ff   :  { %v4085_v7 = vmul.f32 %v13875_v47, %v4069_v19  ;;  %v4070_v38 = vadd.f32 -0.28449672, %v4054_v50  ;;  %v4052_v52 = vmul.f32 %v13909_v46, %v4036_v59  ;;  %v4025_v43 = vmul.f32 %v13929_v0, %v4009_v53 }
0x1100   :  { %v4083_v24 = vmul.f32 %v13882_v3, %v4067_v44  ;;  %v4007_v14 = vadd.f32 -1.4531521, %v3991_v63  ;;  %v4173_v19 = vmul.f32 1.442695, %v4152_v2  ;;  %v3994_v44 = vmul.f32 1.0614054, %v13941_v37 }
0x1101   :  { %v4101_v61 = vadd.f32 0.2548296, %v4085_v7  ;;  %v4086_v1 = vmul.f32 %v13898_v34, %v4070_v38  ;;  %v4068_v32 = vadd.f32 -0.28449672, %v4052_v52  ;;  %v4041_v7 = vadd.f32 1.4214138, %v4025_v43 }
0x1102   :  { %v4099_v33 = vadd.f32 0.2548296, %v4083_v24  ;;  %v4023_v59 = vmul.f32 %v13934_v62, %v4007_v14  ;;  %11570 = vrcp.f32 %v3949_v30 }
0x1103   :  { %v4117_v57 = vmul.f32 %v13875_v47, %v4101_v61  ;;  %v4102_v63 = vadd.f32 0.2548296, %v4086_v1  ;;  %v4084_v12 = vmul.f32 %v13909_v46, %v4068_v32  ;;  %v13952_v2 = vpop.eup %11562  ;;  %v4057_v24 = vmul.f32 %v13929_v0, %v4041_v7 }
0x1104   :  { %v4115_v53 = vmul.f32 %v13882_v3, %v4099_v33  ;;  %v4039_v47 = vadd.f32 1.4214138, %v4023_v59  ;;  %v4010_v61 = vadd.f32 -1.4531521, %v3994_v44  ;;  %11572 = vpow2.f32 %v4173_v19 }
0x1105   :  { %v4197_v50 = vmul.f32 %v11549_v26, %v4117_v57  ;;  %v4118_v43 = vmul.f32 %v13898_v34, %v4102_v63  ;;  %v4100_v30 = vadd.f32 0.2548296, %v4084_v12  ;;  %v11565_v26 = vpop.eup %11564  ;;  %v4073_v3 = vadd.f32 -0.28449672, %v4057_v24 }
0x1106   :  { %v4195_v52 = vmul.f32 %v11551_v8, %v4115_v53  ;;  %v4055_v14 = vmul.f32 %v13934_v62, %v4039_v47  ;;  %v4026_v57 = vmul.f32 %v13941_v37, %v4010_v61  ;;  %v3992_v33 = vmul.f32 1.0614054, %v13952_v2  ;;  %v11567_v8 = vpop.eup %11566 }
0x1107   :  { %v4213_v38 = vsub.f32 1.0, %v4197_v50  ;;  %v4198_v7 = vmul.f32 %v13923_v35, %v4118_v43  ;;  %v4116_v19 = vmul.f32 %v13909_v46, %v4100_v30  ;;  %v4089_v34 = vmul.f32 %v13929_v0, %v4073_v3 }
0x1108   :  { %v4211_v32 = vsub.f32 1.0, %v4195_v52  ;;  %v4071_v59 = vadd.f32 -0.28449672, %v4055_v14  ;;  %v4042_v44 = vadd.f32 1.4214138, %v4026_v57  ;;  %v11569_v47 = vpop.eup %11568 }
0x1109   :  { %v4245_v1 = vsub.f32 0.0, %v4213_v38  ;;  %v4008_v50 = vadd.f32 -1.4531521, %v3992_v33  ;;  %v4214_v12 = vsub.f32 1.0, %v4198_v7  ;;  %v4196_v24 = vmul.f32 %v11559_v10, %v4116_v19 }
0x110a   :  { %v4243_v63 = vsub.f32 0.0, %v4211_v32  ;;  %v4105_v28 = vadd.f32 0.2548296, %v4089_v34  ;;  %v4087_v52 = vmul.f32 %v13934_v62, %v4071_v59  ;;  %v4058_v35 = vmul.f32 %v13941_v37, %v4042_v44 }
0x110b   :  { %v4261_v53 = vsel %vm4229_vm4, %v4213_v38, %v4245_v1  ;;  %v4246_v43 = vsub.f32 0.0, %v4214_v12  ;;  %v4212_v30 = vsub.f32 1.0, %v4196_v24  ;;  %v4024_v3 = vmul.f32 %v13952_v2, %v4008_v50 }
0x110c   :  { %v4277_v61 = vadd.f32 1.0, %v4261_v53  ;;  %v4259_v46 = vsel %vm4227_vm5, %v4211_v32, %v4243_v63  ;;  %v13971_v14 = vpop.eup %11570  ;;  %v4121_v10 = vmul.f32 %v13929_v0, %v4105_v28  ;;  %v4103_v38 = vadd.f32 0.2548296, %v4087_v52 }
0x110d   :  { %v13976_v57 = vmul.f32 0.70710677, %v13927_v49  ;;  %v4262_v33 = vsel %vm4230_vm6, %v4214_v12, %v4246_v43  ;;  %v4244_v1 = vsub.f32 0.0, %v4212_v30  ;;  %v4074_v40 = vadd.f32 -0.28449672, %v4058_v35 }
0x110e   :  { %v4293_v45 = vmul.f32 %v4277_v61, %v13871_v41  ;;  %v4040_v32 = vadd.f32 1.4214138, %v4024_v3  ;;  %v11573_v7 = vpop.eup %11572  ;;  %v4275_v19 = vadd.f32 1.0, %v4259_v46  ;;  %v4278_v34 = vadd.f32 1.0, %v4262_v33 }
0x110f   :  { %v4201_v59 = vmul.f32 %v11565_v26, %v4121_v10  ;;  %v4119_v44 = vmul.f32 %v13934_v62, %v4103_v38  ;;  %v4260_v41 = vsel %vm4228_vm7, %v4212_v30, %v4244_v1  ;;  %v4090_v28 = vmul.f32 %v13941_v37, %v4074_v40 }
0x1110   :  { %v4056_v0 = vmul.f32 %v13952_v2, %v4040_v32  ;;  %v3997_v50 = vmul.f32 1.0614054, %v13971_v14  ;;  %v4294_v55 = vmul.f32 %v4278_v34, %v13880_v42  ;;  %v4276_v53 = vadd.f32 1.0, %v4260_v41 }
0x1111   :  { %v4217_v63 = vsub.f32 1.0, %v4201_v59  ;;  %v4199_v12 = vmul.f32 %v11567_v8, %v4119_v44  ;;  %v4106_v24 = vadd.f32 0.2548296, %v4090_v28  ;;  %v4291_v26 = vmul.f32 %v4275_v19, %v13873_v48 }
0x1112   :  { %v4072_v61 = vadd.f32 -0.28449672, %v4056_v0  ;;  %v4013_v52 = vadd.f32 -1.4531521, %v3997_v50  ;;  %v4308_v62 = vpack.c.bf16 %v4294_v55, %v4293_v45  ;;  %v4292_v11 = vmul.f32 %v4276_v53, %v13894_v58 }
0x1113   :  { %v4249_v35 = vsub.f32 0.0, %v4217_v63  ;;  %v4215_v46 = vsub.f32 1.0, %v4199_v12  ;;  %v4122_v43 = vmul.f32 %v13941_v37, %v4106_v24  ;;  %v3915_v3 = vand.u32 2147483647, %v13976_v57 }
0x1114   :  { %v4088_v30 = vmul.f32 %v13952_v2, %v4072_v61  ;;  %v4307_v42 = vpack.c.bf16 %v4292_v11, %v4291_v26  ;;  %v4029_v10 = vmul.f32 %v13971_v14, %v4013_v52  ;;  %v3881_v33 = vmul.f32 0.5, %v13839_v29 }
0x1115   :  { %v4202_v8 = vmul.f32 %v11569_v47, %v4122_v43  ;;  %v3879_v48 = vmul.f32 0.5, %v13842_v36  ;;  %v3931_v58 = vmul.f32 0.3275911, %v3915_v3  ;;  %v4265_v45 = vsel %vm4233_vm8, %v4217_v63, %v4249_v35 }
0x1116   :  { %v4104_v38 = vadd.f32 0.2548296, %v4088_v30  ;;  %10488 = vmatprep.mubr.msk.bf16.mxu0 %vm390_vm1, %v4307_v42  ;;  %v4247_v37 = vsub.f32 0.0, %v4215_v46  ;;  %v4045_v47 = vadd.f32 1.4214138, %v4029_v10  ;;  %v14002_v29 = vadd.f32 %v13861_v16, %v13802_v60 }
0x1117   :  { %v4218_v1 = vsub.f32 1.0, %v4202_v8  ;;  %10489 = vmatmul.mubr.msk.bf16.vlgmr.msra.gmra.mrb[88].mxu0 %vm390_vm1, %v4308_v62  ;;  %v3947_v32 = vadd.f32 1.0, %v3931_v58  ;;  %v4141_v19 = vmul.f32 %v13912_v5, %v13912_v5  ;;  %v14008_v34 = vadd.f32 %v13802_v60, %v13869_v31 }
0x1118   :  { %v4120_v40 = vmul.f32 %v13952_v2, %v4104_v38  ;;  %v4281_v2 = vadd.f32 1.0, %v4265_v45  ;;  %v14012_v13 = vmul.f32 0.70710677, %v14002_v29  ;;  %v4263_v59 = vsel %vm4231_vm9, %v4215_v46, %v4247_v37 }
0x1119   :  { %v4250_v17 = vsub.f32 0.0, %v4218_v1  ;;  %11574 = vrcp.f32 %v3947_v32  ;;  %v14015_v41 = vmul.f32 0.70710677, %v14008_v34  ;;  %v4061_v0 = vmul.f32 %v13971_v14, %v4045_v47 }
0x111a   :  { %v4200_v36 = vmul.f32 %v11573_v7, %v4120_v40  ;;  %v3882_v7 = vmul.f32 0.5, %v13853_v51  ;;  %v3918_v31 = vand.u32 2147483647, %v14012_v13  ;;  %v4157_v50 = vsub.f32 0.0, %v4141_v19 }
0x111b   :  { %v4266_v44 = vsel %vm4234_vm10, %v4218_v1, %v4250_v17  ;;  %v3916_v55 = vand.u32 2147483647, %v14015_v41  ;;  %v4297_v53 = vmul.f32 %v4281_v2, %v3881_v33  ;;  %v4279_v63 = vadd.f32 1.0, %v4263_v59 }
0x111c   :  { %v4216_v16 = vsub.f32 1.0, %v4200_v36  ;;  %v4282_v28 = vadd.f32 1.0, %v4266_v44  ;;  %v3934_v24 = vmul.f32 0.3275911, %v3918_v31  ;;  %v3880_v61 = vmul.f32 0.5, %v13867_v21 }
0x111d   :  { %v4139_v51 = vmul.f32 %v13976_v57, %v13976_v57  ;;  %v3932_v26 = vmul.f32 0.3275911, %v3916_v55  ;;  %v4077_v35 = vadd.f32 -0.28449672, %v4061_v0  ;;  %v4183_v23 = vmul.f32 1.442695, %v4157_v50 }
0x111e   :  { %v4248_v54 = vsub.f32 0.0, %v4216_v16  ;;  %v4298_v12 = vmul.f32 %v4282_v28, %v3882_v7  ;;  %v3950_v46 = vadd.f32 1.0, %v3934_v24  ;;  %v14027_v30 = vadd.f32 %v13896_v15, %v13802_v60 }
0x111f   :  { %v3948_v43 = vadd.f32 1.0, %v3932_v26  ;;  %v4295_v3 = vmul.f32 %v4279_v63, %v3879_v48  ;;  %v14031_v21 = vadd.f32 %v13802_v60, %v13903_v27  ;;  %v4093_v33 = vmul.f32 %v13971_v14, %v4077_v35 }
0x1120   :  { %v4264_v52 = vsel %vm4232_vm11, %v4216_v16, %v4248_v54  ;;  %v4310_v62 = vpack.c.bf16 %v4298_v12, %v4297_v53  ;;  %11576 = vrcp.f32 %v3950_v46  ;;  %v14034_v10 = vmul.f32 0.70710677, %v14027_v30 }
0x1121   :  { %v4280_v11 = vadd.f32 1.0, %v4264_v52  ;;  %v4155_v58 = vsub.f32 0.0, %v4139_v51  ;;  %11578 = vrcp.f32 %v3948_v43  ;;  %v4142_v45 = vmul.f32 %v14012_v13, %v14012_v13 }
0x1122   :  { %11580 = vpow2.f32 %v4183_v23  ;;  %v3921_v48 = vand.u32 2147483647, %v14034_v10  ;;  %v14044_v27 = vmul.f32 0.70710677, %v14031_v21  ;;  %v14048_v37 = vadd.f32 %v13907_v20, %v13802_v60 }
0x1123   :  { %v4296_v42 = vmul.f32 %v4280_v11, %v3880_v61  ;;  %v14036_v8 = vpop.eup %11574  ;;  %v14053_v47 = vadd.f32 %v13802_v60, %v13914_v22  ;;  %v4109_v32 = vadd.f32 0.2548296, %v4093_v33  ;;  %v4179_v17 = vmul.f32 1.442695, %v4155_v58 }
0x1124   :  { %v3995_v15 = vmul.f32 1.0614054, %v14036_v8  ;;  %v3937_v40 = vmul.f32 0.3275911, %v3921_v48  ;;  %v3919_v36 = vand.u32 2147483647, %v14044_v27  ;;  %v4140_v20 = vmul.f32 %v14015_v41, %v14015_v41 }
0x1125   :  { %v4309_v38 = vpack.c.bf16 %v4296_v42, %v4295_v3  ;;  %v4158_v59 = vsub.f32 0.0, %v4142_v45  ;;  %v14061_v16 = vmul.f32 0.70710677, %v14048_v37  ;;  %v14064_v60 = vmul.f32 0.70710677, %v14053_v47 }
0x1126   :  { %v4011_v1 = vadd.f32 -1.4531521, %v3995_v15  ;;  %v3953_v2 = vadd.f32 1.0, %v3937_v40  ;;  %v3935_v44 = vmul.f32 0.3275911, %v3919_v36  ;;  %v4125_v28 = vmul.f32 %v13971_v14, %v4109_v32 }
0x1127   :  { %10492 = vmatprep.mubr.msk.bf16.mxu0 %vm390_vm1, %v4309_v38  ;;  %v3922_v31 = vand.u32 2147483647, %v14061_v16  ;;  %v4156_v55 = vsub.f32 0.0, %v4140_v20  ;;  %v4185_v63 = vmul.f32 1.442695, %v4158_v59  ;;  %v14081_v38 = vmul.f32 0.5, %v13890_v6 }
0x1128   :  { %10493 = vmatmul.mubr.msk.bf16.gmra.mrb[92].mxu0 %vm390_vm1, %v4310_v62  ;;  %v4027_v19 = vmul.f32 %v14036_v8, %v4011_v1  ;;  %11582 = vrcp.f32 %v3953_v2  ;;  %v3951_v0 = vadd.f32 1.0, %v3935_v44  ;;  %v3920_v24 = vand.u32 2147483647, %v14064_v60 }
0x1129   :  { %11584 = vpow2.f32 %v4179_v17  ;;  %v3938_v12 = vmul.f32 0.3275911, %v3922_v31  ;;  %v4145_v62 = vmul.f32 %v14034_v10, %v14034_v10  ;;  %v4181_v3 = vmul.f32 1.442695, %v4156_v55 }
0x112a   :  { %v4043_v7 = vadd.f32 1.4214138, %v4027_v19  ;;  %v14066_v22 = vpop.eup %11576  ;;  %11586 = vrcp.f32 %v3951_v0  ;;  %v3936_v35 = vmul.f32 0.3275911, %v3920_v24  ;;  %v4143_v1 = vmul.f32 %v14044_v27, %v14044_v27 }
0x112b   :  { %v3998_v50 = vmul.f32 1.0614054, %v14066_v22  ;;  %v14072_v53 = vpop.eup %11578  ;;  %v3954_v11 = vadd.f32 1.0, %v3938_v12  ;;  %v4161_v45 = vsub.f32 0.0, %v4145_v62  ;;  %v14092_v19 = vmul.f32 0.5, %v13927_v49 }
0x112c   :  { %v4059_v54 = vmul.f32 %v14036_v8, %v4043_v7  ;;  %v11581_v61 = vpop.eup %11580  ;;  %v3996_v14 = vmul.f32 1.0614054, %v14072_v53  ;;  %v3952_v42 = vadd.f32 1.0, %v3936_v35  ;;  %v14101_v0 = vmul.f32 0.5, %v14002_v29 }
0x112d   :  { %v4014_v51 = vadd.f32 -1.4531521, %v3998_v50  ;;  %v4205_v26 = vmul.f32 %v11581_v61, %v4125_v28  ;;  %11588 = vrcp.f32 %v3954_v11  ;;  %vm4235_vm13 = vcmp.ge.f32.partialorder %v13976_v57, 0.0 }
0x112e   :  { %v4075_v52 = vadd.f32 -0.28449672, %v4059_v54  ;;  %v4012_v43 = vadd.f32 -1.4531521, %v3996_v14  ;;  %11590 = vpow2.f32 %v4185_v63  ;;  %v4159_v54 = vsub.f32 0.0, %v4143_v1 }
0x112f   :  { %v4030_v23 = vmul.f32 %v14066_v22, %v4014_v51  ;;  %v4221_v48 = vsub.f32 1.0, %v4205_v26  ;;  %11592 = vrcp.f32 %v3952_v42  ;;  %v4191_v55 = vmul.f32 1.442695, %v4161_v45 }
0x1130   :  { %v4091_v46 = vmul.f32 %v14036_v8, %v4075_v52  ;;  %v4028_v15 = vmul.f32 %v14072_v53, %v4012_v43  ;;  %11594 = vpow2.f32 %v4181_v3  ;;  %v14107_v24 = vmul.f32 0.5, %v14008_v34 }
0x1131   :  { %v4046_v58 = vadd.f32 1.4214138, %v4030_v23  ;;  %v4253_v28 = vsub.f32 0.0, %v4221_v48  ;;  %v4144_v29 = vmul.f32 %v14064_v60, %v14064_v60  ;;  %vm4238_vm14 = vcmp.ge.f32.partialorder %v14012_v13, 0.0 }
0x1132   :  { %v4107_v33 = vadd.f32 0.2548296, %v4091_v46  ;;  %v14086_v40 = vpop.eup %11582  ;;  %v4044_v36 = vadd.f32 1.4214138, %v4028_v15  ;;  %v4187_v34 = vmul.f32 1.442695, %v4159_v54  ;;  %11596 = vpow2.f32 %v4191_v55 }
0x1133   :  { %v4062_v17 = vmul.f32 %v14066_v22, %v4046_v58  ;;  %v11585_v6 = vpop.eup %11584  ;;  %v4001_v20 = vmul.f32 1.0614054, %v14086_v40  ;;  %v4269_v11 = vsel %vm4237_vm12, %v4221_v48, %v4253_v28  ;;  %vm4236_vm15 = vcmp.ge.f32.partialorder %v14015_v41, 0.0 }
0x1134   :  { %v4123_v32 = vmul.f32 %v14036_v8, %v4107_v33  ;;  %v4060_v44 = vmul.f32 %v14072_v53, %v4044_v36  ;;  %v4146_v8 = vmul.f32 %v14061_v16, %v14061_v16  ;;  %v14098_v7 = vpop.eup %11586  ;;  %v4160_v5 = vsub.f32 0.0, %v4144_v29 }
0x1135   :  { %v4078_v59 = vadd.f32 -0.28449672, %v4062_v17  ;;  %v4017_v31 = vadd.f32 -1.4531521, %v4001_v20  ;;  %v3999_v63 = vmul.f32 1.0614054, %v14098_v7  ;;  %11598 = vpow2.f32 %v4187_v34 }
0x1136   :  { %v4203_v2 = vmul.f32 %v11585_v6, %v4123_v32  ;;  %v4076_v50 = vadd.f32 -0.28449672, %v4060_v44  ;;  %v4162_v26 = vsub.f32 0.0, %v4146_v8  ;;  %v4285_v20 = vadd.f32 1.0, %v4269_v11 }
0x1137   :  { %v4094_v49 = vmul.f32 %v14066_v22, %v4078_v59  ;;  %v4033_v61 = vmul.f32 %v14086_v40, %v4017_v31  ;;  %v4015_v14 = vadd.f32 -1.4531521, %v3999_v63  ;;  %v14113_v62 = vpop.eup %11588  ;;  %v4189_v55 = vmul.f32 1.442695, %v4160_v5 }
0x1138   :  { %v4219_v12 = vsub.f32 1.0, %v4203_v2  ;;  %v4092_v51 = vmul.f32 %v14072_v53, %v4076_v50  ;;  %v11591_v3 = vpop.eup %11590  ;;  %v4002_v58 = vmul.f32 1.0614054, %v14113_v62  ;;  %vm4241_vm4 = vcmp.ge.f32.partialorder %v14034_v10, 0.0 }
0x1139   :  { %v4110_v52 = vadd.f32 0.2548296, %v4094_v49  ;;  %v4049_v35 = vadd.f32 1.4214138, %v4033_v61  ;;  %v4031_v43 = vmul.f32 %v14098_v7, %v4015_v14  ;;  %v14123_v15 = vpop.eup %11592  ;;  %vm4239_vm5 = vcmp.ge.f32.partialorder %v14044_v27, 0.0 }
0x113a   :  { %v4108_v23 = vadd.f32 0.2548296, %v4092_v51  ;;  %v4251_v42 = vsub.f32 0.0, %v4219_v12  ;;  %v11595_v32 = vpop.eup %11594  ;;  %v4018_v36 = vadd.f32 -1.4531521, %v4002_v58  ;;  %vm4242_vm6 = vcmp.ge.f32.partialorder %v14061_v16, 0.0 }
0x113b   :  { %v4126_v46 = vmul.f32 %v14066_v22, %v4110_v52  ;;  %v4065_v33 = vmul.f32 %v14086_v40, %v4049_v35  ;;  %v4047_v1 = vadd.f32 1.4214138, %v4031_v43  ;;  %v4193_v22 = vmul.f32 1.442695, %v4162_v26 }
0x113c   :  { %v4124_v45 = vmul.f32 %v14072_v53, %v4108_v23  ;;  %v4000_v6 = vmul.f32 1.0614054, %v14123_v15  ;;  %v4267_v8 = vsel %vm4235_vm13, %v4219_v12, %v4251_v42  ;;  %v4034_v53 = vmul.f32 %v14113_v62, %v4018_v36  ;;  %v11597_v34 = vpop.eup %11596 }
0x113d   :  { %v4206_v48 = vmul.f32 %v11591_v3, %v4126_v46  ;;  %v4081_v17 = vadd.f32 -0.28449672, %v4065_v33  ;;  %v4063_v44 = vmul.f32 %v14098_v7, %v4047_v1  ;;  %11600 = vpow2.f32 %v4193_v22 }
0x113e   :  { %v4204_v59 = vmul.f32 %v11595_v32, %v4124_v45  ;;  %v4016_v31 = vadd.f32 -1.4531521, %v4000_v6  ;;  %v4050_v61 = vadd.f32 1.4214138, %v4034_v53  ;;  %v4283_v52 = vadd.f32 1.0, %v4267_v8 }
0x113f   :  { %v4222_v2 = vsub.f32 1.0, %v4206_v48  ;;  %v4097_v28 = vmul.f32 %v14086_v40, %v4081_v17  ;;  %v4079_v50 = vadd.f32 -0.28449672, %v4063_v44  ;;  %v4301_v46 = vmul.f32 %v4285_v20, %v14081_v38  ;;  %v11599_v48 = vpop.eup %11598 }
0x1140   :  { %v4220_v49 = vsub.f32 1.0, %v4204_v59  ;;  %v4032_v29 = vmul.f32 %v14123_v15, %v4016_v31  ;;  %v4066_v11 = vmul.f32 %v14113_v62, %v4050_v61  ;;  %11602 = vpow2.f32 %v4189_v55 }
0x1141   :  { %v4254_v54 = vsub.f32 0.0, %v4222_v2  ;;  %v4113_v63 = vadd.f32 0.2548296, %v4097_v28  ;;  %v4095_v12 = vmul.f32 %v14098_v7, %v4079_v50  ;;  %v4299_v58 = vmul.f32 %v4283_v52, %v14092_v19 }
0x1142   :  { %v4252_v57 = vsub.f32 0.0, %v4220_v49  ;;  %v4048_v35 = vadd.f32 1.4214138, %v4032_v29  ;;  %v4082_v33 = vadd.f32 -0.28449672, %v4066_v11  ;;  %v3890_v61 = vmul.f32 0.5, %v14048_v37 }
0x1143   :  { %v4270_v51 = vsel %vm4238_vm14, %v4222_v2, %v4254_v54  ;;  %v4129_v26 = vmul.f32 %v14086_v40, %v4113_v63  ;;  %v4111_v43 = vadd.f32 0.2548296, %v4095_v12  ;;  %v3889_v63 = vmul.f32 0.5, %v14027_v30  ;;  %v14162_v30 = vpop.permute.xlu0 %4322 }
0x1144   :  { %v4286_v14 = vadd.f32 1.0, %v4270_v51  ;;  %v4268_v23 = vsel %vm4236_vm15, %v4220_v49, %v4252_v57  ;;  %v4064_v5 = vmul.f32 %v14123_v15, %v4048_v35  ;;  %v4098_v41 = vmul.f32 %v14113_v62, %v4082_v33 }
0x1145   :  { %v4284_v3 = vadd.f32 1.0, %v4268_v23  ;;  %v4209_v42 = vmul.f32 %v11597_v34, %v4129_v26  ;;  %v4127_v40 = vmul.f32 %v14098_v7, %v4111_v43  ;;  %vm4240_vm7 = vcmp.ge.f32.partialorder %v14064_v60, 0.0 }
0x1146   :  { %v4302_v13 = vmul.f32 %v4286_v14, %v14101_v0  ;;  %v4080_v32 = vadd.f32 -0.28449672, %v4064_v5  ;;  %v4114_v0 = vadd.f32 0.2548296, %v4098_v41  ;;  %v3887_v27 = vmul.f32 0.5, %v14031_v21 }
0x1147   :  { %v4300_v38 = vmul.f32 %v4284_v3, %v14107_v24  ;;  %v4225_v1 = vsub.f32 1.0, %v4209_v42  ;;  %v4207_v22 = vmul.f32 %v11599_v48, %v4127_v40  ;;  %v11601_v20 = vpop.eup %11600  ;;  %v3888_v12 = vmul.f32 0.5, %v14053_v47 }
0x1148   :  { %v4312_v45 = vpack.c.bf16 %v4302_v13, %v4301_v46  ;;  %v4096_v6 = vmul.f32 %v14123_v15, %v4080_v32  ;;  %v4130_v7 = vmul.f32 %v14113_v62, %v4114_v0 }
0x1149   :  { %v4311_v17 = vpack.c.bf16 %v4300_v38, %v4299_v58  ;;  %v4223_v36 = vsub.f32 1.0, %v4207_v22  ;;  %v4257_v19 = vsub.f32 0.0, %v4225_v1 }
0x114a   :  { %v4112_v2 = vadd.f32 0.2548296, %v4096_v6  ;;  %v4210_v24 = vmul.f32 %v11601_v20, %v4130_v7  ;;  %v11603_v59 = vpop.eup %11602  ;;  %v16887_v6 = vld [vmem:[#allocation8_spill] sm:$0xff] }
0x114b   :  { %10496 = vmatprep.mubr.msk.bf16.mxu0 %vm390_vm1, %v4311_v17  ;;  %v4255_v44 = vsub.f32 0.0, %v4223_v36  ;;  %v4273_v28 = vsel %vm4241_vm4, %v4225_v1, %v4257_v19  ;;  %v16885_v17 = vld [vmem:[#allocation7_spill] sm:$0xff] }
0x114c   :  { %10497 = vmatmul.mubr.msk.bf16.gmra.mrb[96].mxu0 %vm390_vm1, %v4312_v45  ;;  %v4128_v8 = vmul.f32 %v14123_v15, %v4112_v2  ;;  %v4226_v53 = vsub.f32 1.0, %v4210_v24  ;;  %v4289_v49 = vadd.f32 1.0, %v4273_v28  ;;  %v16889_v28 = vld [vmem:[#allocation9_spill] sm:$0xff] }
0x114d   :  { %v4271_v62 = vsel %vm4239_vm5, %v4223_v36, %v4255_v44 }
0x114e   :  { %v4208_v31 = vmul.f32 %v11603_v59, %v4128_v8  ;;  %v4258_v54 = vsub.f32 0.0, %v4226_v53  ;;  %v4287_v52 = vadd.f32 1.0, %v4271_v62  ;;  %v4305_v15 = vmul.f32 %v4289_v49, %v3889_v63  ;;  %v16891_v49 = vld [vmem:[#allocation10_spill] sm:$0xff] }
0x1150   :  { %v4224_v50 = vsub.f32 1.0, %v4208_v31  ;;  %v4274_v55 = vsel %vm4242_vm6, %v4226_v53, %v4258_v54  ;;  %v4303_v26 = vmul.f32 %v4287_v52, %v3887_v27 }
0x1151   :  { %v4290_v10 = vadd.f32 1.0, %v4274_v55 }
0x1152   :  { %v4256_v29 = vsub.f32 0.0, %v4224_v50 }
0x1153   :  { %v4306_v51 = vmul.f32 %v4290_v10, %v3890_v61  ;;  %v16895_v61 = vld [vmem:[#allocation12_spill] sm:$0xff] }
0x1154   :  { %v4272_v57 = vsel %vm4240_vm7, %v4224_v50, %v4256_v29  ;;  %v16893_v50 = vld [vmem:[#allocation11_spill] sm:$0xff] }
0x1155   :  { %v4288_v14 = vadd.f32 1.0, %v4272_v57  ;;  %v4314_v16 = vpack.c.bf16 %v4306_v51, %v4305_v15 }
0x1157   :  { %v4304_v11 = vmul.f32 %v4288_v14, %v3888_v12 }
0x1159   :  { %v4313_v35 = vpack.c.bf16 %v4304_v11, %v4303_v26  ;;  %v16897_v26 = vld [vmem:[#allocation13_spill] sm:$0xff] }
0x115b   :  { %10500 = vmatprep.mubr.msk.bf16.mxu0 %vm390_vm1, %v4313_v35 }
0x115c   :  { %10501 = vmatmul.mubr.msk.bf16.gmra.mrb[100].mxu0 %vm390_vm1, %v4314_v16 }
0x11ea   :  { %v10490_v37 = vpop.f32.mrb[88].mxu0 }
0x11eb   :  { %v4398_v60 = vadd.f32 %v10490_v37, %v14162_v30  ;;  %v4389_v34 = vpop.f32.mrb[89].mxu0 }
0x11ec   :  { %v4390_v46 = vadd.f32 %v4389_v34, %v14162_v30  ;;  %v10491_v21 = vpop.f32.mrb[90].mxu0 }
0x11ed   :  { %v14167_v47 = vadd.f32 %v4398_v60, %v13508_v18  ;;  %v4392_v23 = vpop.f32.mrb[91].mxu0  ;;  %v4401_v3 = vadd.f32 %v10491_v21, %v14162_v30  ;;  %v16899_v60 = vld [vmem:[#allocation14_spill] sm:$0xff] }
0x11ee   :  { %v14170_v43 = vadd.f32 %v4390_v46, %v13502_v39  ;;  %v4393_v13 = vadd.f32 %v4392_v23, %v14162_v30  ;;  %v16901_v46 = vld [vmem:[#allocation15_spill] sm:$0xff] }
0x11ef   :  { %16879 = vst [vmem:[#allocation17_spill] sm:$0xff] %v14167_v47  ;;  %v4475_v42 = vsel %vm100_vm0, %v14167_v47, 0.0  ;;  %v14184_v39 = vadd.f32 %v4401_v3, %v13523_v4 }
0x11f0   :  { %16880 = vst [vmem:[#allocation18_spill] sm:$0xff] %v14170_v43  ;;  %v14177_v33 = vadd.f32 %v4393_v13, %v13514_v9  ;;  %4476 = vadd.xlane.f32.xlu0 %v4475_v42  ;;  %v4469_v58 = vsel %vm100_vm0, %v14170_v43, 0.0  ;;  %v16903_v13 = vld [vmem:[#allocation16_spill] sm:$0xff] }
0x11f1   :  { %4470 = vadd.xlane.f32.xlu1 %v4469_v58  ;;  %16882 = vst [vmem:[#allocation20_spill] sm:$0xff] %v14184_v39  ;;  %v4478_v40 = vsel %vm100_vm0, %v14184_v39, 0.0 }
0x11f2   :  { %16881 = vst [vmem:[#allocation19_spill] sm:$0xff] %v14177_v33  ;;  %v4472_v18 = vsel %vm100_vm0, %v14177_v33, 0.0 }
0x11f4   :  { %4473 = vadd.xlane.f32.xlu0 %v4472_v18 }
0x11f8   :  { %4479 = vadd.xlane.f32.xlu0 %v4478_v40 }
0x11fb   :  { %v10494_v5 = vpop.f32.mrb[92].mxu0 }
0x11fc   :  { %v4405_v48 = vpop.f32.mrb[93].mxu0  ;;  %v4414_v9 = vadd.f32 %v10494_v5, %v14162_v30 }
0x11fd   :  { %v4406_v45 = vadd.f32 %v4405_v48, %v14162_v30  ;;  %v10495_v38 = vpop.f32.mrb[94].mxu0 }
0x11fe   :  { %v4408_v1 = vpop.f32.mrb[95].mxu0  ;;  %v4417_v22 = vadd.f32 %v10495_v38, %v14162_v30  ;;  %v14196_v32 = vadd.f32 %v4414_v9, %v13553_v56 }
0x11ff   :  { %v14191_v41 = vadd.f32 %v4406_v45, %v13534_v25  ;;  %v4409_v4 = vadd.f32 %v4408_v1, %v14162_v30 }
0x1200   :  { %16884 = vst [vmem:[#allocation22_spill] sm:$0xff] %v14196_v32  ;;  %v14204_v20 = vadd.f32 %v4417_v22, %v16887_v6  ;;  %v4487_v19 = vsel %vm100_vm0, %v14196_v32, 0.0 }
0x1201   :  { %16883 = vst [vmem:[#allocation21_spill] sm:$0xff] %v14191_v41  ;;  %v14199_v0 = vadd.f32 %v4409_v4, %v16885_v17  ;;  %v4481_v36 = vsel %vm100_vm0, %v14191_v41, 0.0 }
0x1202   :  { %4482 = vadd.xlane.f32.xlu1 %v4481_v36  ;;  %16888 = vst [vmem:[#allocation8_spill] sm:$0xff] %v14204_v20  ;;  %v4490_v56 = vsel %vm100_vm0, %v14204_v20, 0.0 }
0x1203   :  { %16886 = vst [vmem:[#allocation7_spill] sm:$0xff] %v14199_v0  ;;  %v4484_v25 = vsel %vm100_vm0, %v14199_v0, 0.0 }
0x1204   :  { %4485 = vadd.xlane.f32.xlu0 %v4484_v25 }
0x1206   :  { %4488 = vadd.xlane.f32.xlu1 %v4487_v19 }
0x1208   :  { %4491 = vadd.xlane.f32.xlu0 %v4490_v56 }
0x121f   :  { %v10498_v7 = vpop.f32.mrb[96].mxu0 }
0x1220   :  { %v4421_v2 = vpop.f32.mrb[97].mxu0  ;;  %v4430_v24 = vadd.f32 %v10498_v7, %v14162_v30 }
0x1221   :  { %v4422_v59 = vadd.f32 %v4421_v2, %v14162_v30  ;;  %v10499_v44 = vpop.f32.mrb[98].mxu0 }
0x1222   :  { %v4424_v8 = vpop.f32.mrb[99].mxu0  ;;  %v4433_v31 = vadd.f32 %v10499_v44, %v14162_v30  ;;  %v14220_v62 = vadd.f32 %v4430_v24, %v16891_v49 }
0x1223   :  { %v14215_v53 = vadd.f32 %v4422_v59, %v16889_v28  ;;  %v4425_v54 = vadd.f32 %v4424_v8, %v14162_v30 }
0x1224   :  { %16892 = vst [vmem:[#allocation10_spill] sm:$0xff] %v14220_v62  ;;  %v14228_v10 = vadd.f32 %v4433_v31, %v16895_v61  ;;  %v4499_v52 = vsel %vm100_vm0, %v14220_v62, 0.0 }
0x1225   :  { %16890 = vst [vmem:[#allocation9_spill] sm:$0xff] %v14215_v53  ;;  %v14223_v55 = vadd.f32 %v4425_v54, %v16893_v50  ;;  %v4493_v63 = vsel %vm100_vm0, %v14215_v53, 0.0 }
0x1226   :  { %4494 = vadd.xlane.f32.xlu1 %v4493_v63  ;;  %16896 = vst [vmem:[#allocation12_spill] sm:$0xff] %v14228_v10  ;;  %v4502_v15 = vsel %vm100_vm0, %v14228_v10, 0.0 }
0x1227   :  { %16894 = vst [vmem:[#allocation11_spill] sm:$0xff] %v14223_v55  ;;  %v4496_v29 = vsel %vm100_vm0, %v14223_v55, 0.0 }
0x1228   :  { %4497 = vadd.xlane.f32.xlu0 %v4496_v29 }
0x122a   :  { %4500 = vadd.xlane.f32.xlu1 %v4499_v52 }
0x122c   :  { %4503 = vadd.xlane.f32.xlu0 %v4502_v15 }
0x122f   :  { %v10502_v51 = vpop.f32.mrb[100].mxu0 }
0x1230   :  { %v4437_v57 = vpop.f32.mrb[101].mxu0  ;;  %v4446_v27 = vadd.f32 %v10502_v51, %v14162_v30 }
0x1231   :  { %v4438_v12 = vadd.f32 %v4437_v57, %v14162_v30  ;;  %v10503_v14 = vpop.f32.mrb[102].mxu0 }
0x1232   :  { %v4440_v16 = vpop.f32.mrb[103].mxu0  ;;  %v4449_v35 = vadd.f32 %v10503_v14, %v14162_v30  ;;  %v14244_v34 = vadd.f32 %v4446_v27, %v16899_v60 }
0x1233   :  { %v14239_v11 = vadd.f32 %v4438_v12, %v16897_v26  ;;  %v4441_v37 = vadd.f32 %v4440_v16, %v14162_v30 }
0x1234   :  { %16900 = vst [vmem:[#allocation14_spill] sm:$0xff] %v14244_v34  ;;  %v14252_v3 = vadd.f32 %v4449_v35, %v16903_v13  ;;  %v4511_v30 = vsel %vm100_vm0, %v14244_v34, 0.0 }
0x1235   :  { %16898 = vst [vmem:[#allocation13_spill] sm:$0xff] %v14239_v11  ;;  %v14247_v21 = vadd.f32 %v4441_v37, %v16901_v46  ;;  %v4505_v23 = vsel %vm100_vm0, %v14239_v11, 0.0 }
0x1236   :  { %4506 = vadd.xlane.f32.xlu1 %v4505_v23  ;;  %16904 = vst [vmem:[#allocation16_spill] sm:$0xff] %v14252_v3  ;;  %v4514_v58 = vsel %vm100_vm0, %v14252_v3, 0.0 }
0x1237   :  { %16902 = vst [vmem:[#allocation15_spill] sm:$0xff] %v14247_v21  ;;  %v4508_v42 = vsel %vm100_vm0, %v14247_v21, 0.0 }
0x1238   :  { %4509 = vadd.xlane.f32.xlu0 %v4508_v42 }
0x123a   :  { %4512 = vadd.xlane.f32.xlu1 %v4511_v30 }
0x123c   :  { %4515 = vadd.xlane.f32.xlu0 %v4514_v58 }
0x127d   :  { %v4477_v18 = vpop.xlane.xlu0 %4476 }
0x127e   :  { %v4519_v40 = vmul.f32 0.03125, %v4477_v18  ;;  %v4471_v5 = vpop.xlane.xlu1 %4470 }
0x127f   :  { %v4517_v48 = vmul.f32 0.03125, %v4471_v5 }
0x1280   :  { %v14261_v9 = vsub.f32 %v14167_v47, %v4519_v40 }
0x1281   :  { %v14264_v45 = vsub.f32 %v14170_v43, %v4517_v48  ;;  %v4474_v38 = vpop.xlane.xlu0 %4473 }
0x1282   :  { %v4518_v1 = vmul.f32 0.03125, %v4474_v38  ;;  %v4551_v6 = vmul.f32 %v14261_v9, %v14261_v9 }
0x1283   :  { %v4549_v22 = vmul.f32 %v14264_v45, %v14264_v45 }
0x1284   :  { %v14269_v4 = vsub.f32 %v14177_v33, %v4518_v1  ;;  %v4571_v2 = vsel %vm100_vm0, %v4551_v6, 0.0 }
0x1285   :  { %v4480_v17 = vpop.xlane.xlu0 %4479  ;;  %v4565_v36 = vsel %vm100_vm0, %v4549_v22, 0.0 }
0x1286   :  { %v4520_v25 = vmul.f32 0.03125, %v4480_v17  ;;  %4566 = vadd.xlane.f32.xlu1 %v4565_v36  ;;  %v4550_v19 = vmul.f32 %v14269_v4, %v14269_v4 }
0x1288   :  { %v14277_v56 = vsub.f32 %v14184_v39, %v4520_v25  ;;  %v4568_v7 = vsel %vm100_vm0, %v4550_v19, 0.0 }
0x1289   :  { %4569 = vadd.xlane.f32.xlu0 %v4568_v7 }
0x128a   :  { %4572 = vadd.xlane.f32.xlu1 %v4571_v2  ;;  %v4552_v24 = vmul.f32 %v14277_v56, %v14277_v56 }
0x128c   :  { %v4574_v59 = vsel %vm100_vm0, %v4552_v24, 0.0 }
0x128d   :  { %4575 = vadd.xlane.f32.xlu0 %v4574_v59 }
0x128f   :  { %v4483_v44 = vpop.xlane.xlu1 %4482 }
0x1290   :  { %v4521_v8 = vmul.f32 0.03125, %v4483_v44 }
0x1291   :  { %v4486_v28 = vpop.xlane.xlu0 %4485 }
0x1292   :  { %v14285_v31 = vsub.f32 %v14191_v41, %v4521_v8  ;;  %v4522_v54 = vmul.f32 0.03125, %v4486_v28 }
0x1293   :  { %v4489_v49 = vpop.xlane.xlu1 %4488 }
0x1294   :  { %v14288_v50 = vsub.f32 %v14199_v0, %v4522_v54  ;;  %v4523_v63 = vmul.f32 0.03125, %v4489_v49  ;;  %v4553_v61 = vmul.f32 %v14285_v31, %v14285_v31 }
0x1295   :  { %v4492_v29 = vpop.xlane.xlu0 %4491 }
0x1296   :  { %v14293_v52 = vsub.f32 %v14196_v32, %v4523_v63  ;;  %v4524_v15 = vmul.f32 0.03125, %v4492_v29  ;;  %v4577_v51 = vsel %vm100_vm0, %v4553_v61, 0.0  ;;  %v4554_v57 = vmul.f32 %v14288_v50, %v14288_v50 }
0x1297   :  { %4578 = vadd.xlane.f32.xlu1 %v4577_v51 }
0x1298   :  { %v14299_v27 = vsub.f32 %v14204_v20, %v4524_v15  ;;  %v4580_v12 = vsel %vm100_vm0, %v4554_v57, 0.0  ;;  %v4555_v14 = vmul.f32 %v14293_v52, %v14293_v52 }
0x1299   :  { %4581 = vadd.xlane.f32.xlu0 %v4580_v12 }
0x129a   :  { %v4583_v16 = vsel %vm100_vm0, %v4555_v14, 0.0  ;;  %v4556_v26 = vmul.f32 %v14299_v27, %v14299_v27 }
0x129b   :  { %4584 = vadd.xlane.f32.xlu1 %v4583_v16 }
0x129c   :  { %v4586_v35 = vsel %vm100_vm0, %v4556_v26, 0.0 }
0x129d   :  { %4587 = vadd.xlane.f32.xlu0 %v4586_v35 }
0x12b3   :  { %v4495_v37 = vpop.xlane.xlu1 %4494 }
0x12b4   :  { %v4525_v46 = vmul.f32 0.03125, %v4495_v37  ;;  %v14359_v37 = vld [vmem:[%s16787_s1 + $0x1] ss:$0 sm:$0xff] }
0x12b5   :  { %v4498_v60 = vpop.xlane.xlu0 %4497 }
0x12b6   :  { %v4526_v23 = vmul.f32 0.03125, %v4498_v60  ;;  %v14312_v18 = vsub.f32 %v14215_v53, %v4525_v46  ;;  %v12036_v60 = vld [vmem:[%s16787_s1 + $0x4] ss:$0 sm:$0xff] }
0x12b7   :  { %v4501_v13 = vpop.xlane.xlu1 %4500  ;;  %v16905_v46 = vld [vmem:[#allocation5_spill] sm:$0xff] }
0x12b8   :  { %v14309_v42 = vsub.f32 %v14223_v55, %v4526_v23  ;;  %v4527_v30 = vmul.f32 0.03125, %v4501_v13  ;;  %v4557_v6 = vmul.f32 %v14312_v18, %v14312_v18  ;;  %v18_v23 = vadd.s32 8, %v16905_v46 }
0x12b9   :  { %v4504_v58 = vpop.xlane.xlu0 %4503  ;;  %v16906_v13 = vlaneseq }
0x12ba   :  { %v14315_v40 = vsub.f32 %v14220_v62, %v4527_v30  ;;  %v4528_v5 = vmul.f32 0.03125, %v4504_v58  ;;  %v4558_v48 = vmul.f32 %v14309_v42, %v14309_v42  ;;  %v4589_v19 = vsel %vm100_vm0, %v4557_v6, 0.0 }
0x12bb   :  { %v14369_v30 = vand.u32 127, %v16906_v13  ;;  %v19_v58 = vadd.s32 16, %v16905_v46  ;;  %v23_v6 = vadd.s32 48, %v16905_v46 }
0x12bc   :  { %v14320_v38 = vsub.f32 %v14228_v10, %v4528_v5  ;;  %v4592_v1 = vsel %vm100_vm0, %v4558_v48, 0.0  ;;  %v4559_v22 = vmul.f32 %v14315_v40, %v14315_v40  ;;  %v20_v5 = vadd.s32 24, %v16905_v46 }
0x12bd   :  { %4593 = vadd.xlane.f32.xlu0 %v4592_v1  ;;  %vm35_vm8 = vcmp.eq.s32.totalorder %v16905_v46, %v14369_v30  ;;  %vm36_vm9 = vcmp.eq.s32.totalorder %v18_v23, %v14369_v30  ;;  %vm37_vm10 = vcmp.eq.s32.totalorder %v19_v58, %v14369_v30  ;;  %v21_v48 = vadd.s32 32, %v16905_v46 }
0x12be   :  { %v4595_v17 = vsel %vm100_vm0, %v4559_v22, 0.0  ;;  %v4560_v36 = vmul.f32 %v14320_v38, %v14320_v38  ;;  %vm14378_vm11 = vmpackc.low %vm36_vm9, %vm35_vm8  ;;  %v16907_v1 = vmov 0  ;;  %vm38_vm12 = vcmp.eq.s32.totalorder %v20_v5, %v14369_v30 }
0x12bf   :  { %4596 = vadd.xlane.f32.xlu1 %v4595_v17  ;;  %v16908_v1 = vsel %vm14378_vm11, 4294967295, %v16907_v1  ;;  %v22_v22 = vadd.s32 40, %v16905_v46  ;;  %v16810_v17 = vmov 1.0|1.0   ;;  %vm14387_vm13 = vmpackc.low %vm38_vm12, %vm37_vm10  ;;  %vm39_vm14 = vcmp.eq.s32.totalorder %v21_v48, %v14369_v30 }
0x12c0   :  { %v4598_v25 = vsel %vm100_vm0, %v4560_v36, 0.0  ;;  %16909 = vst [vmem:[#allocation5_spill] sm:$0xff] %v16908_v1  ;;  %10969 = vmatprep.subr.msk.bf16.mxu1 %vm14378_vm11, %v16810_v17  ;;  %v16910_v36 = vmov 0  ;;  %vm41_vm5 = vcmp.eq.s32.totalorder %v23_v6, %v14369_v30 }
0x12c1   :  { %4599 = vadd.xlane.f32.xlu0 %v4598_v25  ;;  %v16911_v36 = vsel %vm14387_vm13, 4294967295, %v16910_v36  ;;  %v24_v25 = vadd.s32 56, %v16905_v46  ;;  %10971 = vmatpush3.bf16.msk.msra.mxu1 %vm14378_vm11, %v16810_v17  ;;  %vm40_vm15 = vcmp.eq.s32.totalorder %v22_v22, %v14369_v30 }
0x12c2   :  { %16912 = vst [vmem:[#allocation23_spill] sm:$0xff] %v16911_v36  ;;  %10973 = vmatprep.subr.msk.bf16.mxu1 %vm14387_vm13, %v16810_v17  ;;  %vm14401_vm4 = vmpackc.low %vm40_vm15, %vm39_vm14 }
0x12c3   :  { %4590 = vadd.xlane.f32.xlu1 %v4589_v19  ;;  %v4507_v7 = vpop.xlane.xlu1 %4506  ;;  %v16913_v19 = vmov 0  ;;  %vm42_vm6 = vcmp.eq.s32.totalorder %v24_v25, %v14369_v30 }
0x12c4   :  { %v4529_v24 = vmul.f32 0.03125, %v4507_v7  ;;  %v16914_v19 = vsel %vm14401_vm4, 4294967295, %v16913_v19  ;;  %v25_v7 = vadd.s32 64, %v16905_v46  ;;  %vm14415_vm7 = vmpackc.low %vm42_vm6, %vm41_vm5 }
0x12c5   :  { %v4510_v2 = vpop.xlane.xlu0 %4509  ;;  %16915 = vst [vmem:[#allocation24_spill] sm:$0xff] %v16914_v19  ;;  %10975 = vmatpush3.bf16.msk.msra.mxu1 %vm14387_vm13, %v16810_v17 }
0x12c6   :  { %v4530_v59 = vmul.f32 0.03125, %v4510_v2  ;;  %v14336_v49 = vsub.f32 %v14239_v11, %v4529_v24  ;;  %v26_v2 = vadd.s32 72, %v16905_v46  ;;  %10977 = vmatprep.subr.msk.bf16.mxu1 %vm14401_vm4, %v16810_v17  ;;  %v16916_v24 = vmov 0 }
0x12c7   :  { %v4513_v44 = vpop.xlane.xlu1 %4512  ;;  %v16917_v24 = vsel %vm14415_vm7, 4294967295, %v16916_v24  ;;  %vm43_vm8 = vcmp.eq.s32.totalorder %v25_v7, %v14369_v30 }
0x12c8   :  { %v14333_v8 = vsub.f32 %v14247_v21, %v4530_v59  ;;  %v4531_v28 = vmul.f32 0.03125, %v4513_v44  ;;  %v4561_v16 = vmul.f32 %v14336_v49, %v14336_v49  ;;  %16918 = vst [vmem:[#allocation25_spill] sm:$0xff] %v16917_v24  ;;  %vm44_vm9 = vcmp.eq.s32.totalorder %v26_v2, %v14369_v30 }
0x12c9   :  { %v4516_v54 = vpop.xlane.xlu0 %4515  ;;  %v27_v59 = vadd.s32 80, %v16905_v46  ;;  %v28_v44 = vadd.s32 88, %v16905_v46  ;;  %10979 = vmatpush3.bf16.msk.msra.mxu1 %vm14401_vm4, %v16810_v17  ;;  %vm14429_vm10 = vmpackc.low %vm44_vm9, %vm43_vm8 }
0x12ca   :  { %v14339_v63 = vsub.f32 %v14244_v34, %v4531_v28  ;;  %v4532_v61 = vmul.f32 0.03125, %v4516_v54  ;;  %v4562_v29 = vmul.f32 %v14333_v8, %v14333_v8  ;;  %v4601_v35 = vsel %vm100_vm0, %v4561_v16, 0.0  ;;  %10981 = vmatprep.subr.msk.bf16.mxu1 %vm14415_vm7, %v16810_v17 }
0x12cb   :  { %vm45_vm12 = vcmp.eq.s32.totalorder %v27_v59, %v14369_v30  ;;  %vm46_vm14 = vcmp.eq.s32.totalorder %v28_v44, %v14369_v30  ;;  %v16925_v16 = vmov 0 }
0x12cc   :  { %v14344_v15 = vsub.f32 %v14252_v3, %v4532_v61  ;;  %v4604_v51 = vsel %vm100_vm0, %v4562_v29, 0.0  ;;  %v4563_v57 = vmul.f32 %v14339_v63, %v14339_v63  ;;  %v16919_v61 = vmov 0  ;;  %vm14443_vm15 = vmpackc.low %vm46_vm14, %vm45_vm12 }
0x12cd   :  { %4605 = vadd.xlane.f32.xlu0 %v4604_v51  ;;  %v16920_v61 = vsel %vm14429_vm10, 4294967295, %v16919_v61  ;;  %v29_v29 = vadd.s32 96, %v16905_v46  ;;  %v30_v51 = vadd.s32 104, %v16905_v46  ;;  %10983 = vmatpush3.bf16.msk.msra.mxu1 %vm14415_vm7, %v16810_v17 }
0x12ce   :  { %v4607_v12 = vsel %vm100_vm0, %v4563_v57, 0.0  ;;  %v4564_v14 = vmul.f32 %v14344_v15, %v14344_v15  ;;  %16921 = vst [vmem:[#allocation26_spill] sm:$0xff] %v16920_v61  ;;  %10985 = vmatprep.subr.msk.bf16.mxu1 %vm14429_vm10, %v16810_v17 }
0x12cf   :  { %4608 = vadd.xlane.f32.xlu1 %v4607_v12  ;;  %v16922_v12 = vmov 0  ;;  %vm47_vm5 = vcmp.eq.s32.totalorder %v29_v29, %v14369_v30  ;;  %vm48_vm6 = vcmp.eq.s32.totalorder %v30_v51, %v14369_v30 }
0x12d0   :  { %v4610_v26 = vsel %vm100_vm0, %v4564_v14, 0.0  ;;  %v16923_v12 = vsel %vm14443_vm15, 4294967295, %v16922_v12  ;;  %vm14455_vm8 = vmpackc.low %vm48_vm6, %vm47_vm5 }
0x12d1   :  { %4611 = vadd.xlane.f32.xlu0 %v4610_v26  ;;  %16924 = vst [vmem:[#allocation27_spill] sm:$0xff] %v16923_v12  ;;  %10987 = vmatpush3.bf16.msk.msra.mxu1 %vm14429_vm10, %v16810_v17  ;;  %v16926_v16 = vsel %vm14455_vm8, 4294967295, %v16925_v16 }
0x12d2   :  { %10989 = vmatprep.subr.msk.bf16.mxu1 %vm14443_vm15, %v16810_v17  ;;  %16927 = vst [vmem:[#allocation28_spill] sm:$0xff] %v16926_v16 }
0x12d3   :  { %4602 = vadd.xlane.f32.xlu1 %v4601_v35 }
0x12d5   :  { %10991 = vmatpush3.bf16.msk.msra.mxu1 %vm14443_vm15, %v16810_v17 }
0x12d6   :  { %10993 = vmatprep.subr.msk.bf16.mxu1 %vm14455_vm8, %v16810_v17 }
0x12d9   :  { %10995 = vmatpush3.bf16.msk.msra.mxu1 %vm14455_vm8, %v16810_v17 }
0x12e4   :  { %4677 = vrot.lane.b32.xlu1 %v12036_v60, %s12070_s14 }
0x12e7   :  { %4859 = vrot.lane.b32.xlu0 %v14359_v37, %s12062_s27 }
0x1313   :  { %v4567_v54 = vpop.xlane.xlu1 %4566 }
0x1314   :  { %v4613_v13 = vmul.f32 0.03125, %v4567_v54 }
0x1316   :  { %v4570_v28 = vpop.xlane.xlu0 %4569  ;;  %v4629_v25 = vadd.f32 1e-06, %v4613_v13 }
0x1317   :  { %v4573_v14 = vpop.xlane.xlu1 %4572  ;;  %v4614_v5 = vmul.f32 0.03125, %v4570_v28 }
0x1318   :  { %v4615_v7 = vmul.f32 0.03125, %v4573_v14  ;;  %11604 = vrsqrt.f32 %v4629_v25 }
0x1319   :  { %v4630_v2 = vadd.f32 1e-06, %v4614_v5 }
0x131a   :  { %v4576_v57 = vpop.xlane.xlu0 %4575  ;;  %v4631_v17 = vadd.f32 1e-06, %v4615_v7 }
0x131b   :  { %11606 = vrsqrt.f32 %v4630_v2 }
0x1324   :  { %v4579_v35 = vpop.xlane.xlu1 %4578 }
0x1325   :  { %v4617_v22 = vmul.f32 0.03125, %v4579_v35 }
0x1326   :  { %v4582_v26 = vpop.xlane.xlu0 %4581 }
0x1327   :  { %v4618_v6 = vmul.f32 0.03125, %v4582_v26  ;;  %v4633_v29 = vadd.f32 1e-06, %v4617_v22  ;;  %v4616_v26 = vmul.f32 0.03125, %v4576_v57 }
0x1328   :  { %v4585_v23 = vpop.xlane.xlu1 %4584 }
0x1329   :  { %v4619_v59 = vmul.f32 0.03125, %v4585_v23  ;;  %v4634_v3 = vadd.f32 1e-06, %v4618_v6  ;;  %11608 = vrsqrt.f32 %v4633_v29  ;;  %v4632_v5 = vadd.f32 1e-06, %v4616_v26  ;;  %v11605_v6 = vpop.eup %11604 }
0x132a   :  { %v4588_v60 = vpop.xlane.xlu0 %4587  ;;  %v11607_v25 = vpop.eup %11606 }
0x132b   :  { %v4620_v51 = vmul.f32 0.03125, %v4588_v60  ;;  %v4635_v54 = vadd.f32 1e-06, %v4619_v59  ;;  %11610 = vrsqrt.f32 %v4634_v3 }
0x132c   :  { %11612 = vrsqrt.f32 %v4631_v17 }
0x132d   :  { %v4636_v28 = vadd.f32 1e-06, %v4620_v51  ;;  %11614 = vrsqrt.f32 %v4635_v54 }
0x132f   :  { %11616 = vrsqrt.f32 %v4636_v28 }
0x134a   :  { %v4594_v48 = vpop.xlane.xlu0 %4593 }
0x134b   :  { %v4622_v21 = vmul.f32 0.03125, %v4594_v48 }
0x134c   :  { %v4597_v58 = vpop.xlane.xlu1 %4596 }
0x134d   :  { %v4623_v10 = vmul.f32 0.03125, %v4597_v58  ;;  %v4638_v14 = vadd.f32 1e-06, %v4622_v21  ;;  %v11609_v21 = vpop.eup %11608 }
0x134e   :  { %v4600_v34 = vpop.xlane.xlu0 %4599  ;;  %v14469_v54 = vmul.f32 %v11609_v21, %v14285_v31 }
0x134f   :  { %v4624_v35 = vmul.f32 0.03125, %v4600_v34  ;;  %v4639_v13 = vadd.f32 1e-06, %v4623_v10  ;;  %11618 = vrsqrt.f32 %v4638_v14  ;;  %v14475_v14 = vmul.f32 %v11605_v6, %v14264_v45 }
0x1350   :  { %v4591_v44 = vpop.xlane.xlu1 %4590  ;;  %v4846_v45 = vmul.f32 %v14359_v37, %v14469_v54 }
0x1351   :  { %v4621_v11 = vmul.f32 0.03125, %v4591_v44  ;;  %v4640_v60 = vadd.f32 1e-06, %v4624_v35 }
0x1353   :  { %v4637_v23 = vadd.f32 1e-06, %v4621_v11  ;;  %v11611_v11 = vpop.eup %11610 }
0x1354   :  { %v11613_v7 = vpop.eup %11612  ;;  %v14472_v28 = vmul.f32 %v11611_v11, %v14288_v50  ;;  %v14487_v50 = vmul.f32 %v11607_v25, %v14269_v4 }
0x1355   :  { %11620 = vrsqrt.f32 %v4637_v23  ;;  %v11615_v59 = vpop.eup %11614 }
0x1356   :  { %11622 = vrsqrt.f32 %v4639_v13  ;;  %v11617_v51 = vpop.eup %11616  ;;  %v4847_v6 = vmul.f32 %v14359_v37, %v14472_v28  ;;  %v14511_v11 = vmul.f32 %v11615_v59, %v14293_v52 }
0x1357   :  { %11624 = vrsqrt.f32 %v4640_v60  ;;  %v14482_v60 = vld [vmem:[%s16787_s1 + $0x6] ss:$0 sm:$0xff] }
0x1358   :  { %11626 = vrsqrt.f32 %v4632_v5 }
0x1359   :  { %v11619_v35 = vpop.eup %11618 }
0x135a   :  { %v4606_v48 = vpop.xlane.xlu0 %4605  ;;  %v14505_v25 = vmul.f32 %v11619_v35, %v14309_v42 }
0x135b   :  { %v4626_v22 = vmul.f32 0.03125, %v4606_v48 }
0x135c   :  { %v4609_v58 = vpop.xlane.xlu1 %4608 }
0x135d   :  { %v4642_v34 = vadd.f32 1e-06, %v4626_v22  ;;  %v4627_v3 = vmul.f32 0.03125, %v4609_v58  ;;  %v14496_v58 = vmul.f32 %v11617_v51, %v14299_v27 }
0x135e   :  { %v4612_v17 = vpop.xlane.xlu0 %4611 }
0x135f   :  { %11628 = vrsqrt.f32 %v4642_v34  ;;  %v4643_v10 = vadd.f32 1e-06, %v4627_v3  ;;  %v4628_v57 = vmul.f32 0.03125, %v4612_v17  ;;  %v11621_v23 = vpop.eup %11620  ;;  %v14508_v17 = vmul.f32 %v11613_v7, %v14261_v9 }
0x1360   :  { %v4603_v2 = vpop.xlane.xlu1 %4602  ;;  %v11623_v5 = vpop.eup %11622  ;;  %v14502_v4 = vmul.f32 %v11621_v23, %v14312_v18  ;;  %v31_v7 = vadd.s32 112, %v16905_v46 }
0x1361   :  { %11630 = vrsqrt.f32 %v4643_v10  ;;  %v4644_v44 = vadd.f32 1e-06, %v4628_v57  ;;  %v4625_v29 = vmul.f32 0.03125, %v4603_v2  ;;  %v11625_v48 = vpop.eup %11624  ;;  %v14514_v27 = vmul.f32 %v11623_v5, %v14315_v40 }
0x1362   :  { %v14489_v22 = vpop.permute.xlu0 %4859  ;;  %v11627_v34 = vpop.eup %11626  ;;  %v14517_v57 = vmul.f32 %v11625_v48, %v14320_v38  ;;  %v4849_v40 = vmul.f32 %v14359_v37, %v14496_v58  ;;  %v4850_v59 = vmul.f32 %v14359_v37, %v14502_v4  ;;  %vm49_vm9 = vcmp.eq.s32.totalorder %v31_v7, %v14369_v30 }
0x1363   :  { %11632 = vrsqrt.f32 %v4644_v44  ;;  %v4641_v26 = vadd.f32 1e-06, %v4625_v29  ;;  %v14520_v18 = vadd.f32 %v14489_v22, %v4846_v45  ;;  %v14523_v42 = vadd.f32 %v14489_v22, %v4847_v6 }
0x1364   :  { %v14477_v13 = vpop.permute.xlu1 %4677  ;;  %v14528_v52 = vmul.f32 %v11627_v34, %v14277_v56  ;;  %v4851_v44 = vmul.f32 %v14359_v37, %v14505_v25  ;;  %v32_v29 = vadd.s32 120, %v16905_v46  ;;  %v4848_v56 = vmul.f32 %v14359_v37, %v14511_v11 }
0x1365   :  { %11634 = vrsqrt.f32 %v4641_v26  ;;  %v4680_v31 = vmul.f32 %v14477_v13, %v14475_v14  ;;  %v4681_v21 = vmul.f32 %v14477_v13, %v14487_v50  ;;  %v4682_v9 = vmul.f32 %v14477_v13, %v14508_v17 }
0x1366   :  { %v4852_v51 = vmul.f32 %v14359_v37, %v14514_v27  ;;  %v4853_v5 = vmul.f32 %v14359_v37, %v14517_v57  ;;  %vm50_vm12 = vcmp.eq.s32.totalorder %v32_v29, %v14369_v30  ;;  %v16928_v6 = vmov 0 }
0x1367   :  { %v4700_v3 = vadd.f32 %v14482_v60, %v4680_v31  ;;  %v4701_v38 = vadd.f32 %v14482_v60, %v4681_v21  ;;  %v4880_v31 = vpack.c.bf16 %v14523_v42, %v14520_v18  ;;  %v4702_v48 = vadd.f32 %v14482_v60, %v4682_v9  ;;  %vm14563_vm14 = vmpackc.low %vm50_vm12, %vm49_vm9 }
0x1368   :  { %v16929_v6 = vsel %vm14563_vm14, 4294967295, %v16928_v6  ;;  %v16931_v30 = vmov 1.0|1.0   ;;  %v14574_v21 = vadd.f32 %v14489_v22, %v4849_v40  ;;  %v4684_v29 = vmul.f32 %v14477_v13, %v14469_v54 }
0x1369   :  { %v11629_v10 = vpop.eup %11628  ;;  %4716 = vxpose.xlu1.b32.start [1/16] (narrow) %v4700_v3, 32  ;;  %16930 = vst [vmem:[#allocation29_spill] sm:$0xff] %v16929_v6  ;;  %10997 = vmatprep.subr.msk.bf16.mxu1 %vm14563_vm14, %v16931_v30  ;;  %v14571_v3 = vadd.f32 %v14489_v22, %v4848_v56 }
0x136a   :  { %v14544_v35 = vmul.f32 %v11629_v10, %v14333_v8  ;;  %v4683_v8 = vmul.f32 %v14477_v13, %v14528_v52  ;;  %v14577_v10 = vadd.f32 %v14489_v22, %v4850_v59  ;;  %10999 = vmatpush3.bf16.msk.msra.mxu1 %vm14563_vm14, %v16931_v30  ;;  %v14595_v59 = vadd.f32 %v14489_v22, %v4852_v51 }
0x136b   :  { %v11631_v2 = vpop.eup %11630  ;;  %v4881_v40 = vpack.c.bf16 %v14574_v21, %v14571_v3 }
0x136c   :  { %v14547_v26 = vmul.f32 %v11631_v2, %v14339_v63  ;;  %v4855_v7 = vmul.f32 %v14359_v37, %v14544_v35 }
0x136d   :  { %v11633_v23 = vpop.eup %11632  ;;  %4717 = vxpose.xlu1.b32.cont [2/16] (narrow) %v4701_v38, 32 }
0x136e   :  { %v4856_v63 = vmul.f32 %v14359_v37, %v14547_v26  ;;  %v14561_v45 = vmul.f32 %v11633_v23, %v14344_v15  ;;  %v14580_v15 = vadd.f32 %v14489_v22, %v4851_v44  ;;  %v4703_v44 = vadd.f32 %v14482_v60, %v4683_v8  ;;  %v9537_v23 = vld [vmem:[%s16788_s2 + $0x40] sm:$0xff] }
0x136f   :  { %v11635_v34 = vpop.eup %11634  ;;  %v14622_v38 = vadd.f32 %v14489_v22, %v4855_v7  ;;  %v4686_v7 = vmul.f32 %v14477_v13, %v14511_v11 }
0x1370   :  { %v4673_v9 = vmul.f32 %v11635_v34, %v14336_v49  ;;  %v4857_v2 = vmul.f32 %v14359_v37, %v14561_v45  ;;  %v14598_v49 = vadd.f32 %v14489_v22, %v4853_v5  ;;  %v14613_v34 = vadd.f32 %v14489_v22, %v4856_v63 }
0x1371   :  { %4718 = vxpose.xlu1.b32.cont [3/16] (narrow) %v4702_v48, 32  ;;  %v9538_v48 = vld [vmem:[%s16788_s2 + $0x48] sm:$0xff]  ;;  %v4704_v63 = vadd.f32 %v14482_v60, %v4684_v29  ;;  %v4688_v29 = vmul.f32 %v14477_v13, %v14502_v4  ;;  %v4893_v4 = vld [vmem:[%s16787_s1 + $0x1] sm:$0x5] }
0x1372   :  { %v4854_v56 = vmul.f32 %v14359_v37, %v4673_v9  ;;  %v4891_v51 = vpack.c.bf16 %v9538_v48, %v9537_v23  ;;  %v4883_v5 = vpack.c.bf16 %v14598_v49, %v14595_v59  ;;  %v14616_v8 = vadd.f32 %v14489_v22, %v4857_v2 }
0x1373   :  { %v4685_v2 = vmul.f32 %v14477_v13, %v14472_v28  ;;  %v4687_v23 = vmul.f32 %v14477_v13, %v14496_v58  ;;  %v4708_v28 = vadd.f32 %v14482_v60, %v4688_v29 }
0x1374   :  { %v14619_v54 = vadd.f32 %v14489_v22, %v4854_v56  ;;  %10542 = vmatprep.subr.bf16.mxu1 %v4891_v51 }
0x1375   :  { %4719 = vxpose.xlu1.b32.cont [4/16] (narrow) %v4703_v44, 32  ;;  %v4705_v56 = vadd.f32 %v14482_v60, %v4685_v2  ;;  %v4706_v44 = vadd.f32 %v14482_v60, %v4686_v7  ;;  %v4707_v48 = vadd.f32 %v14482_v60, %v4687_v23  ;;  %v4690_v2 = vmul.f32 %v14477_v13, %v14514_v27 }
0x1376   :  { %v4691_v23 = vmul.f32 %v14477_v13, %v14517_v57  ;;  %v4693_v57 = vmul.f32 %v14477_v13, %v14544_v35 }
0x1377   :  { %v4710_v58 = vadd.f32 %v14482_v60, %v4690_v2  ;;  %v4695_v2 = vmul.f32 %v14477_v13, %v14561_v45 }
0x1379   :  { %4720 = vxpose.xlu1.b32.cont [5/16] (narrow) %v4704_v63, 32  ;;  %v4689_v63 = vmul.f32 %v14477_v13, %v14505_v25  ;;  %v4692_v25 = vmul.f32 %v14477_v13, %v4673_v9  ;;  %v4713_v9 = vadd.f32 %v14482_v60, %v4693_v57  ;;  %v4715_v35 = vadd.f32 %v14482_v60, %v4695_v2 }
0x137b   :  { %v4709_v11 = vadd.f32 %v14482_v60, %v4689_v63 }
0x137d   :  { %4721 = vxpose.xlu1.b32.cont [6/16] (narrow) %v4705_v56, 32  ;;  %v16932_v56 = vld [vmem:[#allocation6_spill] sm:$0xff] }
0x137e   :  { %v4898_v7 = vrot.slane %v4893_v4, %v16932_v56 }
0x1380   :  { %v4908_v29 = vrot.slane %v4898_v7, %v16932_v56  ;;  %v4844_v7 = vmul.f32 %v14359_v37, %v14508_v17  ;;  %v16936_v17 = vpack.c.bf16 %v14616_v8, %v14613_v34 }
0x1381   :  { %4722 = vxpose.xlu1.b32.cont [7/16] (narrow) %v4706_v44, 32  ;;  %v16933_v44 = vsub.s32 2, %v16905_v46 }
0x1382   :  { %4915 = vrot.lane.b32.xlu0 %v4908_v29, %s12063_s30 }
0x1383   :  { %v4902_v27 = vrot.slane %v4893_v4, %v16933_v44  ;;  %v4845_v44 = vmul.f32 %v14359_v37, %v14528_v52 }
0x1385   :  { %4723 = vxpose.xlu1.b32.cont [8/16] (narrow) %v4707_v48, 32  ;;  %v4711_v48 = vadd.f32 %v14482_v60, %v4691_v23  ;;  %v4912_v63 = vrot.slane %v4902_v27, %v16932_v56  ;;  %v9539_v23 = vld [vmem:[%s16788_s2 + $0x50] sm:$0xff]  ;;  %v4865_v27 = vadd.f32 %v14489_v22, %v4845_v44 }
0x1387   :  { %4917 = vrot.lane.b32.xlu0 %v4912_v63, %s12063_s30 }
0x1389   :  { %4724 = vxpose.xlu1.b32.cont [9/16] (narrow) %v4708_v28, 32  ;;  %v4712_v28 = vadd.f32 %v14482_v60, %v4692_v25 }
0x138d   :  { %4725 = vxpose.xlu1.b32.cont [10/16] (narrow) %v4709_v11, 32  ;;  %v4694_v11 = vmul.f32 %v14477_v13, %v14547_v26  ;;  %v9540_v26 = vld [vmem:[%s16788_s2 + $0x58] sm:$0xff]  ;;  %v4842_v13 = vmul.f32 %v14359_v37, %v14475_v14  ;;  %v4864_v14 = vadd.f32 %v14489_v22, %v4844_v7 }
0x138e   :  { %v4892_v4 = vpack.c.bf16 %v9540_v26, %v9539_v23 }
0x138f   :  { %v4714_v46 = vadd.f32 %v14482_v60, %v4694_v11  ;;  %v4843_v60 = vmul.f32 %v14359_v37, %v14487_v50  ;;  %v4862_v25 = vadd.f32 %v14489_v22, %v4842_v13  ;;  %v4879_v29 = vpack.c.bf16 %v4865_v27, %v4864_v14 }
0x1390   :  { %v16934_v37 = vpack.c.bf16 %v14580_v15, %v14577_v10 }
0x1391   :  { %4726 = vxpose.xlu1.b32.cont [11/16] (narrow) %v4710_v58, 32  ;;  %v4863_v56 = vadd.f32 %v14489_v22, %v4843_v60  ;;  %v16935_v22 = vpack.c.bf16 %v14622_v38, %v14619_v54 }
0x1395   :  { %4727 = vxpose.xlu1.b32.cont [12/16] (narrow) %v4711_v48, 32 }
0x1399   :  { %4728 = vxpose.xlu1.b32.cont [13/16] (narrow) %v4712_v28, 32 }
0x139d   :  { %4729 = vxpose.xlu1.b32.cont [14/16] (narrow) %v4713_v9, 32 }
0x13a1   :  { %4730 = vxpose.xlu1.b32.cont [15/16] (narrow) %v4714_v46, 32 }
0x13a5   :  { %4731 = vxpose.xlu1.b32.end [16/16] (narrow) %v4715_v35, 32 }
0x13e9   :  { %v4732_v58 = vpop.trf.xlu1 }
0x13ea   :  { %10536 = vmatprep.mubr.f32.mxu1 %v4732_v58 }
0x13ed   :  { %v4733_v48 = vpop.trf.xlu1 }
0x13ee   :  { %10537 = vmatmul.mubr.f32.vlgmr.msra.gmra.mrb[88].mxu1 %v4733_v48 }
0x13ef   :  { %10543 = vmatpush3.bf16.msra.mxu1 %v4891_v51  ;;  %v4878_v51 = vpack.c.bf16 %v4863_v56, %v4862_v25 }
0x13f0   :  { %10544 = vmatprep.subr.bf16.mxu1 %v4892_v4 }
0x13f1   :  { %v4734_v45 = vpop.trf.xlu1 }
0x13f2   :  { %10539 = vmatprep.mubr.f32.mxu1 %v4734_v45 }
0x13f3   :  { %10545 = vmatpush3.bf16.msra.mxu1 %v4892_v4 }
0x13f4   :  { %v4916_v52 = vpop.permute.xlu0 %4915 }
0x13f5   :  { %v4735_v50 = vpop.trf.xlu1 }
0x13f6   :  { %10540 = vmatmul.mubr.f32.gmra.mrb[90].mxu1 %v4735_v50 }
0x13f7   :  { %10546 = vmatprep.mubr.msk.bf16.mxu1 %vm100_vm0, %v4878_v51 }
0x13f9   :  { %v4918_v21 = vpop.permute.xlu0 %4917 }
0x13fa   :  { %10547 = vmatmul.mubr.msk.bf16.vlgmr.msra.gmra.mrb[92].mxu1 %vm100_vm0, %v4879_v29  ;;  %v4919_v10 = vsel %vm390_vm1, %v4916_v52, %v4918_v21 }
0x13fb   :  { %10550 = vmatprep.mubr.msk.bf16.mxu1 %vm100_vm0, %v4880_v31 }
0x1402   :  { %10551 = vmatmul.mubr.msk.bf16.gmra.mrb[96].mxu1 %vm100_vm0, %v4881_v40 }
0x1403   :  { %10554 = vmatprep.mubr.msk.bf16.mxu1 %vm100_vm0, %v16934_v37 }
0x140a   :  { %10555 = vmatmul.mubr.msk.bf16.gmra.mrb[100].mxu1 %vm100_vm0, %v4883_v5 }
0x140b   :  { %10558 = vmatprep.mubr.msk.bf16.mxu1 %vm100_vm0, %v16935_v22 }
0x1412   :  { %10559 = vmatmul.mubr.msk.bf16.gmra.mrb[104].mxu1 %vm100_vm0, %v16936_v17 }
0x14c1   :  { %v10538_v18 = vpop.f32.mrb[88].mxu1 }
0x14c2   :  { %4834 = vst [vmem:[#allocation2 + $0x8] sm:$0xff] %v10538_v18  ;;  %v4814_v42 = vpop.f32.mrb[89].mxu1 }
0x14c3   :  { %4833 = vst [vmem:[#allocation2] sm:$0xff] %v4814_v42 }
0x14c9   :  { %v10541_v31 = vpop.f32.mrb[90].mxu1 }
0x14ca   :  { %4836 = vst [vmem:[#allocation2 + $0x18] sm:$0xff] %v10541_v31  ;;  %v4824_v3 = vpop.f32.mrb[91].mxu1 }
0x14cb   :  { %4835 = vst [vmem:[#allocation2 + $0x10] sm:$0xff] %v4824_v3 }
0x14cd   :  { %v10548_v15 = vpop.f32.mrb[92].mxu1 }
0x14ce   :  { %v4979_v40 = vpop.f32.mrb[93].mxu1  ;;  %v4988_v59 = vadd.f32 %v10548_v15, %v4919_v10 }
0x14cf   :  { %v10549_v38 = vpop.f32.mrb[94].mxu1  ;;  %v4980_v34 = vadd.f32 %v4979_v40, %v4919_v10 }
0x14d0   :  { %v4991_v49 = vadd.f32 %v10549_v38, %v4919_v10  ;;  %v4982_v5 = vpop.f32.mrb[95].mxu1 }
0x14d1   :  { %v4983_v8 = vadd.f32 %v4982_v5, %v4919_v10 }
0x14d2   :  { %v14716_v54 = vpack.c.bf16 %v4991_v49, %v4988_v59 }
0x14d3   :  { %v14718_v28 = vpack.c.bf16 %v4983_v8, %v4980_v34 }
0x14d5   :  { %v10552_v57 = vpop.f32.mrb[96].mxu1  ;;  %5452 = vrot.lane.b32.xlu1 %v14718_v28, %s12065_s5  ;;  %5054 = vrot.lane.b32.xlu0 %v14718_v28, %s12064_s4 }
0x14d6   :  { %10570 = vmatprep.mubr.msk.bf16.mxu0 %vm534_vm2, %v14718_v28  ;;  %v4995_v63 = vpop.f32.mrb[97].mxu1  ;;  %v5004_v11 = vadd.f32 %v10552_v57, %v4919_v10 }
0x14d7   :  { %v10553_v9 = vpop.f32.mrb[98].mxu1  ;;  %v4996_v35 = vadd.f32 %v4995_v63, %v4919_v10 }
0x14d8   :  { %v5007_v46 = vadd.f32 %v10553_v9, %v4919_v10  ;;  %v4998_v2 = vpop.f32.mrb[99].mxu1 }
0x14d9   :  { %v4999_v58 = vadd.f32 %v4998_v2, %v4919_v10  ;;  %5056 = vrot.lane.b32.xlu0 %v14716_v54, %s12064_s4 }
0x14da   :  { %v14728_v23 = vpack.c.bf16 %v5007_v46, %v5004_v11 }
0x14db   :  { %v14730_v26 = vpack.c.bf16 %v4999_v58, %v4996_v35 }
0x14dd   :  { %v10556_v4 = vpop.f32.mrb[100].mxu1  ;;  %5456 = vrot.lane.b32.xlu1 %v14730_v26, %s12065_s5  ;;  %5058 = vrot.lane.b32.xlu0 %v14730_v26, %s12064_s4 }
0x14de   :  { %v5011_v48 = vpop.f32.mrb[101].mxu1  ;;  %v5020_v60 = vadd.f32 %v10556_v4, %v4919_v10 }
0x14df   :  { %v10557_v13 = vpop.f32.mrb[102].mxu1  ;;  %v5012_v56 = vadd.f32 %v5011_v48, %v4919_v10 }
0x14e0   :  { %v5023_v45 = vadd.f32 %v10557_v13, %v4919_v10  ;;  %v5014_v25 = vpop.f32.mrb[103].mxu1 }
0x14e1   :  { %v5015_v7 = vadd.f32 %v5014_v25, %v4919_v10  ;;  %5458 = vrot.lane.b32.xlu1 %v14728_v23, %s12065_s5 }
0x14e2   :  { %v14738_v44 = vpack.c.bf16 %v5023_v45, %v5020_v60 }
0x14e3   :  { %v14740_v14 = vpack.c.bf16 %v5015_v7, %v5012_v56 }
0x14e5   :  { %v10560_v27 = vpop.f32.mrb[104].mxu1  ;;  %10586 = vmatprep.mubr.msk.bf16.mxu1 %vm534_vm2, %v14740_v14  ;;  %5155 = vrot.lane.b32.xlu0 %v14740_v14, %s12064_s4 }
0x14e6   :  { %v5027_v50 = vpop.f32.mrb[105].mxu1  ;;  %v5036_v29 = vadd.f32 %v10560_v27, %v4919_v10 }
0x14e7   :  { %v10561_v51 = vpop.f32.mrb[106].mxu1  ;;  %v5028_v17 = vadd.f32 %v5027_v50, %v4919_v10 }
0x14e8   :  { %v5039_v37 = vadd.f32 %v10561_v51, %v4919_v10  ;;  %v5030_v22 = vpop.f32.mrb[107].mxu1 }
0x14e9   :  { %v5031_v18 = vadd.f32 %v5030_v22, %v4919_v10  ;;  %5060 = vrot.lane.b32.xlu0 %v14728_v23, %s12064_s4 }
0x14ea   :  { %v14748_v42 = vpack.c.bf16 %v5039_v37, %v5036_v29 }
0x14eb   :  { %v14750_v52 = vpack.c.bf16 %v5031_v18, %v5028_v17 }
0x14ed   :  { %5157 = vrot.lane.b32.xlu0 %v14738_v44, %s12064_s4 }
0x14f1   :  { %5159 = vrot.lane.b32.xlu0 %v14750_v52, %s12064_s4 }
0x14f5   :  { %5161 = vrot.lane.b32.xlu0 %v14748_v42, %s12064_s4 }
0x14f9   :  { %5454 = vrot.lane.b32.xlu0 %v14716_v54, %s12065_s5 }
0x1547   :  { %v5055_v31 = vpop.permute.xlu0 %5054  ;;  %v5453_v57 = vpop.permute.xlu1 %5452 }
0x1548   :  { %11166 = vmatprep.subr.msk.bf16.mxu0 %vm534_vm2, %v5055_v31  ;;  %v5075_v3 = vsel %vm534_vm2, %v5055_v31, 0 }
0x1549   :  { %10563 = vmatpush3.bf16.xpose.msra.mxu0 %v5075_v3 }
0x154b   :  { %v5057_v21 = vpop.permute.xlu0 %5056 }
0x154c   :  { %11167 = vmatprep.subr.msk.bf16.mxu0 %vm534_vm2, %v5057_v21  ;;  %v5078_v10 = vsel %vm534_vm2, %v5057_v21, 0 }
0x154f   :  { %v5059_v15 = vpop.permute.xlu0 %5058  ;;  %v5457_v2 = vpop.permute.xlu1 %5456 }
0x1550   :  { %v5081_v38 = vsel %vm534_vm2, %v5059_v15, 0 }
0x1551   :  { %10565 = vmatpush3.bf16.xpose.msra.mxu0 %v5078_v10 }
0x1552   :  { %11168 = vmatprep.subr.msk.bf16.mxu0 %vm534_vm2, %v5059_v15 }
0x1553   :  { %v5459_v58 = vpop.permute.xlu1 %5458 }
0x1557   :  { %v5156_v40 = vpop.permute.xlu0 %5155 }
0x1558   :  { %11170 = vmatprep.subr.msk.bf16.mxu1 %vm534_vm2, %v5156_v40  ;;  %v5176_v59 = vsel %vm534_vm2, %v5156_v40, 0 }
0x1559   :  { %10567 = vmatpush3.bf16.xpose.msra.mxu0 %v5081_v38  ;;  %10579 = vmatpush3.bf16.xpose.msra.mxu1 %v5176_v59 }
0x155b   :  { %v5061_v49 = vpop.permute.xlu0 %5060 }
0x155c   :  { %11169 = vmatprep.subr.msk.bf16.mxu0 %vm534_vm2, %v5061_v49  ;;  %v5084_v34 = vsel %vm534_vm2, %v5061_v49, 0 }
0x155f   :  { %v5158_v5 = vpop.permute.xlu0 %5157 }
0x1560   :  { %11171 = vmatprep.subr.msk.bf16.mxu1 %vm534_vm2, %v5158_v5  ;;  %v5179_v8 = vsel %vm534_vm2, %v5158_v5, 0 }
0x1561   :  { %10569 = vmatpush3.bf16.xpose.msra.mxu0 %v5084_v34  ;;  %10581 = vmatpush3.bf16.xpose.msra.mxu1 %v5179_v8 }
0x1562   :  { %10594 = vmatprep.subr.bf16.mxu0 %v5453_v57 }
0x1563   :  { %v5160_v63 = vpop.permute.xlu0 %5159 }
0x1564   :  { %11172 = vmatprep.subr.msk.bf16.mxu1 %vm534_vm2, %v5160_v63  ;;  %v5182_v11 = vsel %vm534_vm2, %v5160_v63, 0 }
0x1567   :  { %v5162_v9 = vpop.permute.xlu0 %5161 }
0x1568   :  { %10571 = vmatmul.mubr.msk.bf16.vlgmr.msra.gmra.mrb[104].mxu0 %vm534_vm2, %v14716_v54  ;;  %v5185_v35 = vsel %vm534_vm2, %v5162_v9, 0 }
0x1569   :  { %10574 = vmatprep.mubr.msk.bf16.mxu0 %vm534_vm2, %v14730_v26  ;;  %10583 = vmatpush3.bf16.xpose.msra.mxu1 %v5182_v11 }
0x156a   :  { %10595 = vmatpush3.bf16.msra.mxu0 %v5453_v57  ;;  %11173 = vmatprep.subr.msk.bf16.mxu1 %vm534_vm2, %v5162_v9 }
0x156b   :  { %v5455_v46 = vpop.permute.xlu0 %5454 }
0x156c   :  { %10596 = vmatprep.subr.bf16.mxu0 %v5455_v46 }
0x156e   :  { %10597 = vmatpush3.bf16.msra.mxu0 %v5455_v46 }
0x156f   :  { %10598 = vmatprep.subr.bf16.mxu0 %v5457_v2 }
0x1570   :  { %10575 = vmatmul.mubr.msk.bf16.gmra.mrb[108].mxu0 %vm534_vm2, %v14728_v23 }
0x1571   :  { %10585 = vmatpush3.bf16.xpose.msra.mxu1 %v5185_v35 }
0x1572   :  { %10599 = vmatpush3.bf16.msra.mxu0 %v5457_v2 }
0x1573   :  { %10600 = vmatprep.subr.bf16.mxu0 %v5459_v58 }
0x1576   :  { %10601 = vmatpush3.bf16.msra.mxu0 %v5459_v58 }
0x1578   :  { %10587 = vmatmul.mubr.msk.bf16.vlgmr.msra.gmra.mrb[108].mxu1 %vm534_vm2, %v14738_v44 }
0x1579   :  { %10590 = vmatprep.mubr.msk.bf16.mxu1 %vm534_vm2, %v14750_v52 }
0x1580   :  { %10591 = vmatmul.mubr.msk.bf16.gmra.mrb[112].mxu1 %vm534_vm2, %v14748_v42 }
0x163b   :  { %v10572_v4 = vpop.f32.mrb[104].mxu0 }
0x163c   :  { %v14788_v48 = vmul.f32 0.35355338, %v10572_v4  ;;  %v5120_v13 = vpop.f32.mrb[105].mxu0 }
0x163d   :  { %v10573_v60 = vpop.f32.mrb[106].mxu0  ;;  %v14790_v45 = vmul.f32 0.35355338, %v5120_v13 }
0x163e   :  { %v5123_v25 = vpop.f32.mrb[107].mxu0  ;;  %v5274_v56 = vsel %vm390_vm1, %v14788_v48, -inf  ;;  %v14794_v7 = vmul.f32 0.35355338, %v10573_v60 }
0x163f   :  { %5275 = vmax.xlane.f32.xlu0 %v5274_v56  ;;  %v5268_v27 = vsel %vm390_vm1, %v14790_v45, -inf  ;;  %v14798_v37 = vmul.f32 0.35355338, %v5123_v25 }
0x1640   :  { %v5277_v18 = vsel %vm390_vm1, %v14794_v7, -inf }
0x1641   :  { %v5271_v21 = vsel %vm390_vm1, %v14798_v37, -inf }
0x1643   :  { %5269 = vmax.xlane.f32.xlu0 %v5268_v27  ;;  %v10576_v50 = vpop.f32.mrb[108].mxu0 }
0x1644   :  { %v5136_v51 = vpop.f32.mrb[109].mxu0  ;;  %v14806_v3 = vmul.f32 0.35355338, %v10576_v50 }
0x1645   :  { %v10577_v29 = vpop.f32.mrb[110].mxu0  ;;  %v14810_v38 = vmul.f32 0.35355338, %v5136_v51 }
0x1646   :  { %v14800_v22 = vmul.f32 0.35355338, %v10577_v29  ;;  %v5139_v17 = vpop.f32.mrb[111].mxu0  ;;  %v5286_v49 = vsel %vm390_vm1, %v14806_v3, -inf }
0x1647   :  { %5278 = vmax.xlane.f32.xlu0 %v5277_v18  ;;  %v14814_v5 = vmul.f32 0.35355338, %v5139_v17  ;;  %v5280_v34 = vsel %vm390_vm1, %v14810_v38, -inf }
0x1648   :  { %v5289_v31 = vsel %vm390_vm1, %v14800_v22, -inf }
0x1649   :  { %5290 = vmax.xlane.f32.xlu1 %v5289_v31  ;;  %v5283_v46 = vsel %vm390_vm1, %v14814_v5, -inf }
0x164b   :  { %v10588_v10 = vpop.f32.mrb[108].mxu1  ;;  %5272 = vmax.xlane.f32.xlu0 %v5271_v21 }
0x164c   :  { %v5221_v15 = vpop.f32.mrb[109].mxu1  ;;  %v14818_v9 = vmul.f32 0.35355338, %v10588_v10 }
0x164d   :  { %v10589_v40 = vpop.f32.mrb[110].mxu1  ;;  %v14822_v2 = vmul.f32 0.35355338, %v5221_v15 }
0x164e   :  { %v5224_v59 = vpop.f32.mrb[111].mxu1  ;;  %v5298_v35 = vsel %vm390_vm1, %v14818_v9, -inf  ;;  %v14828_v58 = vmul.f32 0.35355338, %v10589_v40 }
0x164f   :  { %5287 = vmax.xlane.f32.xlu0 %v5286_v49  ;;  %v5292_v4 = vsel %vm390_vm1, %v14822_v2, -inf  ;;  %v14834_v13 = vmul.f32 0.35355338, %v5224_v59 }
0x1650   :  { %v5301_v60 = vsel %vm390_vm1, %v14828_v58, -inf }
0x1651   :  { %v5295_v56 = vsel %vm390_vm1, %v14834_v13, -inf }
0x1653   :  { %v10592_v8 = vpop.f32.mrb[112].mxu1  ;;  %5281 = vmax.xlane.f32.xlu0 %v5280_v34 }
0x1654   :  { %v5237_v57 = vpop.f32.mrb[113].mxu1  ;;  %v14840_v25 = vmul.f32 0.35355338, %v10592_v8 }
0x1655   :  { %v10593_v63 = vpop.f32.mrb[114].mxu1  ;;  %v14844_v27 = vmul.f32 0.35355338, %v5237_v57 }
0x1656   :  { %v5240_v11 = vpop.f32.mrb[115].mxu1  ;;  %v5310_v50 = vsel %vm390_vm1, %v14840_v25, -inf  ;;  %v14848_v51 = vmul.f32 0.35355338, %v10593_v63 }
0x1657   :  { %5284 = vmax.xlane.f32.xlu0 %v5283_v46  ;;  %v5304_v29 = vsel %vm390_vm1, %v14844_v27, -inf  ;;  %v14852_v17 = vmul.f32 0.35355338, %v5240_v11 }
0x1658   :  { %v5313_v18 = vsel %vm390_vm1, %v14848_v51, -inf }
0x1659   :  { %v5307_v31 = vsel %vm390_vm1, %v14852_v17, -inf }
0x165a   :  { %5543 = vrot.lane.b32.xlu1 %v14738_v44, %s12065_s5 }
0x165b   :  { %5299 = vmax.xlane.f32.xlu0 %v5298_v35 }
0x165e   :  { %5545 = vrot.lane.b32.xlu1 %v14750_v52, %s12065_s5 }
0x165f   :  { %5293 = vmax.xlane.f32.xlu0 %v5292_v4 }
0x1662   :  { %5547 = vrot.lane.b32.xlu1 %v14748_v42, %s12065_s5 }
0x1663   :  { %5302 = vmax.xlane.f32.xlu0 %v5301_v60 }
0x1667   :  { %5296 = vmax.xlane.f32.xlu0 %v5295_v56 }
0x166b   :  { %5311 = vmax.xlane.f32.xlu0 %v5310_v50 }
0x166f   :  { %5305 = vmax.xlane.f32.xlu0 %v5304_v29 }
0x1673   :  { %5314 = vmax.xlane.f32.xlu0 %v5313_v18 }
0x1677   :  { %5308 = vmax.xlane.f32.xlu0 %v5307_v31 }
0x168d   :  { %5541 = vrot.lane.b32.xlu0 %v14740_v14, %s12065_s5 }
0x16cc   :  { %v5276_v21 = vpop.xlane.xlu0 %5275 }
0x16cd   :  { %v5318_v10 = vsub.f32 %v14788_v48, %v5276_v21 }
0x16cf   :  { %v5336_v15 = vmul.f32 1.442695, %v5318_v10 }
0x16d0   :  { %v5270_v40 = vpop.xlane.xlu0 %5269 }
0x16d1   :  { %11636 = vpow2.f32 %v5336_v15  ;;  %v5316_v59 = vsub.f32 %v14790_v45, %v5270_v40 }
0x16d3   :  { %v5332_v49 = vmul.f32 1.442695, %v5316_v59 }
0x16d4   :  { %v5279_v34 = vpop.xlane.xlu0 %5278 }
0x16d5   :  { %11638 = vpow2.f32 %v5332_v49  ;;  %v5319_v8 = vsub.f32 %v14794_v7, %v5279_v34 }
0x16d6   :  { %v5291_v63 = vpop.xlane.xlu1 %5290 }
0x16d7   :  { %v5338_v57 = vmul.f32 1.442695, %v5319_v8  ;;  %v5323_v48 = vsub.f32 %v14800_v22, %v5291_v63 }
0x16d8   :  { %v5273_v11 = vpop.xlane.xlu0 %5272 }
0x16d9   :  { %11640 = vpow2.f32 %v5338_v57  ;;  %v5317_v46 = vsub.f32 %v14798_v37, %v5273_v11  ;;  %v5346_v50 = vmul.f32 1.442695, %v5323_v48 }
0x16db   :  { %v14864_v35 = vpop.eup %11636  ;;  %v5334_v4 = vmul.f32 1.442695, %v5317_v46 }
0x16dc   :  { %v5288_v60 = vpop.xlane.xlu0 %5287  ;;  %v5370_v45 = vsel %vm390_vm1, %v14864_v35, 0.0 }
0x16dd   :  { %11642 = vpow2.f32 %v5334_v4  ;;  %v5322_v56 = vsub.f32 %v14806_v3, %v5288_v60  ;;  %5371 = vadd.xlane.f32.xlu1 %v5370_v45 }
0x16df   :  { %v14870_v7 = vpop.eup %11638  ;;  %v5344_v29 = vmul.f32 1.442695, %v5322_v56 }
0x16e0   :  { %v5282_v18 = vpop.xlane.xlu0 %5281  ;;  %v5364_v37 = vsel %vm390_vm1, %v14870_v7, 0.0 }
0x16e1   :  { %11644 = vpow2.f32 %v5344_v29  ;;  %v5320_v22 = vsub.f32 %v14810_v38, %v5282_v18  ;;  %5365 = vadd.xlane.f32.xlu0 %v5364_v37 }
0x16e2   :  { %11646 = vpow2.f32 %v5346_v50 }
0x16e3   :  { %v14875_v31 = vpop.eup %11640  ;;  %v5340_v21 = vmul.f32 1.442695, %v5320_v22 }
0x16e4   :  { %v5285_v10 = vpop.xlane.xlu0 %5284  ;;  %v5373_v3 = vsel %vm390_vm1, %v14875_v31, 0.0 }
0x16e5   :  { %11648 = vpow2.f32 %v5340_v21  ;;  %v5321_v15 = vsub.f32 %v14814_v5, %v5285_v10  ;;  %5374 = vadd.xlane.f32.xlu0 %v5373_v3 }
0x16e7   :  { %v14880_v40 = vpop.eup %11642  ;;  %v5342_v59 = vmul.f32 1.442695, %v5321_v15 }
0x16e8   :  { %v5300_v49 = vpop.xlane.xlu0 %5299  ;;  %v5367_v38 = vsel %vm390_vm1, %v14880_v40, 0.0 }
0x16e9   :  { %11650 = vpow2.f32 %v5342_v59  ;;  %v5326_v34 = vsub.f32 %v14818_v9, %v5300_v49  ;;  %5368 = vadd.xlane.f32.xlu0 %v5367_v38 }
0x16eb   :  { %v14885_v8 = vpop.eup %11644  ;;  %v5352_v57 = vmul.f32 1.442695, %v5326_v34 }
0x16ec   :  { %v5294_v63 = vpop.xlane.xlu0 %5293  ;;  %v5382_v11 = vsel %vm390_vm1, %v14885_v8, 0.0  ;;  %v14889_v5 = vpop.eup %11646 }
0x16ed   :  { %11652 = vpow2.f32 %v5352_v57  ;;  %v5324_v46 = vsub.f32 %v14822_v2, %v5294_v63  ;;  %5383 = vadd.xlane.f32.xlu0 %v5382_v11  ;;  %v5385_v45 = vsel %vm390_vm1, %v14889_v5, 0.0 }
0x16ef   :  { %v14892_v48 = vpop.eup %11648  ;;  %v5348_v4 = vmul.f32 1.442695, %v5324_v46 }
0x16f0   :  { %v5303_v60 = vpop.xlane.xlu0 %5302  ;;  %v5376_v9 = vsel %vm390_vm1, %v14892_v48, 0.0 }
0x16f1   :  { %11654 = vpow2.f32 %v5348_v4  ;;  %v5327_v56 = vsub.f32 %v14828_v58, %v5303_v60  ;;  %5377 = vadd.xlane.f32.xlu1 %v5376_v9  ;;  %5386 = vadd.xlane.f32.xlu0 %v5385_v45 }
0x16f3   :  { %v14899_v50 = vpop.eup %11650  ;;  %v5354_v29 = vmul.f32 1.442695, %v5327_v56 }
0x16f4   :  { %v5297_v2 = vpop.xlane.xlu0 %5296  ;;  %v5379_v18 = vsel %vm390_vm1, %v14899_v50, 0.0 }
0x16f5   :  { %11656 = vpow2.f32 %v5354_v29  ;;  %v5325_v37 = vsub.f32 %v14834_v13, %v5297_v2  ;;  %5380 = vadd.xlane.f32.xlu0 %v5379_v18 }
0x16f7   :  { %v14904_v22 = vpop.eup %11652  ;;  %v5350_v21 = vmul.f32 1.442695, %v5325_v37 }
0x16f8   :  { %v5312_v10 = vpop.xlane.xlu0 %5311  ;;  %v5394_v58 = vsel %vm390_vm1, %v14904_v22, 0.0 }
0x16f9   :  { %11658 = vpow2.f32 %v5350_v21  ;;  %5395 = vadd.xlane.f32.xlu0 %v5394_v58  ;;  %v5330_v29 = vsub.f32 %v14840_v25, %v5312_v10 }
0x16fb   :  { %v14908_v3 = vpop.eup %11654  ;;  %v5360_v2 = vmul.f32 1.442695, %v5330_v29 }
0x16fc   :  { %v5306_v15 = vpop.xlane.xlu0 %5305  ;;  %v5388_v59 = vsel %vm390_vm1, %v14908_v3, 0.0 }
0x16fd   :  { %5389 = vadd.xlane.f32.xlu1 %v5388_v59  ;;  %v5328_v18 = vsub.f32 %v14844_v27, %v5306_v15  ;;  %v5544_v27 = vpop.permute.xlu1 %5543 }
0x16ff   :  { %v14912_v49 = vpop.eup %11656  ;;  %v5356_v37 = vmul.f32 1.442695, %v5328_v18 }
0x1700   :  { %v5315_v13 = vpop.xlane.xlu0 %5314  ;;  %v5397_v38 = vsel %vm390_vm1, %v14912_v49, 0.0 }
0x1701   :  { %v5331_v34 = vsub.f32 %v14848_v51, %v5315_v13  ;;  %5398 = vadd.xlane.f32.xlu0 %v5397_v38  ;;  %v5546_v10 = vpop.permute.xlu1 %5545 }
0x1703   :  { %v14917_v57 = vpop.eup %11658  ;;  %v5362_v63 = vmul.f32 1.442695, %v5331_v34 }
0x1704   :  { %v5309_v11 = vpop.xlane.xlu0 %5308  ;;  %v5391_v46 = vsel %vm390_vm1, %v14917_v57, 0.0 }
0x1705   :  { %11660 = vpow2.f32 %v5362_v63  ;;  %v5329_v4 = vsub.f32 %v14852_v17, %v5309_v11  ;;  %5392 = vadd.xlane.f32.xlu0 %v5391_v46  ;;  %v5548_v13 = vpop.permute.xlu1 %5547 }
0x1707   :  { %v5358_v60 = vmul.f32 1.442695, %v5329_v4 }
0x1708   :  { %v14922_v9 = vpop.permute.xlu0 %5541 }
0x1709   :  { %11662 = vpow2.f32 %v5358_v60  ;;  %10610 = vmatprep.subr.bf16.mxu0 %v14922_v9 }
0x170a   :  { %11664 = vpow2.f32 %v5360_v2 }
0x170b   :  { %11666 = vpow2.f32 %v5356_v37 }
0x170e   :  { %5753 = vrot.lane.b32.xlu1 %v14740_v14, %s12062_s27 }
0x170f   :  { %v14927_v51 = vpop.eup %11660 }
0x1710   :  { %v5409_v45 = vsel %vm390_vm1, %v14927_v51, 0.0 }
0x1711   :  { %5410 = vadd.xlane.f32.xlu0 %v5409_v45 }
0x1713   :  { %v14931_v56 = vpop.eup %11662 }
0x1714   :  { %v5403_v17 = vsel %vm390_vm1, %v14931_v56, 0.0  ;;  %v14939_v21 = vpop.eup %11664 }
0x1715   :  { %5404 = vadd.xlane.f32.xlu0 %v5403_v17  ;;  %v5406_v58 = vsel %vm390_vm1, %v14939_v21, 0.0  ;;  %v14945_v59 = vpop.eup %11666 }
0x1716   :  { %v5400_v25 = vsel %vm390_vm1, %v14945_v59, 0.0 }
0x172b   :  { %5755 = vrot.lane.b32.xlu0 %v14738_v44, %s12062_s27 }
0x172f   :  { %5747 = vrot.lane.b32.xlu0 %v14738_v44, %s12066_s6 }
0x1732   :  { %5407 = vadd.xlane.f32.xlu1 %v5406_v58 }
0x1733   :  { %5751 = vrot.lane.b32.xlu0 %v14748_v42, %s12066_s6 }
0x1736   :  { %5401 = vadd.xlane.f32.xlu1 %v5400_v25 }
0x1737   :  { %5650 = vrot.lane.b32.xlu0 %v14716_v54, %s12062_s27 }
0x173b   :  { %5654 = vrot.lane.b32.xlu0 %v14728_v23, %s12062_s27 }
0x173f   :  { %5642 = vrot.lane.b32.xlu0 %v14716_v54, %s12066_s6 }
0x1743   :  { %5646 = vrot.lane.b32.xlu0 %v14728_v23, %s12066_s6 }
0x1747   :  { %5757 = vrot.lane.b32.xlu1 %v14750_v52, %s12062_s27  ;;  %6141 = vrot.lane.b32.xlu0 %v14738_v44, %s12067_s7 }
0x174b   :  { %5759 = vrot.lane.b32.xlu1 %v14748_v42, %s12062_s27  ;;  %6502 = vrot.lane.b32.xlu0 %v14716_v54, %s12068_s8 }
0x174f   :  { %5745 = vrot.lane.b32.xlu1 %v14740_v14, %s12066_s6 }
0x1753   :  { %5749 = vrot.lane.b32.xlu1 %v14750_v52, %s12066_s6 }
0x1757   :  { %5648 = vrot.lane.b32.xlu1 %v14718_v28, %s12062_s27 }
0x175b   :  { %5652 = vrot.lane.b32.xlu1 %v14730_v26, %s12062_s27 }
0x175f   :  { %5640 = vrot.lane.b32.xlu1 %v14718_v28, %s12066_s6 }
0x1763   :  { %5644 = vrot.lane.b32.xlu1 %v14730_v26, %s12066_s6 }
0x1767   :  { %6139 = vrot.lane.b32.xlu1 %v14740_v14, %s12067_s7 }
0x176a   :  { %v5372_v34 = vpop.xlane.xlu1 %5371 }
0x176b   :  { %6143 = vrot.lane.b32.xlu1 %v14750_v52, %s12067_s7 }
0x176e   :  { %v5366_v15 = vpop.xlane.xlu0 %5365 }
0x176f   :  { %6145 = vrot.lane.b32.xlu1 %v14748_v42, %s12067_s7 }
0x1772   :  { %v5375_v38 = vpop.xlane.xlu0 %5374 }
0x1773   :  { %6500 = vrot.lane.b32.xlu1 %v14718_v28, %s12068_s8  ;;  %11668 = vrcp.f32 %v5375_v38 }
0x1774   :  { %11670 = vrcp.f32 %v5366_v15 }
0x1775   :  { %11672 = vrcp.f32 %v5372_v34 }
0x1776   :  { %v5369_v63 = vpop.xlane.xlu0 %5368 }
0x1777   :  { %11674 = vrcp.f32 %v5369_v63  ;;  %6504 = vrot.lane.b32.xlu1 %v14730_v26, %s12068_s8 }
0x177a   :  { %v5384_v11 = vpop.xlane.xlu0 %5383 }
0x177d   :  { %v11669_v46 = vpop.eup %11668 }
0x177e   :  { %v5378_v4 = vpop.xlane.xlu1 %5377  ;;  %v5387_v60 = vpop.xlane.xlu0 %5386  ;;  %v5419_v2 = vmul.f32 %v11669_v46, %v14875_v31 }
0x177f   :  { %v11671_v45 = vpop.eup %11670  ;;  %11676 = vrcp.f32 %v5387_v60 }
0x1780   :  { %v11673_v17 = vpop.eup %11672  ;;  %11678 = vrcp.f32 %v5378_v4  ;;  %v5413_v37 = vmul.f32 %v11671_v45, %v14870_v7 }
0x1781   :  { %v11675_v29 = vpop.eup %11674  ;;  %11680 = vrcp.f32 %v5384_v11  ;;  %v5417_v25 = vmul.f32 %v11673_v17, %v14864_v35 }
0x1782   :  { %v5381_v18 = vpop.xlane.xlu0 %5380  ;;  %v5415_v58 = vmul.f32 %v11675_v29, %v14880_v40 }
0x1783   :  { %11682 = vrcp.f32 %v5381_v18  ;;  %v5445_v38 = vpack.c.bf16 %v5419_v2, %v5417_v25 }
0x1784   :  { %v5444_v15 = vpack.c.bf16 %v5415_v58, %v5413_v37 }
0x1786   :  { %10602 = vmatprep.mubr.msk.bf16.mxu0 %vm390_vm1, %v5444_v15  ;;  %v5396_v34 = vpop.xlane.xlu0 %5395 }
0x1787   :  { %10603 = vmatmul.mubr.msk.bf16.vlgmr.msra.gmra.mrb[112].mxu0 %vm390_vm1, %v5445_v38 }
0x1788   :  { %10611 = vmatpush3.bf16.msra.mxu0 %v14922_v9 }
0x1789   :  { %10612 = vmatprep.subr.bf16.mxu0 %v5544_v27  ;;  %v11677_v31 = vpop.eup %11676 }
0x178a   :  { %v11679_v63 = vpop.eup %11678  ;;  %v5427_v40 = vmul.f32 %v11677_v31, %v14889_v5  ;;  %v5390_v35 = vpop.xlane.xlu1 %5389 }
0x178b   :  { %v11681_v11 = vpop.eup %11680  ;;  %v5421_v4 = vmul.f32 %v11679_v63, %v14892_v48 }
0x178c   :  { %10613 = vmatpush3.bf16.msra.mxu0 %v5544_v27  ;;  %v5425_v45 = vmul.f32 %v11681_v11, %v14885_v8 }
0x178d   :  { %v11683_v7 = vpop.eup %11682  ;;  %10614 = vmatprep.subr.bf16.mxu0 %v5546_v10 }
0x178e   :  { %v5399_v46 = vpop.xlane.xlu0 %5398  ;;  %v5423_v60 = vmul.f32 %v11683_v7, %v14899_v50  ;;  %v5447_v17 = vpack.c.bf16 %v5427_v40, %v5425_v45  ;;  %v5754_v5 = vpop.permute.xlu1 %5753 }
0x178f   :  { %11684 = vrcp.f32 %v5399_v46  ;;  %v5774_v38 = vsel %vm534_vm2, %v5754_v5, 0 }
0x1790   :  { %10615 = vmatpush3.bf16.msra.mxu0 %v5546_v10  ;;  %v5446_v9 = vpack.c.bf16 %v5423_v60, %v5421_v4  ;;  %11686 = vrcp.f32 %v5390_v35 }
0x1791   :  { %10616 = vmatprep.subr.bf16.mxu0 %v5548_v13  ;;  %11688 = vrcp.f32 %v5396_v34 }
0x1792   :  { %10606 = vmatprep.mubr.msk.bf16.mxu0 %vm390_vm1, %v5446_v9  ;;  %v5393_v27 = vpop.xlane.xlu0 %5392 }
0x1793   :  { %11690 = vrcp.f32 %v5393_v27  ;;  %10607 = vmatmul.mubr.msk.bf16.gmra.mrb[116].mxu0 %vm390_vm1, %v5447_v17 }
0x1794   :  { %10617 = vmatpush3.bf16.msra.mxu0 %v5548_v13 }
0x1795   :  { %11178 = vmatprep.subr.msk.bf16.mxu0 %vm534_vm2, %v5754_v5 }
0x1799   :  { %v11685_v48 = vpop.eup %11684 }
0x179a   :  { %v11687_v50 = vpop.eup %11686  ;;  %v5435_v10 = vmul.f32 %v11685_v48, %v14912_v49 }
0x179b   :  { %v11689_v8 = vpop.eup %11688  ;;  %v5429_v18 = vmul.f32 %v11687_v50, %v14908_v3 }
0x179c   :  { %v5433_v58 = vmul.f32 %v11689_v8, %v14904_v22 }
0x179d   :  { %v11691_v29 = vpop.eup %11690 }
0x179e   :  { %v5411_v2 = vpop.xlane.xlu0 %5410  ;;  %v5431_v37 = vmul.f32 %v11691_v29, %v14917_v57  ;;  %v5449_v15 = vpack.c.bf16 %v5435_v10, %v5433_v58 }
0x17a0   :  { %v5448_v25 = vpack.c.bf16 %v5431_v37, %v5429_v18 }
0x17a2   :  { %10618 = vmatprep.mubr.msk.bf16.mxu0 %vm390_vm1, %v5448_v25  ;;  %v5405_v13 = vpop.xlane.xlu0 %5404 }
0x17a3   :  { %10619 = vmatmul.mubr.msk.bf16.vlgmr.msra.gmra.mrb[120].mxu0 %vm390_vm1, %v5449_v15 }
0x17a4   :  { %10643 = vmatpush3.bf16.xpose.msra.mxu0 %v5774_v38 }
0x17a6   :  { %v5756_v31 = vpop.permute.xlu0 %5755 }
0x17a7   :  { %11179 = vmatprep.subr.msk.bf16.mxu0 %vm534_vm2, %v5756_v31  ;;  %v5777_v49 = vsel %vm534_vm2, %v5756_v31, 0 }
0x17aa   :  { %v5748_v57 = vpop.permute.xlu0 %5747 }
0x17ac   :  { %10645 = vmatpush3.bf16.xpose.msra.mxu0 %v5777_v49 }
0x17ae   :  { %v5752_v7 = vpop.permute.xlu0 %5751 }
0x17b2   :  { %v5651_v48 = vpop.permute.xlu0 %5650 }
0x17b3   :  { %v5672_v18 = vsel %vm534_vm2, %v5651_v48, 0 }
0x17bf   :  { %v5408_v3 = vpop.xlane.xlu1 %5407 }
0x17c0   :  { %11692 = vrcp.f32 %v5408_v3 }
0x17c1   :  { %11694 = vrcp.f32 %v5405_v13 }
0x17c2   :  { %11696 = vrcp.f32 %v5411_v2 }
0x17c3   :  { %v5402_v22 = vpop.xlane.xlu1 %5401 }
0x17c4   :  { %11698 = vrcp.f32 %v5402_v22 }
0x17c7   :  { %v5758_v34 = vpop.permute.xlu1 %5757 }
0x17c8   :  { %11180 = vmatprep.subr.msk.bf16.mxu0 %vm534_vm2, %v5758_v34  ;;  %v5780_v63 = vsel %vm534_vm2, %v5758_v34, 0 }
0x17c9   :  { %10647 = vmatpush3.bf16.xpose.msra.mxu0 %v5780_v63 }
0x17ca   :  { %v11693_v11 = vpop.eup %11692 }
0x17cb   :  { %v5760_v40 = vpop.permute.xlu1 %5759  ;;  %v11695_v35 = vpop.eup %11694  ;;  %v5441_v60 = vmul.f32 %v11693_v11, %v14939_v21 }
0x17cc   :  { %11181 = vmatprep.subr.msk.bf16.mxu0 %vm534_vm2, %v5760_v40  ;;  %v11697_v46 = vpop.eup %11696  ;;  %v5439_v17 = vmul.f32 %v11695_v35, %v14931_v56  ;;  %v5783_v27 = vsel %vm534_vm2, %v5760_v40, 0  ;;  %v5655_v21 = vpop.permute.xlu0 %5654 }
0x17cd   :  { %v5443_v5 = vmul.f32 %v11697_v46, %v14927_v51  ;;  %v5678_v49 = vsel %vm534_vm2, %v5655_v21, 0 }
0x17ce   :  { %v11699_v4 = vpop.eup %11698 }
0x17cf   :  { %v5746_v45 = vpop.permute.xlu1 %5745  ;;  %v5437_v9 = vmul.f32 %v11699_v4, %v14945_v59  ;;  %v5451_v8 = vpack.c.bf16 %v5443_v5, %v5441_v60 }
0x17d0   :  { %v5643_v59 = vpop.permute.xlu0 %5642 }
0x17d1   :  { %10649 = vmatpush3.bf16.xpose.msra.mxu0 %v5783_v27  ;;  %v5450_v50 = vpack.c.bf16 %v5439_v17, %v5437_v9 }
0x17d3   :  { %v5750_v29 = vpop.permute.xlu1 %5749  ;;  %10622 = vmatprep.mubr.msk.bf16.mxu0 %vm390_vm1, %v5450_v50 }
0x17d4   :  { %10623 = vmatmul.mubr.msk.bf16.gmra.mrb[124].mxu0 %vm390_vm1, %v5451_v8  ;;  %v5647_v37 = vpop.permute.xlu0 %5646 }
0x17d5   :  { %10650 = vmatprep.mubr.msk.bf16.mxu0 %vm534_vm2, %v5746_v45 }
0x17d7   :  { %v5649_v10 = vpop.permute.xlu1 %5648 }
0x17d8   :  { %11174 = vmatprep.subr.msk.bf16.mxu1 %vm534_vm2, %v5649_v10  ;;  %v5669_v56 = vsel %vm534_vm2, %v5649_v10, 0  ;;  %v6142_v13 = vpop.permute.xlu0 %6141 }
0x17d9   :  { %10627 = vmatpush3.bf16.xpose.msra.mxu1 %v5669_v56 }
0x17da   :  { %11175 = vmatprep.subr.msk.bf16.mxu1 %vm534_vm2, %v5651_v48 }
0x17db   :  { %v5653_v51 = vpop.permute.xlu1 %5652 }
0x17dc   :  { %10651 = vmatmul.mubr.msk.bf16.vlgmr.msra.gmra.mrb[128].mxu0 %vm534_vm2, %v5748_v57  ;;  %v5675_v15 = vsel %vm534_vm2, %v5653_v51, 0  ;;  %v15123_v62 = vpop.permute.xlu0 %6502 }
0x17dd   :  { %10654 = vmatprep.mubr.msk.bf16.mxu0 %vm534_vm2, %v5750_v29 }
0x17df   :  { %v5641_v2 = vpop.permute.xlu1 %5640 }
0x17e0   :  { %10634 = vmatprep.mubr.msk.bf16.mxu1 %vm534_vm2, %v5641_v2 }
0x17e1   :  { %10629 = vmatpush3.bf16.xpose.msra.mxu1 %v5672_v18 }
0x17e2   :  { %11176 = vmatprep.subr.msk.bf16.mxu1 %vm534_vm2, %v5653_v51 }
0x17e3   :  { %v5645_v58 = vpop.permute.xlu1 %5644 }
0x17e4   :  { %10655 = vmatmul.mubr.msk.bf16.gmra.mrb[132].mxu0 %vm534_vm2, %v5752_v7 }
0x17e7   :  { %v6140_v25 = vpop.permute.xlu1 %6139 }
0x17e8   :  { %10674 = vmatprep.subr.bf16.mxu0 %v6140_v25 }
0x17e9   :  { %10631 = vmatpush3.bf16.xpose.msra.mxu1 %v5675_v15  ;;  %10675 = vmatpush3.bf16.msra.mxu0 %v6140_v25 }
0x17ea   :  { %11177 = vmatprep.subr.msk.bf16.mxu1 %vm534_vm2, %v5655_v21  ;;  %10676 = vmatprep.subr.bf16.mxu0 %v6142_v13 }
0x17eb   :  { %v6144_v38 = vpop.permute.xlu1 %6143 }
0x17ed   :  { %10677 = vmatpush3.bf16.msra.mxu0 %v6142_v13 }
0x17ee   :  { %10678 = vmatprep.subr.bf16.mxu0 %v6144_v38 }
0x17ef   :  { %v6146_v31 = vpop.permute.xlu1 %6145 }
0x17f1   :  { %10633 = vmatpush3.bf16.xpose.msra.mxu1 %v5678_v49  ;;  %10679 = vmatpush3.bf16.msra.mxu0 %v6144_v38 }
0x17f2   :  { %10680 = vmatprep.subr.bf16.mxu0 %v6146_v31 }
0x17f3   :  { %v15035_v3 = vpop.permute.xlu1 %6500 }
0x17f5   :  { %10681 = vmatpush3.bf16.msra.mxu0 %v6146_v31 }
0x17f6   :  { %11184 = vmatprep.subr.msk.bf16.mxu0 %vm534_vm2, %v15035_v3 }
0x17f7   :  { %v15125_v53 = vpop.permute.xlu1 %6504 }
0x17f8   :  { %10635 = vmatmul.mubr.msk.bf16.vlgmr.msra.gmra.mrb[116].mxu1 %vm534_vm2, %v5643_v59 }
0x17f9   :  { %10638 = vmatprep.mubr.msk.bf16.mxu1 %vm534_vm2, %v5645_v58 }
0x1800   :  { %10639 = vmatmul.mubr.msk.bf16.gmra.mrb[120].mxu1 %vm534_vm2, %v5647_v37 }
0x185a   :  { %v15042_v22 = vpop.f32.mrb[112].mxu0 }
0x185b   :  { %v15044_v57 = vpop.f32.mrb[113].mxu0 }
0x185c   :  { %v15046_v34 = vpop.f32.mrb[114].mxu0 }
0x185d   :  { %v15050_v11 = vpop.f32.mrb[115].mxu0 }
0x1866   :  { %v15054_v40 = vpop.f32.mrb[116].mxu0 }
0x1867   :  { %v15056_v35 = vpop.f32.mrb[117].mxu0 }
0x1868   :  { %v15058_v46 = vpop.f32.mrb[118].mxu0 }
0x1869   :  { %v15062_v60 = vpop.f32.mrb[119].mxu0 }
0x1876   :  { %v15066_v9 = vpop.f32.mrb[120].mxu0 }
0x1877   :  { %v15068_v17 = vpop.f32.mrb[121].mxu0 }
0x1878   :  { %v15070_v27 = vpop.f32.mrb[122].mxu0 }
0x1879   :  { %v15074_v48 = vpop.f32.mrb[123].mxu0 }
0x18a7   :  { %v15078_v8 = vpop.f32.mrb[124].mxu0 }
0x18a8   :  { %v15080_v29 = vpop.f32.mrb[125].mxu0 }
0x18a9   :  { %v15082_v21 = vpop.f32.mrb[126].mxu0 }
0x18aa   :  { %v15086_v56 = vpop.f32.mrb[127].mxu0 }
0x18af   :  { %v10652_v59 = vpop.f32.mrb[128].mxu0 }
0x18b0   :  { %v5860_v2 = vmul.f32 0.35355338, %v10652_v59  ;;  %v5819_v18 = vpop.f32.mrb[129].mxu0 }
0x18b1   :  { %v5858_v37 = vmul.f32 0.35355338, %v5819_v18  ;;  %v10653_v58 = vpop.f32.mrb[130].mxu0 }
0x18b2   :  { %v5861_v25 = vmul.f32 0.35355338, %v10653_v58  ;;  %v5822_v15 = vpop.f32.mrb[131].mxu0  ;;  %v5896_v13 = vsel %vm390_vm1, %v5860_v2, -inf }
0x18b3   :  { %5897 = vmax.xlane.f32.xlu0 %v5896_v13  ;;  %v5890_v38 = vsel %vm390_vm1, %v5858_v37, -inf  ;;  %v5859_v31 = vmul.f32 0.35355338, %v5822_v15 }
0x18b4   :  { %5891 = vmax.xlane.f32.xlu1 %v5890_v38  ;;  %v5899_v49 = vsel %vm390_vm1, %v5861_v25, -inf }
0x18b5   :  { %v5893_v18 = vsel %vm390_vm1, %v5859_v31, -inf }
0x18b7   :  { %5900 = vmax.xlane.f32.xlu0 %v5899_v49  ;;  %v10656_v10 = vpop.f32.mrb[132].mxu0 }
0x18b8   :  { %v5835_v5 = vpop.f32.mrb[133].mxu0 }
0x18b9   :  { %v10657_v51 = vpop.f32.mrb[134].mxu0  ;;  %v5862_v63 = vmul.f32 0.35355338, %v5835_v5 }
0x18ba   :  { %v5865_v50 = vmul.f32 0.35355338, %v10657_v51  ;;  %v5838_v59 = vpop.f32.mrb[135].mxu0 }
0x18bb   :  { %5894 = vmax.xlane.f32.xlu0 %v5893_v18  ;;  %v15094_v58 = vmul.f32 0.35355338, %v5838_v59  ;;  %v5902_v55 = vsel %vm390_vm1, %v5862_v63, -inf }
0x18bc   :  { %v5911_v4 = vsel %vm390_vm1, %v5865_v50, -inf }
0x18bd   :  { %v5905_v13 = vsel %vm390_vm1, %v15094_v58, -inf }
0x18bf   :  { %5912 = vmax.xlane.f32.xlu0 %v5911_v4 }
0x18c3   :  { %5906 = vmax.xlane.f32.xlu0 %v5905_v13  ;;  %v5864_v13 = vmul.f32 0.35355338, %v10656_v10 }
0x18c5   :  { %6506 = vrot.lane.b32.xlu1 %v14728_v23, %s12068_s8  ;;  %v5908_v7 = vsel %vm390_vm1, %v5864_v13, -inf }
0x18cb   :  { %v15101_v15 = vpop.f32.mrb[116].mxu1 }
0x18cc   :  { %v15103_v38 = vpop.f32.mrb[117].mxu1 }
0x18cd   :  { %v15105_v51 = vpop.f32.mrb[118].mxu1 }
0x18ce   :  { %v15107_v49 = vpop.f32.mrb[119].mxu1 }
0x18d3   :  { %v15109_v59 = vpop.f32.mrb[120].mxu1 }
0x18d4   :  { %v15111_v18 = vpop.f32.mrb[121].mxu1 }
0x18d5   :  { %v15113_v4 = vpop.f32.mrb[122].mxu1 }
0x18d6   :  { %v15115_v45 = vpop.f32.mrb[123].mxu1 }
0x18d9   :  { %6605 = vrot.lane.b32.xlu0 %v14740_v14, %s12068_s8 }
0x18e9   :  { %5909 = vmax.xlane.f32.xlu1 %v5908_v7 }
0x18ed   :  { %5903 = vmax.xlane.f32.xlu1 %v5902_v55 }
0x18fe   :  { %6492 = vrot.lane.b32.xlu1 %v14718_v28, %s12069_s9 }
0x1940   :  { %v5898_v32 = vpop.xlane.xlu0 %5897 }
0x1941   :  { %v5924_v20 = vsub.f32 %v5860_v2, %v5898_v32  ;;  %v5892_v0 = vpop.xlane.xlu1 %5891 }
0x1942   :  { %v5922_v41 = vsub.f32 %v5858_v37, %v5892_v0 }
0x1943   :  { %v5950_v39 = vmul.f32 1.442695, %v5924_v20 }
0x1944   :  { %v5946_v10 = vmul.f32 1.442695, %v5922_v41  ;;  %v5901_v5 = vpop.xlane.xlu0 %5900 }
0x1945   :  { %11700 = vpow2.f32 %v5950_v39  ;;  %v5925_v33 = vsub.f32 %v5861_v25, %v5901_v5  ;;  %v15143_v20 = vpop.permute.xlu1 %6506 }
0x1946   :  { %11702 = vpow2.f32 %v5946_v10 }
0x1947   :  { %v5952_v7 = vmul.f32 1.442695, %v5925_v33 }
0x1948   :  { %v5895_v47 = vpop.xlane.xlu0 %5894 }
0x1949   :  { %11704 = vpow2.f32 %v5952_v7  ;;  %v5923_v55 = vsub.f32 %v5859_v31, %v5895_v47 }
0x194b   :  { %v5948_v43 = vmul.f32 1.442695, %v5923_v55 }
0x194c   :  { %v5913_v41 = vpop.xlane.xlu0 %5912 }
0x194d   :  { %11706 = vpow2.f32 %v5948_v43 }
0x194f   :  { %v15127_v6 = vpop.eup %11700 }
0x1950   :  { %v5992_v16 = vsel %vm390_vm1, %v15127_v6, 0.0  ;;  %v15131_v32 = vpop.eup %11702  ;;  %v5907_v2 = vpop.xlane.xlu0 %5906 }
0x1951   :  { %5993 = vadd.xlane.f32.xlu1 %v5992_v16  ;;  %v5986_v39 = vsel %vm390_vm1, %v15131_v32, 0.0  ;;  %v5929_v16 = vsub.f32 %v5865_v50, %v5913_v41  ;;  %v5927_v10 = vsub.f32 %v15094_v58, %v5907_v2 }
0x1953   :  { %v15133_v0 = vpop.eup %11704  ;;  %v5960_v31 = vmul.f32 1.442695, %v5929_v16 }
0x1954   :  { %v5995_v33 = vsel %vm390_vm1, %v15133_v0, 0.0 }
0x1955   :  { %5987 = vadd.xlane.f32.xlu1 %v5986_v39  ;;  %5996 = vadd.xlane.f32.xlu0 %v5995_v33  ;;  %v5956_v39 = vmul.f32 1.442695, %v5927_v10  ;;  %v15175_v10 = vmul.f32 0.35355338, %v15101_v15  ;;  %v15190_v15 = vmul.f32 0.35355338, %v15115_v45 }
0x1956   :  { %v15204_v45 = vmul.f32 0.35355338, %v15113_v4 }
0x1957   :  { %v15139_v47 = vpop.eup %11706 }
0x1958   :  { %v5989_v43 = vsel %vm390_vm1, %v15139_v47, 0.0 }
0x1959   :  { %5990 = vadd.xlane.f32.xlu0 %v5989_v43 }
0x1976   :  { %v5910_v37 = vpop.xlane.xlu1 %5909 }
0x1977   :  { %v5928_v25 = vsub.f32 %v5864_v13, %v5910_v37  ;;  %v15167_v37 = vmul.f32 0.35355338, %v15103_v38  ;;  %v5872_v38 = vsel %vm390_vm1, %v15175_v10, -inf }
0x1979   :  { %v5958_v5 = vmul.f32 1.442695, %v5928_v25  ;;  %v15170_v25 = vmul.f32 0.35355338, %v15107_v49  ;;  %v15185_v49 = vmul.f32 0.35355338, %v15111_v18 }
0x197a   :  { %v5904_v7 = vpop.xlane.xlu1 %5903  ;;  %v5881_v18 = vsel %vm390_vm1, %v15190_v15, -inf }
0x197b   :  { %11708 = vpow2.f32 %v5958_v5  ;;  %v5926_v55 = vsub.f32 %v5862_v63, %v5904_v7  ;;  %v5869_v5 = vsel %vm390_vm1, %v15170_v25, -inf  ;;  %v15180_v7 = vmul.f32 0.35355338, %v15105_v51 }
0x197c   :  { %11710 = vpow2.f32 %v5960_v31  ;;  %v5866_v31 = vsel %vm390_vm1, %v15167_v37, -inf  ;;  %v15197_v51 = vmul.f32 0.35355338, %v15109_v59  ;;  %v5887_v59 = vsel %vm390_vm1, %v15204_v45, -inf }
0x197d   :  { %v5954_v33 = vmul.f32 1.442695, %v5926_v55  ;;  %v5875_v55 = vsel %vm390_vm1, %v15180_v7, -inf }
0x197f   :  { %11712 = vpow2.f32 %v5954_v33  ;;  %v5884_v33 = vsel %vm390_vm1, %v15197_v51, -inf }
0x1980   :  { %11714 = vpow2.f32 %v5956_v39  ;;  %v5878_v39 = vsel %vm390_vm1, %v15185_v49, -inf }
0x1985   :  { %v15146_v43 = vpop.eup %11708 }
0x1986   :  { %v6004_v50 = vsel %vm390_vm1, %v15146_v43, 0.0  ;;  %v15150_v41 = vpop.eup %11710 }
0x1987   :  { %6005 = vadd.xlane.f32.xlu0 %v6004_v50  ;;  %v6007_v63 = vsel %vm390_vm1, %v15150_v41, 0.0  ;;  %v6493_v50 = vpop.permute.xlu1 %6492 }
0x1989   :  { %v15152_v13 = vpop.eup %11712 }
0x198a   :  { %v5998_v58 = vsel %vm390_vm1, %v15152_v13, 0.0  ;;  %v15158_v16 = vpop.eup %11714 }
0x198b   :  { %5999 = vadd.xlane.f32.xlu1 %v5998_v58  ;;  %6008 = vadd.xlane.f32.xlu0 %v6007_v63  ;;  %v6001_v2 = vsel %vm390_vm1, %v15158_v16, 0.0  ;;  %v6606_v58 = vpop.permute.xlu0 %6605 }
0x198f   :  { %6002 = vadd.xlane.f32.xlu0 %v6001_v2 }
0x199c   :  { %6494 = vrot.lane.b32.xlu1 %v14716_v54, %s12069_s9 }
0x19a5   :  { %6607 = vrot.lane.b32.xlu0 %v14738_v44, %s12068_s8 }
0x19c0   :  { %5867 = vmax.xlane.f32.xlu1 %v5866_v31 }
0x19c4   :  { %5870 = vmax.xlane.f32.xlu0 %v5869_v5 }
0x19c8   :  { %5873 = vmax.xlane.f32.xlu0 %v5872_v38 }
0x19cc   :  { %5876 = vmax.xlane.f32.xlu0 %v5875_v55 }
0x19d0   :  { %5879 = vmax.xlane.f32.xlu0 %v5878_v39 }
0x19d1   :  { %6609 = vrot.lane.b32.xlu1 %v14750_v52, %s12068_s8 }
0x19d4   :  { %5882 = vmax.xlane.f32.xlu0 %v5881_v18 }
0x19d5   :  { %6496 = vrot.lane.b32.xlu1 %v14730_v26, %s12069_s9 }
0x19d8   :  { %5885 = vmax.xlane.f32.xlu0 %v5884_v33 }
0x19d9   :  { %6611 = vrot.lane.b32.xlu1 %v14748_v42, %s12068_s8 }
0x19dc   :  { %5888 = vmax.xlane.f32.xlu0 %v5887_v59 }
0x19dd   :  { %6597 = vrot.lane.b32.xlu1 %v14740_v14, %s12069_s9 }
0x19de   :  { %v5994_v63 = vpop.xlane.xlu1 %5993 }
0x19e1   :  { %6599 = vrot.lane.b32.xlu1 %v14738_v44, %s12069_s9 }
0x19e2   :  { %v5988_v4 = vpop.xlane.xlu1 %5987  ;;  %v5997_v2 = vpop.xlane.xlu0 %5996 }
0x19e3   :  { %11716 = vrcp.f32 %v5997_v2 }
0x19e4   :  { %11718 = vrcp.f32 %v5988_v4 }
0x19e5   :  { %6601 = vrot.lane.b32.xlu1 %v14750_v52, %s12069_s9  ;;  %11720 = vrcp.f32 %v5994_v63 }
0x19e6   :  { %v5991_v31 = vpop.xlane.xlu0 %5990 }
0x19e7   :  { %11722 = vrcp.f32 %v5991_v31  ;;  %v6521_v31 = vsel %vm534_vm2, %v15035_v3, 0  ;;  %v6530_v3 = vsel %vm534_vm2, %v15143_v20, 0 }
0x19e9   :  { %6603 = vrot.lane.b32.xlu1 %v14748_v42, %s12069_s9 }
0x19ed   :  { %v11717_v5 = vpop.eup %11716 }
0x19ee   :  { %v11719_v38 = vpop.eup %11718  ;;  %v6033_v18 = vmul.f32 %v11717_v5, %v15133_v0 }
0x19ef   :  { %v11721_v55 = vpop.eup %11720  ;;  %v6027_v33 = vmul.f32 %v11719_v38, %v15131_v32  ;;  %v6524_v32 = vsel %vm534_vm2, %v15123_v62, 0 }
0x19f0   :  { %v6031_v63 = vmul.f32 %v11721_v55, %v15127_v6  ;;  %v6527_v6 = vsel %vm534_vm2, %v15125_v53, 0 }
0x19f1   :  { %v11723_v39 = vpop.eup %11722 }
0x19f2   :  { %6498 = vrot.lane.b32.xlu0 %v14728_v23, %s12069_s9  ;;  %v6029_v59 = vmul.f32 %v11723_v39, %v15139_v47  ;;  %v6047_v2 = vpack.c.bf16 %v6033_v18, %v6031_v63 }
0x19f4   :  { %v6046_v4 = vpack.c.bf16 %v6029_v59, %v6027_v33 }
0x19f6   :  { %10682 = vmatprep.mubr.msk.bf16.mxu0 %vm390_vm1, %v6046_v4 }
0x19f7   :  { %10683 = vmatmul.mubr.msk.bf16.vlgmr.msra.gmra.mrb[136].mxu0 %vm390_vm1, %v6047_v2 }
0x19f8   :  { %10727 = vmatpush3.bf16.xpose.msra.mxu0 %v6521_v31  ;;  %v6626_v31 = vsel %vm534_vm2, %v6606_v58, 0 }
0x19f9   :  { %11185 = vmatprep.subr.msk.bf16.mxu0 %vm534_vm2, %v15123_v62 }
0x1a00   :  { %10729 = vmatpush3.bf16.xpose.msra.mxu0 %v6524_v32 }
0x1a01   :  { %11186 = vmatprep.subr.msk.bf16.mxu0 %vm534_vm2, %v15125_v53 }
0x1a08   :  { %10731 = vmatpush3.bf16.xpose.msra.mxu0 %v6527_v6 }
0x1a09   :  { %11187 = vmatprep.subr.msk.bf16.mxu0 %vm534_vm2, %v15143_v20 }
0x1a10   :  { %10733 = vmatpush3.bf16.xpose.msra.mxu0 %v6530_v3 }
0x1a11   :  { %11188 = vmatprep.subr.msk.bf16.mxu0 %vm534_vm2, %v6606_v58 }
0x1a14   :  { %v6006_v0 = vpop.xlane.xlu0 %6005 }
0x1a18   :  { %v6000_v47 = vpop.xlane.xlu1 %5999  ;;  %v6009_v62 = vpop.xlane.xlu0 %6008 }
0x1a19   :  { %11724 = vrcp.f32 %v6009_v62 }
0x1a1a   :  { %11726 = vrcp.f32 %v6000_v47 }
0x1a1b   :  { %11728 = vrcp.f32 %v6006_v0 }
0x1a1c   :  { %v6003_v5 = vpop.xlane.xlu0 %6002  ;;  %v6495_v2 = vpop.permute.xlu1 %6494 }
0x1a1d   :  { %11730 = vrcp.f32 %v6003_v5 }
0x1a23   :  { %v11725_v38 = vpop.eup %11724 }
0x1a24   :  { %v11727_v53 = vpop.eup %11726  ;;  %v6041_v18 = vmul.f32 %v11725_v38, %v15150_v41  ;;  %v6608_v41 = vpop.permute.xlu0 %6607 }
0x1a25   :  { %v11729_v55 = vpop.eup %11728  ;;  %v6035_v33 = vmul.f32 %v11727_v53, %v15152_v13  ;;  %v6629_v13 = vsel %vm534_vm2, %v6608_v41, 0 }
0x1a26   :  { %v6039_v59 = vmul.f32 %v11729_v55, %v15146_v43 }
0x1a27   :  { %v11731_v39 = vpop.eup %11730 }
0x1a28   :  { %v6037_v20 = vmul.f32 %v11731_v39, %v15158_v16  ;;  %v6049_v4 = vpack.c.bf16 %v6041_v18, %v6039_v59 }
0x1a2a   :  { %v6048_v63 = vpack.c.bf16 %v6037_v20, %v6035_v33 }
0x1a2c   :  { %10686 = vmatprep.mubr.msk.bf16.mxu0 %vm390_vm1, %v6048_v63 }
0x1a2d   :  { %10687 = vmatmul.mubr.msk.bf16.gmra.mrb[140].mxu0 %vm390_vm1, %v6049_v4 }
0x1a2e   :  { %10734 = vmatprep.mubr.msk.bf16.mxu0 %vm534_vm2, %v6493_v50 }
0x1a35   :  { %10735 = vmatmul.mubr.msk.bf16.vlgmr.msra.gmra.mrb[144].mxu0 %vm534_vm2, %v6495_v2 }
0x1a36   :  { %10743 = vmatpush3.bf16.xpose.msra.mxu0 %v6626_v31 }
0x1a37   :  { %11189 = vmatprep.subr.msk.bf16.mxu0 %vm534_vm2, %v6608_v41 }
0x1a3e   :  { %10745 = vmatpush3.bf16.xpose.msra.mxu0 %v6629_v13 }
0x1a4d   :  { %v5868_v43 = vpop.xlane.xlu1 %5867 }
0x1a4e   :  { %v5914_v16 = vsub.f32 %v15167_v37, %v5868_v43 }
0x1a50   :  { %v5930_v32 = vmul.f32 1.442695, %v5914_v16 }
0x1a51   :  { %v6610_v6 = vpop.permute.xlu1 %6609  ;;  %v5871_v3 = vpop.xlane.xlu0 %5870 }
0x1a52   :  { %11732 = vpow2.f32 %v5930_v32  ;;  %v5915_v50 = vsub.f32 %v15170_v25, %v5871_v3  ;;  %11190 = vmatprep.subr.msk.bf16.mxu0 %vm534_vm2, %v6610_v6  ;;  %v6632_v58 = vsel %vm534_vm2, %v6610_v6, 0 }
0x1a53   :  { %10747 = vmatpush3.bf16.xpose.msra.mxu0 %v6632_v58 }
0x1a54   :  { %v5932_v0 = vmul.f32 1.442695, %v5915_v50 }
0x1a55   :  { %v6497_v47 = vpop.permute.xlu1 %6496  ;;  %v5874_v62 = vpop.xlane.xlu0 %5873 }
0x1a56   :  { %11734 = vpow2.f32 %v5932_v0  ;;  %v5916_v5 = vsub.f32 %v15175_v10, %v5874_v62  ;;  %10738 = vmatprep.mubr.msk.bf16.mxu0 %vm534_vm2, %v6497_v47 }
0x1a58   :  { %v5934_v37 = vmul.f32 1.442695, %v5916_v5 }
0x1a59   :  { %v6612_v38 = vpop.permute.xlu1 %6611  ;;  %v5877_v53 = vpop.xlane.xlu0 %5876 }
0x1a5a   :  { %11736 = vpow2.f32 %v5934_v37  ;;  %v5917_v55 = vsub.f32 %v15180_v7, %v5877_v53  ;;  %11191 = vmatprep.subr.msk.bf16.mxu0 %vm534_vm2, %v6612_v38  ;;  %v6635_v25 = vsel %vm534_vm2, %v6612_v38, 0 }
0x1a5b   :  { %10749 = vmatpush3.bf16.xpose.msra.mxu0 %v6635_v25 }
0x1a5c   :  { %v15263_v39 = vpop.eup %11732  ;;  %v5936_v18 = vmul.f32 1.442695, %v5917_v55 }
0x1a5d   :  { %v5880_v33 = vpop.xlane.xlu0 %5879  ;;  %v5962_v10 = vsel %vm390_vm1, %v15263_v39, 0.0 }
0x1a5e   :  { %11738 = vpow2.f32 %v5936_v18  ;;  %v5918_v20 = vsub.f32 %v15185_v49, %v5880_v33  ;;  %5963 = vadd.xlane.f32.xlu1 %v5962_v10  ;;  %v9582_v33 = vld [vmem:[%s16788_s2 + $0x48] sm:$0xff]  ;;  %v9565_v10 = vld [vmem:[%s16788_s2 + $0x40] sm:$0xff] }
0x1a60   :  { %v15268_v59 = vpop.eup %11734  ;;  %v5938_v63 = vmul.f32 1.442695, %v5918_v20  ;;  %v6237_v20 = vpack.c.bf16 %v9582_v33, %v9582_v33 }
0x1a61   :  { %v5883_v7 = vpop.xlane.xlu0 %5882  ;;  %v5965_v4 = vsel %vm390_vm1, %v15268_v59, 0.0 }
0x1a62   :  { %11740 = vpow2.f32 %v5938_v63  ;;  %v5919_v2 = vsub.f32 %v15190_v15, %v5883_v7  ;;  %5966 = vadd.xlane.f32.xlu0 %v5965_v4  ;;  %v6598_v15 = vpop.permute.xlu1 %6597  ;;  %v5639_v63 = vpack.c.bf16 %v9565_v10, %v9565_v10 }
0x1a64   :  { %v15273_v31 = vpop.eup %11736  ;;  %v5940_v41 = vmul.f32 1.442695, %v5919_v2 }
0x1a65   :  { %v5886_v13 = vpop.xlane.xlu0 %5885  ;;  %v5968_v43 = vsel %vm390_vm1, %v15273_v31, 0.0 }
0x1a66   :  { %11742 = vpow2.f32 %v5940_v41  ;;  %v5920_v49 = vsub.f32 %v15197_v51, %v5886_v13  ;;  %5969 = vadd.xlane.f32.xlu0 %v5968_v43  ;;  %v6600_v5 = vpop.permute.xlu1 %6599 }
0x1a68   :  { %v15278_v16 = vpop.eup %11738  ;;  %v5942_v32 = vmul.f32 1.442695, %v5920_v49 }
0x1a69   :  { %v5889_v6 = vpop.xlane.xlu0 %5888  ;;  %v5971_v3 = vsel %vm390_vm1, %v15278_v16, 0.0 }
0x1a6a   :  { %11744 = vpow2.f32 %v5942_v32  ;;  %v5921_v50 = vsub.f32 %v15204_v45, %v5889_v6  ;;  %5972 = vadd.xlane.f32.xlu0 %v5971_v3  ;;  %v6602_v53 = vpop.permute.xlu1 %6601 }
0x1a6c   :  { %v15283_v58 = vpop.eup %11740  ;;  %v5944_v0 = vmul.f32 1.442695, %v5921_v50 }
0x1a6d   :  { %v6499_v47 = vpop.permute.xlu0 %6498  ;;  %v5974_v51 = vsel %vm390_vm1, %v15283_v58, 0.0 }
0x1a6e   :  { %11746 = vpow2.f32 %v5944_v0  ;;  %5975 = vadd.xlane.f32.xlu1 %v5974_v51  ;;  %10739 = vmatmul.mubr.msk.bf16.gmra.mrb[148].mxu0 %vm534_vm2, %v6499_v47  ;;  %v6604_v18 = vpop.permute.xlu1 %6603 }
0x1a6f   :  { %10750 = vmatprep.mubr.msk.bf16.mxu0 %vm534_vm2, %v6598_v15 }
0x1a70   :  { %v15289_v62 = vpop.eup %11742 }
0x1a71   :  { %v5977_v45 = vsel %vm390_vm1, %v15289_v62, 0.0 }
0x1a72   :  { %5978 = vadd.xlane.f32.xlu0 %v5977_v45 }
0x1a74   :  { %v15293_v37 = vpop.eup %11744 }
0x1a75   :  { %v5980_v38 = vsel %vm390_vm1, %v15293_v37, 0.0 }
0x1a76   :  { %5981 = vadd.xlane.f32.xlu1 %v5980_v38  ;;  %10751 = vmatmul.mubr.msk.bf16.vlgmr.msra.gmra.mrb[152].mxu0 %vm534_vm2, %v6600_v5 }
0x1a77   :  { %10754 = vmatprep.mubr.msk.bf16.mxu0 %vm534_vm2, %v6602_v53 }
0x1a78   :  { %v15299_v55 = vpop.eup %11746 }
0x1a79   :  { %v5983_v25 = vsel %vm390_vm1, %v15299_v55, 0.0 }
0x1a7a   :  { %5984 = vadd.xlane.f32.xlu0 %v5983_v25 }
0x1a7e   :  { %10755 = vmatmul.mubr.msk.bf16.gmra.mrb[156].mxu0 %vm534_vm2, %v6604_v18 }
0x1a87   :  { %6050 = vrot.lane.b32.xlu1 %v14718_v28, %s12067_s7 }
0x1a8b   :  { %6054 = vrot.lane.b32.xlu1 %v14730_v26, %s12067_s7 }
0x1a8f   :  { %6056 = vrot.lane.b32.xlu1 %v14728_v23, %s12067_s7 }
0x1a90   :  { %6052 = vrot.lane.b32.xlu0 %v14716_v54, %s12067_s7 }
0x1a93   :  { %6239 = vrot.lane.b32.xlu1 %v6237_v20, %s12070_s14 }
0x1a94   :  { %6366 = vrot.lane.b32.xlu0 %v5639_v63, %s12070_s14 }
0x1a97   :  { %6902 = vrot.lane.b32.xlu1 %v14718_v28, %s12063_s30 }
0x1a9b   :  { %6904 = vrot.lane.b32.xlu1 %v14716_v54, %s12063_s30 }
0x1aca   :  { %v15324_v7 = vpop.f32.mrb[136].mxu0 }
0x1acb   :  { %v15326_v4 = vpop.f32.mrb[137].mxu0 }
0x1acc   :  { %v15328_v2 = vpop.f32.mrb[138].mxu0 }
0x1acd   :  { %v15332_v13 = vpop.f32.mrb[139].mxu0 }
0x1aeb   :  { %v5964_v49 = vpop.xlane.xlu1 %5963 }
0x1aec   :  { %11748 = vrcp.f32 %v5964_v49 }
0x1aef   :  { %v5967_v32 = vpop.xlane.xlu0 %5966 }
0x1af0   :  { %11750 = vrcp.f32 %v5967_v32 }
0x1af3   :  { %v5970_v3 = vpop.xlane.xlu0 %5969 }
0x1af6   :  { %v11749_v6 = vpop.eup %11748 }
0x1af7   :  { %v6011_v50 = vmul.f32 %v11749_v6, %v15263_v39  ;;  %v5973_v51 = vpop.xlane.xlu0 %5972 }
0x1af8   :  { %11752 = vrcp.f32 %v5973_v51 }
0x1afa   :  { %v11751_v15 = vpop.eup %11750 }
0x1afb   :  { %v6013_v0 = vmul.f32 %v11751_v15, %v15268_v59  ;;  %v5976_v5 = vpop.xlane.xlu1 %5975 }
0x1afd   :  { %v6042_v47 = vpack.c.bf16 %v6013_v0, %v6011_v50 }
0x1aff   :  { %10666 = vmatprep.mubr.msk.bf16.mxu1 %vm390_vm1, %v6042_v47  ;;  %v5979_v53 = vpop.xlane.xlu0 %5978 }
0x1b00   :  { %v15339_v45 = vpop.f32.mrb[140].mxu0  ;;  %11754 = vrcp.f32 %v5979_v53 }
0x1b01   :  { %v15341_v38 = vpop.f32.mrb[141].mxu0  ;;  %11756 = vrcp.f32 %v5970_v3 }
0x1b02   :  { %v15343_v25 = vpop.f32.mrb[142].mxu0  ;;  %11758 = vrcp.f32 %v5976_v5 }
0x1b03   :  { %v15347_v33 = vpop.f32.mrb[143].mxu0  ;;  %v5982_v39 = vpop.xlane.xlu1 %5981 }
0x1b07   :  { %v6051_v10 = vpop.permute.xlu1 %6050  ;;  %v5985_v20 = vpop.xlane.xlu0 %5984 }
0x1b08   :  { %10658 = vmatprep.subr.bf16.mxu1 %v6051_v10  ;;  %v10736_v63 = vpop.f32.mrb[144].mxu0  ;;  %11760 = vrcp.f32 %v5985_v20 }
0x1b09   :  { %v15351_v49 = vmul.f32 0.35355338, %v10736_v63  ;;  %10659 = vmatpush3.bf16.msra.mxu1 %v6051_v10  ;;  %v6566_v32 = vpop.f32.mrb[145].mxu0  ;;  %v11753_v63 = vpop.eup %11752  ;;  %11762 = vrcp.f32 %v5982_v39 }
0x1b0a   :  { %v15353_v6 = vmul.f32 0.35355338, %v6566_v32  ;;  %v10737_v15 = vpop.f32.mrb[146].mxu0  ;;  %v6017_v59 = vmul.f32 %v11753_v63, %v15278_v16 }
0x1b0b   :  { %v15355_v50 = vmul.f32 0.35355338, %v10737_v15  ;;  %v6569_v0 = vpop.f32.mrb[147].mxu0  ;;  %v6055_v47 = vpop.permute.xlu1 %6054  ;;  %v6724_v51 = vsel %vm390_vm1, %v15351_v49, -inf }
0x1b0c   :  { %v6053_v53 = vpop.permute.xlu0 %6052  ;;  %6725 = vmax.xlane.f32.xlu0 %v6724_v51  ;;  %v6718_v3 = vsel %vm390_vm1, %v15353_v6, -inf  ;;  %v15361_v5 = vmul.f32 0.35355338, %v6569_v0  ;;  %v11755_v15 = vpop.eup %11754 }
0x1b0d   :  { %10660 = vmatprep.subr.bf16.mxu1 %v6053_v53  ;;  %6719 = vmax.xlane.f32.xlu1 %v6718_v3  ;;  %v6727_v10 = vsel %vm390_vm1, %v15355_v50, -inf  ;;  %v11757_v18 = vpop.eup %11756  ;;  %v6021_v0 = vmul.f32 %v11755_v15, %v15289_v62 }
0x1b0e   :  { %10661 = vmatpush3.bf16.msra.mxu1 %v6053_v53  ;;  %v11759_v51 = vpop.eup %11758  ;;  %v6721_v20 = vsel %vm390_vm1, %v15361_v5, -inf  ;;  %v6015_v53 = vmul.f32 %v11757_v18, %v15273_v31 }
0x1b0f   :  { %10662 = vmatprep.subr.bf16.mxu1 %v6055_v47  ;;  %v6057_v32 = vpop.permute.xlu1 %6056  ;;  %v6019_v39 = vmul.f32 %v11759_v51, %v15283_v58 }
0x1b10   :  { %6728 = vmax.xlane.f32.xlu0 %v6727_v10  ;;  %v6043_v10 = vpack.c.bf16 %v6017_v59, %v6015_v53  ;;  %v15373_v63 = vpop.permute.xlu0 %6366 }
0x1b11   :  { %v6044_v16 = vpack.c.bf16 %v6021_v0, %v6019_v39 }
0x1b12   :  { %10663 = vmatpush3.bf16.msra.mxu1 %v6055_v47  ;;  %v11761_v41 = vpop.eup %11760 }
0x1b13   :  { %10664 = vmatprep.subr.bf16.mxu1 %v6057_v32  ;;  %v6240_v3 = vpop.permute.xlu1 %6239  ;;  %v6025_v31 = vmul.f32 %v11761_v41, %v15299_v55 }
0x1b14   :  { %6722 = vmax.xlane.f32.xlu0 %v6721_v20  ;;  %v6266_v47 = vsel %vm1738_vm3, %v6240_v3, 0  ;;  %v11763_v20 = vpop.eup %11762 }
0x1b15   :  { %v6023_v58 = vmul.f32 %v11763_v20, %v15293_v37 }
0x1b16   :  { %10665 = vmatpush3.bf16.msra.mxu1 %v6057_v32 }
0x1b17   :  { %11182 = vmatprep.subr.msk.bf16.mxu1 %vm1738_vm3, %v6240_v3  ;;  %v6045_v62 = vpack.c.bf16 %v6025_v31, %v6023_v58 }
0x1b19   :  { %10667 = vmatmul.mubr.msk.bf16.vlgmr.msra.gmra.mrb[124].mxu1 %vm390_vm1, %v6043_v10 }
0x1b1a   :  { %10670 = vmatprep.mubr.msk.bf16.mxu1 %vm390_vm1, %v6044_v16  ;;  %10691 = vmatpush3.bf16.msra.mxu1 %v6266_v47 }
0x1b1b   :  { %11183 = vmatprep.subr.msk.bf16.mxu1 %vm1738_vm3, %v15373_v63 }
0x1b21   :  { %10671 = vmatmul.mubr.msk.bf16.gmra.mrb[128].mxu1 %vm390_vm1, %v6045_v62 }
0x1b41   :  { %v10740_v18 = vpop.f32.mrb[148].mxu0 }
0x1b42   :  { %v15382_v59 = vmul.f32 0.35355338, %v10740_v18  ;;  %v6582_v32 = vpop.f32.mrb[149].mxu0 }
0x1b43   :  { %v10741_v15 = vpop.f32.mrb[150].mxu0  ;;  %v15384_v51 = vmul.f32 0.35355338, %v6582_v32 }
0x1b44   :  { %v15386_v0 = vmul.f32 0.35355338, %v10741_v15  ;;  %v6585_v53 = vpop.f32.mrb[151].mxu0  ;;  %v6736_v55 = vsel %vm390_vm1, %v15382_v59, -inf }
0x1b45   :  { %6737 = vmax.xlane.f32.xlu1 %v6736_v55  ;;  %v15390_v41 = vmul.f32 0.35355338, %v6585_v53  ;;  %v6730_v3 = vsel %vm390_vm1, %v15384_v51, -inf }
0x1b46   :  { %v6739_v37 = vsel %vm390_vm1, %v15386_v0, -inf }
0x1b47   :  { %6740 = vmax.xlane.f32.xlu0 %v6739_v37  ;;  %v6733_v16 = vsel %vm390_vm1, %v15390_v41, -inf }
0x1b49   :  { %6731 = vmax.xlane.f32.xlu1 %v6730_v3  ;;  %v10752_v39 = vpop.f32.mrb[152].mxu0 }
0x1b4a   :  { %v15396_v10 = vmul.f32 0.35355338, %v10752_v39  ;;  %v6671_v47 = vpop.f32.mrb[153].mxu0 }
0x1b4b   :  { %6734 = vmax.xlane.f32.xlu0 %v6733_v16  ;;  %v10753_v20 = vpop.f32.mrb[154].mxu0  ;;  %v15400_v31 = vmul.f32 0.35355338, %v6671_v47 }
0x1b4c   :  { %v15402_v58 = vmul.f32 0.35355338, %v10753_v20  ;;  %v6674_v62 = vpop.f32.mrb[155].mxu0  ;;  %v6748_v18 = vsel %vm390_vm1, %v15396_v10, -inf }
0x1b4d   :  { %6749 = vmax.xlane.f32.xlu1 %v6748_v18  ;;  %v15406_v32 = vmul.f32 0.35355338, %v6674_v62  ;;  %v6742_v53 = vsel %vm390_vm1, %v15400_v31, -inf }
0x1b4e   :  { %v6751_v15 = vsel %vm390_vm1, %v15402_v58, -inf }
0x1b4f   :  { %6752 = vmax.xlane.f32.xlu0 %v6751_v15  ;;  %v6745_v39 = vsel %vm390_vm1, %v15406_v32, -inf }
0x1b51   :  { %6743 = vmax.xlane.f32.xlu1 %v6742_v53  ;;  %v10756_v55 = vpop.f32.mrb[156].mxu0 }
0x1b52   :  { %v15412_v37 = vmul.f32 0.35355338, %v10756_v55  ;;  %v6687_v3 = vpop.f32.mrb[157].mxu0 }
0x1b53   :  { %6746 = vmax.xlane.f32.xlu0 %v6745_v39  ;;  %v10757_v47 = vpop.f32.mrb[158].mxu0  ;;  %v15416_v16 = vmul.f32 0.35355338, %v6687_v3  ;;  %v15434_v39 = vpop.permute.xlu1 %6902 }
0x1b54   :  { %v15418_v20 = vmul.f32 0.35355338, %v10757_v47  ;;  %v6690_v62 = vpop.f32.mrb[159].mxu0  ;;  %v6760_v18 = vsel %vm390_vm1, %v15412_v37, -inf }
0x1b55   :  { %6761 = vmax.xlane.f32.xlu1 %v6760_v18  ;;  %v15422_v15 = vmul.f32 0.35355338, %v6690_v62  ;;  %v6754_v55 = vsel %vm390_vm1, %v15416_v16, -inf }
0x1b56   :  { %v6763_v53 = vsel %vm390_vm1, %v15418_v20, -inf }
0x1b57   :  { %6764 = vmax.xlane.f32.xlu0 %v6763_v53  ;;  %v6757_v3 = vsel %vm390_vm1, %v15422_v15, -inf  ;;  %v15436_v47 = vpop.permute.xlu1 %6904 }
0x1b59   :  { %6755 = vmax.xlane.f32.xlu1 %v6754_v55 }
0x1b5b   :  { %6758 = vmax.xlane.f32.xlu0 %v6757_v3 }
0x1b6a   :  { %6908 = vrot.lane.b32.xlu1 %v14728_v23, %s12063_s30 }
0x1b71   :  { %6906 = vrot.lane.b32.xlu0 %v14730_v26, %s12063_s30 }
0x1b99   :  { %v6726_v62 = vpop.xlane.xlu0 %6725 }
0x1b9a   :  { %v6768_v18 = vsub.f32 %v15351_v49, %v6726_v62  ;;  %v6720_v53 = vpop.xlane.xlu1 %6719 }
0x1b9b   :  { %v6766_v55 = vsub.f32 %v15353_v6, %v6720_v53 }
0x1b9c   :  { %v6786_v43 = vmul.f32 1.442695, %v6768_v18 }
0x1b9d   :  { %v6782_v12 = vmul.f32 1.442695, %v6766_v55  ;;  %v6729_v61 = vpop.xlane.xlu0 %6728 }
0x1b9e   :  { %11764 = vpow2.f32 %v6786_v43  ;;  %v6769_v3 = vsub.f32 %v15355_v50, %v6729_v61 }
0x1b9f   :  { %11766 = vpow2.f32 %v6782_v12 }
0x1ba0   :  { %v6788_v24 = vmul.f32 1.442695, %v6769_v3 }
0x1ba1   :  { %v6723_v19 = vpop.xlane.xlu0 %6722 }
0x1ba2   :  { %11768 = vpow2.f32 %v6788_v24  ;;  %v6767_v36 = vsub.f32 %v15361_v5, %v6723_v19 }
0x1ba4   :  { %v6784_v1 = vmul.f32 1.442695, %v6767_v36 }
0x1ba6   :  { %11770 = vpow2.f32 %v6784_v1 }
0x1ba8   :  { %v15442_v30 = vpop.eup %11764 }
0x1ba9   :  { %16937 = vst [vmem:[#allocation6_spill] sm:$0xff] %v15442_v30  ;;  %v6820_v49 = vsel %vm390_vm1, %v15442_v30, 0.0  ;;  %v15446_v6 = vpop.eup %11766 }
0x1baa   :  { %6821 = vadd.xlane.f32.xlu1 %v6820_v49  ;;  %v6814_v61 = vsel %vm390_vm1, %v15446_v6, 0.0 }
0x1bac   :  { %v15448_v62 = vpop.eup %11768 }
0x1bad   :  { %v6823_v24 = vsel %vm390_vm1, %v15448_v62, 0.0 }
0x1bae   :  { %6815 = vadd.xlane.f32.xlu1 %v6814_v61  ;;  %6824 = vadd.xlane.f32.xlu0 %v6823_v24 }
0x1bb0   :  { %v15454_v36 = vpop.eup %11770 }
0x1bb1   :  { %v6817_v1 = vsel %vm390_vm1, %v15454_v36, 0.0 }
0x1bb2   :  { %6818 = vadd.xlane.f32.xlu0 %v6817_v1 }
0x1bd2   :  { %v6738_v19 = vpop.xlane.xlu1 %6737 }
0x1bd3   :  { %v6772_v12 = vsub.f32 %v15382_v59, %v6738_v19 }
0x1bd4   :  { %v6741_v43 = vpop.xlane.xlu0 %6740 }
0x1bd5   :  { %v6794_v50 = vmul.f32 1.442695, %v6772_v12  ;;  %v6773_v5 = vsub.f32 %v15386_v0, %v6741_v43 }
0x1bd6   :  { %v6732_v18 = vpop.xlane.xlu1 %6731 }
0x1bd7   :  { %11772 = vpow2.f32 %v6794_v50  ;;  %v6796_v53 = vmul.f32 1.442695, %v6773_v5  ;;  %v6770_v55 = vsub.f32 %v15384_v51, %v6732_v18 }
0x1bd8   :  { %v6735_v3 = vpop.xlane.xlu0 %6734 }
0x1bd9   :  { %11774 = vpow2.f32 %v6796_v53  ;;  %v6790_v49 = vmul.f32 1.442695, %v6770_v55  ;;  %v6771_v61 = vsub.f32 %v15390_v41, %v6735_v3 }
0x1bda   :  { %v6750_v24 = vpop.xlane.xlu1 %6749 }
0x1bdb   :  { %11776 = vpow2.f32 %v6790_v49  ;;  %v6792_v1 = vmul.f32 1.442695, %v6771_v61  ;;  %v6776_v30 = vsub.f32 %v15396_v10, %v6750_v24 }
0x1bdc   :  { %v6753_v59 = vpop.xlane.xlu0 %6752 }
0x1bdd   :  { %11778 = vpow2.f32 %v6792_v1  ;;  %v6802_v19 = vmul.f32 1.442695, %v6776_v30  ;;  %v6777_v0 = vsub.f32 %v15402_v58, %v6753_v59 }
0x1bde   :  { %v6744_v12 = vpop.xlane.xlu1 %6743 }
0x1bdf   :  { %11780 = vpow2.f32 %v6802_v19  ;;  %v6774_v43 = vsub.f32 %v15400_v31, %v6744_v12  ;;  %v6804_v18 = vmul.f32 1.442695, %v6777_v0 }
0x1be0   :  { %v6747_v51 = vpop.xlane.xlu0 %6746 }
0x1be1   :  { %v15465_v50 = vpop.eup %11772  ;;  %v6798_v5 = vmul.f32 1.442695, %v6774_v43  ;;  %v6775_v41 = vsub.f32 %v15406_v32, %v6747_v51 }
0x1be2   :  { %v6762_v53 = vpop.xlane.xlu1 %6761  ;;  %v6832_v10 = vsel %vm390_vm1, %v15465_v50, 0.0 }
0x1be3   :  { %v15470_v55 = vpop.eup %11774  ;;  %11782 = vpow2.f32 %v6798_v5  ;;  %v6780_v30 = vsub.f32 %v15412_v37, %v6762_v53  ;;  %6833 = vadd.xlane.f32.xlu1 %v6832_v10  ;;  %v6800_v32 = vmul.f32 1.442695, %v6775_v41 }
0x1be4   :  { %v6765_v58 = vpop.xlane.xlu0 %6764  ;;  %v6835_v31 = vsel %vm390_vm1, %v15470_v55, 0.0  ;;  %11784 = vpow2.f32 %v6804_v18 }
0x1be5   :  { %v15475_v3 = vpop.eup %11776  ;;  %v6810_v49 = vmul.f32 1.442695, %v6780_v30  ;;  %v6781_v61 = vsub.f32 %v15418_v20, %v6765_v58  ;;  %6836 = vadd.xlane.f32.xlu0 %v6835_v31 }
0x1be6   :  { %v6756_v24 = vpop.xlane.xlu1 %6755  ;;  %v6826_v1 = vsel %vm390_vm1, %v15475_v3, 0.0 }
0x1be7   :  { %v15480_v59 = vpop.eup %11778  ;;  %11786 = vpow2.f32 %v6810_v49  ;;  %v6778_v37 = vsub.f32 %v15416_v16, %v6756_v24  ;;  %6827 = vadd.xlane.f32.xlu1 %v6826_v1  ;;  %v6812_v20 = vmul.f32 1.442695, %v6781_v61  ;;  %v6393_v24 = vsel %vm1738_vm3, %v15373_v63, 0 }
0x1be8   :  { %v6759_v19 = vpop.xlane.xlu0 %6758  ;;  %v6829_v0 = vsel %vm390_vm1, %v15480_v59, 0.0  ;;  %11788 = vpow2.f32 %v6800_v32 }
0x1be9   :  { %v15485_v12 = vpop.eup %11780  ;;  %v6806_v43 = vmul.f32 1.442695, %v6778_v37  ;;  %v6779_v51 = vsub.f32 %v15422_v15, %v6759_v19  ;;  %6830 = vadd.xlane.f32.xlu0 %v6829_v0 }
0x1bea   :  { %v6844_v41 = vsel %vm390_vm1, %v15485_v12, 0.0 }
0x1beb   :  { %11790 = vpow2.f32 %v6806_v43  ;;  %v6808_v5 = vmul.f32 1.442695, %v6779_v51 }
0x1bec   :  { %v10668_v18 = vpop.f32.mrb[124].mxu1  ;;  %11792 = vpow2.f32 %v6812_v20 }
0x1bed   :  { %v15490_v16 = vpop.eup %11782  ;;  %v6108_v53 = vpop.f32.mrb[125].mxu1  ;;  %6845 = vadd.xlane.f32.xlu0 %v6844_v41  ;;  %11794 = vpow2.f32 %v6808_v5 }
0x1bee   :  { %v10669_v10 = vpop.f32.mrb[126].mxu1  ;;  %v15492_v31 = vpop.eup %11784  ;;  %v6838_v49 = vsel %vm390_vm1, %v15490_v16, 0.0 }
0x1bef   :  { %v6230_v30 = vpack.c.bf16 %v10669_v10, %v10668_v18  ;;  %v6111_v58 = vpop.f32.mrb[127].mxu1  ;;  %v6847_v19 = vsel %vm390_vm1, %v15492_v31, 0.0 }
0x1bf0   :  { %v6229_v15 = vpack.c.bf16 %v6111_v58, %v6108_v53  ;;  %v16938_v58 = vpack.c.bf16 %v15332_v13, %v15326_v4  ;;  %v16942_v4 = vpack.c.bf16 %v15050_v11, %v15044_v57  ;;  %v16944_v11 = vpack.c.bf16 %v15062_v60, %v15056_v35  ;;  %v6909_v35 = vpop.permute.xlu1 %6908 }
0x1bf1   :  { %v15496_v61 = vpop.eup %11786  ;;  %6839 = vadd.xlane.f32.xlu0 %v6838_v49  ;;  %v16939_v49 = vpack.c.bf16 %v15328_v2, %v15324_v7  ;;  %v9615_v7 = vld [vmem:[%s16788_s2 + $0x50] sm:$0xff]  ;;  %v16943_v2 = vpack.c.bf16 %v15046_v34, %v15042_v22  ;;  %v6907_v22 = vpop.permute.xlu0 %6906  ;;  %v16945_v34 = vpack.c.bf16 %v15058_v46, %v15054_v40  ;;  %v16946_v60 = vpack.c.bf16 %v15074_v48, %v15068_v17 }
0x1bf2   :  { %10692 = vmatprep.mubr.msk.bf16.mxu1 %vm534_vm2, %v6229_v15  ;;  %v6856_v32 = vsel %vm390_vm1, %v15496_v61, 0.0  ;;  %v15504_v1 = vpop.eup %11788  ;;  %v7089_v57 = vpack.c.bf16 %v9615_v7, %v9615_v7  ;;  %v16947_v40 = vpack.c.bf16 %v15070_v27, %v15066_v9  ;;  %v16948_v46 = vpack.c.bf16 %v15086_v56, %v15080_v29 }
0x1bf3   :  { %10693 = vmatmul.mubr.msk.bf16.vlgmr.msra.gmra.mrb[132].mxu1 %vm534_vm2, %v6230_v30  ;;  %6857 = vadd.xlane.f32.xlu1 %v6856_v32  ;;  %v6841_v53 = vsel %vm390_vm1, %v15504_v1, 0.0  ;;  %v16940_v32 = vpack.c.bf16 %v15347_v33, %v15341_v38  ;;  %v16949_v9 = vpack.c.bf16 %v15082_v21, %v15078_v8  ;;  %v16950_v33 = vld [vmem:[#allocation6_spill] sm:$0xff] }
0x1bf4   :  { %10709 = vmatpush3.bf16.msra.mxu1 %v6393_v24  ;;  %v10672_v37 = vpop.f32.mrb[128].mxu1  ;;  %v16941_v24 = vpack.c.bf16 %v15343_v25, %v15339_v45 }
0x1bf5   :  { %v15508_v0 = vpop.eup %11790  ;;  %10758 = vmatprep.subr.bf16.mxu1 %v15434_v39  ;;  %v6124_v20 = vpop.f32.mrb[129].mxu1  ;;  %6848 = vadd.xlane.f32.xlu0 %v6847_v19 }
0x1bf6   :  { %v10673_v43 = vpop.f32.mrb[130].mxu1  ;;  %v6850_v51 = vsel %vm390_vm1, %v15508_v0, 0.0  ;;  %v15513_v5 = vpop.eup %11792 }
0x1bf7   :  { %v6232_v63 = vpack.c.bf16 %v10673_v43, %v10672_v37  ;;  %v6127_v18 = vpop.f32.mrb[131].mxu1  ;;  %6851 = vadd.xlane.f32.xlu1 %v6850_v51  ;;  %v15517_v10 = vpop.eup %11794  ;;  %v6859_v30 = vsel %vm390_vm1, %v15513_v5, 0.0 }
0x1bf8   :  { %v6231_v41 = vpack.c.bf16 %v6127_v18, %v6124_v20  ;;  %v6853_v15 = vsel %vm390_vm1, %v15517_v10, 0.0 }
0x1bf9   :  { %6842 = vadd.xlane.f32.xlu0 %v6841_v53 }
0x1bfa   :  { %10696 = vmatprep.mubr.msk.bf16.mxu1 %vm534_vm2, %v6231_v41 }
0x1bfb   :  { %10697 = vmatmul.mubr.msk.bf16.gmra.mrb[136].mxu1 %vm534_vm2, %v6232_v63  ;;  %6860 = vadd.xlane.f32.xlu1 %v6859_v30 }
0x1bfc   :  { %10700 = vmatprep.mubr.msk.bf16.mxu1 %vm534_vm2, %v16938_v58 }
0x1bfd   :  { %6854 = vadd.xlane.f32.xlu0 %v6853_v15 }
0x1c03   :  { %10701 = vmatmul.mubr.msk.bf16.gmra.mrb[140].mxu1 %vm534_vm2, %v16939_v49 }
0x1c04   :  { %10704 = vmatprep.mubr.msk.bf16.mxu1 %vm534_vm2, %v16940_v32 }
0x1c0b   :  { %10705 = vmatmul.mubr.msk.bf16.gmra.mrb[144].mxu1 %vm534_vm2, %v16941_v24 }
0x1c0c   :  { %10710 = vmatprep.mubr.msk.bf16.mxu1 %vm534_vm2, %v16942_v4  ;;  %6993 = vrot.lane.b32.xlu1 %v14738_v44, %s12063_s30 }
0x1c10   :  { %6995 = vrot.lane.b32.xlu1 %v14750_v52, %s12063_s30 }
0x1c13   :  { %10711 = vmatmul.mubr.msk.bf16.vlgmr.msra.gmra.mrb[132].mxu1 %vm534_vm2, %v16943_v2  ;;  %6991 = vrot.lane.b32.xlu0 %v14740_v14, %s12063_s30 }
0x1c14   :  { %10759 = vmatpush3.bf16.msra.mxu1 %v15434_v39  ;;  %10714 = vmatprep.mubr.msk.bf16.mxu1 %vm534_vm2, %v16944_v11 }
0x1c15   :  { %10760 = vmatprep.subr.bf16.mxu1 %v15436_v47  ;;  %6997 = vrot.lane.b32.xlu1 %v14748_v42, %s12063_s30 }
0x1c17   :  { %7091 = vrot.lane.b32.xlu0 %v7089_v57, %s12070_s14 }
0x1c18   :  { %10761 = vmatpush3.bf16.msra.mxu1 %v15436_v47 }
0x1c19   :  { %10762 = vmatprep.subr.bf16.mxu1 %v6907_v22  ;;  %7241 = vrot.lane.b32.xlu1 %v14718_v28, %s12071_s17 }
0x1c1b   :  { %10715 = vmatmul.mubr.msk.bf16.gmra.mrb[136].mxu1 %vm534_vm2, %v16945_v34  ;;  %7245 = vrot.lane.b32.xlu0 %v14730_v26, %s12071_s17 }
0x1c1c   :  { %10763 = vmatpush3.bf16.msra.mxu1 %v6907_v22  ;;  %10718 = vmatprep.mubr.msk.bf16.mxu1 %vm534_vm2, %v16946_v60 }
0x1c1d   :  { %10764 = vmatprep.subr.bf16.mxu1 %v6909_v35  ;;  %7243 = vrot.lane.b32.xlu1 %v14716_v54, %s12071_s17 }
0x1c1f   :  { %7247 = vrot.lane.b32.xlu0 %v14728_v23, %s12071_s17 }
0x1c20   :  { %10765 = vmatpush3.bf16.msra.mxu1 %v6909_v35 }
0x1c21   :  { %7346 = vrot.lane.b32.xlu1 %v14740_v14, %s12071_s17 }
0x1c23   :  { %10719 = vmatmul.mubr.msk.bf16.gmra.mrb[140].mxu1 %vm534_vm2, %v16947_v40  ;;  %7233 = vrot.lane.b32.xlu0 %v14718_v28, %s12072_s18 }
0x1c24   :  { %10722 = vmatprep.mubr.msk.bf16.mxu1 %vm534_vm2, %v16948_v46 }
0x1c25   :  { %7348 = vrot.lane.b32.xlu1 %v14738_v44, %s12071_s17 }
0x1c27   :  { %7350 = vrot.lane.b32.xlu0 %v14750_v52, %s12071_s17 }
0x1c29   :  { %7235 = vrot.lane.b32.xlu1 %v14716_v54, %s12072_s18 }
0x1c2b   :  { %10723 = vmatmul.mubr.msk.bf16.gmra.mrb[144].mxu1 %vm534_vm2, %v16949_v9  ;;  %7239 = vrot.lane.b32.xlu0 %v14728_v23, %s12072_s18 }
0x1c2d   :  { %7237 = vrot.lane.b32.xlu1 %v14730_v26, %s12072_s18 }
0x1c2f   :  { %7338 = vrot.lane.b32.xlu0 %v14740_v14, %s12072_s18 }
0x1c31   :  { %7352 = vrot.lane.b32.xlu1 %v14748_v42, %s12071_s17 }
0x1c33   :  { %7342 = vrot.lane.b32.xlu0 %v14750_v52, %s12072_s18 }
0x1c35   :  { %7340 = vrot.lane.b32.xlu1 %v14738_v44, %s12072_s18 }
0x1c37   :  { %v6822_v17 = vpop.xlane.xlu1 %6821 }
0x1c39   :  { %7344 = vrot.lane.b32.xlu1 %v14748_v42, %s12072_s18 }
0x1c3b   :  { %v6816_v27 = vpop.xlane.xlu1 %6815  ;;  %v6825_v48 = vpop.xlane.xlu0 %6824 }
0x1c3c   :  { %11796 = vrcp.f32 %v6825_v48 }
0x1c3d   :  { %11798 = vrcp.f32 %v6816_v27 }
0x1c3e   :  { %11800 = vrcp.f32 %v6822_v17 }
0x1c3f   :  { %v6819_v8 = vpop.xlane.xlu0 %6818 }
0x1c40   :  { %11802 = vrcp.f32 %v6819_v8 }
0x1c46   :  { %v11797_v29 = vpop.eup %11796 }
0x1c47   :  { %v11799_v21 = vpop.eup %11798  ;;  %v6869_v45 = vmul.f32 %v11797_v29, %v15448_v62 }
0x1c48   :  { %v11801_v56 = vpop.eup %11800  ;;  %v6863_v38 = vmul.f32 %v11799_v21, %v15446_v6 }
0x1c49   :  { %v6867_v39 = vmul.f32 %v11801_v56, %v16950_v33 }
0x1c4a   :  { %v11803_v13 = vpop.eup %11802 }
0x1c4b   :  { %v6865_v25 = vmul.f32 %v11803_v13, %v15454_v36  ;;  %v6895_v37 = vpack.c.bf16 %v6869_v45, %v6867_v39 }
0x1c4d   :  { %v6894_v47 = vpack.c.bf16 %v6865_v25, %v6863_v38 }
0x1c4f   :  { %10766 = vmatprep.mubr.msk.bf16.mxu1 %vm390_vm1, %v6894_v47 }
0x1c50   :  { %10767 = vmatmul.mubr.msk.bf16.vlgmr.msra.gmra.mrb[148].mxu1 %vm390_vm1, %v6895_v37 }
0x1c70   :  { %v6834_v19 = vpop.xlane.xlu1 %6833 }
0x1c72   :  { %v6837_v20 = vpop.xlane.xlu0 %6836 }
0x1c73   :  { %11804 = vrcp.f32 %v6837_v20 }
0x1c74   :  { %v6828_v43 = vpop.xlane.xlu1 %6827 }
0x1c75   :  { %11806 = vrcp.f32 %v6828_v43 }
0x1c76   :  { %11808 = vrcp.f32 %v6834_v19  ;;  %v6831_v51 = vpop.xlane.xlu0 %6830 }
0x1c77   :  { %11810 = vrcp.f32 %v6831_v51 }
0x1c7a   :  { %v6846_v62 = vpop.xlane.xlu0 %6845 }
0x1c7d   :  { %v11805_v6 = vpop.eup %11804 }
0x1c7e   :  { %v6840_v63 = vpop.xlane.xlu0 %6839  ;;  %v6877_v30 = vmul.f32 %v11805_v6, %v15470_v55 }
0x1c7f   :  { %v11807_v36 = vpop.eup %11806  ;;  %11812 = vrcp.f32 %v6840_v63 }
0x1c80   :  { %v11809_v18 = vpop.eup %11808  ;;  %v6858_v41 = vpop.xlane.xlu1 %6857  ;;  %v6871_v15 = vmul.f32 %v11807_v36, %v15475_v3 }
0x1c81   :  { %v11811_v53 = vpop.eup %11810  ;;  %v6875_v32 = vmul.f32 %v11809_v18, %v15465_v50 }
0x1c82   :  { %v6849_v58 = vpop.xlane.xlu0 %6848  ;;  %v6873_v49 = vmul.f32 %v11811_v53, %v15480_v59 }
0x1c83   :  { %v6897_v7 = vpack.c.bf16 %v6877_v30, %v6875_v32 }
0x1c84   :  { %v6852_v24 = vpop.xlane.xlu1 %6851  ;;  %v6896_v4 = vpack.c.bf16 %v6873_v49, %v6871_v15 }
0x1c86   :  { %10770 = vmatprep.mubr.msk.bf16.mxu1 %vm390_vm1, %v6896_v4  ;;  %v6843_v2 = vpop.xlane.xlu0 %6842 }
0x1c87   :  { %11814 = vrcp.f32 %v6843_v2  ;;  %10771 = vmatmul.mubr.msk.bf16.gmra.mrb[152].mxu1 %vm390_vm1, %v6897_v7 }
0x1c88   :  { %v6861_v57 = vpop.xlane.xlu1 %6860  ;;  %11816 = vrcp.f32 %v6849_v58 }
0x1c89   :  { %v11813_v59 = vpop.eup %11812 }
0x1c8a   :  { %v6855_v11 = vpop.xlane.xlu0 %6854  ;;  %v6879_v35 = vmul.f32 %v11813_v59, %v15490_v16 }
0x1c8b   :  { %11818 = vrcp.f32 %v6855_v11 }
0x1c8c   :  { %v6994_v55 = vpop.permute.xlu1 %6993  ;;  %11820 = vrcp.f32 %v6846_v62 }
0x1c8d   :  { %11822 = vrcp.f32 %v6852_v24 }
0x1c8e   :  { %v6992_v3 = vpop.permute.xlu0 %6991  ;;  %11824 = vrcp.f32 %v6861_v57 }
0x1c8f   :  { %10774 = vmatprep.subr.bf16.mxu0 %v6992_v3  ;;  %11826 = vrcp.f32 %v6858_v41 }
0x1c90   :  { %v6996_v50 = vpop.permute.xlu1 %6995  ;;  %10775 = vmatpush3.bf16.msra.mxu0 %v6992_v3 }
0x1c91   :  { %v11815_v22 = vpop.eup %11814  ;;  %10776 = vmatprep.subr.bf16.mxu0 %v6994_v55 }
0x1c92   :  { %v7092_v34 = vpop.permute.xlu0 %7091  ;;  %v6881_v60 = vmul.f32 %v11815_v22, %v15504_v1  ;;  %v11817_v17 = vpop.eup %11816 }
0x1c93   :  { %11192 = vmatprep.subr.msk.bf16.mxu1 %vm1738_vm3, %v7092_v34  ;;  %v7118_v40 = vsel %vm1738_vm3, %v7092_v34, 0  ;;  %v6885_v1 = vmul.f32 %v11817_v17, %v15492_v31 }
0x1c94   :  { %v6998_v46 = vpop.permute.xlu1 %6997  ;;  %10777 = vmatpush3.bf16.msra.mxu0 %v6994_v55  ;;  %v6898_v9 = vpack.c.bf16 %v6881_v60, %v6879_v35  ;;  %10791 = vmatpush3.bf16.msra.mxu1 %v7118_v40 }
0x1c95   :  { %10778 = vmatprep.subr.bf16.mxu0 %v6996_v50  ;;  %v11819_v27 = vpop.eup %11818 }
0x1c96   :  { %10782 = vmatprep.mubr.msk.bf16.mxu0 %vm390_vm1, %v6898_v9  ;;  %v11821_v48 = vpop.eup %11820  ;;  %v6889_v29 = vmul.f32 %v11819_v27, %v15517_v10  ;;  %v7246_v56 = vpop.permute.xlu0 %7245 }
0x1c97   :  { %v11823_v16 = vpop.eup %11822  ;;  %v6883_v21 = vmul.f32 %v11821_v48, %v15485_v12 }
0x1c98   :  { %v7242_v8 = vpop.permute.xlu1 %7241  ;;  %10779 = vmatpush3.bf16.msra.mxu0 %v6996_v50  ;;  %v6887_v45 = vmul.f32 %v11823_v16, %v15508_v0  ;;  %v11825_v25 = vpop.eup %11824 }
0x1c99   :  { %10780 = vmatprep.subr.bf16.mxu0 %v6998_v46  ;;  %v6899_v38 = vpack.c.bf16 %v6885_v1, %v6883_v21  ;;  %v11827_v39 = vpop.eup %11826  ;;  %v6893_v12 = vmul.f32 %v11825_v25, %v15513_v5  ;;  %v7262_v0 = vsel %vm534_vm2, %v7242_v8, 0  ;;  %v7268_v5 = vsel %vm534_vm2, %v7246_v56, 0 }
0x1c9a   :  { %v6900_v33 = vpack.c.bf16 %v6889_v29, %v6887_v45  ;;  %v7248_v31 = vpop.permute.xlu0 %7247  ;;  %v6891_v10 = vmul.f32 %v11827_v39, %v15496_v61 }
0x1c9b   :  { %v7271_v43 = vsel %vm534_vm2, %v7248_v31, 0 }
0x1c9c   :  { %v7244_v13 = vpop.permute.xlu1 %7243  ;;  %10781 = vmatpush3.bf16.msra.mxu0 %v6998_v46  ;;  %v6901_v37 = vpack.c.bf16 %v6893_v12, %v6891_v10 }
0x1c9d   :  { %11193 = vmatprep.subr.msk.bf16.mxu0 %vm534_vm2, %v7242_v8  ;;  %v7265_v20 = vsel %vm534_vm2, %v7244_v13, 0 }
0x1c9e   :  { %v7234_v19 = vpop.permute.xlu0 %7233 }
0x1c9f   :  { %10783 = vmatmul.mubr.msk.bf16.vlgmr.msra.gmra.mrb[160].mxu0 %vm390_vm1, %v6899_v38 }
0x1ca0   :  { %v7347_v47 = vpop.permute.xlu1 %7346  ;;  %10786 = vmatprep.mubr.msk.bf16.mxu0 %vm390_vm1, %v6900_v33 }
0x1ca1   :  { %11197 = vmatprep.subr.msk.bf16.mxu1 %vm534_vm2, %v7347_v47  ;;  %v7367_v15 = vsel %vm534_vm2, %v7347_v47, 0 }
0x1ca2   :  { %v7351_v6 = vpop.permute.xlu0 %7350 }
0x1ca3   :  { %v7373_v32 = vsel %vm534_vm2, %v7351_v6, 0 }
0x1ca4   :  { %v7349_v61 = vpop.permute.xlu1 %7348 }
0x1ca5   :  { %10809 = vmatpush3.bf16.xpose.msra.mxu0 %v7262_v0  ;;  %v7370_v49 = vsel %vm534_vm2, %v7349_v61, 0 }
0x1ca6   :  { %11194 = vmatprep.subr.msk.bf16.mxu0 %vm534_vm2, %v7244_v13  ;;  %v7240_v63 = vpop.permute.xlu0 %7239 }
0x1ca7   :  { %10787 = vmatmul.mubr.msk.bf16.gmra.mrb[164].mxu0 %vm390_vm1, %v6901_v37 }
0x1ca8   :  { %10816 = vmatprep.mubr.msk.bf16.mxu0 %vm534_vm2, %v7234_v19  ;;  %v7236_v51 = vpop.permute.xlu1 %7235 }
0x1caa   :  { %v7339_v8 = vpop.permute.xlu0 %7338 }
0x1cac   :  { %v7238_v62 = vpop.permute.xlu1 %7237 }
0x1cad   :  { %10811 = vmatpush3.bf16.xpose.msra.mxu0 %v7265_v20 }
0x1cae   :  { %11195 = vmatprep.subr.msk.bf16.mxu0 %vm534_vm2, %v7246_v56  ;;  %v7343_v1 = vpop.permute.xlu0 %7342 }
0x1cb0   :  { %v7353_v24 = vpop.permute.xlu1 %7352 }
0x1cb1   :  { %v7376_v4 = vsel %vm534_vm2, %v7353_v24, 0 }
0x1cb4   :  { %v7341_v16 = vpop.permute.xlu1 %7340 }
0x1cb5   :  { %10813 = vmatpush3.bf16.xpose.msra.mxu0 %v7268_v5 }
0x1cb6   :  { %11196 = vmatprep.subr.msk.bf16.mxu0 %vm534_vm2, %v7248_v31 }
0x1cb8   :  { %v7345_v29 = vpop.permute.xlu1 %7344 }
0x1cbd   :  { %10815 = vmatpush3.bf16.xpose.msra.mxu0 %v7271_v43 }
0x1cc4   :  { %10817 = vmatmul.mubr.msk.bf16.vlgmr.msra.gmra.mrb[168].mxu0 %vm534_vm2, %v7236_v51 }
0x1cc5   :  { %10820 = vmatprep.mubr.msk.bf16.mxu0 %vm534_vm2, %v7238_v62 }
0x1ccc   :  { %10821 = vmatmul.mubr.msk.bf16.gmra.mrb[172].mxu0 %vm534_vm2, %v7240_v63 }
0x1d23   :  { %v10768_v36 = vpop.f32.mrb[148].mxu1 }
0x1d24   :  { %v6960_v18 = vpop.f32.mrb[149].mxu1 }
0x1d25   :  { %v10769_v41 = vpop.f32.mrb[150].mxu1 }
0x1d26   :  { %v7082_v53 = vpack.c.bf16 %v10769_v41, %v10768_v36  ;;  %v6963_v30 = vpop.f32.mrb[151].mxu1 }
0x1d27   :  { %v7081_v58 = vpack.c.bf16 %v6963_v30, %v6960_v18 }
0x1d29   :  { %10792 = vmatprep.mubr.msk.bf16.mxu1 %vm534_vm2, %v7081_v58 }
0x1d2a   :  { %10793 = vmatmul.mubr.msk.bf16.vlgmr.msra.gmra.mrb[132].mxu1 %vm534_vm2, %v7082_v53 }
0x1d2b   :  { %10825 = vmatpush3.bf16.xpose.msra.mxu1 %v7367_v15 }
0x1d2c   :  { %11198 = vmatprep.subr.msk.bf16.mxu1 %vm534_vm2, %v7349_v61 }
0x1d33   :  { %10827 = vmatpush3.bf16.xpose.msra.mxu1 %v7370_v49 }
0x1d34   :  { %11199 = vmatprep.subr.msk.bf16.mxu1 %vm534_vm2, %v7351_v6 }
0x1d3b   :  { %10829 = vmatpush3.bf16.xpose.msra.mxu1 %v7373_v32 }
0x1d3c   :  { %11200 = vmatprep.subr.msk.bf16.mxu1 %vm534_vm2, %v7353_v24 }
0x1d43   :  { %10831 = vmatpush3.bf16.xpose.msra.mxu1 %v7376_v4 }
0x1d5a   :  { %v10772_v7 = vpop.f32.mrb[152].mxu1 }
0x1d5b   :  { %v6976_v2 = vpop.f32.mrb[153].mxu1 }
0x1d5c   :  { %v10773_v57 = vpop.f32.mrb[154].mxu1 }
0x1d5d   :  { %v7084_v11 = vpack.c.bf16 %v10773_v57, %v10772_v7  ;;  %v6979_v55 = vpop.f32.mrb[155].mxu1 }
0x1d5e   :  { %v7083_v3 = vpack.c.bf16 %v6979_v55, %v6976_v2 }
0x1d60   :  { %10796 = vmatprep.mubr.msk.bf16.mxu1 %vm534_vm2, %v7083_v3 }
0x1d61   :  { %10797 = vmatmul.mubr.msk.bf16.gmra.mrb[136].mxu1 %vm534_vm2, %v7084_v11 }
0x1d72   :  { %v10784_v59 = vpop.f32.mrb[160].mxu0 }
0x1d73   :  { %v7049_v50 = vpop.f32.mrb[161].mxu0 }
0x1d74   :  { %v10785_v22 = vpop.f32.mrb[162].mxu0 }
0x1d75   :  { %v7086_v34 = vpack.c.bf16 %v10785_v22, %v10784_v59  ;;  %v7052_v35 = vpop.f32.mrb[163].mxu0 }
0x1d76   :  { %v7085_v60 = vpack.c.bf16 %v7052_v35, %v7049_v50 }
0x1d78   :  { %10800 = vmatprep.mubr.msk.bf16.mxu1 %vm534_vm2, %v7085_v60 }
0x1d79   :  { %10801 = vmatmul.mubr.msk.bf16.gmra.mrb[140].mxu1 %vm534_vm2, %v7086_v34 }
0x1d7a   :  { %v10788_v40 = vpop.f32.mrb[164].mxu0 }
0x1d7b   :  { %v7065_v46 = vpop.f32.mrb[165].mxu0 }
0x1d7c   :  { %v10789_v9 = vpop.f32.mrb[166].mxu0 }
0x1d7d   :  { %v7088_v17 = vpack.c.bf16 %v10789_v9, %v10788_v40  ;;  %v7068_v27 = vpop.f32.mrb[167].mxu0 }
0x1d7e   :  { %v7087_v48 = vpack.c.bf16 %v7068_v27, %v7065_v46 }
0x1d80   :  { %10804 = vmatprep.mubr.msk.bf16.mxu1 %vm534_vm2, %v7087_v48 }
0x1d81   :  { %10805 = vmatmul.mubr.msk.bf16.gmra.mrb[144].mxu1 %vm534_vm2, %v7088_v17 }
0x1d82   :  { %10832 = vmatprep.mubr.msk.bf16.mxu1 %vm534_vm2, %v7339_v8 }
0x1d89   :  { %10833 = vmatmul.mubr.msk.bf16.vlgmr.msra.gmra.mrb[156].mxu1 %vm534_vm2, %v7341_v16 }
0x1d8a   :  { %10836 = vmatprep.mubr.msk.bf16.mxu1 %vm534_vm2, %v7343_v1 }
0x1d91   :  { %10837 = vmatmul.mubr.msk.bf16.gmra.mrb[160].mxu1 %vm534_vm2, %v7345_v29 }
0x1d97   :  { %v10818_v21 = vpop.f32.mrb[168].mxu0 }
0x1d98   :  { %v7445_v56 = vmul.f32 0.35355338, %v10818_v21  ;;  %v7307_v13 = vpop.f32.mrb[169].mxu0 }
0x1d99   :  { %v10819_v45 = vpop.f32.mrb[170].mxu0  ;;  %v7443_v38 = vmul.f32 0.35355338, %v7307_v13 }
0x1d9a   :  { %v7310_v25 = vpop.f32.mrb[171].mxu0  ;;  %v7465_v33 = vsel %vm390_vm1, %v7445_v56, -inf  ;;  %v7446_v31 = vmul.f32 0.35355338, %v10819_v45 }
0x1d9b   :  { %v7444_v39 = vmul.f32 0.35355338, %v7310_v25  ;;  %7466 = vmax.xlane.f32.xlu0 %v7465_v33  ;;  %v7459_v12 = vsel %vm390_vm1, %v7443_v38, -inf }
0x1d9c   :  { %v7468_v61 = vsel %vm390_vm1, %v7446_v31, -inf }
0x1d9d   :  { %v7462_v47 = vsel %vm390_vm1, %v7444_v39, -inf }
0x1d9e   :  { %7463 = vmax.xlane.f32.xlu1 %v7462_v47 }
0x1d9f   :  { %7460 = vmax.xlane.f32.xlu0 %v7459_v12  ;;  %v10822_v10 = vpop.f32.mrb[172].mxu0 }
0x1da0   :  { %v7323_v0 = vpop.f32.mrb[173].mxu0  ;;  %v15681_v19 = vmul.f32 0.35355338, %v10822_v10 }
0x1da1   :  { %v10823_v37 = vpop.f32.mrb[174].mxu0  ;;  %v7447_v62 = vmul.f32 0.35355338, %v7323_v0 }
0x1da2   :  { %v7450_v20 = vmul.f32 0.35355338, %v10823_v37  ;;  %v7326_v5 = vpop.f32.mrb[175].mxu0  ;;  %v7477_v6 = vsel %vm390_vm1, %v15681_v19, -inf }
0x1da3   :  { %7469 = vmax.xlane.f32.xlu0 %v7468_v61  ;;  %v7448_v43 = vmul.f32 0.35355338, %v7326_v5  ;;  %v7471_v36 = vsel %vm390_vm1, %v7447_v62, -inf }
0x1da4   :  { %v7480_v51 = vsel %vm390_vm1, %v7450_v20, -inf }
0x1da5   :  { %7481 = vmax.xlane.f32.xlu1 %v7480_v51  ;;  %v7474_v63 = vsel %vm390_vm1, %v7448_v43, -inf }
0x1da7   :  { %7478 = vmax.xlane.f32.xlu0 %v7477_v6 }
0x1da9   :  { %7475 = vmax.xlane.f32.xlu1 %v7474_v63 }
0x1dab   :  { %7472 = vmax.xlane.f32.xlu0 %v7471_v36 }
0x1e28   :  { %v7467_v18 = vpop.xlane.xlu0 %7466 }
0x1e29   :  { %v7509_v41 = vsub.f32 %v7445_v56, %v7467_v18 }
0x1e2b   :  { %v7527_v53 = vmul.f32 1.442695, %v7509_v41  ;;  %v7464_v30 = vpop.xlane.xlu1 %7463 }
0x1e2c   :  { %v7461_v58 = vpop.xlane.xlu0 %7460  ;;  %v7508_v49 = vsub.f32 %v7444_v39, %v7464_v30 }
0x1e2d   :  { %11828 = vpow2.f32 %v7527_v53  ;;  %v7507_v15 = vsub.f32 %v7443_v38, %v7461_v58 }
0x1e2e   :  { %v7525_v2 = vmul.f32 1.442695, %v7508_v49 }
0x1e2f   :  { %v7523_v32 = vmul.f32 1.442695, %v7507_v15 }
0x1e30   :  { %v7470_v24 = vpop.xlane.xlu0 %7469 }
0x1e31   :  { %11830 = vpow2.f32 %v7523_v32  ;;  %v7510_v4 = vsub.f32 %v7446_v31, %v7470_v24 }
0x1e32   :  { %v7482_v7 = vpop.xlane.xlu1 %7481 }
0x1e33   :  { %v7529_v57 = vmul.f32 1.442695, %v7510_v4  ;;  %v7514_v21 = vsub.f32 %v7450_v20, %v7482_v7 }
0x1e34   :  { %v7479_v11 = vpop.xlane.xlu0 %7478 }
0x1e35   :  { %11832 = vpow2.f32 %v7529_v57  ;;  %v7537_v56 = vmul.f32 1.442695, %v7514_v21  ;;  %v7513_v13 = vsub.f32 %v15681_v19, %v7479_v11 }
0x1e36   :  { %v7476_v55 = vpop.xlane.xlu1 %7475  ;;  %11834 = vpow2.f32 %v7525_v2 }
0x1e37   :  { %v15689_v3 = vpop.eup %11828  ;;  %v7512_v59 = vsub.f32 %v7448_v43, %v7476_v55  ;;  %v7535_v33 = vmul.f32 1.442695, %v7513_v13 }
0x1e38   :  { %v7473_v50 = vpop.xlane.xlu0 %7472  ;;  %v7561_v22 = vsel %vm390_vm1, %v15689_v3, 0.0 }
0x1e39   :  { %v7533_v34 = vmul.f32 1.442695, %v7512_v59  ;;  %v7511_v35 = vsub.f32 %v7447_v62, %v7473_v50  ;;  %7562 = vadd.xlane.f32.xlu0 %v7561_v22 }
0x1e3b   :  { %v15693_v60 = vpop.eup %11830  ;;  %11836 = vpow2.f32 %v7533_v34  ;;  %v7531_v40 = vmul.f32 1.442695, %v7511_v35 }
0x1e3c   :  { %v7555_v46 = vsel %vm390_vm1, %v15693_v60, 0.0 }
0x1e3d   :  { %11838 = vpow2.f32 %v7531_v40  ;;  %7556 = vadd.xlane.f32.xlu0 %v7555_v46 }
0x1e3e   :  { %11840 = vpow2.f32 %v7537_v56 }
0x1e3f   :  { %v15697_v9 = vpop.eup %11832  ;;  %11842 = vpow2.f32 %v7535_v33 }
0x1e40   :  { %v7564_v17 = vsel %vm390_vm1, %v15697_v9, 0.0  ;;  %v15701_v27 = vpop.eup %11834 }
0x1e41   :  { %7565 = vadd.xlane.f32.xlu1 %v7564_v17  ;;  %v7558_v48 = vsel %vm390_vm1, %v15701_v27, 0.0 }
0x1e45   :  { %v15705_v8 = vpop.eup %11836  ;;  %7559 = vadd.xlane.f32.xlu1 %v7558_v48 }
0x1e46   :  { %v7570_v1 = vsel %vm390_vm1, %v15705_v8, 0.0 }
0x1e47   :  { %v15707_v16 = vpop.eup %11838 }
0x1e48   :  { %v7567_v29 = vsel %vm390_vm1, %v15707_v16, 0.0  ;;  %v15727_v51 = vpop.eup %11840 }
0x1e49   :  { %7571 = vadd.xlane.f32.xlu1 %v7570_v1  ;;  %7568 = vadd.xlane.f32.xlu0 %v7567_v29  ;;  %v7576_v18 = vsel %vm390_vm1, %v15727_v51, 0.0  ;;  %v15733_v53 = vpop.eup %11842 }
0x1e4a   :  { %v7573_v30 = vsel %vm390_vm1, %v15733_v53, 0.0 }
0x1e5c   :  { %v10834_v45 = vpop.f32.mrb[156].mxu1 }
0x1e5d   :  { %v7453_v38 = vmul.f32 0.35355338, %v10834_v45  ;;  %v7412_v25 = vpop.f32.mrb[157].mxu1 }
0x1e5e   :  { %v10835_v39 = vpop.f32.mrb[158].mxu1  ;;  %v15714_v47 = vmul.f32 0.35355338, %v7412_v25 }
0x1e5f   :  { %v15716_v31 = vmul.f32 0.35355338, %v10835_v39  ;;  %v7415_v12 = vpop.f32.mrb[159].mxu1  ;;  %v7489_v10 = vsel %vm390_vm1, %v7453_v38, -inf }
0x1e60   :  { %7490 = vmax.xlane.f32.xlu0 %v7489_v10  ;;  %v15719_v0 = vmul.f32 0.35355338, %v7415_v12  ;;  %v7483_v19 = vsel %vm390_vm1, %v15714_v47, -inf }
0x1e61   :  { %v7492_v37 = vsel %vm390_vm1, %v15716_v31, -inf }
0x1e62   :  { %7493 = vmax.xlane.f32.xlu1 %v7492_v37  ;;  %v7486_v43 = vsel %vm390_vm1, %v15719_v0, -inf }
0x1e64   :  { %v10838_v20 = vpop.f32.mrb[160].mxu1  ;;  %7484 = vmax.xlane.f32.xlu0 %v7483_v19 }
0x1e65   :  { %v7457_v5 = vmul.f32 0.35355338, %v10838_v20  ;;  %v7428_v61 = vpop.f32.mrb[161].mxu1 }
0x1e66   :  { %v10839_v62 = vpop.f32.mrb[162].mxu1  ;;  %7487 = vmax.xlane.f32.xlu1 %v7486_v43  ;;  %v7455_v6 = vmul.f32 0.35355338, %v7428_v61 }
0x1e67   :  { %v7431_v63 = vpop.f32.mrb[163].mxu1  ;;  %v7501_v36 = vsel %vm390_vm1, %v7457_v5, -inf  ;;  %v15745_v58 = vmul.f32 0.35355338, %v10839_v62 }
0x1e68   :  { %7502 = vmax.xlane.f32.xlu0 %v7501_v36  ;;  %v7495_v41 = vsel %vm390_vm1, %v7455_v6, -inf  ;;  %v15747_v15 = vmul.f32 0.35355338, %v7431_v63 }
0x1e69   :  { %v7504_v49 = vsel %vm390_vm1, %v15745_v58, -inf }
0x1e6a   :  { %7577 = vadd.xlane.f32.xlu1 %v7576_v18 }
0x1e6c   :  { %7496 = vmax.xlane.f32.xlu0 %v7495_v41 }
0x1e70   :  { %7574 = vadd.xlane.f32.xlu0 %v7573_v30 }
0x1e7b   :  { %7645 = vrot.lane.b32.xlu1 %v14716_v54, %s12073_s19  ;;  %v7498_v54 = vsel %vm390_vm1, %v15747_v15, -inf }
0x1e86   :  { %7643 = vrot.lane.b32.xlu0 %v14718_v28, %s12073_s19 }
0x1e8a   :  { %7647 = vrot.lane.b32.xlu0 %v14730_v26, %s12073_s19 }
0x1e8e   :  { %7649 = vrot.lane.b32.xlu0 %v14728_v23, %s12073_s19 }
0x1e9f   :  { %7505 = vmax.xlane.f32.xlu1 %v7504_v49 }
0x1ea3   :  { %7499 = vmax.xlane.f32.xlu1 %v7498_v54 }
0x1eb4   :  { %7732 = vrot.lane.b32.xlu1 %v14740_v14, %s12073_s19 }
0x1eb8   :  { %7734 = vrot.lane.b32.xlu1 %v14738_v44, %s12073_s19 }
0x1ec6   :  { %v7563_v28 = vpop.xlane.xlu0 %7562 }
0x1eca   :  { %v7557_v23 = vpop.xlane.xlu0 %7556 }
0x1ecb   :  { %11844 = vrcp.f32 %v7557_v23 }
0x1ece   :  { %v7566_v26 = vpop.xlane.xlu1 %7565 }
0x1ed2   :  { %v7560_v32 = vpop.xlane.xlu1 %7559 }
0x1ed3   :  { %11846 = vrcp.f32 %v7560_v32 }
0x1ed5   :  { %v11845_v24 = vpop.eup %11844 }
0x1ed6   :  { %v7604_v7 = vmul.f32 %v11845_v24, %v15693_v60  ;;  %v7569_v11 = vpop.xlane.xlu0 %7568  ;;  %v7572_v14 = vpop.xlane.xlu1 %7571 }
0x1edd   :  { %v11847_v4 = vpop.eup %11846 }
0x1ede   :  { %v7606_v2 = vmul.f32 %v11847_v4, %v15701_v27 }
0x1ee0   :  { %v7635_v57 = vpack.c.bf16 %v7606_v2, %v7604_v7 }
0x1ee2   :  { %10848 = vmatprep.mubr.msk.bf16.mxu0 %vm390_vm1, %v7635_v57 }
0x1eed   :  { %v7491_v55 = vpop.xlane.xlu0 %7490 }
0x1eee   :  { %v7517_v59 = vsub.f32 %v7453_v38, %v7491_v55 }
0x1eef   :  { %v7494_v44 = vpop.xlane.xlu1 %7493 }
0x1ef0   :  { %v7543_v50 = vmul.f32 1.442695, %v7517_v59  ;;  %v7518_v22 = vsub.f32 %v15716_v31, %v7494_v44 }
0x1ef1   :  { %v7485_v34 = vpop.xlane.xlu0 %7484 }
0x1ef2   :  { %11848 = vpow2.f32 %v7543_v50  ;;  %v7515_v35 = vsub.f32 %v15714_v47, %v7485_v34  ;;  %v7545_v46 = vmul.f32 1.442695, %v7518_v22  ;;  %v15811_v50 = vld [vmem:[%s16787_s1 + $0x3] ss:$0 sm:$0xff] }
0x1ef3   :  { %v7488_v40 = vpop.xlane.xlu1 %7487 }
0x1ef4   :  { %v7539_v60 = vmul.f32 1.442695, %v7515_v35  ;;  %v7516_v17 = vsub.f32 %v15719_v0, %v7488_v40 }
0x1ef5   :  { %v7503_v27 = vpop.xlane.xlu0 %7502 }
0x1ef6   :  { %11850 = vpow2.f32 %v7539_v60  ;;  %v7521_v48 = vsub.f32 %v7457_v5, %v7503_v27  ;;  %v7541_v1 = vmul.f32 1.442695, %v7516_v17 }
0x1ef7   :  { %11852 = vpow2.f32 %v7545_v46  ;;  %v7578_v38 = vpop.xlane.xlu1 %7577 }
0x1ef8   :  { %v7551_v29 = vmul.f32 1.442695, %v7521_v48 }
0x1ef9   :  { %v7497_v21 = vpop.xlane.xlu0 %7496 }
0x1efa   :  { %11854 = vpow2.f32 %v7551_v29  ;;  %v7519_v56 = vsub.f32 %v7455_v6, %v7497_v21 }
0x1efb   :  { %11856 = vpow2.f32 %v7541_v1  ;;  %v7646_v10 = vpop.permute.xlu1 %7645 }
0x1efc   :  { %v15763_v13 = vpop.eup %11848  ;;  %v7547_v45 = vmul.f32 1.442695, %v7519_v56  ;;  %11858 = vrcp.f32 %v7566_v26 }
0x1efd   :  { %v7575_v25 = vpop.xlane.xlu0 %7574  ;;  %v7585_v33 = vsel %vm390_vm1, %v15763_v13, 0.0 }
0x1efe   :  { %11860 = vpow2.f32 %v7547_v45  ;;  %7586 = vadd.xlane.f32.xlu1 %v7585_v33 }
0x1eff   :  { %11862 = vrcp.f32 %v7572_v14 }
0x1f00   :  { %v15767_v39 = vpop.eup %11850  ;;  %11864 = vrcp.f32 %v7569_v11 }
0x1f01   :  { %11866 = vrcp.f32 %v7563_v28  ;;  %v7644_v47 = vpop.permute.xlu0 %7643  ;;  %v7579_v31 = vsel %vm390_vm1, %v15767_v39, 0.0  ;;  %v15771_v12 = vpop.eup %11852 }
0x1f02   :  { %7580 = vadd.xlane.f32.xlu1 %v7579_v31  ;;  %10840 = vmatprep.subr.bf16.mxu0 %v7644_v47  ;;  %v7588_v19 = vsel %vm390_vm1, %v15771_v12, 0.0  ;;  %11868 = vrcp.f32 %v7575_v25 }
0x1f03   :  { %10841 = vmatpush3.bf16.msra.mxu0 %v7644_v47  ;;  %11870 = vrcp.f32 %v7578_v38 }
0x1f04   :  { %v15773_v0 = vpop.eup %11854  ;;  %10842 = vmatprep.subr.bf16.mxu0 %v7646_v10 }
0x1f05   :  { %v7648_v37 = vpop.permute.xlu0 %7647  ;;  %v7597_v20 = vsel %vm390_vm1, %v15773_v0, 0.0  ;;  %v15779_v5 = vpop.eup %11856 }
0x1f06   :  { %7589 = vadd.xlane.f32.xlu1 %v7588_v19  ;;  %7598 = vadd.xlane.f32.xlu0 %v7597_v20  ;;  %v11859_v61 = vpop.eup %11858  ;;  %v7582_v6 = vsel %vm390_vm1, %v15779_v5, 0.0 }
0x1f07   :  { %10843 = vmatpush3.bf16.msra.mxu0 %v7646_v10  ;;  %v7610_v30 = vmul.f32 %v11859_v61, %v15697_v9 }
0x1f08   :  { %v15781_v43 = vpop.eup %11860  ;;  %10844 = vmatprep.subr.bf16.mxu0 %v7648_v37 }
0x1f09   :  { %v11863_v62 = vpop.eup %11862  ;;  %v7591_v63 = vsel %vm390_vm1, %v15781_v43, 0.0  ;;  %v7650_v41 = vpop.permute.xlu0 %7649 }
0x1f0a   :  { %v11865_v36 = vpop.eup %11864  ;;  %7583 = vadd.xlane.f32.xlu1 %v7582_v6  ;;  %7592 = vadd.xlane.f32.xlu0 %v7591_v63  ;;  %v7614_v54 = vmul.f32 %v11863_v62, %v15705_v8 }
0x1f0b   :  { %v11867_v18 = vpop.eup %11866  ;;  %10845 = vmatpush3.bf16.msra.mxu0 %v7648_v37  ;;  %v7612_v49 = vmul.f32 %v11865_v36, %v15707_v16 }
0x1f0c   :  { %10846 = vmatprep.subr.bf16.mxu0 %v7650_v41  ;;  %v7608_v28 = vmul.f32 %v11867_v18, %v15689_v3  ;;  %v11869_v26 = vpop.eup %11868 }
0x1f0d   :  { %v7637_v32 = vpack.c.bf16 %v7614_v54, %v7612_v49  ;;  %v11871_v24 = vpop.eup %11870  ;;  %v7616_v4 = vmul.f32 %v11869_v26, %v15733_v53 }
0x1f0e   :  { %v7636_v23 = vpack.c.bf16 %v7610_v30, %v7608_v28  ;;  %v7618_v9 = vmul.f32 %v11871_v24, %v15727_v51 }
0x1f0f   :  { %10847 = vmatpush3.bf16.msra.mxu0 %v7650_v41 }
0x1f10   :  { %v7638_v7 = vpack.c.bf16 %v7618_v9, %v7616_v4 }
0x1f12   :  { %10849 = vmatmul.mubr.msk.bf16.vlgmr.msra.gmra.mrb[176].mxu0 %vm390_vm1, %v7636_v23 }
0x1f13   :  { %10852 = vmatprep.mubr.msk.bf16.mxu0 %vm390_vm1, %v7637_v32 }
0x1f1a   :  { %10853 = vmatmul.mubr.msk.bf16.gmra.mrb[180].mxu0 %vm390_vm1, %v7638_v7 }
0x1f2c   :  { %v7506_v16 = vpop.xlane.xlu1 %7505 }
0x1f2d   :  { %v7522_v8 = vsub.f32 %v15745_v58, %v7506_v16 }
0x1f2f   :  { %v7553_v3 = vmul.f32 1.442695, %v7522_v8 }
0x1f30   :  { %v7500_v2 = vpop.xlane.xlu1 %7499 }
0x1f31   :  { %11872 = vpow2.f32 %v7553_v3  ;;  %v7520_v57 = vsub.f32 %v15747_v15, %v7500_v2  ;;  %v9640_v15 = vld [vmem:[%s16788_s2 + $0x58] sm:$0xff]  ;;  %v16970_v3 = vld [vmem:[#allocation9_spill] sm:$0xff] }
0x1f32   :  { %v7830_v44 = vpack.c.bf16 %v9640_v15, %v9640_v15 }
0x1f33   :  { %v7549_v11 = vmul.f32 1.442695, %v7520_v57 }
0x1f34   :  { %v7733_v14 = vpop.permute.xlu1 %7732 }
0x1f35   :  { %11874 = vpow2.f32 %v7549_v11  ;;  %10856 = vmatprep.subr.bf16.mxu1 %v7733_v14 }
0x1f36   :  { %10857 = vmatpush3.bf16.msra.mxu1 %v7733_v14 }
0x1f38   :  { %v7735_v55 = vpop.permute.xlu1 %7734 }
0x1f39   :  { %10858 = vmatprep.subr.bf16.mxu1 %v7735_v55 }
0x1f3a   :  { %10859 = vmatpush3.bf16.msra.mxu1 %v7735_v55 }
0x1f3b   :  { %v11873_v51 = vpop.eup %11872 }
0x1f3c   :  { %v7600_v53 = vsel %vm390_vm1, %v11873_v51, 0.0 }
0x1f3d   :  { %7601 = vadd.xlane.f32.xlu0 %v7600_v53 }
0x1f3f   :  { %v11875_v59 = vpop.eup %11874 }
0x1f40   :  { %v7594_v58 = vsel %vm390_vm1, %v11875_v59, 0.0 }
0x1f41   :  { %7595 = vadd.xlane.f32.xlu1 %v7594_v58 }
0x1f52   :  { %7738 = vrot.lane.b32.xlu1 %v14748_v42, %s12073_s19 }
0x1f53   :  { %7736 = vrot.lane.b32.xlu0 %v14750_v52, %s12073_s19 }
0x1f56   :  { %7980 = vrot.lane.b32.xlu1 %v15811_v50, %s12062_s27 }
0x1f57   :  { %7832 = vrot.lane.b32.xlu0 %v7830_v44, %s12070_s14 }
0x1f8b   :  { %v7587_v22 = vpop.xlane.xlu1 %7586 }
0x1f8f   :  { %v7581_v34 = vpop.xlane.xlu1 %7580 }
0x1f90   :  { %11876 = vrcp.f32 %v7581_v34 }
0x1f93   :  { %v7590_v35 = vpop.xlane.xlu1 %7589  ;;  %v7599_v27 = vpop.xlane.xlu0 %7598 }
0x1f97   :  { %v7584_v40 = vpop.xlane.xlu1 %7583  ;;  %v7593_v48 = vpop.xlane.xlu0 %7592 }
0x1f98   :  { %11878 = vrcp.f32 %v7584_v40 }
0x1f99   :  { %11880 = vrcp.f32 %v7590_v35 }
0x1f9a   :  { %v11877_v42 = vpop.eup %11876  ;;  %11882 = vrcp.f32 %v7587_v22 }
0x1f9b   :  { %v7620_v52 = vmul.f32 %v11877_v42, %v15767_v39 }
0x1fa2   :  { %v11879_v46 = vpop.eup %11878 }
0x1fa3   :  { %v7622_v60 = vmul.f32 %v11879_v46, %v15779_v5  ;;  %v11881_v29 = vpop.eup %11880 }
0x1fa4   :  { %v11883_v45 = vpop.eup %11882  ;;  %v7626_v38 = vmul.f32 %v11881_v29, %v15771_v12  ;;  %v16951_v12 = vmov 1.0|1.0   ;;  %v16961_v29 = vld [vmem:[#allocation17_spill] sm:$0xff] }
0x1fa5   :  { %v7639_v17 = vpack.c.bf16 %v7622_v60, %v7620_v52  ;;  %v7624_v39 = vmul.f32 %v11883_v45, %v15763_v13  ;;  %v16962_v45 = vld [vmem:[#allocation19_spill] sm:$0xff] }
0x1fa7   :  { %10864 = vmatprep.mubr.msk.bf16.mxu1 %vm390_vm1, %v7639_v17  ;;  %v7640_v47 = vpack.c.bf16 %v7626_v38, %v7624_v39 }
0x1fca   :  { %v7602_v1 = vpop.xlane.xlu0 %7601 }
0x1fcb   :  { %11884 = vrcp.f32 %v7602_v1 }
0x1fcc   :  { %11886 = vrcp.f32 %v7593_v48 }
0x1fcd   :  { %11888 = vrcp.f32 %v7599_v27  ;;  %v16960_v27 = vld [vmem:[#allocation18_spill] sm:$0xff] }
0x1fce   :  { %v7596_v21 = vpop.xlane.xlu1 %7595  ;;  %v7737_v56 = vpop.permute.xlu0 %7736 }
0x1fcf   :  { %11890 = vrcp.f32 %v7596_v21  ;;  %10860 = vmatprep.subr.bf16.mxu1 %v7737_v56 }
0x1fd0   :  { %10861 = vmatpush3.bf16.msra.mxu1 %v7737_v56 }
0x1fd2   :  { %v7739_v25 = vpop.permute.xlu1 %7738  ;;  %v7833_v33 = vpop.permute.xlu0 %7832 }
0x1fd3   :  { %10862 = vmatprep.subr.bf16.mxu1 %v7739_v25  ;;  %v7859_v31 = vsel %vm1738_vm3, %v7833_v33, 0 }
0x1fd4   :  { %10863 = vmatpush3.bf16.msra.mxu1 %v7739_v25 }
0x1fd5   :  { %11201 = vmatprep.subr.msk.bf16.mxu1 %vm1738_vm3, %v7833_v33  ;;  %v11885_v10 = vpop.eup %11884 }
0x1fd6   :  { %v11887_v37 = vpop.eup %11886  ;;  %v7634_v5 = vmul.f32 %v11885_v10, %v11873_v51  ;;  %v15883_v35 = vpop.permute.xlu1 %7980 }
0x1fd7   :  { %10865 = vmatmul.mubr.msk.bf16.vlgmr.msra.gmra.mrb[164].mxu1 %vm390_vm1, %v7640_v47  ;;  %v11889_v19 = vpop.eup %11888  ;;  %v7628_v13 = vmul.f32 %v11887_v37, %v15781_v43 }
0x1fd8   :  { %10873 = vmatpush3.bf16.msra.mxu1 %v7859_v31  ;;  %v7632_v6 = vmul.f32 %v11889_v19, %v15773_v0  ;;  %v16963_v31 = vld [vmem:[#allocation20_spill] sm:$0xff] }
0x1fd9   :  { %v11891_v20 = vpop.eup %11890  ;;  %11001 = vmatprep.subr.msk.bf16.mxu1 %vm14378_vm11, %v16951_v12 }
0x1fda   :  { %v7630_v62 = vmul.f32 %v11891_v20, %v11875_v59  ;;  %v7642_v36 = vpack.c.bf16 %v7634_v5, %v7632_v6 }
0x1fdc   :  { %v7641_v63 = vpack.c.bf16 %v7630_v62, %v7628_v13  ;;  %v16964_v62 = vld [vmem:[#allocation21_spill] sm:$0xff] }
0x1fde   :  { %10868 = vmatprep.mubr.msk.bf16.mxu1 %vm390_vm1, %v7641_v63  ;;  %v16965_v63 = vld [vmem:[#allocation7_spill] sm:$0xff] }
0x1fdf   :  { %10869 = vmatmul.mubr.msk.bf16.gmra.mrb[168].mxu1 %vm390_vm1, %v7642_v36 }
0x1fe5   :  { %v10850_v18 = vpop.f32.mrb[176].mxu0 }
0x1fe6   :  { %v7701_v41 = vpop.f32.mrb[177].mxu0 }
0x1fe7   :  { %v10851_v30 = vpop.f32.mrb[178].mxu0 }
0x1fe8   :  { %v7823_v49 = vpack.c.bf16 %v10851_v30, %v10850_v18  ;;  %v7704_v54 = vpop.f32.mrb[179].mxu0 }
0x1fe9   :  { %v7822_v28 = vpack.c.bf16 %v7704_v54, %v7701_v41  ;;  %v16967_v41 = vld [vmem:[#allocation8_spill] sm:$0xff]  ;;  %v16969_v54 = vld [vmem:[#allocation22_spill] sm:$0xff] }
0x1feb   :  { %10874 = vmatprep.mubr.msk.bf16.mxu1 %vm534_vm2, %v7822_v28 }
0x1fec   :  { %10875 = vmatmul.mubr.msk.bf16.vlgmr.msra.gmra.mrb[132].mxu1 %vm534_vm2, %v7823_v49 }
0x1fed   :  { %v10854_v43 = vpop.f32.mrb[180].mxu0  ;;  %11003 = vmatpush3.bf16.msk.msra.mxu1 %vm14378_vm11, %v16951_v12 }
0x1fee   :  { %v7717_v0 = vpop.f32.mrb[181].mxu0  ;;  %11005 = vmatprep.subr.msk.bf16.mxu1 %vm14387_vm13, %v16951_v12 }
0x1fef   :  { %v10855_v26 = vpop.f32.mrb[182].mxu0 }
0x1ff0   :  { %v7825_v32 = vpack.c.bf16 %v10855_v26, %v10854_v43  ;;  %v7720_v24 = vpop.f32.mrb[183].mxu0 }
0x1ff1   :  { %v7824_v4 = vpack.c.bf16 %v7720_v24, %v7717_v0  ;;  %11007 = vmatpush3.bf16.msk.msra.mxu1 %vm14387_vm13, %v16951_v12 }
0x1ff2   :  { %11009 = vmatprep.subr.msk.bf16.mxu1 %vm14401_vm4, %v16951_v12 }
0x1ff3   :  { %10878 = vmatprep.mubr.msk.bf16.mxu1 %vm534_vm2, %v7824_v4 }
0x1ff4   :  { %10879 = vmatmul.mubr.msk.bf16.gmra.mrb[136].mxu1 %vm534_vm2, %v7825_v32 }
0x1ff5   :  { %11011 = vmatpush3.bf16.msk.msra.mxu1 %vm14401_vm4, %v16951_v12 }
0x1ff6   :  { %11013 = vmatprep.subr.msk.bf16.mxu1 %vm14415_vm7, %v16951_v12 }
0x1ff9   :  { %11015 = vmatpush3.bf16.msk.msra.mxu1 %vm14415_vm7, %v16951_v12 }
0x1ffa   :  { %11017 = vmatprep.subr.msk.bf16.mxu1 %vm14429_vm10, %v16951_v12 }
0x1ffd   :  { %11019 = vmatpush3.bf16.msk.msra.mxu1 %vm14429_vm10, %v16951_v12 }
0x1ffe   :  { %11021 = vmatprep.subr.msk.bf16.mxu1 %vm14443_vm15, %v16951_v12 }
0x2001   :  { %11023 = vmatpush3.bf16.msk.msra.mxu1 %vm14443_vm15, %v16951_v12 }
0x2002   :  { %11025 = vmatprep.subr.msk.bf16.mxu1 %vm14455_vm8, %v16951_v12 }
0x2005   :  { %11027 = vmatpush3.bf16.msk.msra.mxu1 %vm14455_vm8, %v16951_v12 }
0x2006   :  { %11029 = vmatprep.subr.msk.bf16.mxu1 %vm14563_vm14, %v16951_v12 }
0x2009   :  { %11031 = vmatpush3.bf16.msk.msra.mxu1 %vm14563_vm14, %v16951_v12 }
0x20aa   :  { %v10866_v57 = vpop.f32.mrb[164].mxu1 }
0x20ab   :  { %v7790_v11 = vpop.f32.mrb[165].mxu1 }
0x20ac   :  { %v10867_v14 = vpop.f32.mrb[166].mxu1 }
0x20ad   :  { %v7827_v55 = vpack.c.bf16 %v10867_v14, %v10866_v57  ;;  %v7793_v51 = vpop.f32.mrb[167].mxu1  ;;  %v16972_v14 = vld [vmem:[#allocation10_spill] sm:$0xff] }
0x20ae   :  { %v7826_v53 = vpack.c.bf16 %v7793_v51, %v7790_v11  ;;  %v16974_v51 = vld [vmem:[#allocation11_spill] sm:$0xff] }
0x20b0   :  { %10882 = vmatprep.mubr.msk.bf16.mxu1 %vm534_vm2, %v7826_v53 }
0x20b1   :  { %10883 = vmatmul.mubr.msk.bf16.gmra.mrb[140].mxu1 %vm534_vm2, %v7827_v55 }
0x20b2   :  { %v10870_v59 = vpop.f32.mrb[168].mxu1 }
0x20b3   :  { %v7806_v58 = vpop.f32.mrb[169].mxu1 }
0x20b4   :  { %v10871_v15 = vpop.f32.mrb[170].mxu1 }
0x20b5   :  { %v7829_v44 = vpack.c.bf16 %v10871_v15, %v10870_v59  ;;  %v7809_v22 = vpop.f32.mrb[171].mxu1 }
0x20b6   :  { %v7828_v34 = vpack.c.bf16 %v7809_v22, %v7806_v58 }
0x20b8   :  { %10886 = vmatprep.mubr.msk.bf16.mxu1 %vm534_vm2, %v7828_v34 }
0x20b9   :  { %10887 = vmatmul.mubr.msk.bf16.gmra.mrb[144].mxu1 %vm534_vm2, %v7829_v44  ;;  %v16976_v44 = vld [vmem:[#allocation12_spill] sm:$0xff] }
0x20bf   :  { %v10876_v40 = vpop.f32.mrb[132].mxu1 }
0x20c0   :  { %v7895_v42 = vpop.f32.mrb[133].mxu1  ;;  %v7985_v46 = vadd.f32 %v10876_v40, %v15883_v35 }
0x20c1   :  { %v7983_v52 = vadd.f32 %v15883_v35, %v7895_v42  ;;  %v10877_v60 = vpop.f32.mrb[134].mxu1 }
0x20c2   :  { %v7898_v17 = vpop.f32.mrb[135].mxu1  ;;  %v15892_v21 = vadd.f32 %v7985_v46, %v16961_v29  ;;  %v7986_v56 = vadd.f32 %v10877_v60, %v15883_v35 }
0x20c3   :  { %v15888_v48 = vadd.f32 %v7983_v52, %v16960_v27  ;;  %v7984_v1 = vadd.f32 %v15883_v35, %v7898_v17 }
0x20c4   :  { %v15903_v10 = vadd.f32 %v7986_v56, %v16963_v31  ;;  %v8021_v20 = vsel %vm100_vm0, %v15892_v21, 0.0  ;;  %v16978_v56 = vld [vmem:[#allocation13_spill] sm:$0xff] }
0x20c5   :  { %v15896_v38 = vadd.f32 %v7984_v1, %v16962_v45  ;;  %v8015_v25 = vsel %vm100_vm0, %v15888_v48, 0.0 }
0x20c6   :  { %8016 = vadd.xlane.f32.xlu0 %v8015_v25  ;;  %v8024_v18 = vsel %vm100_vm0, %v15903_v10, 0.0 }
0x20c7   :  { %v10880_v33 = vpop.f32.mrb[136].mxu1  ;;  %v8018_v39 = vsel %vm100_vm0, %v15896_v38, 0.0 }
0x20c8   :  { %8019 = vadd.xlane.f32.xlu1 %v8018_v39  ;;  %v7911_v47 = vpop.f32.mrb[137].mxu1  ;;  %v7989_v13 = vadd.f32 %v10880_v33, %v15883_v35 }
0x20c9   :  { %v7987_v37 = vadd.f32 %v15883_v35, %v7911_v47  ;;  %v10881_v19 = vpop.f32.mrb[138].mxu1 }
0x20ca   :  { %8022 = vadd.xlane.f32.xlu0 %v8021_v20  ;;  %v7914_v5 = vpop.f32.mrb[139].mxu1  ;;  %v7990_v12 = vadd.f32 %v10881_v19, %v15883_v35  ;;  %v15925_v28 = vadd.f32 %v7989_v13, %v16969_v54  ;;  %v16980_v19 = vld [vmem:[#allocation14_spill] sm:$0xff] }
0x20cb   :  { %v7988_v61 = vadd.f32 %v15883_v35, %v7914_v5  ;;  %v15912_v6 = vadd.f32 %v7987_v37, %v16964_v62  ;;  %v16982_v5 = vld [vmem:[#allocation15_spill] sm:$0xff] }
0x20cc   :  { %v15920_v30 = vadd.f32 %v7990_v12, %v16967_v41  ;;  %v8033_v23 = vsel %vm100_vm0, %v15925_v28, 0.0 }
0x20cd   :  { %v15915_v36 = vadd.f32 %v7988_v61, %v16965_v63  ;;  %v8027_v43 = vsel %vm100_vm0, %v15912_v6, 0.0  ;;  %v16984_v63 = vld [vmem:[#allocation16_spill] sm:$0xff] }
0x20ce   :  { %8025 = vadd.xlane.f32.xlu0 %v8024_v18  ;;  %16968 = vst [vmem:[#allocation5_spill] sm:$0xff] %v15920_v30  ;;  %v8036_v0 = vsel %vm100_vm0, %v15920_v30, 0.0 }
0x20cf   :  { %16966 = vst [vmem:[#allocation6_spill] sm:$0xff] %v15915_v36  ;;  %v8030_v49 = vsel %vm100_vm0, %v15915_v36, 0.0 }
0x20d0   :  { %8031 = vadd.xlane.f32.xlu1 %v8030_v49 }
0x20d2   :  { %8028 = vadd.xlane.f32.xlu0 %v8027_v43 }
0x20d4   :  { %8037 = vadd.xlane.f32.xlu1 %v8036_v0 }
0x20d6   :  { %8034 = vadd.xlane.f32.xlu0 %v8033_v23 }
0x2153   :  { %v8017_v26 = vpop.xlane.xlu0 %8016 }
0x2154   :  { %v8063_v42 = vmul.f32 0.03125, %v8017_v26 }
0x2155   :  { %v8020_v15 = vpop.xlane.xlu1 %8019 }
0x2156   :  { %v8064_v1 = vmul.f32 0.03125, %v8020_v15  ;;  %v15965_v47 = vsub.f32 %v15888_v48, %v8063_v42 }
0x2157   :  { %v8023_v24 = vpop.xlane.xlu0 %8022 }
0x2158   :  { %v8065_v37 = vmul.f32 0.03125, %v8023_v24  ;;  %v8095_v0 = vmul.f32 %v15965_v47, %v15965_v47 }
0x215a   :  { %v15984_v49 = vsub.f32 %v15892_v21, %v8065_v37 }
0x215b   :  { %v8026_v58 = vpop.xlane.xlu0 %8025 }
0x215c   :  { %v8066_v62 = vmul.f32 0.03125, %v8026_v58 }
0x215d   :  { %v8032_v13 = vpop.xlane.xlu1 %8031 }
0x215e   :  { %v15991_v26 = vsub.f32 %v15903_v10, %v8066_v62 }
0x215f   :  { %v8029_v31 = vpop.xlane.xlu0 %8028 }
0x2160   :  { %v8067_v54 = vmul.f32 0.03125, %v8029_v31 }
0x2163   :  { %v8035_v23 = vpop.xlane.xlu0 %8034 }
0x2184   :  { %v10884_v32 = vpop.f32.mrb[140].mxu1 }
0x2185   :  { %v7927_v4 = vpop.f32.mrb[141].mxu1  ;;  %v7993_v9 = vadd.f32 %v10884_v32, %v15883_v35  ;;  %v8068_v32 = vmul.f32 0.03125, %v8032_v13 }
0x2186   :  { %v7991_v7 = vadd.f32 %v15883_v35, %v7927_v4  ;;  %v10885_v16 = vpop.f32.mrb[142].mxu1 }
0x2187   :  { %v7930_v8 = vpop.f32.mrb[143].mxu1  ;;  %v7994_v57 = vadd.f32 %v10885_v16, %v15883_v35  ;;  %v15941_v55 = vadd.f32 %v7993_v9, %v16972_v14  ;;  %v8038_v9 = vpop.xlane.xlu1 %8037  ;;  %v8069_v16 = vmul.f32 0.03125, %v8035_v23 }
0x2188   :  { %v15936_v2 = vadd.f32 %v7991_v7, %v16970_v3  ;;  %v7992_v11 = vadd.f32 %v15883_v35, %v7930_v8  ;;  %v15998_v7 = vsub.f32 %v15912_v6, %v8067_v54  ;;  %v8111_v8 = vsel %vm100_vm0, %v8095_v0, 0.0 }
0x2189   :  { %16973 = vst [vmem:[#allocation24_spill] sm:$0xff] %v15941_v55  ;;  %v15949_v22 = vadd.f32 %v7994_v57, %v16976_v44  ;;  %v8045_v27 = vsel %vm100_vm0, %v15941_v55, 0.0  ;;  %v8097_v3 = vmul.f32 %v15984_v49, %v15984_v49  ;;  %v16004_v57 = vsub.f32 %v15915_v36, %v8068_v32 }
0x218a   :  { %16971 = vst [vmem:[#allocation23_spill] sm:$0xff] %v15936_v2  ;;  %v15944_v53 = vadd.f32 %v7992_v11, %v16974_v51  ;;  %v8039_v59 = vsel %vm100_vm0, %v15936_v2, 0.0  ;;  %v8070_v11 = vmul.f32 0.03125, %v8038_v9  ;;  %v8098_v51 = vmul.f32 %v15991_v26, %v15991_v26 }
0x218b   :  { %8040 = vadd.xlane.f32.xlu0 %v8039_v59  ;;  %16977 = vst [vmem:[#allocation26_spill] sm:$0xff] %v15949_v22  ;;  %v8048_v39 = vsel %vm100_vm0, %v15949_v22, 0.0  ;;  %v16010_v59 = vsub.f32 %v15925_v28, %v8069_v16  ;;  %v8117_v58 = vsel %vm100_vm0, %v8097_v3, 0.0  ;;  %v8099_v15 = vmul.f32 %v15998_v7, %v15998_v7 }
0x218c   :  { %16975 = vst [vmem:[#allocation25_spill] sm:$0xff] %v15944_v53  ;;  %v10888_v34 = vpop.f32.mrb[144].mxu1  ;;  %v8042_v40 = vsel %vm100_vm0, %v15944_v53, 0.0  ;;  %v16016_v44 = vsub.f32 %v15920_v30, %v8070_v11 }
0x218d   :  { %8043 = vadd.xlane.f32.xlu1 %v8042_v40  ;;  %v7943_v46 = vpop.f32.mrb[145].mxu1  ;;  %v7997_v52 = vadd.f32 %v10888_v34, %v15883_v35  ;;  %v8120_v34 = vsel %vm100_vm0, %v8098_v51, 0.0  ;;  %v8100_v40 = vmul.f32 %v16004_v57, %v16004_v57  ;;  %v8123_v42 = vsel %vm100_vm0, %v8099_v15, 0.0 }
0x218e   :  { %v7995_v60 = vadd.f32 %v15883_v35, %v7943_v46  ;;  %v10889_v17 = vpop.f32.mrb[146].mxu1  ;;  %v8101_v46 = vmul.f32 %v16010_v59, %v16010_v59 }
0x218f   :  { %8046 = vadd.xlane.f32.xlu0 %v8045_v27  ;;  %v7946_v29 = vpop.f32.mrb[147].mxu1  ;;  %v7998_v25 = vadd.f32 %v10889_v17, %v15883_v35  ;;  %v15968_v20 = vadd.f32 %v7997_v52, %v16980_v19  ;;  %v8126_v52 = vsel %vm100_vm0, %v8100_v40, 0.0 }
0x2190   :  { %v15958_v45 = vadd.f32 %v7995_v60, %v16978_v56  ;;  %v7996_v33 = vadd.f32 %v15883_v35, %v7946_v29  ;;  %v15976_v35 = vsub.f32 %v15896_v38, %v8064_v1  ;;  %v8102_v60 = vmul.f32 %v16016_v44, %v16016_v44 }
0x2191   :  { %8049 = vadd.xlane.f32.xlu1 %v8048_v39  ;;  %16981 = vst [vmem:[#allocation28_spill] sm:$0xff] %v15968_v20  ;;  %v15979_v18 = vadd.f32 %v7998_v25, %v16984_v63  ;;  %v8057_v43 = vsel %vm100_vm0, %v15968_v20, 0.0  ;;  %v8129_v17 = vsel %vm100_vm0, %v8101_v46, 0.0 }
0x2192   :  { %16979 = vst [vmem:[#allocation27_spill] sm:$0xff] %v15958_v45  ;;  %v15971_v12 = vadd.f32 %v7996_v33, %v16982_v5  ;;  %v8051_v61 = vsel %vm100_vm0, %v15958_v45, 0.0  ;;  %v8096_v4 = vmul.f32 %v15976_v35, %v15976_v35  ;;  %v8132_v27 = vsel %vm100_vm0, %v8102_v60, 0.0 }
0x2193   :  { %8052 = vadd.xlane.f32.xlu0 %v8051_v61  ;;  %16985 = vst [vmem:[#allocation18_spill] sm:$0xff] %v15979_v18  ;;  %v8060_v24 = vsel %vm100_vm0, %v15979_v18, 0.0 }
0x2194   :  { %16983 = vst [vmem:[#allocation29_spill] sm:$0xff] %v15971_v12  ;;  %v8054_v41 = vsel %vm100_vm0, %v15971_v12, 0.0  ;;  %v8114_v14 = vsel %vm100_vm0, %v8096_v4, 0.0 }
0x2195   :  { %8055 = vadd.xlane.f32.xlu1 %v8054_v41 }
0x2197   :  { %8058 = vadd.xlane.f32.xlu0 %v8057_v43 }
0x2199   :  { %8061 = vadd.xlane.f32.xlu1 %v8060_v24 }
0x219b   :  { %8112 = vadd.xlane.f32.xlu0 %v8111_v8 }
0x219d   :  { %8115 = vadd.xlane.f32.xlu1 %v8114_v14 }
0x219f   :  { %8118 = vadd.xlane.f32.xlu0 %v8117_v58 }
0x21a1   :  { %8121 = vadd.xlane.f32.xlu1 %v8120_v34 }
0x21a3   :  { %8124 = vadd.xlane.f32.xlu0 %v8123_v42 }
0x21a5   :  { %8127 = vadd.xlane.f32.xlu1 %v8126_v52 }
0x21a7   :  { %8130 = vadd.xlane.f32.xlu0 %v8129_v17 }
0x21a9   :  { %8133 = vadd.xlane.f32.xlu1 %v8132_v27 }
0x2218   :  { %v8041_v1 = vpop.xlane.xlu0 %8040 }
0x2219   :  { %v8071_v56 = vmul.f32 0.03125, %v8041_v1 }
0x221a   :  { %v8044_v29 = vpop.xlane.xlu1 %8043 }
0x221b   :  { %v8072_v33 = vmul.f32 0.03125, %v8044_v29  ;;  %v16030_v37 = vsub.f32 %v15936_v2, %v8071_v56  ;;  %v9650_v29 = vld [vmem:[%s16788_s2 + $0x60] sm:$0xff]  ;;  %v9651_v56 = vld [vmem:[%s16788_s2 + $0x68] sm:$0xff] }
0x221c   :  { %v8047_v25 = vpop.xlane.xlu0 %8046 }
0x221d   :  { %v8073_v39 = vmul.f32 0.03125, %v8047_v25  ;;  %v16036_v13 = vsub.f32 %v15944_v53, %v8072_v33  ;;  %v8103_v23 = vmul.f32 %v16030_v37, %v16030_v37  ;;  %v8273_v25 = vpack.c.bf16 %v9651_v56, %v9650_v29  ;;  %v9652_v33 = vld [vmem:[%s16788_s2 + $0x70] sm:$0xff] }
0x221e   :  { %v8050_v31 = vpop.xlane.xlu1 %8049 }
0x221f   :  { %v16033_v19 = vsub.f32 %v15941_v55, %v8073_v39  ;;  %v8074_v5 = vmul.f32 0.03125, %v8050_v31  ;;  %v8104_v16 = vmul.f32 %v16036_v13, %v16036_v13  ;;  %v8135_v51 = vsel %vm100_vm0, %v8103_v23, 0.0  ;;  %10890 = vmatprep.subr.bf16.mxu0 %v8273_v25 }
0x2220   :  { %v8053_v61 = vpop.xlane.xlu0 %8052  ;;  %10891 = vmatpush3.bf16.msra.mxu0 %v8273_v25 }
0x2221   :  { %v16039_v62 = vsub.f32 %v15949_v22, %v8074_v5  ;;  %v8105_v63 = vmul.f32 %v16033_v19, %v16033_v19  ;;  %v8075_v54 = vmul.f32 0.03125, %v8053_v61  ;;  %v8138_v34 = vsel %vm100_vm0, %v8104_v16, 0.0 }
0x2222   :  { %v8056_v41 = vpop.xlane.xlu1 %8055 }
0x2223   :  { %v8141_v43 = vsel %vm100_vm0, %v8105_v63, 0.0  ;;  %v8106_v0 = vmul.f32 %v16039_v62, %v16039_v62  ;;  %v8076_v24 = vmul.f32 0.03125, %v8056_v41  ;;  %v16052_v3 = vsub.f32 %v15958_v45, %v8075_v54 }
0x2224   :  { %8142 = vadd.xlane.f32.xlu0 %v8141_v43  ;;  %v8059_v32 = vpop.xlane.xlu0 %8058 }
0x2225   :  { %v8077_v4 = vmul.f32 0.03125, %v8059_v32  ;;  %v8144_v9 = vsel %vm100_vm0, %v8106_v0, 0.0  ;;  %v16059_v58 = vsub.f32 %v15971_v12, %v8076_v24  ;;  %v8107_v52 = vmul.f32 %v16052_v3, %v16052_v3 }
0x2226   :  { %8145 = vadd.xlane.f32.xlu1 %v8144_v9  ;;  %v8062_v8 = vpop.xlane.xlu1 %8061 }
0x2227   :  { %v16055_v11 = vsub.f32 %v15968_v20, %v8077_v4  ;;  %v8078_v14 = vmul.f32 0.03125, %v8062_v8  ;;  %v8108_v17 = vmul.f32 %v16059_v58, %v16059_v58  ;;  %v8147_v27 = vsel %vm100_vm0, %v8107_v52, 0.0 }
0x2228   :  { %8136 = vadd.xlane.f32.xlu0 %v8135_v51  ;;  %v8113_v31 = vpop.xlane.xlu0 %8112 }
0x2229   :  { %v16062_v15 = vsub.f32 %v15979_v18, %v8078_v14  ;;  %v8109_v40 = vmul.f32 %v16055_v11, %v16055_v11  ;;  %v8150_v1 = vsel %vm100_vm0, %v8108_v17, 0.0  ;;  %v8159_v54 = vmul.f32 0.03125, %v8113_v31 }
0x222a   :  { %8139 = vadd.xlane.f32.xlu1 %v8138_v34  ;;  %v8116_v5 = vpop.xlane.xlu1 %8115 }
0x222b   :  { %v8153_v42 = vsel %vm100_vm0, %v8109_v40, 0.0  ;;  %v8110_v46 = vmul.f32 %v16062_v15, %v16062_v15  ;;  %v8160_v43 = vmul.f32 0.03125, %v8116_v5  ;;  %v8175_v4 = vadd.f32 1e-06, %v8159_v54 }
0x222c   :  { %8154 = vadd.xlane.f32.xlu0 %v8153_v42  ;;  %v8119_v61 = vpop.xlane.xlu0 %8118 }
0x222d   :  { %v8156_v60 = vsel %vm100_vm0, %v8110_v46, 0.0  ;;  %v8161_v23 = vmul.f32 0.03125, %v8119_v61  ;;  %v8176_v16 = vadd.f32 1e-06, %v8160_v43  ;;  %11892 = vrsqrt.f32 %v8175_v4 }
0x222e   :  { %8157 = vadd.xlane.f32.xlu1 %v8156_v60  ;;  %v8122_v63 = vpop.xlane.xlu1 %8121 }
0x222f   :  { %v8162_v32 = vmul.f32 0.03125, %v8122_v63  ;;  %v8177_v14 = vadd.f32 1e-06, %v8161_v23  ;;  %11894 = vrsqrt.f32 %v8176_v16 }
0x2230   :  { %8148 = vadd.xlane.f32.xlu0 %v8147_v27  ;;  %v8125_v41 = vpop.xlane.xlu0 %8124 }
0x2231   :  { %v8163_v9 = vmul.f32 0.03125, %v8125_v41  ;;  %v8178_v34 = vadd.f32 1e-06, %v8162_v32  ;;  %11896 = vrsqrt.f32 %v8177_v14 }
0x2232   :  { %8151 = vadd.xlane.f32.xlu1 %v8150_v1  ;;  %v8128_v0 = vpop.xlane.xlu1 %8127 }
0x2233   :  { %v8164_v8 = vmul.f32 0.03125, %v8128_v0  ;;  %v8179_v42 = vadd.f32 1e-06, %v8163_v9  ;;  %11898 = vrsqrt.f32 %v8178_v34 }
0x2234   :  { %v8131_v24 = vpop.xlane.xlu0 %8130 }
0x2235   :  { %v8165_v51 = vmul.f32 0.03125, %v8131_v24  ;;  %v8180_v46 = vadd.f32 1e-06, %v8164_v8  ;;  %11900 = vrsqrt.f32 %v8179_v42 }
0x2236   :  { %v8134_v40 = vpop.xlane.xlu1 %8133 }
0x2237   :  { %v8181_v52 = vadd.f32 1e-06, %v8165_v51  ;;  %v8166_v60 = vmul.f32 0.03125, %v8134_v40  ;;  %11902 = vrsqrt.f32 %v8180_v46 }
0x2239   :  { %11904 = vrsqrt.f32 %v8181_v52  ;;  %v8182_v1 = vadd.f32 1e-06, %v8166_v60 }
0x223b   :  { %11906 = vrsqrt.f32 %v8182_v1 }
0x2243   :  { %8242 = vrot.lane.b32.xlu1 %v15811_v50, %s12070_s14 }
0x2246   :  { %8223 = vrot.lane.b32.xlu0 %v15811_v50, %s12063_s30  ;;  %v9653_v50 = vld [vmem:[%s16788_s2 + $0x78] sm:$0xff] }
0x2247   :  { %8843 = vrot.lane.b32.xlu1 %v8273_v25, %s12063_s30  ;;  %v8274_v39 = vpack.c.bf16 %v9653_v50, %v9652_v33  ;;  %v11893_v50 = vpop.eup %11892 }
0x2248   :  { %v11895_v61 = vpop.eup %11894  ;;  %v8207_v51 = vmul.f32 %v11893_v50, %v15965_v47 }
0x2249   :  { %10892 = vmatprep.subr.bf16.mxu0 %v8274_v39  ;;  %v11897_v41 = vpop.eup %11896  ;;  %v8208_v34 = vmul.f32 %v11895_v61, %v15976_v35 }
0x224a   :  { %10893 = vmatpush3.bf16.msra.mxu0 %v8274_v39  ;;  %v11899_v0 = vpop.eup %11898  ;;  %v8209_v40 = vmul.f32 %v11897_v41, %v15984_v49 }
0x224b   :  { %8845 = vrot.lane.b32.xlu1 %v8274_v39, %s12063_s30  ;;  %v11901_v32 = vpop.eup %11900  ;;  %v8210_v52 = vmul.f32 %v11899_v0, %v15991_v26 }
0x224c   :  { %v11903_v4 = vpop.eup %11902 }
0x224d   :  { %v11905_v8 = vpop.eup %11904  ;;  %v8212_v1 = vmul.f32 %v11903_v4, %v16004_v57 }
0x224e   :  { %v11907_v47 = vpop.eup %11906 }
0x22b1   :  { %v8143_v17 = vpop.xlane.xlu0 %8142 }
0x22b2   :  { %v8169_v39 = vmul.f32 0.03125, %v8143_v17 }
0x22b3   :  { %v8146_v27 = vpop.xlane.xlu1 %8145 }
0x22b4   :  { %v8170_v56 = vmul.f32 0.03125, %v8146_v27  ;;  %v8185_v24 = vadd.f32 1e-06, %v8169_v39  ;;  %v8211_v27 = vmul.f32 %v11901_v32, %v15998_v7 }
0x22b5   :  { %v8137_v29 = vpop.xlane.xlu0 %8136 }
0x22b6   :  { %v8167_v25 = vmul.f32 0.03125, %v8137_v29  ;;  %v8186_v54 = vadd.f32 1e-06, %v8170_v56  ;;  %v8213_v29 = vmul.f32 %v11905_v8, %v16010_v59 }
0x22b7   :  { %v8140_v33 = vpop.xlane.xlu1 %8139 }
0x22b8   :  { %v8183_v31 = vadd.f32 1e-06, %v8167_v25  ;;  %v8168_v5 = vmul.f32 0.03125, %v8140_v33 }
0x22b9   :  { %v8155_v63 = vpop.xlane.xlu0 %8154 }
0x22ba   :  { %11908 = vrsqrt.f32 %v8183_v31  ;;  %v8184_v43 = vadd.f32 1e-06, %v8168_v5  ;;  %v8173_v42 = vmul.f32 0.03125, %v8155_v63  ;;  %v8214_v63 = vmul.f32 %v11907_v47, %v16016_v44 }
0x22bb   :  { %v8158_v23 = vpop.xlane.xlu1 %8157 }
0x22bc   :  { %11910 = vrsqrt.f32 %v8184_v43  ;;  %v8174_v9 = vmul.f32 0.03125, %v8158_v23  ;;  %v8189_v26 = vadd.f32 1e-06, %v8173_v42 }
0x22bd   :  { %v8149_v16 = vpop.xlane.xlu0 %8148  ;;  %11912 = vrsqrt.f32 %v8186_v54 }
0x22be   :  { %v8171_v14 = vmul.f32 0.03125, %v8149_v16  ;;  %11914 = vrsqrt.f32 %v8185_v24  ;;  %v8190_v56 = vadd.f32 1e-06, %v8174_v9 }
0x22bf   :  { %v8152_v46 = vpop.xlane.xlu1 %8151 }
0x22c0   :  { %v8187_v60 = vadd.f32 1e-06, %v8171_v14  ;;  %v8172_v17 = vmul.f32 0.03125, %v8152_v46 }
0x22c1   :  { %v16102_v25 = vpop.permute.xlu0 %8223 }
0x22c2   :  { %11916 = vrsqrt.f32 %v8187_v60  ;;  %v8188_v35 = vadd.f32 1e-06, %v8172_v17  ;;  %v8226_v49 = vmul.f32 %v16102_v25, %v8207_v51  ;;  %v8227_v33 = vmul.f32 %v16102_v25, %v8208_v34 }
0x22c3   :  { %v16106_v50 = vpop.permute.xlu1 %8242  ;;  %v8228_v39 = vmul.f32 %v16102_v25, %v8209_v40  ;;  %v8229_v7 = vmul.f32 %v16102_v25, %v8210_v52  ;;  %v8230_v57 = vmul.f32 %v16102_v25, %v8211_v27  ;;  %v8231_v61 = vmul.f32 %v16102_v25, %v8212_v1 }
0x22c4   :  { %v11909_v59 = vpop.eup %11908  ;;  %11918 = vrsqrt.f32 %v8188_v35  ;;  %v8245_v31 = vadd.f32 %v16106_v50, %v8226_v49  ;;  %v8246_v5 = vadd.f32 %v16106_v50, %v8227_v33  ;;  %v8232_v16 = vmul.f32 %v16102_v25, %v8213_v29 }
0x22c5   :  { %v8247_v41 = vadd.f32 %v16106_v50, %v8228_v39  ;;  %v8248_v54 = vadd.f32 %v16106_v50, %v8229_v7  ;;  %v8249_v43 = vadd.f32 %v16106_v50, %v8230_v57  ;;  %v8215_v23 = vmul.f32 %v11909_v59, %v16030_v37 }
0x22c6   :  { %v11911_v0 = vpop.eup %11910  ;;  %11920 = vrsqrt.f32 %v8190_v56  ;;  %v8261_v32 = vpack.c.bf16 %v8246_v5, %v8245_v31  ;;  %v8250_v24 = vadd.f32 %v16106_v50, %v8231_v61  ;;  %v8233_v44 = vmul.f32 %v16102_v25, %v8214_v63 }
0x22c7   :  { %v8216_v4 = vmul.f32 %v11911_v0, %v16036_v13  ;;  %v8262_v9 = vpack.c.bf16 %v8248_v54, %v8247_v41  ;;  %v11913_v8 = vpop.eup %11912  ;;  %11922 = vrsqrt.f32 %v8189_v26  ;;  %v8234_v34 = vmul.f32 %v16102_v25, %v8215_v23 }
0x22c8   :  { %10894 = vmatprep.mubr.msk.bf16.mxu0 %vm100_vm0, %v8261_v32  ;;  %v8263_v14 = vpack.c.bf16 %v8250_v24, %v8249_v43  ;;  %v11915_v51 = vpop.eup %11914  ;;  %v8218_v13 = vmul.f32 %v11913_v8, %v16039_v62  ;;  %v8251_v40 = vadd.f32 %v16106_v50, %v8232_v16  ;;  %v8252_v42 = vadd.f32 %v16106_v50, %v8233_v44  ;;  %v8844_v43 = vpop.permute.xlu1 %8843 }
0x22c9   :  { %10895 = vmatmul.mubr.msk.bf16.vlgmr.msra.gmra.mrb[184].mxu0 %vm100_vm0, %v8262_v9  ;;  %v8235_v37 = vmul.f32 %v16102_v25, %v8216_v4  ;;  %v8217_v60 = vmul.f32 %v11915_v51, %v16033_v19  ;;  %v8253_v1 = vadd.f32 %v16106_v50, %v8234_v34  ;;  %11202 = vmatprep.subr.msk.bf16.mxu0 %vm390_vm1, %v8844_v43 }
0x22ca   :  { %10898 = vmatprep.mubr.msk.bf16.mxu0 %vm100_vm0, %v8263_v14  ;;  %v8264_v56 = vpack.c.bf16 %v8252_v42, %v8251_v40  ;;  %v8237_v47 = vmul.f32 %v16102_v25, %v8218_v13 }
0x22cb   :  { %v8254_v52 = vadd.f32 %v16106_v50, %v8235_v37  ;;  %v8236_v49 = vmul.f32 %v16102_v25, %v8217_v60 }
0x22cc   :  { %v11917_v46 = vpop.eup %11916  ;;  %v8846_v0 = vpop.permute.xlu1 %8845 }
0x22cd   :  { %v8219_v27 = vmul.f32 %v11917_v46, %v16052_v3  ;;  %v8265_v35 = vpack.c.bf16 %v8254_v52, %v8253_v1  ;;  %v8255_v57 = vadd.f32 %v16106_v50, %v8236_v49 }
0x22ce   :  { %v11919_v17 = vpop.eup %11918 }
0x22cf   :  { %v8220_v29 = vmul.f32 %v11919_v17, %v16059_v58  ;;  %v8238_v19 = vmul.f32 %v16102_v25, %v8219_v27  ;;  %v8256_v58 = vadd.f32 %v16106_v50, %v8237_v47 }
0x22d0   :  { %v11921_v62 = vpop.eup %11920 }
0x22d1   :  { %10899 = vmatmul.mubr.msk.bf16.gmra.mrb[188].mxu0 %vm100_vm0, %v8264_v56  ;;  %v8239_v33 = vmul.f32 %v16102_v25, %v8220_v29  ;;  %v11923_v26 = vpop.eup %11922  ;;  %v8222_v3 = vmul.f32 %v11921_v62, %v16062_v15  ;;  %v8257_v59 = vadd.f32 %v16106_v50, %v8238_v19  ;;  %v8266_v31 = vpack.c.bf16 %v8256_v58, %v8255_v57 }
0x22d2   :  { %10902 = vmatprep.mubr.msk.bf16.mxu0 %vm100_vm0, %v8265_v35  ;;  %v8221_v7 = vmul.f32 %v11923_v26, %v16055_v11  ;;  %v16158_v11 = vld [vmem:[%s16787_s1 + $0x5] ss:$0 sm:$0xff] }
0x22d3   :  { %v8258_v39 = vadd.f32 %v16106_v50, %v8239_v33  ;;  %v8241_v5 = vmul.f32 %v16102_v25, %v8222_v3  ;;  %8848 = vrot.lane.b32.xlu0 %v16158_v11, %s12063_s30 }
0x22d4   :  { %v8240_v63 = vmul.f32 %v16102_v25, %v8221_v7  ;;  %v8876_v25 = vsel %vm390_vm1, %v8844_v43, 0 }
0x22d5   :  { %v8267_v61 = vpack.c.bf16 %v8258_v39, %v8257_v59  ;;  %v8260_v15 = vadd.f32 %v16106_v50, %v8241_v5  ;;  %10911 = vmatpush3.bf16.xpose.msra.mxu0 %v8876_v25 }
0x22d6   :  { %v8259_v41 = vadd.f32 %v16106_v50, %v8240_v63  ;;  %v8879_v50 = vsel %vm390_vm1, %v8846_v0, 0  ;;  %11203 = vmatprep.subr.msk.bf16.mxu0 %vm390_vm1, %v8846_v0 }
0x22d8   :  { %v8268_v54 = vpack.c.bf16 %v8260_v15, %v8259_v41 }
0x22d9   :  { %10903 = vmatmul.mubr.msk.bf16.gmra.mrb[192].mxu0 %vm100_vm0, %v8266_v31 }
0x22da   :  { %10906 = vmatprep.mubr.msk.bf16.mxu0 %vm100_vm0, %v8267_v61 }
0x22dd   :  { %10913 = vmatpush3.bf16.xpose.msra.mxu0 %v8879_v50 }
0x22e1   :  { %10907 = vmatmul.mubr.msk.bf16.gmra.mrb[196].mxu0 %vm100_vm0, %v8268_v54 }
0x239c   :  { %v10896_v23 = vpop.f32.mrb[184].mxu0 }
0x239d   :  { %v8347_v32 = vadd.f32 %v10896_v23, %v16158_v11  ;;  %v8338_v24 = vpop.f32.mrb[185].mxu0 }
0x239e   :  { %v8339_v4 = vadd.f32 %v16158_v11, %v8338_v24  ;;  %v10897_v9 = vpop.f32.mrb[186].mxu0 }
0x239f   :  { %v16168_v16 = vmul.f32 0.70710677, %v8347_v32  ;;  %v16171_v44 = vadd.f32 %v10897_v9, %v16158_v11  ;;  %v8341_v8 = vpop.f32.mrb[187].mxu0 }
0x23a0   :  { %v16173_v14 = vmul.f32 0.70710677, %v8339_v4  ;;  %v16176_v37 = vadd.f32 %v16158_v11, %v8341_v8 }
0x23a1   :  { %v8435_v51 = vand.u32 2147483647, %v16168_v16  ;;  %v16181_v13 = vmul.f32 0.70710677, %v16171_v44  ;;  %v8659_v42 = vmul.f32 %v16168_v16, %v16168_v16  ;;  %vm8755_vm2 = vcmp.ge.f32.partialorder %v16168_v16, 0.0 }
0x23a2   :  { %v8433_v34 = vand.u32 2147483647, %v16173_v14  ;;  %v16186_v46 = vmul.f32 0.70710677, %v16176_v37  ;;  %v8657_v60 = vmul.f32 %v16173_v14, %v16173_v14  ;;  %vm8753_vm3 = vcmp.ge.f32.partialorder %v16173_v14, 0.0 }
0x23a3   :  { %v8451_v40 = vmul.f32 0.3275911, %v8435_v51  ;;  %v8436_v17 = vand.u32 2147483647, %v16181_v13  ;;  %v8660_v29 = vmul.f32 %v16181_v13, %v16181_v13  ;;  %v8675_v35 = vsub.f32 0.0, %v8659_v42 }
0x23a4   :  { %v8449_v52 = vmul.f32 0.3275911, %v8433_v34  ;;  %v10900_v27 = vpop.f32.mrb[188].mxu0  ;;  %v8434_v56 = vand.u32 2147483647, %v16186_v46  ;;  %v8673_v26 = vsub.f32 0.0, %v8657_v60  ;;  %v8658_v31 = vmul.f32 %v16186_v46, %v16186_v46 }
0x23a5   :  { %v8467_v1 = vadd.f32 1.0, %v8451_v40  ;;  %v8452_v62 = vmul.f32 0.3275911, %v8436_v17  ;;  %v8354_v33 = vpop.f32.mrb[189].mxu0  ;;  %v16195_v3 = vadd.f32 %v10900_v27, %v16158_v11  ;;  %v8676_v39 = vsub.f32 0.0, %v8660_v29 }
0x23a6   :  { %v8465_v47 = vadd.f32 1.0, %v8449_v52  ;;  %v8450_v49 = vmul.f32 0.3275911, %v8434_v56  ;;  %v10901_v58 = vpop.f32.mrb[190].mxu0  ;;  %v16198_v57 = vadd.f32 %v16158_v11, %v8354_v33  ;;  %v8693_v61 = vmul.f32 1.442695, %v8675_v35 }
0x23a7   :  { %11924 = vrcp.f32 %v8467_v1  ;;  %v8468_v19 = vadd.f32 1.0, %v8452_v62  ;;  %v8357_v59 = vpop.f32.mrb[191].mxu0  ;;  %v16203_v5 = vmul.f32 0.70710677, %v16195_v3  ;;  %v16209_v15 = vadd.f32 %v10901_v58, %v16158_v11 }
0x23a8   :  { %11926 = vrcp.f32 %v8465_v47  ;;  %v8466_v7 = vadd.f32 1.0, %v8450_v49  ;;  %v16206_v63 = vmul.f32 0.70710677, %v16198_v57  ;;  %v8689_v41 = vmul.f32 1.442695, %v8673_v26 }
0x23a9   :  { %11928 = vrcp.f32 %v8468_v19  ;;  %v8439_v54 = vand.u32 2147483647, %v16203_v5  ;;  %v8695_v25 = vmul.f32 1.442695, %v8676_v39  ;;  %v8663_v0 = vmul.f32 %v16203_v5, %v16203_v5 }
0x23aa   :  { %11930 = vrcp.f32 %v8466_v7  ;;  %v8437_v50 = vand.u32 2147483647, %v16206_v63  ;;  %v8674_v24 = vsub.f32 0.0, %v8658_v31  ;;  %v16220_v34 = vmul.f32 0.70710677, %v16209_v15 }
0x23ab   :  { %v8455_v9 = vmul.f32 0.3275911, %v8439_v54  ;;  %11932 = vpow2.f32 %v8693_v61  ;;  %v16223_v40 = vadd.f32 %v16158_v11, %v8357_v59  ;;  %v16227_v52 = vmul.f32 0.5, %v8347_v32 }
0x23ac   :  { %v10904_v43 = vpop.f32.mrb[192].mxu0  ;;  %v8453_v51 = vmul.f32 0.3275911, %v8437_v50  ;;  %v16229_v60 = vmul.f32 0.5, %v8339_v4  ;;  %11934 = vpow2.f32 %v8689_v41  ;;  %v8679_v1 = vsub.f32 0.0, %v8663_v0 }
0x23ad   :  { %v16215_v23 = vpop.f32.mrb[193].mxu0  ;;  %v8471_v17 = vadd.f32 1.0, %v8455_v9  ;;  %11936 = vpow2.f32 %v8695_v25  ;;  %v8440_v56 = vand.u32 2147483647, %v16220_v34  ;;  %v16236_v62 = vmul.f32 0.5, %v16171_v44 }
0x23ae   :  { %v16217_v8 = vpop.f32.mrb[194].mxu0  ;;  %v8469_v29 = vadd.f32 1.0, %v8453_v51  ;;  %v8691_v35 = vmul.f32 1.442695, %v8674_v24  ;;  %v8661_v4 = vmul.f32 %v16206_v63, %v16206_v63  ;;  %v16243_v33 = vmul.f32 0.70710677, %v16223_v40 }
0x23af   :  { %v16225_v42 = vpop.f32.mrb[195].mxu0  ;;  %11938 = vrcp.f32 %v8471_v17  ;;  %v8456_v49 = vmul.f32 0.3275911, %v8440_v56  ;;  %v16246_v26 = vadd.f32 %v10904_v43, %v16158_v11  ;;  %v16250_v44 = vmul.f32 0.5, %v16176_v37 }
0x23b0   :  { %11940 = vrcp.f32 %v8469_v29  ;;  %v8701_v59 = vmul.f32 1.442695, %v8679_v1  ;;  %v8664_v61 = vmul.f32 %v16220_v34, %v16220_v34  ;;  %v8438_v41 = vand.u32 2147483647, %v16243_v33 }
0x23b1   :  { %v16231_v27 = vpop.eup %11924  ;;  %v8472_v31 = vadd.f32 1.0, %v8456_v49  ;;  %11942 = vpow2.f32 %v8691_v35  ;;  %v8677_v24 = vsub.f32 0.0, %v8661_v4  ;;  %v16268_v51 = vmul.f32 0.70710677, %v16246_v26 }
0x23b2   :  { %v8515_v47 = vmul.f32 1.0614054, %v16231_v27  ;;  %v16238_v32 = vpop.eup %11926  ;;  %v8454_v9 = vmul.f32 0.3275911, %v8438_v41  ;;  %v8680_v35 = vsub.f32 0.0, %v8664_v61  ;;  %v16283_v61 = vadd.f32 %v16158_v11, %v16215_v23 }
0x23b3   :  { %v8513_v58 = vmul.f32 1.0614054, %v16238_v32  ;;  %v16254_v7 = vpop.eup %11928  ;;  %11944 = vrcp.f32 %v8472_v31  ;;  %v8443_v4 = vand.u32 2147483647, %v16268_v51  ;;  %vm8756_vm11 = vcmp.ge.f32.partialorder %v16181_v13, 0.0 }
0x23b4   :  { %v8531_v19 = vadd.f32 -1.4531521, %v8515_v47  ;;  %v16252_v39 = vpop.f32.mrb[196].mxu0  ;;  %v8516_v37 = vmul.f32 1.0614054, %v16254_v7  ;;  %v16265_v50 = vpop.eup %11930  ;;  %vm8754_vm13 = vcmp.ge.f32.partialorder %v16186_v46, 0.0 }
0x23b5   :  { %v16259_v54 = vpop.f32.mrb[197].mxu0  ;;  %v8529_v25 = vadd.f32 -1.4531521, %v8513_v58  ;;  %v8514_v47 = vmul.f32 1.0614054, %v16265_v50  ;;  %v11933_v49 = vpop.eup %11932  ;;  %v8662_v58 = vmul.f32 %v16243_v33, %v16243_v33  ;;  %vm8759_vm4 = vcmp.ge.f32.partialorder %v16203_v5, 0.0 }
0x23b6   :  { %v8547_v43 = vmul.f32 %v16231_v27, %v8531_v19  ;;  %v16263_v0 = vpop.f32.mrb[198].mxu0  ;;  %v8532_v56 = vadd.f32 -1.4531521, %v8516_v37  ;;  %v8470_v19 = vadd.f32 1.0, %v8454_v9  ;;  %v11935_v31 = vpop.eup %11934  ;;  %v8459_v37 = vmul.f32 0.3275911, %v8443_v4 }
0x23b7   :  { %v16270_v17 = vpop.f32.mrb[199].mxu0  ;;  %v8545_v29 = vmul.f32 %v16238_v32, %v8529_v25  ;;  %v16279_v20 = vpop.eup %11936  ;;  %v8697_v25 = vmul.f32 1.442695, %v8677_v24  ;;  %vm8757_vm7 = vcmp.ge.f32.partialorder %v16206_v63, 0.0  ;;  %vm8760_vm10 = vcmp.ge.f32.partialorder %v16220_v34, 0.0 }
0x23b8   :  { %v8563_v1 = vadd.f32 1.4214138, %v8547_v43  ;;  %v8548_v12 = vmul.f32 %v16254_v7, %v8532_v56  ;;  %v8530_v43 = vadd.f32 -1.4531521, %v8514_v47  ;;  %11946 = vrcp.f32 %v8470_v19 }
0x23b9   :  { %v8561_v18 = vadd.f32 1.4214138, %v8545_v29  ;;  %v16285_v9 = vpop.eup %11938  ;;  %11948 = vpow2.f32 %v8701_v59  ;;  %v8703_v56 = vmul.f32 1.442695, %v8680_v35  ;;  %v8678_v47 = vsub.f32 0.0, %v8662_v58 }
0x23ba   :  { %v8579_v41 = vmul.f32 %v16231_v27, %v8563_v1  ;;  %v8564_v53 = vadd.f32 1.4214138, %v8548_v12  ;;  %v8546_v1 = vmul.f32 %v16265_v50, %v8530_v43  ;;  %v8519_v29 = vmul.f32 1.0614054, %v16285_v9  ;;  %v16290_v24 = vpop.eup %11940 }
0x23bb   :  { %v8577_v22 = vmul.f32 %v16238_v32, %v8561_v18  ;;  %11950 = vpow2.f32 %v8697_v25  ;;  %v8475_v12 = vadd.f32 1.0, %v8459_v37  ;;  %v11943_v18 = vpop.eup %11942  ;;  %vm8758_vm15 = vcmp.ge.f32.partialorder %v16243_v33, 0.0 }
0x23bc   :  { %v8595_v45 = vadd.f32 -0.28449672, %v8579_v41  ;;  %v8580_v23 = vmul.f32 %v16254_v7, %v8564_v53  ;;  %v8562_v55 = vadd.f32 1.4214138, %v8546_v1  ;;  %v8535_v2 = vadd.f32 -1.4531521, %v8519_v29 }
0x23bd   :  { %v8593_v4 = vadd.f32 -0.28449672, %v8577_v22  ;;  %v8517_v41 = vmul.f32 1.0614054, %v16290_v24  ;;  %v16297_v58 = vpop.eup %11944  ;;  %11952 = vpow2.f32 %v8703_v56  ;;  %vm8763_vm5 = vcmp.ge.f32.partialorder %v16268_v51, 0.0 }
0x23be   :  { %v8611_v19 = vmul.f32 %v16231_v27, %v8595_v45  ;;  %v8596_v59 = vadd.f32 -0.28449672, %v8580_v23  ;;  %v8578_v35 = vmul.f32 %v16265_v50, %v8562_v55  ;;  %v8551_v22 = vmul.f32 %v16285_v9, %v8535_v2 }
0x23bf   :  { %v8609_v30 = vmul.f32 %v16238_v32, %v8593_v4  ;;  %v8533_v53 = vadd.f32 -1.4531521, %v8517_v41  ;;  %v8699_v45 = vmul.f32 1.442695, %v8678_v47  ;;  %v8520_v4 = vmul.f32 1.0614054, %v16297_v58 }
0x23c0   :  { %v8627_v43 = vadd.f32 0.2548296, %v8611_v19  ;;  %v8612_v37 = vmul.f32 %v16254_v7, %v8596_v59  ;;  %v8594_v29 = vadd.f32 -0.28449672, %v8578_v35  ;;  %v8567_v19 = vadd.f32 1.4214138, %v8551_v22 }
0x23c1   :  { %v8625_v25 = vadd.f32 0.2548296, %v8609_v30  ;;  %v8549_v55 = vmul.f32 %v16290_v24, %v8533_v53  ;;  %11954 = vrcp.f32 %v8475_v12 }
0x23c2   :  { %v8643_v1 = vmul.f32 %v16231_v27, %v8627_v43  ;;  %v8628_v41 = vadd.f32 0.2548296, %v8612_v37  ;;  %v8610_v56 = vmul.f32 %v16265_v50, %v8594_v29  ;;  %v16308_v47 = vpop.eup %11946  ;;  %v8583_v30 = vmul.f32 %v16285_v9, %v8567_v19 }
0x23c3   :  { %v8641_v2 = vmul.f32 %v16238_v32, %v8625_v25  ;;  %v8565_v27 = vadd.f32 1.4214138, %v8549_v55  ;;  %v8536_v43 = vadd.f32 -1.4531521, %v8520_v4  ;;  %11956 = vpow2.f32 %v8699_v45 }
0x23c4   :  { %v8723_v23 = vmul.f32 %v11933_v49, %v8643_v1  ;;  %v8644_v22 = vmul.f32 %v16254_v7, %v8628_v41  ;;  %v8626_v12 = vadd.f32 0.2548296, %v8610_v56  ;;  %v11949_v49 = vpop.eup %11948  ;;  %v8599_v32 = vadd.f32 -0.28449672, %v8583_v30 }
0x23c5   :  { %v8721_v35 = vmul.f32 %v11935_v31, %v8641_v2  ;;  %v8581_v53 = vmul.f32 %v16290_v24, %v8565_v27  ;;  %v8552_v1 = vmul.f32 %v16297_v58, %v8536_v43  ;;  %v8518_v25 = vmul.f32 1.0614054, %v16308_v47  ;;  %v11951_v31 = vpop.eup %11950 }
0x23c6   :  { %v8739_v59 = vsub.f32 1.0, %v8723_v23  ;;  %v8724_v19 = vmul.f32 %v16279_v20, %v8644_v22  ;;  %v8642_v45 = vmul.f32 %v16265_v50, %v8626_v12  ;;  %v8615_v7 = vmul.f32 %v16285_v9, %v8599_v32 }
0x23c7   :  { %v8737_v29 = vsub.f32 1.0, %v8721_v35  ;;  %v8597_v55 = vadd.f32 -0.28449672, %v8581_v53  ;;  %v8568_v4 = vadd.f32 1.4214138, %v8552_v1  ;;  %v11953_v27 = vpop.eup %11952 }
0x23c8   :  { %v8771_v37 = vsub.f32 0.0, %v8739_v59  ;;  %v8534_v23 = vadd.f32 -1.4531521, %v8518_v25  ;;  %v8740_v56 = vsub.f32 1.0, %v8724_v19  ;;  %v8722_v30 = vmul.f32 %v11943_v18, %v8642_v45 }
0x23c9   :  { %v8769_v41 = vsub.f32 0.0, %v8737_v29  ;;  %v8631_v36 = vadd.f32 0.2548296, %v8615_v7  ;;  %v8613_v35 = vmul.f32 %v16290_v24, %v8597_v55  ;;  %v8584_v20 = vmul.f32 %v16297_v58, %v8568_v4 }
0x23ca   :  { %v8787_v2 = vsel %vm8755_vm2, %v8739_v59, %v8771_v37  ;;  %v8772_v22 = vsub.f32 0.0, %v8740_v56  ;;  %v8738_v12 = vsub.f32 1.0, %v8722_v30  ;;  %v8550_v32 = vmul.f32 %v16308_v47, %v8534_v23 }
0x23cb   :  { %v8803_v43 = vadd.f32 1.0, %v8787_v2  ;;  %v8785_v50 = vsel %vm8753_vm3, %v8737_v29, %v8769_v41  ;;  %v16327_v53 = vpop.eup %11954  ;;  %v8647_v18 = vmul.f32 %v16285_v9, %v8631_v36  ;;  %v8629_v59 = vadd.f32 0.2548296, %v8613_v35 }
0x23cc   :  { %v16332_v1 = vmul.f32 0.70710677, %v16283_v61  ;;  %v8788_v25 = vsel %vm8756_vm11, %v8740_v56, %v8772_v22  ;;  %v8770_v37 = vsub.f32 0.0, %v8738_v12  ;;  %v8600_v14 = vadd.f32 -0.28449672, %v8584_v20 }
0x23cd   :  { %v8819_v16 = vmul.f32 %v8803_v43, %v16227_v52  ;;  %v8566_v29 = vadd.f32 1.4214138, %v8550_v32  ;;  %v11957_v19 = vpop.eup %11956  ;;  %v8801_v45 = vadd.f32 1.0, %v8785_v50  ;;  %v8804_v7 = vadd.f32 1.0, %v8788_v25 }
0x23ce   :  { %v8727_v55 = vmul.f32 %v11949_v49, %v8647_v18  ;;  %v8645_v4 = vmul.f32 %v16290_v24, %v8629_v59  ;;  %v8786_v52 = vsel %vm8754_vm13, %v8738_v12, %v8770_v37  ;;  %v8616_v36 = vmul.f32 %v16297_v58, %v8600_v14 }
0x23cf   :  { %v8582_v9 = vmul.f32 %v16308_v47, %v8566_v29  ;;  %v8523_v23 = vmul.f32 1.0614054, %v16327_v53  ;;  %v8820_v13 = vmul.f32 %v8804_v7, %v16236_v62  ;;  %v8802_v2 = vadd.f32 1.0, %v8786_v52 }
0x23d0   :  { %v8743_v41 = vsub.f32 1.0, %v8727_v55  ;;  %v8725_v56 = vmul.f32 %v11951_v31, %v8645_v4  ;;  %v8632_v30 = vadd.f32 0.2548296, %v8616_v36  ;;  %v8817_v49 = vmul.f32 %v8801_v45, %v16229_v60 }
0x23d1   :  { %v8598_v43 = vadd.f32 -0.28449672, %v8582_v9  ;;  %v8539_v35 = vadd.f32 -1.4531521, %v8523_v23  ;;  %v8834_v24 = vpack.c.bf16 %v8820_v13, %v8819_v16  ;;  %v8818_v46 = vmul.f32 %v8802_v2, %v16250_v44 }
0x23d2   :  { %v8775_v20 = vsub.f32 0.0, %v8743_v41  ;;  %v8741_v50 = vsub.f32 1.0, %v8725_v56  ;;  %v8648_v22 = vmul.f32 %v16297_v58, %v8632_v30  ;;  %v8441_v32 = vand.u32 2147483647, %v16332_v1 }
0x23d3   :  { %v8614_v12 = vmul.f32 %v16308_v47, %v8598_v43  ;;  %v8833_v62 = vpack.c.bf16 %v8818_v46, %v8817_v49  ;;  %v8555_v18 = vmul.f32 %v16327_v53, %v8539_v35  ;;  %v8407_v25 = vmul.f32 0.5, %v16195_v3 }
0x23d4   :  { %v8728_v31 = vmul.f32 %v11953_v27, %v8648_v22  ;;  %v8405_v60 = vmul.f32 0.5, %v16198_v57  ;;  %v8457_v44 = vmul.f32 0.3275911, %v8441_v32  ;;  %v8791_v16 = vsel %vm8759_vm4, %v8743_v41, %v8775_v20 }
0x23d5   :  { %v8630_v59 = vadd.f32 0.2548296, %v8614_v12  ;;  %10914 = vmatprep.mubr.msk.bf16.mxu0 %vm390_vm1, %v8833_v62  ;;  %v8773_v58 = vsub.f32 0.0, %v8741_v50  ;;  %v8571_v27 = vadd.f32 1.4214138, %v8555_v18  ;;  %v16358_v3 = vadd.f32 %v16217_v8, %v16158_v11 }
0x23d6   :  { %v8744_v37 = vsub.f32 1.0, %v8728_v31  ;;  %10915 = vmatmul.mubr.msk.bf16.vlgmr.msra.gmra.mrb[200].mxu0 %vm390_vm1, %v8834_v24  ;;  %v8473_v29 = vadd.f32 1.0, %v8457_v44  ;;  %v8667_v45 = vmul.f32 %v16268_v51, %v16268_v51  ;;  %v16364_v7 = vadd.f32 %v16158_v11, %v16225_v42 }
0x23d7   :  { %v8646_v14 = vmul.f32 %v16308_v47, %v8630_v59  ;;  %v8807_v47 = vadd.f32 1.0, %v8791_v16  ;;  %v16368_v63 = vmul.f32 0.70710677, %v16358_v3  ;;  %v8789_v55 = vsel %vm8757_vm7, %v8741_v50, %v8773_v58 }
0x23d8   :  { %v8776_v5 = vsub.f32 0.0, %v8744_v37  ;;  %11958 = vrcp.f32 %v8473_v29  ;;  %v16371_v52 = vmul.f32 0.70710677, %v16364_v7  ;;  %v8587_v9 = vmul.f32 %v16327_v53, %v8571_v27 }
0x23d9   :  { %v8726_v57 = vmul.f32 %v11957_v19, %v8646_v14  ;;  %v8408_v19 = vmul.f32 0.5, %v16209_v15  ;;  %v8444_v42 = vand.u32 2147483647, %v16368_v63  ;;  %v8683_v23 = vsub.f32 0.0, %v8667_v45 }
0x23da   :  { %v8792_v4 = vsel %vm8760_vm10, %v8744_v37, %v8776_v5  ;;  %v8442_v13 = vand.u32 2147483647, %v16371_v52  ;;  %v8823_v2 = vmul.f32 %v8807_v47, %v8407_v25  ;;  %v8805_v41 = vadd.f32 1.0, %v8789_v55 }
0x23db   :  { %v8742_v8 = vsub.f32 1.0, %v8726_v57  ;;  %v8808_v36 = vadd.f32 1.0, %v8792_v4  ;;  %v8460_v30 = vmul.f32 0.3275911, %v8444_v42  ;;  %v8406_v43 = vmul.f32 0.5, %v16223_v40 }
0x23dc   :  { %v8665_v15 = vmul.f32 %v16332_v1, %v16332_v1  ;;  %v8458_v49 = vmul.f32 0.3275911, %v8442_v13  ;;  %v8603_v20 = vadd.f32 -0.28449672, %v8587_v9  ;;  %v8709_v33 = vmul.f32 1.442695, %v8683_v23 }
0x23dd   :  { %v8774_v34 = vsub.f32 0.0, %v8742_v8  ;;  %v8824_v56 = vmul.f32 %v8808_v36, %v8408_v19  ;;  %v8476_v50 = vadd.f32 1.0, %v8460_v30  ;;  %v16383_v12 = vadd.f32 %v16252_v39, %v16158_v11 }
0x23de   :  { %v8474_v22 = vadd.f32 1.0, %v8458_v49  ;;  %v8821_v32 = vmul.f32 %v8805_v41, %v8405_v60  ;;  %v16387_v40 = vadd.f32 %v16158_v11, %v16259_v54  ;;  %v8619_v25 = vmul.f32 %v16327_v53, %v8603_v20 }
0x23df   :  { %v8790_v35 = vsel %vm8758_vm15, %v8742_v8, %v8774_v34  ;;  %v8836_v24 = vpack.c.bf16 %v8824_v56, %v8823_v2  ;;  %11960 = vrcp.f32 %v8476_v50  ;;  %v16390_v18 = vmul.f32 0.70710677, %v16383_v12 }
0x23e0   :  { %v8806_v46 = vadd.f32 1.0, %v8790_v35  ;;  %v8681_v44 = vsub.f32 0.0, %v8665_v15  ;;  %11962 = vrcp.f32 %v8474_v22  ;;  %v8668_v16 = vmul.f32 %v16368_v63, %v16368_v63 }
0x23e1   :  { %11964 = vpow2.f32 %v8709_v33  ;;  %v8447_v60 = vand.u32 2147483647, %v16390_v18  ;;  %v16400_v54 = vmul.f32 0.70710677, %v16387_v40  ;;  %v16404_v58 = vadd.f32 %v16263_v0, %v16158_v11 }
0x23e2   :  { %v8822_v62 = vmul.f32 %v8806_v46, %v8406_v43  ;;  %v16392_v31 = vpop.eup %11958  ;;  %v16409_v27 = vadd.f32 %v16158_v11, %v16270_v17  ;;  %v8635_v29 = vadd.f32 0.2548296, %v8619_v25  ;;  %v8705_v5 = vmul.f32 1.442695, %v8681_v44 }
0x23e3   :  { %v8521_v39 = vmul.f32 1.0614054, %v16392_v31  ;;  %v8463_v14 = vmul.f32 0.3275911, %v8447_v60  ;;  %v8445_v57 = vand.u32 2147483647, %v16400_v54  ;;  %v8666_v0 = vmul.f32 %v16371_v52, %v16371_v52 }
0x23e4   :  { %v8835_v59 = vpack.c.bf16 %v8822_v62, %v8821_v32  ;;  %v8684_v55 = vsub.f32 0.0, %v8668_v16  ;;  %v16417_v8 = vmul.f32 0.70710677, %v16404_v58  ;;  %v16420_v11 = vmul.f32 0.70710677, %v16409_v27 }
0x23e5   :  { %v8537_v37 = vadd.f32 -1.4531521, %v8521_v39  ;;  %v8479_v47 = vadd.f32 1.0, %v8463_v14  ;;  %v8461_v4 = vmul.f32 0.3275911, %v8445_v57  ;;  %v8651_v36 = vmul.f32 %v16327_v53, %v8635_v29 }
0x23e6   :  { %10918 = vmatprep.mubr.msk.bf16.mxu0 %vm390_vm1, %v8835_v59  ;;  %v8448_v42 = vand.u32 2147483647, %v16417_v8  ;;  %v8682_v13 = vsub.f32 0.0, %v8666_v0  ;;  %v8711_v41 = vmul.f32 1.442695, %v8684_v55  ;;  %v16437_v59 = vmul.f32 0.5, %v16246_v26 }
0x23e7   :  { %10919 = vmatmul.mubr.msk.bf16.gmra.mrb[204].mxu0 %vm390_vm1, %v8836_v24  ;;  %v8553_v45 = vmul.f32 %v16392_v31, %v8537_v37  ;;  %11966 = vrcp.f32 %v8479_v47  ;;  %v8477_v9 = vadd.f32 1.0, %v8461_v4  ;;  %v8446_v30 = vand.u32 2147483647, %v16420_v11 }
0x23e8   :  { %11968 = vpow2.f32 %v8705_v5  ;;  %v8464_v56 = vmul.f32 0.3275911, %v8448_v42  ;;  %v8671_v24 = vmul.f32 %v16390_v18, %v16390_v18  ;;  %v8707_v32 = vmul.f32 1.442695, %v8682_v13 }
0x23e9   :  { %v8569_v19 = vadd.f32 1.4214138, %v8553_v45  ;;  %v16422_v17 = vpop.eup %11960  ;;  %11970 = vrcp.f32 %v8477_v9  ;;  %v8462_v20 = vmul.f32 0.3275911, %v8446_v30  ;;  %v8669_v37 = vmul.f32 %v16400_v54, %v16400_v54 }
0x23ea   :  { %v8524_v23 = vmul.f32 1.0614054, %v16422_v17  ;;  %v16428_v2 = vpop.eup %11962  ;;  %v8480_v46 = vadd.f32 1.0, %v8464_v56  ;;  %v8687_v16 = vsub.f32 0.0, %v8671_v24  ;;  %v16448_v45 = vmul.f32 0.5, %v16283_v61 }
0x23eb   :  { %v8585_v34 = vmul.f32 %v16392_v31, %v8569_v19  ;;  %v11965_v43 = vpop.eup %11964  ;;  %v8522_v53 = vmul.f32 1.0614054, %v16428_v2  ;;  %v8478_v62 = vadd.f32 1.0, %v8462_v20  ;;  %v16457_v9 = vmul.f32 0.5, %v16358_v3 }
0x23ec   :  { %v8540_v15 = vadd.f32 -1.4531521, %v8524_v23  ;;  %v8731_v49 = vmul.f32 %v11965_v43, %v8651_v36  ;;  %11972 = vrcp.f32 %v8480_v46  ;;  %vm8761_vm6 = vcmp.ge.f32.partialorder %v16332_v1, 0.0 }
0x23ed   :  { %v8601_v35 = vadd.f32 -0.28449672, %v8585_v34  ;;  %v8538_v22 = vadd.f32 -1.4531521, %v8522_v53  ;;  %11974 = vpow2.f32 %v8711_v41  ;;  %v8685_v34 = vsub.f32 0.0, %v8669_v37 }
0x23ee   :  { %v8556_v33 = vmul.f32 %v16422_v17, %v8540_v15  ;;  %v8747_v60 = vsub.f32 1.0, %v8731_v49  ;;  %11976 = vrcp.f32 %v8478_v62  ;;  %v8717_v13 = vmul.f32 1.442695, %v8687_v16 }
0x23ef   :  { %v8617_v50 = vmul.f32 %v16392_v31, %v8601_v35  ;;  %v8554_v39 = vmul.f32 %v16428_v2, %v8538_v22  ;;  %11978 = vpow2.f32 %v8707_v32  ;;  %v16463_v30 = vmul.f32 0.5, %v16364_v7 }
0x23f0   :  { %v8572_v44 = vadd.f32 1.4214138, %v8556_v33  ;;  %v8779_v36 = vsub.f32 0.0, %v8747_v60  ;;  %v8670_v3 = vmul.f32 %v16420_v11, %v16420_v11  ;;  %vm8764_vm8 = vcmp.ge.f32.partialorder %v16368_v63, 0.0 }
0x23f1   :  { %v8633_v25 = vadd.f32 0.2548296, %v8617_v50  ;;  %v16442_v14 = vpop.eup %11966  ;;  %v8570_v57 = vadd.f32 1.4214138, %v8554_v39  ;;  %v8713_v7 = vmul.f32 1.442695, %v8685_v34  ;;  %11980 = vpow2.f32 %v8717_v13 }
0x23f2   :  { %v8588_v5 = vmul.f32 %v16422_v17, %v8572_v44  ;;  %v11969_v26 = vpop.eup %11968  ;;  %v8527_v0 = vmul.f32 1.0614054, %v16442_v14  ;;  %v8795_v46 = vsel %vm8763_vm5, %v8747_v60, %v8779_v36  ;;  %vm8762_vm9 = vcmp.ge.f32.partialorder %v16371_v52, 0.0 }
0x23f3   :  { %v8649_v29 = vmul.f32 %v16392_v31, %v8633_v25  ;;  %v8586_v4 = vmul.f32 %v16428_v2, %v8570_v57  ;;  %v8672_v31 = vmul.f32 %v16417_v8, %v16417_v8  ;;  %v16454_v19 = vpop.eup %11970  ;;  %v8686_v51 = vsub.f32 0.0, %v8670_v3 }
0x23f4   :  { %v8604_v55 = vadd.f32 -0.28449672, %v8588_v5  ;;  %v8543_v42 = vadd.f32 -1.4531521, %v8527_v0  ;;  %v8525_v41 = vmul.f32 1.0614054, %v16454_v19  ;;  %11982 = vpow2.f32 %v8713_v7 }
0x23f5   :  { %v8729_v47 = vmul.f32 %v11969_v26, %v8649_v29  ;;  %v8602_v23 = vadd.f32 -0.28449672, %v8586_v4  ;;  %v8688_v49 = vsub.f32 0.0, %v8672_v31  ;;  %v8811_v0 = vadd.f32 1.0, %v8795_v46 }
0x23f6   :  { %v8620_v61 = vmul.f32 %v16422_v17, %v8604_v55  ;;  %v8559_v43 = vmul.f32 %v16442_v14, %v8543_v42  ;;  %v8541_v53 = vadd.f32 -1.4531521, %v8525_v41  ;;  %v16469_v24 = vpop.eup %11972  ;;  %v8715_v13 = vmul.f32 1.442695, %v8686_v51 }
0x23f7   :  { %v8745_v56 = vsub.f32 1.0, %v8729_v47  ;;  %v8618_v15 = vmul.f32 %v16428_v2, %v8602_v23  ;;  %v11975_v32 = vpop.eup %11974  ;;  %v8528_v44 = vmul.f32 1.0614054, %v16469_v24  ;;  %vm8767_vm12 = vcmp.ge.f32.partialorder %v16390_v18, 0.0 }
0x23f8   :  { %v8636_v35 = vadd.f32 0.2548296, %v8620_v61  ;;  %v8575_v20 = vadd.f32 1.4214138, %v8559_v43  ;;  %v8557_v22 = vmul.f32 %v16454_v19, %v8541_v53  ;;  %v16479_v39 = vpop.eup %11976  ;;  %vm8765_vm14 = vcmp.ge.f32.partialorder %v16400_v54, 0.0 }
0x23f9   :  { %v8634_v33 = vadd.f32 0.2548296, %v8618_v15  ;;  %v8777_v62 = vsub.f32 0.0, %v8745_v56  ;;  %v11979_v29 = vpop.eup %11978  ;;  %v8544_v57 = vadd.f32 -1.4531521, %v8528_v44  ;;  %vm8768_vm2 = vcmp.ge.f32.partialorder %v16417_v8, 0.0 }
0x23fa   :  { %v8652_v50 = vmul.f32 %v16422_v17, %v8636_v35  ;;  %v8591_v25 = vmul.f32 %v16442_v14, %v8575_v20  ;;  %v8573_v37 = vadd.f32 1.4214138, %v8557_v22  ;;  %v8719_v17 = vmul.f32 1.442695, %v8688_v49 }
0x23fb   :  { %v8650_v16 = vmul.f32 %v16428_v2, %v8634_v33  ;;  %v8526_v26 = vmul.f32 1.0614054, %v16479_v39  ;;  %v8793_v31 = vsel %vm8761_vm6, %v8745_v56, %v8777_v62  ;;  %v8560_v2 = vmul.f32 %v16469_v24, %v8544_v57  ;;  %v11981_v7 = vpop.eup %11980 }
0x23fc   :  { %v8732_v60 = vmul.f32 %v11975_v32, %v8652_v50  ;;  %v8607_v5 = vadd.f32 -0.28449672, %v8591_v25  ;;  %v8589_v4 = vmul.f32 %v16454_v19, %v8573_v37  ;;  %11984 = vpow2.f32 %v8719_v17 }
0x23fd   :  { %v8730_v55 = vmul.f32 %v11979_v29, %v8650_v16  ;;  %v8542_v42 = vadd.f32 -1.4531521, %v8526_v26  ;;  %v8576_v43 = vadd.f32 1.4214138, %v8560_v2  ;;  %v8809_v35 = vadd.f32 1.0, %v8793_v31 }
0x23fe   :  { %v8748_v47 = vsub.f32 1.0, %v8732_v60  ;;  %v8623_v36 = vmul.f32 %v16442_v14, %v8607_v5  ;;  %v8605_v23 = vadd.f32 -0.28449672, %v8589_v4  ;;  %v8827_v50 = vmul.f32 %v8811_v0, %v16437_v59  ;;  %v11983_v60 = vpop.eup %11982 }
0x23ff   :  { %v8746_v61 = vsub.f32 1.0, %v8730_v55  ;;  %v8558_v3 = vmul.f32 %v16479_v39, %v8542_v42  ;;  %v8592_v46 = vmul.f32 %v16469_v24, %v8576_v43  ;;  %11986 = vpow2.f32 %v8715_v13 }
0x2400   :  { %v8780_v34 = vsub.f32 0.0, %v8748_v47  ;;  %v8639_v41 = vadd.f32 0.2548296, %v8623_v36  ;;  %v8621_v56 = vmul.f32 %v16454_v19, %v8605_v23  ;;  %v8825_v44 = vmul.f32 %v8809_v35, %v16448_v45 }
0x2401   :  { %v8778_v1 = vsub.f32 0.0, %v8746_v61  ;;  %v8574_v20 = vadd.f32 1.4214138, %v8558_v3  ;;  %v8608_v25 = vadd.f32 -0.28449672, %v8592_v46  ;;  %v8416_v43 = vmul.f32 0.5, %v16404_v58 }
0x2402   :  { %v8796_v15 = vsel %vm8764_vm8, %v8748_v47, %v8780_v34  ;;  %v8655_v49 = vmul.f32 %v16442_v14, %v8639_v41  ;;  %v8637_v22 = vadd.f32 0.2548296, %v8621_v56  ;;  %v8415_v41 = vmul.f32 0.5, %v16383_v12  ;;  %v16518_v12 = vpop.permute.xlu0 %8848 }
0x2403   :  { %v8812_v53 = vadd.f32 1.0, %v8796_v15  ;;  %v8794_v33 = vsel %vm8762_vm9, %v8746_v61, %v8778_v1  ;;  %v8590_v51 = vmul.f32 %v16479_v39, %v8574_v20  ;;  %v8624_v52 = vmul.f32 %v16469_v24, %v8608_v25 }
0x2404   :  { %v8810_v32 = vadd.f32 1.0, %v8794_v33  ;;  %v8735_v62 = vmul.f32 %v11981_v7, %v8655_v49  ;;  %v8653_v14 = vmul.f32 %v16454_v19, %v8637_v22  ;;  %vm8766_vm3 = vcmp.ge.f32.partialorder %v16420_v11, 0.0 }
0x2405   :  { %v8828_v63 = vmul.f32 %v8812_v53, %v16457_v9  ;;  %v8606_v29 = vadd.f32 -0.28449672, %v8590_v51  ;;  %v8640_v9 = vadd.f32 0.2548296, %v8624_v52  ;;  %v8413_v54 = vmul.f32 0.5, %v16387_v40 }
0x2406   :  { %v8826_v59 = vmul.f32 %v8810_v32, %v16463_v30  ;;  %v8751_v37 = vsub.f32 1.0, %v8735_v62  ;;  %v8733_v17 = vmul.f32 %v11983_v60, %v8653_v14  ;;  %v11985_v0 = vpop.eup %11984  ;;  %v8414_v56 = vmul.f32 0.5, %v16409_v27 }
0x2407   :  { %v8838_v16 = vpack.c.bf16 %v8828_v63, %v8827_v50  ;;  %v8622_v26 = vmul.f32 %v16479_v39, %v8606_v29  ;;  %v8656_v19 = vmul.f32 %v16469_v24, %v8640_v9 }
0x2408   :  { %v8837_v5 = vpack.c.bf16 %v8826_v59, %v8825_v44  ;;  %v8749_v57 = vsub.f32 1.0, %v8733_v17  ;;  %v8783_v45 = vsub.f32 0.0, %v8751_v37 }
0x2409   :  { %v8638_v47 = vadd.f32 0.2548296, %v8622_v26  ;;  %v8736_v30 = vmul.f32 %v11985_v0, %v8656_v19  ;;  %v11987_v55 = vpop.eup %11986  ;;  %v16987_v26 = vld [vmem:[#allocation5_spill] sm:$0xff] }
0x240a   :  { %10922 = vmatprep.mubr.msk.bf16.mxu0 %vm390_vm1, %v8837_v5  ;;  %v8781_v4 = vsub.f32 0.0, %v8749_v57  ;;  %v8799_v36 = vsel %vm8767_vm12, %v8751_v37, %v8783_v45  ;;  %v16986_v5 = vld [vmem:[#allocation6_spill] sm:$0xff] }
0x240b   :  { %10923 = vmatmul.mubr.msk.bf16.gmra.mrb[208].mxu0 %vm390_vm1, %v8838_v16  ;;  %v8654_v31 = vmul.f32 %v16479_v39, %v8638_v47  ;;  %v8752_v2 = vsub.f32 1.0, %v8736_v30  ;;  %v8815_v61 = vadd.f32 1.0, %v8799_v36  ;;  %v16988_v36 = vld [vmem:[#allocation23_spill] sm:$0xff] }
0x240c   :  { %v8797_v24 = vsel %vm8765_vm14, %v8749_v57, %v8781_v4 }
0x240d   :  { %v8734_v42 = vmul.f32 %v11987_v55, %v8654_v31  ;;  %v8784_v34 = vsub.f32 0.0, %v8752_v2  ;;  %v8813_v35 = vadd.f32 1.0, %v8797_v24  ;;  %v8831_v39 = vmul.f32 %v8815_v61, %v8415_v41  ;;  %v16989_v61 = vld [vmem:[#allocation24_spill] sm:$0xff] }
0x240f   :  { %v8750_v23 = vsub.f32 1.0, %v8734_v42  ;;  %v8800_v13 = vsel %vm8768_vm2, %v8752_v2, %v8784_v34  ;;  %v8829_v49 = vmul.f32 %v8813_v35, %v8413_v54 }
0x2410   :  { %v8816_v18 = vadd.f32 1.0, %v8800_v13 }
0x2411   :  { %v8782_v3 = vsub.f32 0.0, %v8750_v23 }
0x2412   :  { %v8832_v15 = vmul.f32 %v8816_v18, %v8416_v43  ;;  %v16991_v43 = vld [vmem:[#allocation26_spill] sm:$0xff] }
0x2413   :  { %v8798_v1 = vsel %vm8766_vm3, %v8750_v23, %v8782_v3  ;;  %v16990_v23 = vld [vmem:[#allocation25_spill] sm:$0xff] }
0x2414   :  { %v8814_v53 = vadd.f32 1.0, %v8798_v1  ;;  %v8840_v8 = vpack.c.bf16 %v8832_v15, %v8831_v39 }
0x2416   :  { %v8830_v46 = vmul.f32 %v8814_v53, %v8414_v56 }
0x2418   :  { %v8839_v20 = vpack.c.bf16 %v8830_v46, %v8829_v49  ;;  %v16992_v49 = vld [vmem:[#allocation27_spill] sm:$0xff] }
0x241a   :  { %10926 = vmatprep.mubr.msk.bf16.mxu0 %vm390_vm1, %v8839_v20 }
0x241b   :  { %10927 = vmatmul.mubr.msk.bf16.gmra.mrb[212].mxu0 %vm390_vm1, %v8840_v8 }
0x24a9   :  { %v10916_v58 = vpop.f32.mrb[200].mxu0 }
0x24aa   :  { %v8924_v11 = vadd.f32 %v10916_v58, %v16518_v12  ;;  %v8915_v7 = vpop.f32.mrb[201].mxu0 }
0x24ab   :  { %v8916_v50 = vadd.f32 %v8915_v7, %v16518_v12  ;;  %v10917_v40 = vpop.f32.mrb[202].mxu0 }
0x24ac   :  { %v16523_v27 = vadd.f32 %v8924_v11, %v15892_v21  ;;  %v8918_v33 = vpop.f32.mrb[203].mxu0  ;;  %v8927_v32 = vadd.f32 %v10917_v40, %v16518_v12  ;;  %v16993_v11 = vld [vmem:[#allocation28_spill] sm:$0xff] }
0x24ad   :  { %v16526_v22 = vadd.f32 %v8916_v50, %v15888_v48  ;;  %v8919_v63 = vadd.f32 %v8918_v33, %v16518_v12  ;;  %v16994_v50 = vld [vmem:[#allocation29_spill] sm:$0xff] }
0x24ae   :  { %v9001_v62 = vsel %vm100_vm0, %v16523_v27, 0.0  ;;  %v16540_v48 = vadd.f32 %v8927_v32, %v15903_v10 }
0x24af   :  { %v16533_v25 = vadd.f32 %v8919_v63, %v15896_v38  ;;  %9002 = vadd.xlane.f32.xlu0 %v9001_v62  ;;  %v8995_v44 = vsel %vm100_vm0, %v16526_v22, 0.0  ;;  %v16995_v63 = vld [vmem:[#allocation18_spill] sm:$0xff] }
0x24b0   :  { %8996 = vadd.xlane.f32.xlu1 %v8995_v44  ;;  %v9004_v14 = vsel %vm100_vm0, %v16540_v48, 0.0 }
0x24b1   :  { %v8998_v21 = vsel %vm100_vm0, %v16533_v25, 0.0 }
0x24b3   :  { %8999 = vadd.xlane.f32.xlu0 %v8998_v21 }
0x24b7   :  { %9005 = vadd.xlane.f32.xlu0 %v9004_v14 }
0x24ba   :  { %v10920_v51 = vpop.f32.mrb[204].mxu0 }
0x24bb   :  { %v8931_v60 = vpop.f32.mrb[205].mxu0  ;;  %v8940_v38 = vadd.f32 %v10920_v51, %v16518_v12 }
0x24bc   :  { %v8932_v16 = vadd.f32 %v8931_v60, %v16518_v12  ;;  %v10921_v59 = vpop.f32.mrb[206].mxu0 }
0x24bd   :  { %v8934_v37 = vpop.f32.mrb[207].mxu0  ;;  %v8943_v17 = vadd.f32 %v10921_v59, %v16518_v12  ;;  %v16552_v29 = vadd.f32 %v8940_v38, %v15925_v28 }
0x24be   :  { %v16547_v52 = vadd.f32 %v8932_v16, %v15912_v6  ;;  %v8935_v10 = vadd.f32 %v8934_v37, %v16518_v12 }
0x24bf   :  { %v16560_v0 = vadd.f32 %v8943_v17, %v16987_v26  ;;  %v9013_v45 = vsel %vm100_vm0, %v16552_v29, 0.0 }
0x24c0   :  { %v16555_v9 = vadd.f32 %v8935_v10, %v16986_v5  ;;  %v9007_v57 = vsel %vm100_vm0, %v16547_v52, 0.0 }
0x24c1   :  { %9008 = vadd.xlane.f32.xlu1 %v9007_v57  ;;  %v9016_v28 = vsel %vm100_vm0, %v16560_v0, 0.0 }
0x24c2   :  { %v9010_v6 = vsel %vm100_vm0, %v16555_v9, 0.0 }
0x24c3   :  { %9011 = vadd.xlane.f32.xlu0 %v9010_v6 }
0x24c5   :  { %9014 = vadd.xlane.f32.xlu1 %v9013_v45 }
0x24c7   :  { %9017 = vadd.xlane.f32.xlu0 %v9016_v28 }
0x24de   :  { %v10924_v19 = vpop.f32.mrb[208].mxu0 }
0x24df   :  { %v8947_v47 = vpop.f32.mrb[209].mxu0  ;;  %v8956_v30 = vadd.f32 %v10924_v19, %v16518_v12 }
0x24e0   :  { %v8948_v55 = vadd.f32 %v8947_v47, %v16518_v12  ;;  %v10925_v4 = vpop.f32.mrb[210].mxu0 }
0x24e1   :  { %v8950_v31 = vpop.f32.mrb[211].mxu0  ;;  %v8959_v42 = vadd.f32 %v10925_v4, %v16518_v12  ;;  %v16576_v24 = vadd.f32 %v8956_v30, %v16989_v61 }
0x24e2   :  { %v16571_v2 = vadd.f32 %v8948_v55, %v16988_v36  ;;  %v8951_v34 = vadd.f32 %v8950_v31, %v16518_v12 }
0x24e3   :  { %v16584_v18 = vadd.f32 %v8959_v42, %v16991_v43  ;;  %v9025_v35 = vsel %vm100_vm0, %v16576_v24, 0.0 }
0x24e4   :  { %v16579_v13 = vadd.f32 %v8951_v34, %v16990_v23  ;;  %v9019_v41 = vsel %vm100_vm0, %v16571_v2, 0.0 }
0x24e5   :  { %9020 = vadd.xlane.f32.xlu1 %v9019_v41  ;;  %v9028_v39 = vsel %vm100_vm0, %v16584_v18, 0.0 }
0x24e6   :  { %v9022_v3 = vsel %vm100_vm0, %v16579_v13, 0.0 }
0x24e7   :  { %9023 = vadd.xlane.f32.xlu0 %v9022_v3 }
0x24e9   :  { %9026 = vadd.xlane.f32.xlu1 %v9025_v35 }
0x24eb   :  { %9029 = vadd.xlane.f32.xlu0 %v9028_v39 }
0x24ee   :  { %v10928_v15 = vpop.f32.mrb[212].mxu0 }
0x24ef   :  { %v8963_v1 = vpop.f32.mrb[213].mxu0  ;;  %v8972_v54 = vadd.f32 %v10928_v15, %v16518_v12 }
0x24f0   :  { %v8964_v56 = vadd.f32 %v8963_v1, %v16518_v12  ;;  %v10929_v53 = vpop.f32.mrb[214].mxu0 }
0x24f1   :  { %v8966_v8 = vpop.f32.mrb[215].mxu0  ;;  %v8975_v20 = vadd.f32 %v10929_v53, %v16518_v12  ;;  %v16600_v7 = vadd.f32 %v8972_v54, %v16993_v11 }
0x24f2   :  { %v16595_v46 = vadd.f32 %v8964_v56, %v16992_v49  ;;  %v8967_v58 = vadd.f32 %v8966_v8, %v16518_v12 }
0x24f3   :  { %v16608_v32 = vadd.f32 %v8975_v20, %v16995_v63  ;;  %v9037_v12 = vsel %vm100_vm0, %v16600_v7, 0.0 }
0x24f4   :  { %v16603_v40 = vadd.f32 %v8967_v58, %v16994_v50  ;;  %v9031_v33 = vsel %vm100_vm0, %v16595_v46, 0.0 }
0x24f5   :  { %9032 = vadd.xlane.f32.xlu1 %v9031_v33  ;;  %v9040_v44 = vsel %vm100_vm0, %v16608_v32, 0.0 }
0x24f6   :  { %v9034_v62 = vsel %vm100_vm0, %v16603_v40, 0.0 }
0x24f7   :  { %9035 = vadd.xlane.f32.xlu0 %v9034_v62 }
0x24f9   :  { %9038 = vadd.xlane.f32.xlu1 %v9037_v12 }
0x24fb   :  { %9041 = vadd.xlane.f32.xlu0 %v9040_v44 }
0x253c   :  { %v9003_v21 = vpop.xlane.xlu0 %9002 }
0x253d   :  { %v9045_v14 = vmul.f32 0.03125, %v9003_v21  ;;  %v8997_v51 = vpop.xlane.xlu1 %8996 }
0x253e   :  { %v9043_v60 = vmul.f32 0.03125, %v8997_v51 }
0x253f   :  { %v16617_v38 = vsub.f32 %v16523_v27, %v9045_v14 }
0x2540   :  { %v16620_v16 = vsub.f32 %v16526_v22, %v9043_v60  ;;  %v9000_v59 = vpop.xlane.xlu0 %8999 }
0x2541   :  { %v9044_v37 = vmul.f32 0.03125, %v9000_v59  ;;  %v9077_v26 = vmul.f32 %v16617_v38, %v16617_v38 }
0x2542   :  { %v9075_v17 = vmul.f32 %v16620_v16, %v16620_v16 }
0x2543   :  { %v16625_v10 = vsub.f32 %v16533_v25, %v9044_v37  ;;  %v9097_v25 = vsel %vm100_vm0, %v9077_v26, 0.0 }
0x2544   :  { %v9006_v5 = vpop.xlane.xlu0 %9005  ;;  %v9091_v57 = vsel %vm100_vm0, %v9075_v17, 0.0 }
0x2545   :  { %v9046_v6 = vmul.f32 0.03125, %v9006_v5  ;;  %9092 = vadd.xlane.f32.xlu1 %v9091_v57  ;;  %v9076_v27 = vmul.f32 %v16625_v10, %v16625_v10 }
0x2547   :  { %v16633_v22 = vsub.f32 %v16540_v48, %v9046_v6  ;;  %v9094_v45 = vsel %vm100_vm0, %v9076_v27, 0.0 }
0x2548   :  { %9095 = vadd.xlane.f32.xlu0 %v9094_v45 }
0x2549   :  { %9098 = vadd.xlane.f32.xlu1 %v9097_v25  ;;  %v9078_v28 = vmul.f32 %v16633_v22, %v16633_v22 }
0x254b   :  { %v9100_v19 = vsel %vm100_vm0, %v9078_v28, 0.0 }
0x254c   :  { %9101 = vadd.xlane.f32.xlu0 %v9100_v19 }
0x254e   :  { %v9009_v47 = vpop.xlane.xlu1 %9008 }
0x254f   :  { %v9047_v30 = vmul.f32 0.03125, %v9009_v47  ;;  %v12037_v47 = vld [vmem:[%s16787_s1 + $0x5] ss:$0 sm:$0xff] }
0x2550   :  { %v9012_v55 = vpop.xlane.xlu0 %9011 }
0x2551   :  { %v16641_v4 = vsub.f32 %v16547_v52, %v9047_v30  ;;  %v9048_v48 = vmul.f32 0.03125, %v9012_v55 }
0x2552   :  { %v9015_v31 = vpop.xlane.xlu1 %9014 }
0x2553   :  { %v16644_v36 = vsub.f32 %v16555_v9, %v9048_v48  ;;  %v9049_v42 = vmul.f32 0.03125, %v9015_v31  ;;  %v9079_v34 = vmul.f32 %v16641_v4, %v16641_v4 }
0x2554   :  { %v9018_v61 = vpop.xlane.xlu0 %9017 }
0x2555   :  { %v16649_v23 = vsub.f32 %v16552_v29, %v9049_v42  ;;  %v9050_v41 = vmul.f32 0.03125, %v9018_v61  ;;  %v9103_v43 = vsel %vm100_vm0, %v9079_v34, 0.0  ;;  %v9080_v52 = vmul.f32 %v16644_v36, %v16644_v36 }
0x2556   :  { %9104 = vadd.xlane.f32.xlu1 %v9103_v43 }
0x2557   :  { %v16655_v3 = vsub.f32 %v16560_v0, %v9050_v41  ;;  %v9106_v9 = vsel %vm100_vm0, %v9080_v52, 0.0  ;;  %v9081_v35 = vmul.f32 %v16649_v23, %v16649_v23 }
0x2558   :  { %9107 = vadd.xlane.f32.xlu0 %v9106_v9 }
0x2559   :  { %v9109_v39 = vsel %vm100_vm0, %v9081_v35, 0.0  ;;  %v9082_v29 = vmul.f32 %v16655_v3, %v16655_v3 }
0x255a   :  { %9110 = vadd.xlane.f32.xlu1 %v9109_v39 }
0x255b   :  { %v9112_v15 = vsel %vm100_vm0, %v9082_v29, 0.0 }
0x255c   :  { %9113 = vadd.xlane.f32.xlu0 %v9112_v15 }
0x2572   :  { %v9021_v1 = vpop.xlane.xlu1 %9020 }
0x2573   :  { %v9051_v56 = vmul.f32 0.03125, %v9021_v1 }
0x2574   :  { %v9024_v54 = vpop.xlane.xlu0 %9023 }
0x2575   :  { %v9052_v53 = vmul.f32 0.03125, %v9024_v54  ;;  %v16665_v20 = vsub.f32 %v16571_v2, %v9051_v56 }
0x2576   :  { %v9027_v0 = vpop.xlane.xlu1 %9026 }
0x2577   :  { %v9053_v8 = vmul.f32 0.03125, %v9027_v0  ;;  %v16671_v50 = vsub.f32 %v16579_v13, %v9052_v53  ;;  %v9083_v2 = vmul.f32 %v16665_v20, %v16665_v20 }
0x2578   :  { %v9030_v49 = vpop.xlane.xlu0 %9029 }
0x2579   :  { %v16668_v58 = vsub.f32 %v16576_v24, %v9053_v8  ;;  %v9054_v11 = vmul.f32 0.03125, %v9030_v49  ;;  %v9084_v13 = vmul.f32 %v16671_v50, %v16671_v50 }
0x257b   :  { %v16674_v33 = vsub.f32 %v16584_v18, %v9054_v11  ;;  %v9085_v63 = vmul.f32 %v16668_v58, %v16668_v58  ;;  %v9115_v18 = vsel %vm100_vm0, %v9083_v2, 0.0  ;;  %v9118_v44 = vsel %vm100_vm0, %v9084_v13, 0.0 }
0x257d   :  { %v9121_v62 = vsel %vm100_vm0, %v9085_v63, 0.0  ;;  %v9086_v12 = vmul.f32 %v16674_v33, %v16674_v33 }
0x257e   :  { %9122 = vadd.xlane.f32.xlu1 %v9121_v62 }
0x257f   :  { %v9124_v24 = vsel %vm100_vm0, %v9086_v12, 0.0 }
0x2580   :  { %9125 = vadd.xlane.f32.xlu0 %v9124_v24 }
0x2582   :  { %9116 = vadd.xlane.f32.xlu1 %v9115_v18  ;;  %v9033_v21 = vpop.xlane.xlu1 %9032  ;;  %v16724_v18 = vld [vmem:[%s16787_s1 + $0x7] ss:$0 sm:$0xff]  ;;  %s12075_s1 = smov [#allocation2]  }
0x2583   :  { %v9055_v51 = vmul.f32 0.03125, %v9033_v21  ;;  %s9369_s11 = sshll.u32 %s12075_s1, 4  ;;  %s9370_s11 = int_to_ptr.vmem [resolvable:$true] %s9369_s11 }
0x2584   :  { %9119 = vadd.xlane.f32.xlu0 %v9118_v44  ;;  %v9036_v14 = vpop.xlane.xlu0 %9035  ;;  %s12038_s12 = scalar_lea.vmem %s9370_s11, 1024  ;;  %p12043_p1 = scmp.lt.s32.totalorder %s9370_s11, %s9370_s11 }
0x2585   :  { %v9056_v59 = vmul.f32 0.03125, %v9036_v14  ;;  %v16689_v5 = vsub.f32 %v16595_v46, %v9055_v51  ;;  %p12039_p0 = scmp.ne.s32.totalorder %s9370_s11, %s12038_s12  ;;  %p12044_p2 = scmp.lt.s32.totalorder %s12038_s12, %s12038_s12 }
0x2586   :  { %v9039_v60 = vpop.xlane.xlu1 %9038 }
0x2587   :  { %v9057_v37 = vmul.f32 0.03125, %v9039_v60  ;;  %v16695_v6 = vsub.f32 %v16603_v40, %v9056_v59  ;;  %v9087_v46 = vmul.f32 %v16689_v5, %v16689_v5  ;;  %p12045_p3 = por %p12044_p2, %p12043_p1 }
0x2588   :  { %v9042_v17 = vpop.xlane.xlu0 %9041 }
0x2589   :  { %v16692_v57 = vsub.f32 %v16600_v7, %v9057_v37  ;;  %v9058_v26 = vmul.f32 0.03125, %v9042_v17  ;;  %v9088_v40 = vmul.f32 %v16695_v6, %v16695_v6  ;;  %p12046_p4 = pnand %p12045_p3, %p12039_p0 }
0x258b   :  { %v16698_v27 = vsub.f32 %v16608_v32, %v9058_v26  ;;  %v9089_v45 = vmul.f32 %v16692_v57, %v16692_v57  ;;  %v9127_v32 = vsel %vm100_vm0, %v9087_v46, 0.0  ;;  %v9130_v19 = vsel %vm100_vm0, %v9088_v40, 0.0 }
0x258d   :  { %v9133_v25 = vsel %vm100_vm0, %v9089_v45, 0.0  ;;  %v9090_v28 = vmul.f32 %v16698_v27, %v16698_v27 }
0x258e   :  { %9134 = vadd.xlane.f32.xlu1 %v9133_v25 }
0x258f   :  { %v9136_v7 = vsel %vm100_vm0, %v9090_v28, 0.0 }
0x2590   :  { %9137 = vadd.xlane.f32.xlu0 %v9136_v7 }
0x2592   :  { %9128 = vadd.xlane.f32.xlu1 %v9127_v32 }
0x2594   :  { %9131 = vadd.xlane.f32.xlu0 %v9130_v19 }
0x25a3   :  { %9203 = vrot.lane.b32.xlu1 %v12037_v47, %s12070_s14 }
0x25d2   :  { %v9093_v30 = vpop.xlane.xlu1 %9092 }
0x25d3   :  { %v9139_v34 = vmul.f32 0.03125, %v9093_v30 }
0x25d5   :  { %v9096_v42 = vpop.xlane.xlu0 %9095  ;;  %v9155_v43 = vadd.f32 1e-06, %v9139_v34 }
0x25d6   :  { %v9099_v55 = vpop.xlane.xlu1 %9098  ;;  %v9140_v61 = vmul.f32 0.03125, %v9096_v42 }
0x25d7   :  { %v9141_v9 = vmul.f32 0.03125, %v9099_v55  ;;  %11988 = vrsqrt.f32 %v9155_v43 }
0x25d8   :  { %v9156_v52 = vadd.f32 1e-06, %v9140_v61 }
0x25d9   :  { %v9102_v35 = vpop.xlane.xlu0 %9101  ;;  %v9157_v29 = vadd.f32 1e-06, %v9141_v9 }
0x25da   :  { %11990 = vrsqrt.f32 %v9156_v52  ;;  %v9142_v15 = vmul.f32 0.03125, %v9102_v35 }
0x25db   :  { %11992 = vrsqrt.f32 %v9157_v29 }
0x25dc   :  { %v9158_v54 = vadd.f32 1e-06, %v9142_v15 }
0x25de   :  { %11994 = vrsqrt.f32 %v9158_v54 }
0x25e1   :  { %v11989_v53 = vpop.eup %11988 }
0x25e2   :  { %v9187_v12 = vmul.f32 %v11989_v53, %v16620_v16 }
0x25e3   :  { %v9105_v48 = vpop.xlane.xlu1 %9104 }
0x25e4   :  { %v9143_v56 = vmul.f32 0.03125, %v9105_v48  ;;  %v11991_v62 = vpop.eup %11990 }
0x25e5   :  { %v9108_v1 = vpop.xlane.xlu0 %9107  ;;  %v9188_v14 = vmul.f32 %v11991_v62, %v16625_v10  ;;  %v11993_v51 = vpop.eup %11992 }
0x25e6   :  { %v9159_v8 = vadd.f32 1e-06, %v9143_v56  ;;  %v9144_v49 = vmul.f32 0.03125, %v9108_v1  ;;  %v9189_v17 = vmul.f32 %v11993_v51, %v16617_v38 }
0x25e7   :  { %v9111_v31 = vpop.xlane.xlu1 %9110 }
0x25e8   :  { %11996 = vrsqrt.f32 %v9159_v8  ;;  %v9160_v2 = vadd.f32 1e-06, %v9144_v49  ;;  %v9145_v24 = vmul.f32 0.03125, %v9111_v31  ;;  %v11995_v26 = vpop.eup %11994 }
0x25e9   :  { %v9114_v63 = vpop.xlane.xlu0 %9113  ;;  %v9190_v7 = vmul.f32 %v11995_v26, %v16633_v22 }
0x25ea   :  { %11998 = vrsqrt.f32 %v9160_v2  ;;  %v9161_v59 = vadd.f32 1e-06, %v9145_v24  ;;  %v9146_v37 = vmul.f32 0.03125, %v9114_v63 }
0x25ec   :  { %12000 = vrsqrt.f32 %v9161_v59  ;;  %v9162_v10 = vadd.f32 1e-06, %v9146_v37 }
0x25ee   :  { %12002 = vrsqrt.f32 %v9162_v10 }
0x25f2   :  { %v11997_v40 = vpop.eup %11996 }
0x25f3   :  { %v9191_v38 = vmul.f32 %v11997_v40, %v16641_v4 }
0x25f4   :  { %v11999_v55 = vpop.eup %11998 }
0x25f5   :  { %v9192_v61 = vmul.f32 %v11999_v55, %v16644_v36 }
0x25f6   :  { %v12001_v43 = vpop.eup %12000 }
0x260b   :  { %v9123_v41 = vpop.xlane.xlu1 %9122 }
0x260c   :  { %v9149_v48 = vmul.f32 0.03125, %v9123_v41  ;;  %v9193_v41 = vmul.f32 %v12001_v43, %v16649_v23 }
0x260d   :  { %v9126_v44 = vpop.xlane.xlu0 %9125 }
0x260e   :  { %v9165_v52 = vadd.f32 1e-06, %v9149_v48  ;;  %v9150_v9 = vmul.f32 0.03125, %v9126_v44 }
0x260f   :  { %v9117_v39 = vpop.xlane.xlu1 %9116 }
0x2610   :  { %v9147_v45 = vmul.f32 0.03125, %v9117_v39  ;;  %v12003_v39 = vpop.eup %12002  ;;  %v9166_v29 = vadd.f32 1e-06, %v9150_v9 }
0x2611   :  { %v9120_v25 = vpop.xlane.xlu0 %9119  ;;  %v9194_v53 = vmul.f32 %v12003_v39, %v16655_v3 }
0x2612   :  { %v9163_v32 = vadd.f32 1e-06, %v9147_v45  ;;  %v9148_v19 = vmul.f32 0.03125, %v9120_v25 }
0x2614   :  { %12004 = vrsqrt.f32 %v9163_v32  ;;  %v9164_v31 = vadd.f32 1e-06, %v9148_v19 }
0x2616   :  { %12006 = vrsqrt.f32 %v9164_v31 }
0x2617   :  { %12008 = vrsqrt.f32 %v9165_v52 }
0x2618   :  { %12010 = vrsqrt.f32 %v9166_v29 }
0x261b   :  { %v16716_v0 = vpop.xlane.xlu1 %9134 }
0x261d   :  { %v9138_v22 = vpop.xlane.xlu0 %9137 }
0x261e   :  { %v12005_v56 = vpop.eup %12004  ;;  %v9154_v51 = vmul.f32 0.03125, %v9138_v22 }
0x261f   :  { %v9129_v11 = vpop.xlane.xlu1 %9128  ;;  %v9195_v62 = vmul.f32 %v12005_v56, %v16665_v20 }
0x2620   :  { %v9151_v15 = vmul.f32 0.03125, %v9129_v11  ;;  %v9153_v11 = vmul.f32 0.03125, %v16716_v0  ;;  %v9170_v59 = vadd.f32 1e-06, %v9154_v51 }
0x2621   :  { %v9132_v1 = vpop.xlane.xlu0 %9131 }
0x2622   :  { %v9167_v8 = vadd.f32 1e-06, %v9151_v15  ;;  %v9152_v49 = vmul.f32 0.03125, %v9132_v1 }
0x2623   :  { %v16719_v13 = vpop.permute.xlu1 %9203 }
0x2624   :  { %v9206_v21 = vmul.f32 %v16719_v13, %v9187_v12  ;;  %v9207_v16 = vmul.f32 %v16719_v13, %v9188_v14  ;;  %v9208_v46 = vmul.f32 %v16719_v13, %v9189_v17  ;;  %v9209_v30 = vmul.f32 %v16719_v13, %v9190_v7  ;;  %v12007_v12 = vpop.eup %12006 }
0x2625   :  { %v9210_v34 = vmul.f32 %v16719_v13, %v9191_v38  ;;  %v9211_v4 = vmul.f32 %v16719_v13, %v9192_v61  ;;  %v9212_v36 = vmul.f32 %v16719_v13, %v9193_v41  ;;  %v9213_v23 = vmul.f32 %v16719_v13, %v9194_v53 }
0x2626   :  { %v9226_v60 = vadd.f32 %v16724_v18, %v9206_v21  ;;  %v9227_v28 = vadd.f32 %v16724_v18, %v9207_v16  ;;  %v9228_v47 = vadd.f32 %v16724_v18, %v9208_v46  ;;  %v9229_v42 = vadd.f32 %v16724_v18, %v9209_v30  ;;  %v12009_v21 = vpop.eup %12008 }
0x2627   :  { %v9230_v35 = vadd.f32 %v16724_v18, %v9210_v34  ;;  %v9231_v54 = vadd.f32 %v16724_v18, %v9211_v4  ;;  %v9232_v63 = vadd.f32 %v16724_v18, %v9212_v36  ;;  %12012 = vrsqrt.f32 %v9167_v8  ;;  %v12011_v0 = vpop.eup %12010 }
0x2628   :  { %9242 = vxpose.xlu0.b32.start [1/16] (narrow) %v9226_v60, 32  ;;  %v9168_v2 = vadd.f32 1e-06, %v9152_v49  ;;  %v9233_v24 = vadd.f32 %v16724_v18, %v9213_v23  ;;  %v9214_v44 = vmul.f32 %v16719_v13, %v9195_v62  ;;  %v9196_v3 = vmul.f32 %v12007_v12, %v16671_v50 }
0x2629   :  { %v9169_v14 = vadd.f32 1e-06, %v9153_v11  ;;  %v9197_v16 = vmul.f32 %v12009_v21, %v16668_v58  ;;  %v9198_v50 = vmul.f32 %v12011_v0, %v16674_v33 }
0x262a   :  { %12014 = vrsqrt.f32 %v9168_v2  ;;  %v9234_v60 = vadd.f32 %v16724_v18, %v9214_v44  ;;  %v9215_v20 = vmul.f32 %v16719_v13, %v9196_v3 }
0x262b   :  { %12016 = vrsqrt.f32 %v9169_v14  ;;  %v9216_v17 = vmul.f32 %v16719_v13, %v9197_v16  ;;  %v9217_v25 = vmul.f32 %v16719_v13, %v9198_v50 }
0x262c   :  { %9243 = vxpose.xlu0.b32.cont [2/16] (narrow) %v9227_v28, 32  ;;  %v9235_v37 = vadd.f32 %v16724_v18, %v9215_v20  ;;  %12018 = vrsqrt.f32 %v9170_v59 }
0x262d   :  { %v9236_v45 = vadd.f32 %v16724_v18, %v9216_v17  ;;  %v9237_v46 = vadd.f32 %v16724_v18, %v9217_v25 }
0x2630   :  { %9244 = vxpose.xlu0.b32.cont [3/16] (narrow) %v9228_v47, 32 }
0x2631   :  { %v12013_v26 = vpop.eup %12012 }
0x2632   :  { %v9199_v28 = vmul.f32 %v12013_v26, %v16689_v5 }
0x2634   :  { %9245 = vxpose.xlu0.b32.cont [4/16] (narrow) %v9229_v42, 32  ;;  %v12015_v58 = vpop.eup %12014  ;;  %v9218_v10 = vmul.f32 %v16719_v13, %v9199_v28 }
0x2635   :  { %v9200_v7 = vmul.f32 %v12015_v58, %v16695_v6  ;;  %v12017_v40 = vpop.eup %12016 }
0x2636   :  { %v9238_v33 = vadd.f32 %v16724_v18, %v9218_v10  ;;  %v9201_v19 = vmul.f32 %v12017_v40, %v16692_v57  ;;  %v12019_v47 = vpop.eup %12018 }
0x2637   :  { %v9219_v32 = vmul.f32 %v16719_v13, %v9200_v7  ;;  %v9202_v38 = vmul.f32 %v12019_v47, %v16698_v27 }
0x2638   :  { %9246 = vxpose.xlu0.b32.cont [5/16] (narrow) %v9230_v35, 32  ;;  %v9220_v30 = vmul.f32 %v16719_v13, %v9201_v19 }
0x2639   :  { %v9239_v5 = vadd.f32 %v16724_v18, %v9219_v32  ;;  %v9221_v6 = vmul.f32 %v16719_v13, %v9202_v38 }
0x263a   :  { %v9240_v55 = vadd.f32 %v16724_v18, %v9220_v30 }
0x263b   :  { %v9241_v48 = vadd.f32 %v16724_v18, %v9221_v6 }
0x263c   :  { %9247 = vxpose.xlu0.b32.cont [6/16] (narrow) %v9231_v54, 32 }
0x2640   :  { %9248 = vxpose.xlu0.b32.cont [7/16] (narrow) %v9232_v63, 32 }
0x2644   :  { %9249 = vxpose.xlu0.b32.cont [8/16] (narrow) %v9233_v24, 32 }
0x2648   :  { %9250 = vxpose.xlu0.b32.cont [9/16] (narrow) %v9234_v60, 32 }
0x264c   :  { %9251 = vxpose.xlu0.b32.cont [10/16] (narrow) %v9235_v37, 32 }
0x2650   :  { %9252 = vxpose.xlu0.b32.cont [11/16] (narrow) %v9236_v45, 32 }
0x2654   :  { %9253 = vxpose.xlu0.b32.cont [12/16] (narrow) %v9237_v46, 32 }
0x2658   :  { %9254 = vxpose.xlu0.b32.cont [13/16] (narrow) %v9238_v33, 32 }
0x265c   :  { %9255 = vxpose.xlu0.b32.cont [14/16] (narrow) %v9239_v5, 32 }
0x2660   :  { %9256 = vxpose.xlu0.b32.cont [15/16] (narrow) %v9240_v55, 32 }
0x2664   :  { %9257 = vxpose.xlu0.b32.end [16/16] (narrow) %v9241_v48, 32 }
0x26a8   :  { %v9258_v31 = vpop.trf.xlu0 }
0x26a9   :  { %10962 = vmatprep.mubr.f32.mxu1 %v9258_v31 }
0x26ac   :  { %v9259_v57 = vpop.trf.xlu0 }
0x26ad   :  { %10963 = vmatmul.mubr.f32.vlgmr.msra.gmra.mrb[172].mxu1 %v9259_v57 }
0x26b0   :  { %v9260_v42 = vpop.trf.xlu0 }
0x26b1   :  { %10965 = vmatprep.mubr.f32.mxu1 %v9260_v42 }
0x26b4   :  { %v9261_v34 = vpop.trf.xlu0 }
0x26b5   :  { %10966 = vmatmul.mubr.f32.gmra.mrb[174].mxu1 %v9261_v34 }
0x2780   :  { %v10964_v22 = vpop.f32.mrb[172].mxu1 }
0x2781   :  { %9361 = vst [vmem:[#allocation2 + $0x28] sm:$0xff] %v10964_v22  ;;  %v9340_v27 = vpop.f32.mrb[173].mxu1 }
0x2782   :  { %9360 = vst [vmem:[#allocation2 + $0x20] sm:$0xff] %v9340_v27 }
0x2788   :  { %v10967_v61 = vpop.f32.mrb[174].mxu1 }
0x2789   :  { %9363 = vst [vmem:[#allocation2 + $0x38] sm:$0xff] %v10967_v61  ;;  %v9350_v13 = vpop.f32.mrb[175].mxu1 }
0x278a   :  { %9362 = vst [vmem:[#allocation2 + $0x30] sm:$0xff] %v9350_v13 }
0x278b   :  { %12049 = shalt.err (!%p12046_p4)
}
0x278c   :  { %s12050_s16 = scalar_lea.hbm %s16789_s3, 1024 }
0x278d   :  { %p12051_p5 = scmp.ne.s32.totalorder %s16789_s3, %s12050_s16  ;;  %p12054_p6 = scmp.lt.u32.totalorder %s12050_s16, %s16789_s3 }
0x278f   :  { %p12056_p7 = pnand %p12054_p6, %p12051_p5 }
0x2791   :  { %12059 = shalt.err (!%p12056_p7)
}
0x2792   :  { %s12076_s7 = smov 128   ;;  %s12077_s9 = smov 8  }
0x2793   :  { %9375 = dma.vmem_to_hbm [thread:$0]  %s9370_s11, 1024, %s16789_s3, [#allocation3], %s12076_s7, %s12076_s7, %s12077_s9  }
0x2794   :  { %12060 = dma.done.wait [#allocation3], 1024  }
0x2795   :  { %12061 = vsyncadd [#allocation3], 4294966272 }
0x2796   :  { %9379 = vsyncpa [#allocation3], 1 }

</bundles_post_ra>
